<compile_context>
chip_gen: v5e
topology: v5e:2x2
jax: 0.10.0
libtpu: 0.0.40
codegen_flags: <defaults>
</compile_context>

<pallas_src>
import functools

import jax
import jax.numpy as jnp
from jax import lax
from jax.experimental import pallas as pl
from jax.experimental.pallas import tpu as pltpu

EPS = 1e-5


# --------------------------- VMEM budget gating ------------------------------

def _vmem_capacity_bytes():
    try:
        info = pltpu.get_tpu_info()
        cap = getattr(info, "vmem_capacity_bytes", None)
        if cap:
            return int(cap)
    except Exception:
        pass
    return 64 << 20                       # conservative (v7x-sized) fallback


_VMEM_CAP = _vmem_capacity_bytes()
_BIG_VMEM = _VMEM_CAP >= (100 << 20)      # v5e / v6e: 128 MiB physical VMEM
_MAX_BLOCK_BYTES = (8 << 20) if _BIG_VMEM else (4 << 20)
_VMEM_LIMIT = (64 << 20) if _BIG_VMEM else (32 << 20)


def _cparams(*sems):
    return pltpu.CompilerParams(dimension_semantics=tuple(sems),
                                vmem_limit_bytes=_VMEM_LIMIT)


# ----------------------------- Pallas kernels -------------------------------

def expand_kernel(x_ref, w_ref, h_ref, sum_ref, sq_ref):
    """1x1 expand conv (bf16 in / f32 acc on MXU) fused with a per-tile partial
    sum / sum-of-squares reduction for BN1 batch stats (reduced later in JAX so
    the grid stays fully 'parallel')."""
    h = jnp.dot(x_ref[...], w_ref[...], preferred_element_type=jnp.float32)
    h_ref[...] = h.astype(h_ref.dtype)
    sum_ref[0] = jnp.sum(h, axis=0, keepdims=True)
    sq_ref[0] = jnp.sum(h * h, axis=0, keepdims=True)


def dw_kernel(h_ref, scale_ref, shift_ref, w_ref, d_ref, sum_ref, sq_ref,
              xpad_ref, *, k, stride, H, W, Ho, Wo, apply_act, row_chunk):
    """Fused BN1+swish prologue -> depthwise kxk conv (zero halo built in a VMEM
    scratch, stride applied in-kernel) -> per-image partial sum/sumsq (BN2).
    The kxk accumulation is chunked over output rows to bound vreg pressure."""
    p = k // 2
    C = h_ref.shape[-1]

    act = h_ref[0].astype(jnp.float32)
    if apply_act:
        act = act * scale_ref[...] + shift_ref[...]
        act = act * jax.nn.sigmoid(act)

    # Zero only the 4 halo strips (top/bottom rows, left/right cols), not the
    # whole padded scratch (>50x less store work for k=3).
    if p > 0:
        zrow = jnp.zeros((p, W + 2 * p, C), jnp.float32)
        xpad_ref[0:p, :, :] = zrow
        xpad_ref[H + p:H + 2 * p, :, :] = zrow
        zcol = jnp.zeros((H, p, C), jnp.float32)
        xpad_ref[p:p + H, 0:p, :] = zcol
        xpad_ref[p:p + H, W + p:W + 2 * p, :] = zcol
    xpad_ref[p:p + H, p:p + W, :] = act

    w = w_ref[...].astype(jnp.float32)
    row_span = stride * (row_chunk - 1) + 1
    col_span = stride * (Wo - 1) + 1

    def chunk_body(ci, carry):
        s, q = carry
        r0 = pl.multiple_of(ci * row_chunk, row_chunk)
        acc = jnp.zeros((row_chunk, Wo, C), jnp.float32)
        for kh in range(k):
            slab = xpad_ref[pl.ds(r0 * stride + kh, row_span), :, :]
            for kw in range(k):
                # TODO(synk): for stride=2, pre-split the slab into the 2x2
                # stride phases once instead of k*k strided slices.
                win = lax.slice(slab, (0, kw, 0),
                                (row_span, kw + col_span, C),
                                (stride, stride, 1))
                acc = acc + win * w[kh, kw, :]
        d_ref[0, pl.ds(r0, row_chunk), :, :] = acc.astype(d_ref.dtype)
        flat = acc.reshape(-1, C)
        s = s + jnp.sum(flat, axis=0, keepdims=True)
        q = q + jnp.sum(flat * flat, axis=0, keepdims=True)
        return s, q

    zero = jnp.zeros((1, C), jnp.float32)
    s, q = lax.fori_loop(0, Ho // row_chunk, chunk_body, (zero, zero),
                         unroll=True)
    sum_ref[0] = s
    sq_ref[0] = q
    # TODO(synk): for large images on v7x (64 MiB VMEM) tile over output rows
    # with a manual halo DMA (memory_space=pl.ANY) instead of whole images.


def se_pool_kernel(d_ref, scale_ref, shift_ref, pool_ref):
    """Per-image channel sums of swish(BN2(d)) (SE squeeze pool).  BN2+swish is
    recomputed on load (cheaper than materializing it in HBM)."""
    C = d_ref.shape[-1]
    a = d_ref[0].astype(jnp.float32) * scale_ref[...] + shift_ref[...]
    a = a * jax.nn.sigmoid(a)
    pool_ref[0] = jnp.sum(a.reshape(-1, C), axis=0, keepdims=True)


def project_kernel(d_ref, scale_ref, shift_ref, gate_ref, w_ref,
                   y_ref, sum_ref, sq_ref):
    """Fused BN2+swish + per-image SE-gate prologue -> 1x1 project conv done as a
    block-diagonal matmul on a lane-dense flattened (rows, reps*C) view (so the y
    store is an unmasked >=128-lane vst) -> per-tile partial BN3 stats."""
    a = d_ref[0].astype(jnp.float32) * scale_ref[...] + shift_ref[...]
    a = a * jax.nn.sigmoid(a)
    a = a * gate_ref[0]
    y = jnp.dot(a.astype(jnp.bfloat16), w_ref[...],
                preferred_element_type=jnp.float32)
    y_ref[...] = y.astype(y_ref.dtype)
    sum_ref[0, 0] = jnp.sum(y, axis=0, keepdims=True)
    sq_ref[0, 0] = jnp.sum(y * y, axis=0, keepdims=True)


def bn_kernel(y_ref, scale_ref, shift_ref, o_ref):
    o_ref[...] = (y_ref[...].astype(jnp.float32) * scale_ref[...]
                  + shift_ref[...]).astype(o_ref.dtype)


def bn_res_kernel(y_ref, scale_ref, shift_ref, r_ref, o_ref):
    y = y_ref[...].astype(jnp.float32) * scale_ref[...] + shift_ref[...]
    o_ref[...] = (y + r_ref[...].astype(jnp.float32)).astype(o_ref.dtype)


# ------------------------------ tiling helpers -------------------------------

def _pick_row_tile(rows, bytes_per_row, max_block_bytes=None, max_rows=4096):
    """Pick a divisor-of-`rows` row tile: multiple of 8, MXU-aligned (512/256/
    128) when possible, staying within the per-generation VMEM budget and never
    falling back to an over-budget whole-array block."""
    # TODO(synk): support non-divisible row counts with pl.cdiv + masked tail.
    if max_block_bytes is None:
        max_block_bytes = _MAX_BLOCK_BYTES
    cap = max(8, min(max_rows, max_block_bytes // max(bytes_per_row, 1)))
    divs = [t for t in range(8, rows + 1, 8) if rows % t == 0]
    if not divs:
        return rows                       # tiny / odd row counts: single block
    fitting = [t for t in divs if t <= cap]
    if not fitting:
        return divs[0]                    # never blow the VMEM budget
    for align in (512, 256, 128, 8):
        aligned = [t for t in fitting if t % align == 0]
        if aligned:
            return max(aligned)
    return max(fitting)


def _pick_reps(Rimg, C, Cout, max_k=2048, max_lanes=1024):
    """Smallest replication factor making the project output lane-dense
    (reps*Cout a multiple of 128) while keeping the block-diagonal weight and
    the per-row lane width bounded.  Falls back to 1 (still correct)."""
    if Cout % 128 == 0:
        return 1
    for r in range(1, Rimg + 1):
        if Rimg % r:
            continue
        if r * C > max_k or r * Cout > max_lanes:
            break
        if (r * Cout) % 128 == 0:
            return r
    return 1


def _pick_dw_row_chunk(Ho, target=8):
    for t in range(min(target, Ho), 0, -1):
        if Ho % t == 0:
            return t
    return Ho


# -------------------------------- wrappers -----------------------------------

def expand_conv(x2d_bf16, w_bf16):
    R, Cin = x2d_bf16.shape
    hidden = w_bf16.shape[1]
    TR = _pick_row_tile(R, (Cin + hidden) * 2 * 2 + hidden * 4)
    nt = R // TR
    return pl.pallas_call(
        expand_kernel,
        out_shape=(jax.ShapeDtypeStruct((R, hidden), jnp.bfloat16),
                   jax.ShapeDtypeStruct((nt, 1, hidden), jnp.float32),
                   jax.ShapeDtypeStruct((nt, 1, hidden), jnp.float32)),
        grid=(nt,),
        in_specs=[pl.BlockSpec((TR, Cin), lambda i: (i, 0)),
                  pl.BlockSpec((Cin, hidden), lambda i: (0, 0))],
        out_specs=(pl.BlockSpec((TR, hidden), lambda i: (i, 0)),
                   pl.BlockSpec((1, 1, hidden), lambda i: (i, 0, 0)),
                   pl.BlockSpec((1, 1, hidden), lambda i: (i, 0, 0))),
        compiler_params=_cparams("parallel"),
    )(x2d_bf16, w_bf16)


def depthwise_conv_fused(h4, scale1, shift1, w_dw, *, stride, apply_act):
    N, H, W, C = h4.shape
    k = w_dw.shape[0]
    p = k // 2
    Ho = (H + 2 * p - k) // stride + 1
    Wo = (W + 2 * p - k) // stride + 1
    row_chunk = _pick_dw_row_chunk(Ho)
    kernel = functools.partial(dw_kernel, k=k, stride=stride, H=H, W=W,
                               Ho=Ho, Wo=Wo, apply_act=apply_act,
                               row_chunk=row_chunk)
    return pl.pallas_call(
        kernel,
        out_shape=(jax.ShapeDtypeStruct((N, Ho, Wo, C), jnp.bfloat16),
                   jax.ShapeDtypeStruct((N, 1, C), jnp.float32),
                   jax.ShapeDtypeStruct((N, 1, C), jnp.float32)),
        grid=(N,),
        in_specs=[pl.BlockSpec((1, H, W, C), lambda n: (n, 0, 0, 0)),
                  pl.BlockSpec((1, C), lambda n: (0, 0)),
                  pl.BlockSpec((1, C), lambda n: (0, 0)),
                  pl.BlockSpec((k, k, C), lambda n: (0, 0, 0))],
        out_specs=(pl.BlockSpec((1, Ho, Wo, C), lambda n: (n, 0, 0, 0)),
                   pl.BlockSpec((1, 1, C), lambda n: (n, 0, 0)),
                   pl.BlockSpec((1, 1, C), lambda n: (n, 0, 0))),
        scratch_shapes=[pltpu.VMEM((H + 2 * p, W + 2 * p, C), jnp.float32)],
        compiler_params=_cparams("parallel"),
    )(h4, scale1, shift1, w_dw)


def se_pool(d4, scale2, shift2):
    N, Ho, Wo, C = d4.shape
    return pl.pallas_call(
        se_pool_kernel,
        out_shape=jax.ShapeDtypeStruct((N, 1, C), jnp.float32),
        grid=(N,),
        in_specs=[pl.BlockSpec((1, Ho, Wo, C), lambda n: (n, 0, 0, 0)),
                  pl.BlockSpec((1, C), lambda n: (0, 0)),
                  pl.BlockSpec((1, C), lambda n: (0, 0))],
        out_specs=pl.BlockSpec((1, 1, C), lambda n: (n, 0, 0)),
        compiler_params=_cparams("parallel"),
    )(d4, scale2, shift2)


def project_conv_fused(d4, scale2, shift2, gate, w_proj):
    """Project conv on a lane-dense flat view: d -> (N, Rimg/reps, reps*C) and
    w -> block-diag (reps*C, reps*Cout), so y is written as (rows, reps*Cout)
    with an unmasked lane-dense store that bn_final consumes directly."""
    N, Ho, Wo, C = d4.shape
    Cout = w_proj.shape[1]
    Rimg = Ho * Wo
    reps = _pick_reps(Rimg, C, Cout)
    L = reps * Cout
    Rf = Rimg // reps
    d_flat = d4.reshape(N, Rf, reps * C)          # free, contiguous reshape

    w_bd = jnp.kron(jnp.eye(reps, dtype=w_proj.dtype),
                    w_proj).astype(jnp.bfloat16)
    scale_f = jnp.tile(scale2, (1, reps))
    shift_f = jnp.tile(shift2, (1, reps))
    gate_f = jnp.tile(gate, (1, reps)).reshape(N, 1, reps * C)

    TRf = _pick_row_tile(Rf, reps * (C + Cout) * 2 * 2 + L * 4)
    num_r = Rf // TRf

    def y_index(n, r):
        return (n * num_r + r, 0)

    y_flat, s, q = pl.pallas_call(
        project_kernel,
        out_shape=(jax.ShapeDtypeStruct((N * Rf, L), jnp.bfloat16),
                   jax.ShapeDtypeStruct((N, num_r, 1, L), jnp.float32),
                   jax.ShapeDtypeStruct((N, num_r, 1, L), jnp.float32)),
        grid=(N, num_r),
        in_specs=[pl.BlockSpec((1, TRf, reps * C), lambda n, r: (n, r, 0)),
                  pl.BlockSpec((1, reps * C), lambda n, r: (0, 0)),
                  pl.BlockSpec((1, reps * C), lambda n, r: (0, 0)),
                  pl.BlockSpec((1, 1, reps * C), lambda n, r: (n, 0, 0)),
                  pl.BlockSpec((reps * C, L), lambda n, r: (0, 0))],
        out_specs=(pl.BlockSpec((TRf, L), y_index),
                   pl.BlockSpec((1, 1, 1, L), lambda n, r: (n, r, 0, 0)),
                   pl.BlockSpec((1, 1, 1, L), lambda n, r: (n, r, 0, 0))),
        compiler_params=_cparams("parallel", "parallel"),
    )(d_flat, scale_f, shift_f, gate_f, w_bd)

    s_tot = jnp.sum(s.reshape(-1, Cout), axis=0)
    q_tot = jnp.sum(q.reshape(-1, Cout), axis=0)
    return y_flat, s_tot, q_tot, reps, L


def bn_final(y_flat, scale3, shift3, Cout, reps, residual_flat=None):
    """BN3 (+ optional residual) on the lane-dense flat (rows, L) view."""
    rows, L = y_flat.shape
    scale_f = jnp.tile(scale3.reshape(1, Cout), (1, reps))
    shift_f = jnp.tile(shift3.reshape(1, Cout), (1, reps))
    nbuf = 3 if residual_flat is None else 4
    TR = _pick_row_tile(rows, L * 4 * nbuf)
    grid = (rows // TR,)
    if residual_flat is None:
        return pl.pallas_call(
            bn_kernel,
            out_shape=jax.ShapeDtypeStruct((rows, L), jnp.float32),
            grid=grid,
            in_specs=[pl.BlockSpec((TR, L), lambda i: (i, 0)),
                      pl.BlockSpec((1, L), lambda i: (0, 0)),
                      pl.BlockSpec((1, L), lambda i: (0, 0))],
            out_specs=pl.BlockSpec((TR, L), lambda i: (i, 0)),
            compiler_params=_cparams("parallel"),
        )(y_flat, scale_f, shift_f)
    return pl.pallas_call(
        bn_res_kernel,
        out_shape=jax.ShapeDtypeStruct((rows, L), jnp.float32),
        grid=grid,
        in_specs=[pl.BlockSpec((TR, L), lambda i: (i, 0)),
                  pl.BlockSpec((1, L), lambda i: (0, 0)),
                  pl.BlockSpec((1, L), lambda i: (0, 0)),
                  pl.BlockSpec((TR, L), lambda i: (i, 0))],
        out_specs=pl.BlockSpec((TR, L), lambda i: (i, 0)),
        compiler_params=_cparams("parallel"),
    )(y_flat, scale_f, shift_f, residual_flat)


# -------------------------- MBConv forward (Pallas) --------------------------

def _scale_shift(total_sum, total_sq, count, gamma, beta):
    """Per-channel BN scale/shift from fused sum / sum-of-squares (batch stats).
    Note: E[x^2]-E[x]^2 in f32; switch to shifted accumulation if tolerances
    ever tighten for large-magnitude activations."""
    mean = total_sum / count
    var = jnp.maximum(total_sq / count - mean * mean, 0.0)
    scale = gamma / jnp.sqrt(var + EPS)
    shift = beta - mean * scale
    return scale.reshape(1, -1), shift.reshape(1, -1)


def mbconv_forward(x_nchw, params, *, stride, expand_ratio):
    # NCHW -> NHWC, cast to bf16 (transpose + cast fuse into one XLA pass);
    # all big intermediates stay bf16, per-kernel accumulation stays f32.
    # TODO(synk): fuse the NHWC<->NCHW transposes into the expand / bn_final
    # kernels to save the two wrapper-level HBM passes.
    x = jnp.transpose(x_nchw, (0, 2, 3, 1)).astype(jnp.bfloat16)
    N, H, W, Cin = x.shape

    # 1) 1x1 expand conv fused with partial BN1-stat reduction.
    if expand_ratio != 1:
        hidden = params["w_expand"].shape[1]
        h2d, s1, q1 = expand_conv(x.reshape(-1, Cin),
                                  params["w_expand"].astype(jnp.bfloat16))
        scale1, shift1 = _scale_shift(jnp.sum(s1, axis=(0, 1)),
                                      jnp.sum(q1, axis=(0, 1)),
                                      N * H * W,
                                      params["bn1_gamma"], params["bn1_beta"])
        h4 = h2d.reshape(N, H, W, hidden)
        apply_act = True
    else:
        hidden = Cin
        h4 = x
        scale1 = jnp.ones((1, hidden), jnp.float32)
        shift1 = jnp.zeros((1, hidden), jnp.float32)
        apply_act = False

    # 2) depthwise conv with fused BN1+swish prologue and partial BN2 stats.
    d4, s2, q2 = depthwise_conv_fused(h4, scale1, shift1, params["w_dw"],
                                      stride=stride, apply_act=apply_act)
    _, Ho, Wo, _ = d4.shape
    scale2, shift2 = _scale_shift(jnp.sum(s2, axis=(0, 1)),
                                  jnp.sum(q2, axis=(0, 1)),
                                  N * Ho * Wo,
                                  params["bn2_gamma"], params["bn2_beta"])

    # 3) SE squeeze pool (one pass over d), tiny squeeze/excite matmuls in JAX.
    pooled = se_pool(d4, scale2, shift2).reshape(N, hidden) / float(Ho * Wo)
    hi = lax.Precision.HIGHEST
    se_mid = jax.nn.relu(jnp.dot(pooled, params["w_se_r"], precision=hi)
                         + params["b_se_r"])
    gate = jax.nn.sigmoid(jnp.dot(se_mid, params["w_se_e"], precision=hi)
                          + params["b_se_e"])

    # 4) project conv (lane-dense flat output) with fused BN2+swish+SE prologue
    #    and partial BN3-stat reduction.
    Cout = params["w_project"].shape[1]
    y_flat, s3, q3, reps, L = project_conv_fused(d4, scale2, shift2, gate,
                                                 params["w_project"])
    scale3, shift3 = _scale_shift(s3, q3, N * Ho * Wo,
                                  params["bn3_gamma"], params["bn3_beta"])

    # 5) BN3 (+ residual) on the lane-dense flat view.
    use_res = (stride == 1 and Cin == Cout)
    res_flat = x.reshape(-1, L) if use_res else None
    out_flat = bn_final(y_flat, scale3, shift3, Cout, reps, res_flat)

    y = out_flat.reshape(N, Ho, Wo, Cout)
    return jnp.transpose(y, (0, 3, 1, 2))     # NHWC -> NCHW


# ------------------------------ pure-JAX reference ---------------------------

def ref_forward(x_nchw, params, *, kernel_size, stride, expand_ratio):
    hi = lax.Precision.HIGHEST
    x = jnp.transpose(x_nchw, (0, 2, 3, 1))
    Cin = x.shape[-1]

    def bn(h, gamma, beta, swish):
        mean = jnp.mean(h, axis=(0, 1, 2))
        var = jnp.var(h, axis=(0, 1, 2))
        y = gamma * (h - mean) / jnp.sqrt(var + EPS) + beta
        if swish:
            y = y * jax.nn.sigmoid(y)
        return y

    h = x
    if expand_ratio != 1:
        h = jnp.einsum("nhwc,cd->nhwd", h, params["w_expand"], precision=hi)
        h = bn(h, params["bn1_gamma"], params["bn1_beta"], swish=True)

    C = h.shape[-1]
    k = kernel_size
    p = k // 2
    w_dw = params["w_dw"].reshape(k, k, 1, C)
    d = lax.conv_general_dilated(h, w_dw, window_strides=(stride, stride),
                                 padding=[(p, p), (p, p)],
                                 dimension_numbers=("NHWC", "HWIO", "NHWC"),
                                 feature_group_count=C, precision=hi)
    d = bn(d, params["bn2_gamma"], params["bn2_beta"], swish=True)

    pooled = jnp.mean(d, axis=(1, 2), keepdims=True)
    s = jax.nn.relu(jnp.einsum("nhwc,cd->nhwd", pooled, params["w_se_r"],
                               precision=hi) + params["b_se_r"].reshape(-1))
    e = jax.nn.sigmoid(jnp.einsum("nhwc,cd->nhwd", s, params["w_se_e"],
                                  precision=hi) + params["b_se_e"].reshape(-1))
    d = d * e

    y = jnp.einsum("nhwc,cd->nhwd", d, params["w_project"], precision=hi)
    y = bn(y, params["bn3_gamma"], params["bn3_beta"], swish=False)
    if stride == 1 and Cin == y.shape[-1]:
        y = y + x
    return jnp.transpose(y, (0, 3, 1, 2))


# ----------------------------------- main ------------------------------------

if __name__ == "__main__":
    N, Cin, H, W = 2, 4, 16, 16
    Cout, k, stride, expand_ratio, se_ratio = 4, 3, 1, 4, 4
    hidden = Cin * expand_ratio
    Cse = hidden // se_ratio

    key = jax.random.PRNGKey(0)
    keys = jax.random.split(key, 8)

    def xavier(kk, fan_in, fan_out, shape):
        limit = (6.0 / (fan_in + fan_out)) ** 0.5
        return jax.random.uniform(kk, shape, jnp.float32, -limit, limit)

    params = dict(
        # 1x1 expand conv: torch weight (hidden, Cin, 1, 1) stored as (Cin, hidden)
        w_expand=xavier(keys[0], Cin, hidden, (Cin, hidden)),
        bn1_gamma=jnp.ones((hidden,), jnp.float32),
        bn1_beta=jnp.zeros((hidden,), jnp.float32),
        # depthwise conv: torch weight (hidden, 1, k, k) stored as (k, k, hidden)
        w_dw=xavier(keys[1], k * k, hidden * k * k, (k, k, hidden)),
        bn2_gamma=jnp.ones((hidden,), jnp.float32),
        bn2_beta=jnp.zeros((hidden,), jnp.float32),
        # SE block 1x1 convs (with bias)
        w_se_r=xavier(keys[2], hidden, Cse, (hidden, Cse)),
        b_se_r=jax.random.uniform(keys[3], (1, Cse), jnp.float32,
                                  -1.0 / hidden ** 0.5, 1.0 / hidden ** 0.5),
        w_se_e=xavier(keys[4], Cse, hidden, (Cse, hidden)),
        b_se_e=jax.random.uniform(keys[5], (1, hidden), jnp.float32,
                                  -1.0 / Cse ** 0.5, 1.0 / Cse ** 0.5),
        # 1x1 project conv: torch weight (Cout, hidden, 1, 1) stored as (hidden, Cout)
        w_project=xavier(keys[6], hidden, Cout, (hidden, Cout)),
        bn3_gamma=jnp.ones((Cout,), jnp.float32),
        bn3_beta=jnp.zeros((Cout,), jnp.float32),
    )

    x = jax.random.normal(keys[7], (N, Cin, H, W), jnp.float32)

    fwd = jax.jit(functools.partial(mbconv_forward, stride=stride,
                                    expand_ratio=expand_ratio))
    out = fwd(x, params)
    out = jax.block_until_ready(out)

    ref = ref_forward(x, params, kernel_size=k, stride=stride,
                      expand_ratio=expand_ratio)

    assert out.shape == (N, Cout, H, W), out.shape
    # Tolerance accommodates bf16 MXU operands and bf16-stored intermediates
    # (f32 accumulation) vs the Precision.HIGHEST f32 reference.
    if not bool(jnp.allclose(out, ref, rtol=3e-2, atol=3e-2)):
        raise AssertionError("Pallas MBConv output does not match reference")

    print("KERNEL_OK")
</pallas_src>

<mosaic_0001>
module attributes {stable_mosaic.version = 11 : i64} {
  func.func @expand_kernel(%arg0: i32, %arg1: memref<512x4xbf16, #tpu.memory_space<vmem>>, %arg2: memref<4x16xbf16, #tpu.memory_space<vmem>>, %arg3: memref<512x16xbf16, #tpu.memory_space<vmem>>, %arg4: memref<1x1x16xf32, #tpu.memory_space<vmem>>, %arg5: memref<1x1x16xf32, #tpu.memory_space<vmem>>) attributes {dimension_semantics = [#tpu.dimension_semantics<parallel>], iteration_bounds = array<i64: 1>, scalar_prefetch = 0 : i64, scratch_operands = 0 : i64, tpu.core_type = #tpu.core_type<tc>, window_params = [{transform_indices = @transform_0, window_bounds = array<i64: 512, 4>}, {pipeline_mode = #tpu.pipeline_mode<synchronous>, transform_indices = @transform_1, window_bounds = array<i64: 4, 16>}, {transform_indices = @transform_2, window_bounds = array<i64: 512, 16>}, {transform_indices = @transform_3, window_bounds = array<i64: 1, 1, 16>}, {transform_indices = @transform_4, window_bounds = array<i64: 1, 1, 16>}]} {
    %c0 = arith.constant 0 : index
    %c0_0 = arith.constant 0 : index
    %0 = vector.load %arg1[%c0, %c0_0] : memref<512x4xbf16, #tpu.memory_space<vmem>>, vector<512x4xbf16>
    %c0_1 = arith.constant 0 : index
    %c0_2 = arith.constant 0 : index
    %1 = vector.load %arg2[%c0_1, %c0_2] : memref<4x16xbf16, #tpu.memory_space<vmem>>, vector<4x16xbf16>
    %cst = arith.constant dense<0.000000e+00> : vector<512x16xf32>
    %2 = tpu.matmul %0, %1, %cst {dimension_numbers = #tpu.dot_dimension_numbers<[1], [0], [0], [1], [0, 0, 1, 1], [], []>} : vector<512x4xbf16>, vector<4x16xbf16>, vector<512x16xf32> -> vector<512x16xf32>
    %3 = arith.truncf %2 : vector<512x16xf32> to vector<512x16xbf16>
    %c0_3 = arith.constant 0 : index
    %c0_4 = arith.constant 0 : index
    %4 = vector.load %arg3[%c0_3, %c0_4] : memref<512x16xbf16, #tpu.memory_space<vmem>>, vector<512x16xbf16>
    tpu.vector_store %arg3[%c0_3, %c0_4], %3 {strides = array<i32>} : memref<512x16xbf16, #tpu.memory_space<vmem>>, vector<512x16xbf16>,
    %cst_5 = arith.constant dense<0.000000e+00> : vector<16xf32>
    %5 = vector.multi_reduction <add>, %2, %cst_5 [0] : vector<512x16xf32> to vector<16xf32>
    %6 = vector.shape_cast %5 : vector<16xf32> to vector<1x16xf32>
    %c0_6 = arith.constant 0 : index
    %c0_7 = arith.constant 0 : index
    %c0_8 = arith.constant 0 : index
    %7 = vector.load %arg4[%c0_6, %c0_7, %c0_8] : memref<1x1x16xf32, #tpu.memory_space<vmem>>, vector<1x1x16xf32>
    %8 = vector.shape_cast %7 : vector<1x1x16xf32> to vector<1x16xf32>
    %9 = vector.shape_cast %6 : vector<1x16xf32> to vector<1x1x16xf32>
    tpu.vector_store %arg4[%c0_6, %c0_7, %c0_8], %9 {strides = array<i32>} : memref<1x1x16xf32, #tpu.memory_space<vmem>>, vector<1x1x16xf32>,
    %10 = arith.mulf %2, %2 : vector<512x16xf32>
    %cst_9 = arith.constant dense<0.000000e+00> : vector<16xf32>
    %11 = vector.multi_reduction <add>, %10, %cst_9 [0] : vector<512x16xf32> to vector<16xf32>
    %12 = vector.shape_cast %11 : vector<16xf32> to vector<1x16xf32>
    %c0_10 = arith.constant 0 : index
    %c0_11 = arith.constant 0 : index
    %c0_12 = arith.constant 0 : index
    %13 = vector.load %arg5[%c0_10, %c0_11, %c0_12] : memref<1x1x16xf32, #tpu.memory_space<vmem>>, vector<1x1x16xf32>
    %14 = vector.shape_cast %13 : vector<1x1x16xf32> to vector<1x16xf32>
    %15 = vector.shape_cast %12 : vector<1x16xf32> to vector<1x1x16xf32>
    tpu.vector_store %arg5[%c0_10, %c0_11, %c0_12], %15 {strides = array<i32>} : memref<1x1x16xf32, #tpu.memory_space<vmem>>, vector<1x1x16xf32>,
    return
  }
  func.func @transform_0(%arg0: i32) -> (i32, i32) {
    %c0_i32 = arith.constant 0 : i32
    %c0_i32_0 = arith.constant 0 : i32
    return %arg0, %c0_i32 : i32, i32
  }
  func.func @transform_1(%arg0: i32) -> (i32, i32) {
    %c0_i32 = arith.constant 0 : i32
    %c0_i32_0 = arith.constant 0 : i32
    %c0_i32_1 = arith.constant 0 : i32
    return %c0_i32, %c0_i32_0 : i32, i32
  }
  func.func @transform_2(%arg0: i32) -> (i32, i32) {
    %c0_i32 = arith.constant 0 : i32
    %c0_i32_0 = arith.constant 0 : i32
    return %arg0, %c0_i32 : i32, i32
  }
  func.func @transform_3(%arg0: i32) -> (i32, i32, i32) {
    %c0_i32 = arith.constant 0 : i32
    %c0_i32_0 = arith.constant 0 : i32
    %c0_i32_1 = arith.constant 0 : i32
    return %arg0, %c0_i32, %c0_i32_0 : i32, i32, i32
  }
  func.func @transform_4(%arg0: i32) -> (i32, i32, i32) {
    %c0_i32 = arith.constant 0 : i32
    %c0_i32_0 = arith.constant 0 : i32
    %c0_i32_1 = arith.constant 0 : i32
    return %arg0, %c0_i32, %c0_i32_0 : i32, i32, i32
  }
}

module attributes {stable_mosaic.version = 11 : i64} {
  func.func @dw_kernel(%arg0: i32, %arg1: memref<1x16x16x16xbf16, #tpu.memory_space<vmem>>, %arg2: memref<1x16xf32, #tpu.memory_space<vmem>>, %arg3: memref<1x16xf32, #tpu.memory_space<vmem>>, %arg4: memref<3x3x16xf32, #tpu.memory_space<vmem>>, %arg5: memref<1x16x16x16xbf16, #tpu.memory_space<vmem>>, %arg6: memref<1x1x16xf32, #tpu.memory_space<vmem>>, %arg7: memref<1x1x16xf32, #tpu.memory_space<vmem>>, %arg8: memref<18x18x16xf32, #tpu.memory_space<vmem>>) attributes {dimension_semantics = [#tpu.dimension_semantics<parallel>], iteration_bounds = array<i64: 2>, scalar_prefetch = 0 : i64, scratch_operands = 1 : i64, tpu.core_type = #tpu.core_type<tc>, window_params = [{transform_indices = @transform_0, window_bounds = array<i64: 1, 16, 16, 16>}, {pipeline_mode = #tpu.pipeline_mode<synchronous>, transform_indices = @transform_1, window_bounds = array<i64: 1, 16>}, {pipeline_mode = #tpu.pipeline_mode<synchronous>, transform_indices = @transform_2, window_bounds = array<i64: 1, 16>}, {pipeline_mode = #tpu.pipeline_mode<synchronous>, transform_indices = @transform_3, window_bounds = array<i64: 3, 3, 16>}, {transform_indices = @transform_4, window_bounds = array<i64: 1, 16, 16, 16>}, {transform_indices = @transform_5, window_bounds = array<i64: 1, 1, 16>}, {transform_indices = @transform_6, window_bounds = array<i64: 1, 1, 16>}]} {
    %c0 = arith.constant 0 : index
    %c0_0 = arith.constant 0 : index
    %c0_1 = arith.constant 0 : index
    %c0_2 = arith.constant 0 : index
    %0 = vector.load %arg1[%c0, %c0_0, %c0_1, %c0_2] : memref<1x16x16x16xbf16, #tpu.memory_space<vmem>>, vector<1x16x16x16xbf16>
    %1 = vector.shape_cast %0 : vector<1x16x16x16xbf16> to vector<16x16x16xbf16>
    %2 = arith.extf %1 : vector<16x16x16xbf16> to vector<16x16x16xf32>
    %c0_3 = arith.constant 0 : index
    %c0_4 = arith.constant 0 : index
    %3 = vector.load %arg2[%c0_3, %c0_4] : memref<1x16xf32, #tpu.memory_space<vmem>>, vector<1x16xf32>
    %4 = vector.shape_cast %3 : vector<1x16xf32> to vector<1x1x16xf32>
    %5 = vector.broadcast %4 : vector<1x1x16xf32> to vector<16x16x16xf32>
    %6 = arith.mulf %2, %5 : vector<16x16x16xf32>
    %c0_5 = arith.constant 0 : index
    %c0_6 = arith.constant 0 : index
    %7 = vector.load %arg3[%c0_5, %c0_6] : memref<1x16xf32, #tpu.memory_space<vmem>>, vector<1x16xf32>
    %8 = vector.shape_cast %7 : vector<1x16xf32> to vector<1x1x16xf32>
    %9 = vector.broadcast %8 : vector<1x1x16xf32> to vector<16x16x16xf32>
    %10 = arith.addf %6, %9 : vector<16x16x16xf32>
    %11 = arith.negf %10 : vector<16x16x16xf32>
    %12 = math.exp %11 : vector<16x16x16xf32>
    %cst = arith.constant 1.000000e+00 : f32
    %13 = vector.broadcast %cst : f32 to vector<16x16x16xf32>
    %14 = arith.addf %13, %12 : vector<16x16x16xf32>
    %15 = arith.divf %13, %14 : vector<16x16x16xf32>
    %16 = arith.mulf %10, %15 : vector<16x16x16xf32>
    %cst_7 = arith.constant 0.000000e+00 : f32
    %17 = vector.broadcast %cst_7 : f32 to vector<1x18x16xf32>
    %c0_8 = arith.constant 0 : index
    %c0_9 = arith.constant 0 : index
    %c0_10 = arith.constant 0 : index
    %18 = vector.load %arg8[%c0_8, %c0_9, %c0_10] : memref<18x18x16xf32, #tpu.memory_space<vmem>>, vector<1x18x16xf32>
    tpu.vector_store %arg8[%c0_8, %c0_9, %c0_10], %17 {strides = array<i32>} : memref<18x18x16xf32, #tpu.memory_space<vmem>>, vector<1x18x16xf32>,
    %c17 = arith.constant 17 : index
    %c0_11 = arith.constant 0 : index
    %c0_12 = arith.constant 0 : index
    %19 = vector.load %arg8[%c17, %c0_11, %c0_12] : memref<18x18x16xf32, #tpu.memory_space<vmem>>, vector<1x18x16xf32>
    tpu.vector_store %arg8[%c17, %c0_11, %c0_12], %17 {strides = array<i32>} : memref<18x18x16xf32, #tpu.memory_space<vmem>>, vector<1x18x16xf32>,
    %cst_13 = arith.constant 0.000000e+00 : f32
    %20 = vector.broadcast %cst_13 : f32 to vector<16x1x16xf32>
    %c1 = arith.constant 1 : index
    %c0_14 = arith.constant 0 : index
    %c0_15 = arith.constant 0 : index
    %21 = vector.load %arg8[%c1, %c0_14, %c0_15] : memref<18x18x16xf32, #tpu.memory_space<vmem>>, vector<16x1x16xf32>
    tpu.vector_store %arg8[%c1, %c0_14, %c0_15], %20 {strides = array<i32>} : memref<18x18x16xf32, #tpu.memory_space<vmem>>, vector<16x1x16xf32>,
    %c1_16 = arith.constant 1 : index
    %c17_17 = arith.constant 17 : index
    %c0_18 = arith.constant 0 : index
    %22 = vector.load %arg8[%c1_16, %c17_17, %c0_18] : memref<18x18x16xf32, #tpu.memory_space<vmem>>, vector<16x1x16xf32>
    tpu.vector_store %arg8[%c1_16, %c17_17, %c0_18], %20 {strides = array<i32>} : memref<18x18x16xf32, #tpu.memory_space<vmem>>, vector<16x1x16xf32>,
    %c1_19 = arith.constant 1 : index
    %c1_20 = arith.constant 1 : index
    %c0_21 = arith.constant 0 : index
    %23 = vector.load %arg8[%c1_19, %c1_20, %c0_21] : memref<18x18x16xf32, #tpu.memory_space<vmem>>, vector<16x16x16xf32>
    tpu.vector_store %arg8[%c1_19, %c1_20, %c0_21], %16 {strides = array<i32>} : memref<18x18x16xf32, #tpu.memory_space<vmem>>, vector<16x16x16xf32>,
    %c0_22 = arith.constant 0 : index
    %c0_23 = arith.constant 0 : index
    %c0_24 = arith.constant 0 : index
    %24 = vector.load %arg4[%c0_22, %c0_23, %c0_24] : memref<3x3x16xf32, #tpu.memory_space<vmem>>, vector<3x3x16xf32>
    %cst_25 = arith.constant 0.000000e+00 : f32
    %25 = vector.broadcast %cst_25 : f32 to vector<1x16xf32>
    %c0_i32 = arith.constant 0 : i32
    %c8_i32 = arith.constant 8 : i32
    %26 = arith.muli %c0_i32, %c8_i32 : i32
    %27 = tpu.assume_multiple %26, 8 : i32
    %cst_26 = arith.constant 0.000000e+00 : f32
    %28 = vector.broadcast %cst_26 : f32 to vector<8x16x16xf32>
    %c1_i32 = arith.constant 1 : i32
    %29 = arith.muli %27, %c1_i32 : i32
    %c0_i32_27 = arith.constant 0 : i32
    %30 = arith.addi %29, %c0_i32_27 : i32
    %31 = arith.index_cast %30 : i32 to index
    %c0_28 = arith.constant 0 : index
    %c0_29 = arith.constant 0 : index
    %32 = vector.load %arg8[%31, %c0_28, %c0_29] : memref<18x18x16xf32, #tpu.memory_space<vmem>>, vector<8x18x16xf32>
    %33 = vector.extract_strided_slice %32 {offsets = [0, 0, 0], sizes = [8, 16, 16], strides = [1, 1, 1]} : vector<8x18x16xf32> to vector<8x16x16xf32>
    %34 = vector.extract_strided_slice %24 {offsets = [0, 0, 0], sizes = [1, 1, 16], strides = [1, 1, 1]} : vector<3x3x16xf32> to vector<1x1x16xf32>
    %35 = vector.shape_cast %34 : vector<1x1x16xf32> to vector<16xf32>
    %36 = vector.shape_cast %35 : vector<16xf32> to vector<1x1x16xf32>
    %37 = vector.broadcast %36 : vector<1x1x16xf32> to vector<8x16x16xf32>
    %38 = arith.mulf %33, %37 : vector<8x16x16xf32>
    %39 = arith.addf %28, %38 : vector<8x16x16xf32>
    %40 = vector.extract_strided_slice %32 {offsets = [0, 1, 0], sizes = [8, 16, 16], strides = [1, 1, 1]} : vector<8x18x16xf32> to vector<8x16x16xf32>
    %41 = vector.extract_strided_slice %24 {offsets = [0, 1, 0], sizes = [1, 1, 16], strides = [1, 1, 1]} : vector<3x3x16xf32> to vector<1x1x16xf32>
    %42 = vector.shape_cast %41 : vector<1x1x16xf32> to vector<16xf32>
    %43 = vector.shape_cast %42 : vector<16xf32> to vector<1x1x16xf32>
    %44 = vector.broadcast %43 : vector<1x1x16xf32> to vector<8x16x16xf32>
    %45 = arith.mulf %40, %44 : vector<8x16x16xf32>
    %46 = arith.addf %39, %45 : vector<8x16x16xf32>
    %47 = vector.extract_strided_slice %32 {offsets = [0, 2, 0], sizes = [8, 16, 16], strides = [1, 1, 1]} : vector<8x18x16xf32> to vector<8x16x16xf32>
    %48 = vector.extract_strided_slice %24 {offsets = [0, 2, 0], sizes = [1, 1, 16], strides = [1, 1, 1]} : vector<3x3x16xf32> to vector<1x1x16xf32>
    %49 = vector.shape_cast %48 : vector<1x1x16xf32> to vector<16xf32>
    %50 = vector.shape_cast %49 : vector<16xf32> to vector<1x1x16xf32>
    %51 = vector.broadcast %50 : vector<1x1x16xf32> to vector<8x16x16xf32>
    %52 = arith.mulf %47, %51 : vector<8x16x16xf32>
    %53 = arith.addf %46, %52 : vector<8x16x16xf32>
    %c1_i32_30 = arith.constant 1 : i32
    %54 = arith.muli %27, %c1_i32_30 : i32
    %c1_i32_31 = arith.constant 1 : i32
    %55 = arith.addi %54, %c1_i32_31 : i32
    %56 = arith.index_cast %55 : i32 to index
    %c0_32 = arith.constant 0 : index
    %c0_33 = arith.constant 0 : index
    %57 = vector.load %arg8[%56, %c0_32, %c0_33] : memref<18x18x16xf32, #tpu.memory_space<vmem>>, vector<8x18x16xf32>
    %58 = vector.extract_strided_slice %57 {offsets = [0, 0, 0], sizes = [8, 16, 16], strides = [1, 1, 1]} : vector<8x18x16xf32> to vector<8x16x16xf32>
    %59 = vector.extract_strided_slice %24 {offsets = [1, 0, 0], sizes = [1, 1, 16], strides = [1, 1, 1]} : vector<3x3x16xf32> to vector<1x1x16xf32>
    %60 = vector.shape_cast %59 : vector<1x1x16xf32> to vector<16xf32>
    %61 = vector.shape_cast %60 : vector<16xf32> to vector<1x1x16xf32>
    %62 = vector.broadcast %61 : vector<1x1x16xf32> to vector<8x16x16xf32>
    %63 = arith.mulf %58, %62 : vector<8x16x16xf32>
    %64 = arith.addf %53, %63 : vector<8x16x16xf32>
    %65 = vector.extract_strided_slice %57 {offsets = [0, 1, 0], sizes = [8, 16, 16], strides = [1, 1, 1]} : vector<8x18x16xf32> to vector<8x16x16xf32>
    %66 = vector.extract_strided_slice %24 {offsets = [1, 1, 0], sizes = [1, 1, 16], strides = [1, 1, 1]} : vector<3x3x16xf32> to vector<1x1x16xf32>
    %67 = vector.shape_cast %66 : vector<1x1x16xf32> to vector<16xf32>
    %68 = vector.shape_cast %67 : vector<16xf32> to vector<1x1x16xf32>
    %69 = vector.broadcast %68 : vector<1x1x16xf32> to vector<8x16x16xf32>
    %70 = arith.mulf %65, %69 : vector<8x16x16xf32>
    %71 = arith.addf %64, %70 : vector<8x16x16xf32>
    %72 = vector.extract_strided_slice %57 {offsets = [0, 2, 0], sizes = [8, 16, 16], strides = [1, 1, 1]} : vector<8x18x16xf32> to vector<8x16x16xf32>
    %73 = vector.extract_strided_slice %24 {offsets = [1, 2, 0], sizes = [1, 1, 16], strides = [1, 1, 1]} : vector<3x3x16xf32> to vector<1x1x16xf32>
    %74 = vector.shape_cast %73 : vector<1x1x16xf32> to vector<16xf32>
    %75 = vector.shape_cast %74 : vector<16xf32> to vector<1x1x16xf32>
    %76 = vector.broadcast %75 : vector<1x1x16xf32> to vector<8x16x16xf32>
    %77 = arith.mulf %72, %76 : vector<8x16x16xf32>
    %78 = arith.addf %71, %77 : vector<8x16x16xf32>
    %c1_i32_34 = arith.constant 1 : i32
    %79 = arith.muli %27, %c1_i32_34 : i32
    %c2_i32 = arith.constant 2 : i32
    %80 = arith.addi %79, %c2_i32 : i32
    %81 = arith.index_cast %80 : i32 to index
    %c0_35 = arith.constant 0 : index
    %c0_36 = arith.constant 0 : index
    %82 = vector.load %arg8[%81, %c0_35, %c0_36] : memref<18x18x16xf32, #tpu.memory_space<vmem>>, vector<8x18x16xf32>
    %83 = vector.extract_strided_slice %82 {offsets = [0, 0, 0], sizes = [8, 16, 16], strides = [1, 1, 1]} : vector<8x18x16xf32> to vector<8x16x16xf32>
    %84 = vector.extract_strided_slice %24 {offsets = [2, 0, 0], sizes = [1, 1, 16], strides = [1, 1, 1]} : vector<3x3x16xf32> to vector<1x1x16xf32>
    %85 = vector.shape_cast %84 : vector<1x1x16xf32> to vector<16xf32>
    %86 = vector.shape_cast %85 : vector<16xf32> to vector<1x1x16xf32>
    %87 = vector.broadcast %86 : vector<1x1x16xf32> to vector<8x16x16xf32>
    %88 = arith.mulf %83, %87 : vector<8x16x16xf32>
    %89 = arith.addf %78, %88 : vector<8x16x16xf32>
    %90 = vector.extract_strided_slice %82 {offsets = [0, 1, 0], sizes = [8, 16, 16], strides = [1, 1, 1]} : vector<8x18x16xf32> to vector<8x16x16xf32>
    %91 = vector.extract_strided_slice %24 {offsets = [2, 1, 0], sizes = [1, 1, 16], strides = [1, 1, 1]} : vector<3x3x16xf32> to vector<1x1x16xf32>
    %92 = vector.shape_cast %91 : vector<1x1x16xf32> to vector<16xf32>
    %93 = vector.shape_cast %92 : vector<16xf32> to vector<1x1x16xf32>
    %94 = vector.broadcast %93 : vector<1x1x16xf32> to vector<8x16x16xf32>
    %95 = arith.mulf %90, %94 : vector<8x16x16xf32>
    %96 = arith.addf %89, %95 : vector<8x16x16xf32>
    %97 = vector.extract_strided_slice %82 {offsets = [0, 2, 0], sizes = [8, 16, 16], strides = [1, 1, 1]} : vector<8x18x16xf32> to vector<8x16x16xf32>
    %98 = vector.extract_strided_slice %24 {offsets = [2, 2, 0], sizes = [1, 1, 16], strides = [1, 1, 1]} : vector<3x3x16xf32> to vector<1x1x16xf32>
    %99 = vector.shape_cast %98 : vector<1x1x16xf32> to vector<16xf32>
    %100 = vector.shape_cast %99 : vector<16xf32> to vector<1x1x16xf32>
    %101 = vector.broadcast %100 : vector<1x1x16xf32> to vector<8x16x16xf32>
    %102 = arith.mulf %97, %101 : vector<8x16x16xf32>
    %103 = arith.addf %96, %102 : vector<8x16x16xf32>
    %104 = arith.truncf %103 : vector<8x16x16xf32> to vector<8x16x16xbf16>
    %c0_37 = arith.constant 0 : index
    %105 = arith.index_cast %27 : i32 to index
    %c0_38 = arith.constant 0 : index
    %c0_39 = arith.constant 0 : index
    %106 = vector.load %arg5[%c0_37, %105, %c0_38, %c0_39] : memref<1x16x16x16xbf16, #tpu.memory_space<vmem>>, vector<1x8x16x16xbf16>
    %107 = vector.shape_cast %106 : vector<1x8x16x16xbf16> to vector<8x16x16xbf16>
    %108 = vector.shape_cast %104 : vector<8x16x16xbf16> to vector<1x8x16x16xbf16>
    tpu.vector_store %arg5[%c0_37, %105, %c0_38, %c0_39], %108 {strides = array<i32>} : memref<1x16x16x16xbf16, #tpu.memory_space<vmem>>, vector<1x8x16x16xbf16>,
    %109 = vector.shape_cast %103 : vector<8x16x16xf32> to vector<128x16xf32>
    %cst_40 = arith.constant dense<0.000000e+00> : vector<16xf32>
    %110 = vector.multi_reduction <add>, %109, %cst_40 [0] : vector<128x16xf32> to vector<16xf32>
    %111 = vector.shape_cast %110 : vector<16xf32> to vector<1x16xf32>
    %112 = arith.addf %25, %111 : vector<1x16xf32>
    %113 = arith.mulf %109, %109 : vector<128x16xf32>
    %cst_41 = arith.constant dense<0.000000e+00> : vector<16xf32>
    %114 = vector.multi_reduction <add>, %113, %cst_41 [0] : vector<128x16xf32> to vector<16xf32>
    %115 = vector.shape_cast %114 : vector<16xf32> to vector<1x16xf32>
    %116 = arith.addf %25, %115 : vector<1x16xf32>
    %c1_i32_42 = arith.constant 1 : i32
    %c8_i32_43 = arith.constant 8 : i32
    %117 = arith.muli %c1_i32_42, %c8_i32_43 : i32
    %118 = tpu.assume_multiple %117, 8 : i32
    %cst_44 = arith.constant 0.000000e+00 : f32
    %119 = vector.broadcast %cst_44 : f32 to vector<8x16x16xf32>
    %c1_i32_45 = arith.constant 1 : i32
    %120 = arith.muli %118, %c1_i32_45 : i32
    %c0_i32_46 = arith.constant 0 : i32
    %121 = arith.addi %120, %c0_i32_46 : i32
    %122 = arith.index_cast %121 : i32 to index
    %c0_47 = arith.constant 0 : index
    %c0_48 = arith.constant 0 : index
    %123 = vector.load %arg8[%122, %c0_47, %c0_48] : memref<18x18x16xf32, #tpu.memory_space<vmem>>, vector<8x18x16xf32>
    %124 = vector.extract_strided_slice %123 {offsets = [0, 0, 0], sizes = [8, 16, 16], strides = [1, 1, 1]} : vector<8x18x16xf32> to vector<8x16x16xf32>
    %125 = vector.extract_strided_slice %24 {offsets = [0, 0, 0], sizes = [1, 1, 16], strides = [1, 1, 1]} : vector<3x3x16xf32> to vector<1x1x16xf32>
    %126 = vector.shape_cast %125 : vector<1x1x16xf32> to vector<16xf32>
    %127 = vector.shape_cast %126 : vector<16xf32> to vector<1x1x16xf32>
    %128 = vector.broadcast %127 : vector<1x1x16xf32> to vector<8x16x16xf32>
    %129 = arith.mulf %124, %128 : vector<8x16x16xf32>
    %130 = arith.addf %119, %129 : vector<8x16x16xf32>
    %131 = vector.extract_strided_slice %123 {offsets = [0, 1, 0], sizes = [8, 16, 16], strides = [1, 1, 1]} : vector<8x18x16xf32> to vector<8x16x16xf32>
    %132 = vector.extract_strided_slice %24 {offsets = [0, 1, 0], sizes = [1, 1, 16], strides = [1, 1, 1]} : vector<3x3x16xf32> to vector<1x1x16xf32>
    %133 = vector.shape_cast %132 : vector<1x1x16xf32> to vector<16xf32>
    %134 = vector.shape_cast %133 : vector<16xf32> to vector<1x1x16xf32>
    %135 = vector.broadcast %134 : vector<1x1x16xf32> to vector<8x16x16xf32>
    %136 = arith.mulf %131, %135 : vector<8x16x16xf32>
    %137 = arith.addf %130, %136 : vector<8x16x16xf32>
    %138 = vector.extract_strided_slice %123 {offsets = [0, 2, 0], sizes = [8, 16, 16], strides = [1, 1, 1]} : vector<8x18x16xf32> to vector<8x16x16xf32>
    %139 = vector.extract_strided_slice %24 {offsets = [0, 2, 0], sizes = [1, 1, 16], strides = [1, 1, 1]} : vector<3x3x16xf32> to vector<1x1x16xf32>
    %140 = vector.shape_cast %139 : vector<1x1x16xf32> to vector<16xf32>
    %141 = vector.shape_cast %140 : vector<16xf32> to vector<1x1x16xf32>
    %142 = vector.broadcast %141 : vector<1x1x16xf32> to vector<8x16x16xf32>
    %143 = arith.mulf %138, %142 : vector<8x16x16xf32>
    %144 = arith.addf %137, %143 : vector<8x16x16xf32>
    %c1_i32_49 = arith.constant 1 : i32
    %145 = arith.muli %118, %c1_i32_49 : i32
    %c1_i32_50 = arith.constant 1 : i32
    %146 = arith.addi %145, %c1_i32_50 : i32
    %147 = arith.index_cast %146 : i32 to index
    %c0_51 = arith.constant 0 : index
    %c0_52 = arith.constant 0 : index
    %148 = vector.load %arg8[%147, %c0_51, %c0_52] : memref<18x18x16xf32, #tpu.memory_space<vmem>>, vector<8x18x16xf32>
    %149 = vector.extract_strided_slice %148 {offsets = [0, 0, 0], sizes = [8, 16, 16], strides = [1, 1, 1]} : vector<8x18x16xf32> to vector<8x16x16xf32>
    %150 = vector.extract_strided_slice %24 {offsets = [1, 0, 0], sizes = [1, 1, 16], strides = [1, 1, 1]} : vector<3x3x16xf32> to vector<1x1x16xf32>
    %151 = vector.shape_cast %150 : vector<1x1x16xf32> to vector<16xf32>
    %152 = vector.shape_cast %151 : vector<16xf32> to vector<1x1x16xf32>
    %153 = vector.broadcast %152 : vector<1x1x16xf32> to vector<8x16x16xf32>
    %154 = arith.mulf %149, %153 : vector<8x16x16xf32>
    %155 = arith.addf %144, %154 : vector<8x16x16xf32>
    %156 = vector.extract_strided_slice %148 {offsets = [0, 1, 0], sizes = [8, 16, 16], strides = [1, 1, 1]} : vector<8x18x16xf32> to vector<8x16x16xf32>
    %157 = vector.extract_strided_slice %24 {offsets = [1, 1, 0], sizes = [1, 1, 16], strides = [1, 1, 1]} : vector<3x3x16xf32> to vector<1x1x16xf32>
    %158 = vector.shape_cast %157 : vector<1x1x16xf32> to vector<16xf32>
    %159 = vector.shape_cast %158 : vector<16xf32> to vector<1x1x16xf32>
    %160 = vector.broadcast %159 : vector<1x1x16xf32> to vector<8x16x16xf32>
    %161 = arith.mulf %156, %160 : vector<8x16x16xf32>
    %162 = arith.addf %155, %161 : vector<8x16x16xf32>
    %163 = vector.extract_strided_slice %148 {offsets = [0, 2, 0], sizes = [8, 16, 16], strides = [1, 1, 1]} : vector<8x18x16xf32> to vector<8x16x16xf32>
    %164 = vector.extract_strided_slice %24 {offsets = [1, 2, 0], sizes = [1, 1, 16], strides = [1, 1, 1]} : vector<3x3x16xf32> to vector<1x1x16xf32>
    %165 = vector.shape_cast %164 : vector<1x1x16xf32> to vector<16xf32>
    %166 = vector.shape_cast %165 : vector<16xf32> to vector<1x1x16xf32>
    %167 = vector.broadcast %166 : vector<1x1x16xf32> to vector<8x16x16xf32>
    %168 = arith.mulf %163, %167 : vector<8x16x16xf32>
    %169 = arith.addf %162, %168 : vector<8x16x16xf32>
    %c1_i32_53 = arith.constant 1 : i32
    %170 = arith.muli %118, %c1_i32_53 : i32
    %c2_i32_54 = arith.constant 2 : i32
    %171 = arith.addi %170, %c2_i32_54 : i32
    %172 = arith.index_cast %171 : i32 to index
    %c0_55 = arith.constant 0 : index
    %c0_56 = arith.constant 0 : index
    %173 = vector.load %arg8[%172, %c0_55, %c0_56] : memref<18x18x16xf32, #tpu.memory_space<vmem>>, vector<8x18x16xf32>
    %174 = vector.extract_strided_slice %173 {offsets = [0, 0, 0], sizes = [8, 16, 16], strides = [1, 1, 1]} : vector<8x18x16xf32> to vector<8x16x16xf32>
    %175 = vector.extract_strided_slice %24 {offsets = [2, 0, 0], sizes = [1, 1, 16], strides = [1, 1, 1]} : vector<3x3x16xf32> to vector<1x1x16xf32>
    %176 = vector.shape_cast %175 : vector<1x1x16xf32> to vector<16xf32>
    %177 = vector.shape_cast %176 : vector<16xf32> to vector<1x1x16xf32>
    %178 = vector.broadcast %177 : vector<1x1x16xf32> to vector<8x16x16xf32>
    %179 = arith.mulf %174, %178 : vector<8x16x16xf32>
    %180 = arith.addf %169, %179 : vector<8x16x16xf32>
    %181 = vector.extract_strided_slice %173 {offsets = [0, 1, 0], sizes = [8, 16, 16], strides = [1, 1, 1]} : vector<8x18x16xf32> to vector<8x16x16xf32>
    %182 = vector.extract_strided_slice %24 {offsets = [2, 1, 0], sizes = [1, 1, 16], strides = [1, 1, 1]} : vector<3x3x16xf32> to vector<1x1x16xf32>
    %183 = vector.shape_cast %182 : vector<1x1x16xf32> to vector<16xf32>
    %184 = vector.shape_cast %183 : vector<16xf32> to vector<1x1x16xf32>
    %185 = vector.broadcast %184 : vector<1x1x16xf32> to vector<8x16x16xf32>
    %186 = arith.mulf %181, %185 : vector<8x16x16xf32>
    %187 = arith.addf %180, %186 : vector<8x16x16xf32>
    %188 = vector.extract_strided_slice %173 {offsets = [0, 2, 0], sizes = [8, 16, 16], strides = [1, 1, 1]} : vector<8x18x16xf32> to vector<8x16x16xf32>
    %189 = vector.extract_strided_slice %24 {offsets = [2, 2, 0], sizes = [1, 1, 16], strides = [1, 1, 1]} : vector<3x3x16xf32> to vector<1x1x16xf32>
    %190 = vector.shape_cast %189 : vector<1x1x16xf32> to vector<16xf32>
    %191 = vector.shape_cast %190 : vector<16xf32> to vector<1x1x16xf32>
    %192 = vector.broadcast %191 : vector<1x1x16xf32> to vector<8x16x16xf32>
    %193 = arith.mulf %188, %192 : vector<8x16x16xf32>
    %194 = arith.addf %187, %193 : vector<8x16x16xf32>
    %195 = arith.truncf %194 : vector<8x16x16xf32> to vector<8x16x16xbf16>
    %c0_57 = arith.constant 0 : index
    %196 = arith.index_cast %118 : i32 to index
    %c0_58 = arith.constant 0 : index
    %c0_59 = arith.constant 0 : index
    %197 = vector.load %arg5[%c0_57, %196, %c0_58, %c0_59] : memref<1x16x16x16xbf16, #tpu.memory_space<vmem>>, vector<1x8x16x16xbf16>
    %198 = vector.shape_cast %197 : vector<1x8x16x16xbf16> to vector<8x16x16xbf16>
    %199 = vector.shape_cast %195 : vector<8x16x16xbf16> to vector<1x8x16x16xbf16>
    tpu.vector_store %arg5[%c0_57, %196, %c0_58, %c0_59], %199 {strides = array<i32>} : memref<1x16x16x16xbf16, #tpu.memory_space<vmem>>, vector<1x8x16x16xbf16>,
    %200 = vector.shape_cast %194 : vector<8x16x16xf32> to vector<128x16xf32>
    %cst_60 = arith.constant dense<0.000000e+00> : vector<16xf32>
    %201 = vector.multi_reduction <add>, %200, %cst_60 [0] : vector<128x16xf32> to vector<16xf32>
    %202 = vector.shape_cast %201 : vector<16xf32> to vector<1x16xf32>
    %203 = arith.addf %112, %202 : vector<1x16xf32>
    %204 = arith.mulf %200, %200 : vector<128x16xf32>
    %cst_61 = arith.constant dense<0.000000e+00> : vector<16xf32>
    %205 = vector.multi_reduction <add>, %204, %cst_61 [0] : vector<128x16xf32> to vector<16xf32>
    %206 = vector.shape_cast %205 : vector<16xf32> to vector<1x16xf32>
    %207 = arith.addf %116, %206 : vector<1x16xf32>
    %c2_i32_62 = arith.constant 2 : i32
    %c0_63 = arith.constant 0 : index
    %c0_64 = arith.constant 0 : index
    %c0_65 = arith.constant 0 : index
    %208 = vector.load %arg6[%c0_63, %c0_64, %c0_65] : memref<1x1x16xf32, #tpu.memory_space<vmem>>, vector<1x1x16xf32>
    %209 = vector.shape_cast %208 : vector<1x1x16xf32> to vector<1x16xf32>
    %210 = vector.shape_cast %203 : vector<1x16xf32> to vector<1x1x16xf32>
    tpu.vector_store %arg6[%c0_63, %c0_64, %c0_65], %210 {strides = array<i32>} : memref<1x1x16xf32, #tpu.memory_space<vmem>>, vector<1x1x16xf32>,
    %c0_66 = arith.constant 0 : index
    %c0_67 = arith.constant 0 : index
    %c0_68 = arith.constant 0 : index
    %211 = vector.load %arg7[%c0_66, %c0_67, %c0_68] : memref<1x1x16xf32, #tpu.memory_space<vmem>>, vector<1x1x16xf32>
    %212 = vector.shape_cast %211 : vector<1x1x16xf32> to vector<1x16xf32>
    %213 = vector.shape_cast %207 : vector<1x16xf32> to vector<1x1x16xf32>
    tpu.vector_store %arg7[%c0_66, %c0_67, %c0_68], %213 {strides = array<i32>} : memref<1x1x16xf32, #tpu.memory_space<vmem>>, vector<1x1x16xf32>,
    return
  }
  func.func @transform_0(%arg0: i32) -> (i32, i32, i32, i32) {
    %c0_i32 = arith.constant 0 : i32
    %c0_i32_0 = arith.constant 0 : i32
    %c0_i32_1 = arith.constant 0 : i32
    %c0_i32_2 = arith.constant 0 : i32
    return %arg0, %c0_i32, %c0_i32_0, %c0_i32_1 : i32, i32, i32, i32
  }
  func.func @transform_1(%arg0: i32) -> (i32, i32) {
    %c0_i32 = arith.constant 0 : i32
    %c0_i32_0 = arith.constant 0 : i32
    %c0_i32_1 = arith.constant 0 : i32
    return %c0_i32, %c0_i32_0 : i32, i32
  }
  func.func @transform_2(%arg0: i32) -> (i32, i32) {
    %c0_i32 = arith.constant 0 : i32
    %c0_i32_0 = arith.constant 0 : i32
    %c0_i32_1 = arith.constant 0 : i32
    return %c0_i32, %c0_i32_0 : i32, i32
  }
  func.func @transform_3(%arg0: i32) -> (i32, i32, i32) {
    %c0_i32 = arith.constant 0 : i32
    %c0_i32_0 = arith.constant 0 : i32
    %c0_i32_1 = arith.constant 0 : i32
    %c0_i32_2 = arith.constant 0 : i32
    return %c0_i32, %c0_i32_0, %c0_i32_1 : i32, i32, i32
  }
  func.func @transform_4(%arg0: i32) -> (i32, i32, i32, i32) {
    %c0_i32 = arith.constant 0 : i32
    %c0_i32_0 = arith.constant 0 : i32
    %c0_i32_1 = arith.constant 0 : i32
    %c0_i32_2 = arith.constant 0 : i32
    return %arg0, %c0_i32, %c0_i32_0, %c0_i32_1 : i32, i32, i32, i32
  }
  func.func @transform_5(%arg0: i32) -> (i32, i32, i32) {
    %c0_i32 = arith.constant 0 : i32
    %c0_i32_0 = arith.constant 0 : i32
    %c0_i32_1 = arith.constant 0 : i32
    return %arg0, %c0_i32, %c0_i32_0 : i32, i32, i32
  }
  func.func @transform_6(%arg0: i32) -> (i32, i32, i32) {
    %c0_i32 = arith.constant 0 : i32
    %c0_i32_0 = arith.constant 0 : i32
    %c0_i32_1 = arith.constant 0 : i32
    return %arg0, %c0_i32, %c0_i32_0 : i32, i32, i32
  }
}

module attributes {stable_mosaic.version = 11 : i64} {
  func.func @se_pool_kernel(%arg0: i32, %arg1: memref<1x16x16x16xbf16, #tpu.memory_space<vmem>>, %arg2: memref<1x16xf32, #tpu.memory_space<vmem>>, %arg3: memref<1x16xf32, #tpu.memory_space<vmem>>, %arg4: memref<1x1x16xf32, #tpu.memory_space<vmem>>) attributes {dimension_semantics = [#tpu.dimension_semantics<parallel>], iteration_bounds = array<i64: 2>, scalar_prefetch = 0 : i64, scratch_operands = 0 : i64, tpu.core_type = #tpu.core_type<tc>, window_params = [{transform_indices = @transform_0, window_bounds = array<i64: 1, 16, 16, 16>}, {pipeline_mode = #tpu.pipeline_mode<synchronous>, transform_indices = @transform_1, window_bounds = array<i64: 1, 16>}, {pipeline_mode = #tpu.pipeline_mode<synchronous>, transform_indices = @transform_2, window_bounds = array<i64: 1, 16>}, {transform_indices = @transform_3, window_bounds = array<i64: 1, 1, 16>}]} {
    %c0 = arith.constant 0 : index
    %c0_0 = arith.constant 0 : index
    %c0_1 = arith.constant 0 : index
    %c0_2 = arith.constant 0 : index
    %0 = vector.load %arg1[%c0, %c0_0, %c0_1, %c0_2] : memref<1x16x16x16xbf16, #tpu.memory_space<vmem>>, vector<1x16x16x16xbf16>
    %1 = vector.shape_cast %0 : vector<1x16x16x16xbf16> to vector<16x16x16xbf16>
    %2 = arith.extf %1 : vector<16x16x16xbf16> to vector<16x16x16xf32>
    %c0_3 = arith.constant 0 : index
    %c0_4 = arith.constant 0 : index
    %3 = vector.load %arg2[%c0_3, %c0_4] : memref<1x16xf32, #tpu.memory_space<vmem>>, vector<1x16xf32>
    %4 = vector.shape_cast %3 : vector<1x16xf32> to vector<1x1x16xf32>
    %5 = vector.broadcast %4 : vector<1x1x16xf32> to vector<16x16x16xf32>
    %6 = arith.mulf %2, %5 : vector<16x16x16xf32>
    %c0_5 = arith.constant 0 : index
    %c0_6 = arith.constant 0 : index
    %7 = vector.load %arg3[%c0_5, %c0_6] : memref<1x16xf32, #tpu.memory_space<vmem>>, vector<1x16xf32>
    %8 = vector.shape_cast %7 : vector<1x16xf32> to vector<1x1x16xf32>
    %9 = vector.broadcast %8 : vector<1x1x16xf32> to vector<16x16x16xf32>
    %10 = arith.addf %6, %9 : vector<16x16x16xf32>
    %11 = arith.negf %10 : vector<16x16x16xf32>
    %12 = math.exp %11 : vector<16x16x16xf32>
    %cst = arith.constant 1.000000e+00 : f32
    %13 = vector.broadcast %cst : f32 to vector<16x16x16xf32>
    %14 = arith.addf %13, %12 : vector<16x16x16xf32>
    %15 = arith.divf %13, %14 : vector<16x16x16xf32>
    %16 = arith.mulf %10, %15 : vector<16x16x16xf32>
    %17 = vector.shape_cast %16 : vector<16x16x16xf32> to vector<256x16xf32>
    %cst_7 = arith.constant dense<0.000000e+00> : vector<16xf32>
    %18 = vector.multi_reduction <add>, %17, %cst_7 [0] : vector<256x16xf32> to vector<16xf32>
    %19 = vector.shape_cast %18 : vector<16xf32> to vector<1x16xf32>
    %c0_8 = arith.constant 0 : index
    %c0_9 = arith.constant 0 : index
    %c0_10 = arith.constant 0 : index
    %20 = vector.load %arg4[%c0_8, %c0_9, %c0_10] : memref<1x1x16xf32, #tpu.memory_space<vmem>>, vector<1x1x16xf32>
    %21 = vector.shape_cast %20 : vector<1x1x16xf32> to vector<1x16xf32>
    %22 = vector.shape_cast %19 : vector<1x16xf32> to vector<1x1x16xf32>
    tpu.vector_store %arg4[%c0_8, %c0_9, %c0_10], %22 {strides = array<i32>} : memref<1x1x16xf32, #tpu.memory_space<vmem>>, vector<1x1x16xf32>,
    return
  }
  func.func @transform_0(%arg0: i32) -> (i32, i32, i32, i32) {
    %c0_i32 = arith.constant 0 : i32
    %c0_i32_0 = arith.constant 0 : i32
    %c0_i32_1 = arith.constant 0 : i32
    %c0_i32_2 = arith.constant 0 : i32
    return %arg0, %c0_i32, %c0_i32_0, %c0_i32_1 : i32, i32, i32, i32
  }
  func.func @transform_1(%arg0: i32) -> (i32, i32) {
    %c0_i32 = arith.constant 0 : i32
    %c0_i32_0 = arith.constant 0 : i32
    %c0_i32_1 = arith.constant 0 : i32
    return %c0_i32, %c0_i32_0 : i32, i32
  }
  func.func @transform_2(%arg0: i32) -> (i32, i32) {
    %c0_i32 = arith.constant 0 : i32
    %c0_i32_0 = arith.constant 0 : i32
    %c0_i32_1 = arith.constant 0 : i32
    return %c0_i32, %c0_i32_0 : i32, i32
  }
  func.func @transform_3(%arg0: i32) -> (i32, i32, i32) {
    %c0_i32 = arith.constant 0 : i32
    %c0_i32_0 = arith.constant 0 : i32
    %c0_i32_1 = arith.constant 0 : i32
    return %arg0, %c0_i32, %c0_i32_0 : i32, i32, i32
  }
}

module attributes {stable_mosaic.version = 11 : i64} {
  func.func @project_kernel(%arg0: i32, %arg1: i32, %arg2: memref<1x8x512xbf16, #tpu.memory_space<vmem>>, %arg3: memref<1x512xf32, #tpu.memory_space<vmem>>, %arg4: memref<1x512xf32, #tpu.memory_space<vmem>>, %arg5: memref<1x1x512xf32, #tpu.memory_space<vmem>>, %arg6: memref<512x128xbf16, #tpu.memory_space<vmem>>, %arg7: memref<8x128xbf16, #tpu.memory_space<vmem>>, %arg8: memref<1x1x1x128xf32, #tpu.memory_space<vmem>>, %arg9: memref<1x1x1x128xf32, #tpu.memory_space<vmem>>) attributes {dimension_semantics = [#tpu.dimension_semantics<parallel>, #tpu.dimension_semantics<parallel>], iteration_bounds = array<i64: 2, 1>, scalar_prefetch = 0 : i64, scratch_operands = 0 : i64, tpu.core_type = #tpu.core_type<tc>, window_params = [{transform_indices = @transform_0, window_bounds = array<i64: 1, 8, 512>}, {pipeline_mode = #tpu.pipeline_mode<synchronous>, transform_indices = @transform_1, window_bounds = array<i64: 1, 512>}, {pipeline_mode = #tpu.pipeline_mode<synchronous>, transform_indices = @transform_2, window_bounds = array<i64: 1, 512>}, {transform_indices = @transform_3, window_bounds = array<i64: 1, 1, 512>}, {pipeline_mode = #tpu.pipeline_mode<synchronous>, transform_indices = @transform_4, window_bounds = array<i64: 512, 128>}, {transform_indices = @transform_5, window_bounds = array<i64: 8, 128>}, {transform_indices = @transform_6, window_bounds = array<i64: 1, 1, 1, 128>}, {transform_indices = @transform_7, window_bounds = array<i64: 1, 1, 1, 128>}]} {
    %c0 = arith.constant 0 : index
    %c0_0 = arith.constant 0 : index
    %c0_1 = arith.constant 0 : index
    %0 = vector.load %arg2[%c0, %c0_0, %c0_1] : memref<1x8x512xbf16, #tpu.memory_space<vmem>>, vector<1x8x512xbf16>
    %1 = vector.shape_cast %0 : vector<1x8x512xbf16> to vector<8x512xbf16>
    %2 = arith.extf %1 : vector<8x512xbf16> to vector<8x512xf32>
    %c0_2 = arith.constant 0 : index
    %c0_3 = arith.constant 0 : index
    %3 = vector.load %arg3[%c0_2, %c0_3] : memref<1x512xf32, #tpu.memory_space<vmem>>, vector<1x512xf32>
    %4 = vector.broadcast %3 : vector<1x512xf32> to vector<8x512xf32>
    %5 = arith.mulf %2, %4 : vector<8x512xf32>
    %c0_4 = arith.constant 0 : index
    %c0_5 = arith.constant 0 : index
    %6 = vector.load %arg4[%c0_4, %c0_5] : memref<1x512xf32, #tpu.memory_space<vmem>>, vector<1x512xf32>
    %7 = vector.broadcast %6 : vector<1x512xf32> to vector<8x512xf32>
    %8 = arith.addf %5, %7 : vector<8x512xf32>
    %9 = arith.negf %8 : vector<8x512xf32>
    %10 = math.exp %9 : vector<8x512xf32>
    %cst = arith.constant 1.000000e+00 : f32
    %11 = vector.broadcast %cst : f32 to vector<8x512xf32>
    %12 = arith.addf %11, %10 : vector<8x512xf32>
    %13 = arith.divf %11, %12 : vector<8x512xf32>
    %14 = arith.mulf %8, %13 : vector<8x512xf32>
    %c0_6 = arith.constant 0 : index
    %c0_7 = arith.constant 0 : index
    %c0_8 = arith.constant 0 : index
    %15 = vector.load %arg5[%c0_6, %c0_7, %c0_8] : memref<1x1x512xf32, #tpu.memory_space<vmem>>, vector<1x1x512xf32>
    %16 = vector.shape_cast %15 : vector<1x1x512xf32> to vector<1x512xf32>
    %17 = vector.broadcast %16 : vector<1x512xf32> to vector<8x512xf32>
    %18 = arith.mulf %14, %17 : vector<8x512xf32>
    %19 = arith.truncf %18 : vector<8x512xf32> to vector<8x512xbf16>
    %c0_9 = arith.constant 0 : index
    %c0_10 = arith.constant 0 : index
    %20 = vector.load %arg6[%c0_9, %c0_10] : memref<512x128xbf16, #tpu.memory_space<vmem>>, vector<512x128xbf16>
    %cst_11 = arith.constant dense<0.000000e+00> : vector<8x128xf32>
    %21 = tpu.matmul %19, %20, %cst_11 {dimension_numbers = #tpu.dot_dimension_numbers<[1], [0], [0], [1], [0, 0, 1, 1], [], []>} : vector<8x512xbf16>, vector<512x128xbf16>, vector<8x128xf32> -> vector<8x128xf32>
    %22 = arith.truncf %21 : vector<8x128xf32> to vector<8x128xbf16>
    %c0_12 = arith.constant 0 : index
    %c0_13 = arith.constant 0 : index
    %23 = vector.load %arg7[%c0_12, %c0_13] : memref<8x128xbf16, #tpu.memory_space<vmem>>, vector<8x128xbf16>
    tpu.vector_store %arg7[%c0_12, %c0_13], %22 {strides = array<i32>} : memref<8x128xbf16, #tpu.memory_space<vmem>>, vector<8x128xbf16>,
    %cst_14 = arith.constant dense<0.000000e+00> : vector<128xf32>
    %24 = vector.multi_reduction <add>, %21, %cst_14 [0] : vector<8x128xf32> to vector<128xf32>
    %25 = vector.shape_cast %24 : vector<128xf32> to vector<1x128xf32>
    %c0_15 = arith.constant 0 : index
    %c0_16 = arith.constant 0 : index
    %c0_17 = arith.constant 0 : index
    %c0_18 = arith.constant 0 : index
    %26 = vector.load %arg8[%c0_15, %c0_16, %c0_17, %c0_18] : memref<1x1x1x128xf32, #tpu.memory_space<vmem>>, vector<1x1x1x128xf32>
    %27 = vector.shape_cast %26 : vector<1x1x1x128xf32> to vector<1x128xf32>
    %28 = vector.shape_cast %25 : vector<1x128xf32> to vector<1x1x1x128xf32>
    tpu.vector_store %arg8[%c0_15, %c0_16, %c0_17, %c0_18], %28 {strides = array<i32>} : memref<1x1x1x128xf32, #tpu.memory_space<vmem>>, vector<1x1x1x128xf32>,
    %29 = arith.mulf %21, %21 : vector<8x128xf32>
    %cst_19 = arith.constant dense<0.000000e+00> : vector<128xf32>
    %30 = vector.multi_reduction <add>, %29, %cst_19 [0] : vector<8x128xf32> to vector<128xf32>
    %31 = vector.shape_cast %30 : vector<128xf32> to vector<1x128xf32>
    %c0_20 = arith.constant 0 : index
    %c0_21 = arith.constant 0 : index
    %c0_22 = arith.constant 0 : index
    %c0_23 = arith.constant 0 : index
    %32 = vector.load %arg9[%c0_20, %c0_21, %c0_22, %c0_23] : memref<1x1x1x128xf32, #tpu.memory_space<vmem>>, vector<1x1x1x128xf32>
    %33 = vector.shape_cast %32 : vector<1x1x1x128xf32> to vector<1x128xf32>
    %34 = vector.shape_cast %31 : vector<1x128xf32> to vector<1x1x1x128xf32>
    tpu.vector_store %arg9[%c0_20, %c0_21, %c0_22, %c0_23], %34 {strides = array<i32>} : memref<1x1x1x128xf32, #tpu.memory_space<vmem>>, vector<1x1x1x128xf32>,
    return
  }
  func.func @transform_0(%arg0: i32, %arg1: i32) -> (i32, i32, i32) {
    %c0_i32 = arith.constant 0 : i32
    %c0_i32_0 = arith.constant 0 : i32
    return %arg0, %arg1, %c0_i32 : i32, i32, i32
  }
  func.func @transform_1(%arg0: i32, %arg1: i32) -> (i32, i32) {
    %c0_i32 = arith.constant 0 : i32
    %c0_i32_0 = arith.constant 0 : i32
    %c0_i32_1 = arith.constant 0 : i32
    return %c0_i32, %c0_i32_0 : i32, i32
  }
  func.func @transform_2(%arg0: i32, %arg1: i32) -> (i32, i32) {
    %c0_i32 = arith.constant 0 : i32
    %c0_i32_0 = arith.constant 0 : i32
    %c0_i32_1 = arith.constant 0 : i32
    return %c0_i32, %c0_i32_0 : i32, i32
  }
  func.func @transform_3(%arg0: i32, %arg1: i32) -> (i32, i32, i32) {
    %c0_i32 = arith.constant 0 : i32
    %c0_i32_0 = arith.constant 0 : i32
    %c0_i32_1 = arith.constant 0 : i32
    return %arg0, %c0_i32, %c0_i32_0 : i32, i32, i32
  }
  func.func @transform_4(%arg0: i32, %arg1: i32) -> (i32, i32) {
    %c0_i32 = arith.constant 0 : i32
    %c0_i32_0 = arith.constant 0 : i32
    %c0_i32_1 = arith.constant 0 : i32
    return %c0_i32, %c0_i32_0 : i32, i32
  }
  func.func @transform_5(%arg0: i32, %arg1: i32) -> (i32, i32) {
    %c1_i32 = arith.constant 1 : i32
    %0 = arith.muli %arg0, %c1_i32 : i32
    %1 = arith.addi %0, %arg1 : i32
    %c0_i32 = arith.constant 0 : i32
    %c0_i32_0 = arith.constant 0 : i32
    return %1, %c0_i32 : i32, i32
  }
  func.func @transform_6(%arg0: i32, %arg1: i32) -> (i32, i32, i32, i32) {
    %c0_i32 = arith.constant 0 : i32
    %c0_i32_0 = arith.constant 0 : i32
    %c0_i32_1 = arith.constant 0 : i32
    return %arg0, %arg1, %c0_i32, %c0_i32_0 : i32, i32, i32, i32
  }
  func.func @transform_7(%arg0: i32, %arg1: i32) -> (i32, i32, i32, i32) {
    %c0_i32 = arith.constant 0 : i32
    %c0_i32_0 = arith.constant 0 : i32
    %c0_i32_1 = arith.constant 0 : i32
    return %arg0, %arg1, %c0_i32, %c0_i32_0 : i32, i32, i32, i32
  }
}

module attributes {stable_mosaic.version = 11 : i64} {
  func.func @bn_res_kernel(%arg0: i32, %arg1: memref<16x128xbf16, #tpu.memory_space<vmem>>, %arg2: memref<1x128xf32, #tpu.memory_space<vmem>>, %arg3: memref<1x128xf32, #tpu.memory_space<vmem>>, %arg4: memref<16x128xbf16, #tpu.memory_space<vmem>>, %arg5: memref<16x128xf32, #tpu.memory_space<vmem>>) attributes {dimension_semantics = [#tpu.dimension_semantics<parallel>], iteration_bounds = array<i64: 1>, scalar_prefetch = 0 : i64, scratch_operands = 0 : i64, tpu.core_type = #tpu.core_type<tc>, window_params = [{transform_indices = @transform_0, window_bounds = array<i64: 16, 128>}, {pipeline_mode = #tpu.pipeline_mode<synchronous>, transform_indices = @transform_1, window_bounds = array<i64: 1, 128>}, {pipeline_mode = #tpu.pipeline_mode<synchronous>, transform_indices = @transform_2, window_bounds = array<i64: 1, 128>}, {transform_indices = @transform_3, window_bounds = array<i64: 16, 128>}, {transform_indices = @transform_4, window_bounds = array<i64: 16, 128>}]} {
    %c0 = arith.constant 0 : index
    %c0_0 = arith.constant 0 : index
    %0 = vector.load %arg1[%c0, %c0_0] : memref<16x128xbf16, #tpu.memory_space<vmem>>, vector<16x128xbf16>
    %1 = arith.extf %0 : vector<16x128xbf16> to vector<16x128xf32>
    %c0_1 = arith.constant 0 : index
    %c0_2 = arith.constant 0 : index
    %2 = vector.load %arg2[%c0_1, %c0_2] : memref<1x128xf32, #tpu.memory_space<vmem>>, vector<1x128xf32>
    %3 = vector.broadcast %2 : vector<1x128xf32> to vector<16x128xf32>
    %4 = arith.mulf %1, %3 : vector<16x128xf32>
    %c0_3 = arith.constant 0 : index
    %c0_4 = arith.constant 0 : index
    %5 = vector.load %arg3[%c0_3, %c0_4] : memref<1x128xf32, #tpu.memory_space<vmem>>, vector<1x128xf32>
    %6 = vector.broadcast %5 : vector<1x128xf32> to vector<16x128xf32>
    %7 = arith.addf %4, %6 : vector<16x128xf32>
    %c0_5 = arith.constant 0 : index
    %c0_6 = arith.constant 0 : index
    %8 = vector.load %arg4[%c0_5, %c0_6] : memref<16x128xbf16, #tpu.memory_space<vmem>>, vector<16x128xbf16>
    %9 = arith.extf %8 : vector<16x128xbf16> to vector<16x128xf32>
    %10 = arith.addf %7, %9 : vector<16x128xf32>
    %c0_7 = arith.constant 0 : index
    %c0_8 = arith.constant 0 : index
    %11 = vector.load %arg5[%c0_7, %c0_8] : memref<16x128xf32, #tpu.memory_space<vmem>>, vector<16x128xf32>
    tpu.vector_store %arg5[%c0_7, %c0_8], %10 {strides = array<i32>} : memref<16x128xf32, #tpu.memory_space<vmem>>, vector<16x128xf32>,
    return
  }
  func.func @transform_0(%arg0: i32) -> (i32, i32) {
    %c0_i32 = arith.constant 0 : i32
    %c0_i32_0 = arith.constant 0 : i32
    return %arg0, %c0_i32 : i32, i32
  }
  func.func @transform_1(%arg0: i32) -> (i32, i32) {
    %c0_i32 = arith.constant 0 : i32
    %c0_i32_0 = arith.constant 0 : i32
    %c0_i32_1 = arith.constant 0 : i32
    return %c0_i32, %c0_i32_0 : i32, i32
  }
  func.func @transform_2(%arg0: i32) -> (i32, i32) {
    %c0_i32 = arith.constant 0 : i32
    %c0_i32_0 = arith.constant 0 : i32
    %c0_i32_1 = arith.constant 0 : i32
    return %c0_i32, %c0_i32_0 : i32, i32
  }
  func.func @transform_3(%arg0: i32) -> (i32, i32) {
    %c0_i32 = arith.constant 0 : i32
    %c0_i32_0 = arith.constant 0 : i32
    return %arg0, %c0_i32 : i32, i32
  }
  func.func @transform_4(%arg0: i32) -> (i32, i32) {
    %c0_i32 = arith.constant 0 : i32
    %c0_i32_0 = arith.constant 0 : i32
    return %arg0, %c0_i32 : i32, i32
  }
}

</mosaic_0001>

<bundles_post_ra>
// kernel: mbconv_forward.7
= control target key start
LH: loop header
LB: loop body
LE: loop exit
PB: predicated region body
PF: predicated region fallthrough
CT: control target
= control target key end

     0   :  { %s1349_s12 = smov 0   ;;  %s2791_s0 = inlined_call_operand.vmem [shape: bf16[2,16,16,16], index: 0, kind: input, shape index: {}]   ;;  %s2792_s1 = inlined_call_operand.vmem [shape: f32[1,16], index: 1, kind: input, shape index: {}]   ;;  %s2793_s2 = inlined_call_operand.vmem [shape: f32[1,16], index: 2, kind: input, shape index: {}]   ;;  %s2794_s3 = inlined_call_operand.vmem [shape: f32[2,1,16], index: 3, kind: output, shape index: {}]  }
   0x1 LB: > { %s1062_s13 = sadd.s32 4294967295, %s1327_s12   ;;  %p1066_p0 = scmp.ge.s32.totalorder %s1327_s12, 1  ;;  %s1327_s12 = sphi %s1349_s12, %s13_s12  }
   0x2   : > { %p137_p1 = scmp.lt.s32.totalorder %s1327_s12, 3 }
   0x4   : > { %p138_p2 = pnand %p1066_p0, %p137_p1 }
   0x6   : > { %141 = sbr.rel (%p138_p2) target bundleno = 217 (0xd9), region = 32 }
   0xb   : > { %p159_p3 = scmp.lt.s32.totalorder %s1062_s13, 1  ;;  %v1376_v7 = vld [vmem:[%s2792_s1] ss:$0 sm:$0xff] }
   0xc   : > { %v1404_v28 = vld [vmem:[%s2793_s2] ss:$0 sm:$0xff] }
   0xd   : > { %s3073_s13 = smov (!%p159_p3, %s1062_s13), 1 }
   0xe   : > { %s1103_s14 = sshll.u32 %s3073_s13, 7  ;;  %s166_s24 = scalar_lea.vmem %s2794_s3, %s3073_s13 }
   0xf   : > { %s1363_s17 = scalar_lea.vmem %s2791_s0, %s1103_s14 }
  0x10   : > { %v1105_v0 = vld [vmem:[%s1363_s17] sm:$0xff]   ;;  %v1168_v1 = vld [vmem:[%s1363_s17 + $0x8] sm:$0xff]   ;;  %v1169_v2 = vld [vmem:[%s1363_s17 + $0x10] sm:$0xff]  }
  0x11   : > { %v1170_v3 = vld [vmem:[%s1363_s17 + $0x18] sm:$0xff]   ;;  %v1106_v4 = vunpack.c.l.bf16 %v1105_v0  ;;  %v1171_v5 = vld [vmem:[%s1363_s17 + $0x20] sm:$0xff]   ;;  %v1371_v6 = vld [vmem:[%s1363_s17 + $0x28] sm:$0xff]   ;;  %v1107_v8 = vunpack.c.h.bf16 %v1105_v0  ;;  %v1110_v9 = vunpack.c.l.bf16 %v1168_v1  ;;  %v1111_v11 = vunpack.c.h.bf16 %v1168_v1 }
  0x12   : > { %v1379_v10 = vld [vmem:[%s1363_s17 + $0x30] sm:$0xff]   ;;  %v1114_v12 = vunpack.c.l.bf16 %v1169_v2  ;;  %v1115_v13 = vunpack.c.h.bf16 %v1169_v2  ;;  %v1118_v14 = vunpack.c.l.bf16 %v1170_v3  ;;  %v1382_v15 = vld [vmem:[%s1363_s17 + $0x38] sm:$0xff]   ;;  %v1385_v16 = vld [vmem:[%s1363_s17 + $0x40] sm:$0xff]   ;;  %v1119_v17 = vunpack.c.h.bf16 %v1170_v3 }
  0x13   : > { %v1122_v18 = vunpack.c.l.bf16 %v1171_v5  ;;  %v1123_v19 = vunpack.c.h.bf16 %v1171_v5  ;;  %v1126_v20 = vunpack.c.l.bf16 %v1371_v6  ;;  %v1389_v21 = vld [vmem:[%s1363_s17 + $0x48] sm:$0xff]   ;;  %v1127_v22 = vunpack.c.h.bf16 %v1371_v6  ;;  %v1395_v25 = vld [vmem:[%s1363_s17 + $0x50] sm:$0xff]   ;;  %v1398_v26 = vld [vmem:[%s1363_s17 + $0x58] sm:$0xff]  }
  0x14   : > { %v1130_v23 = vunpack.c.l.bf16 %v1379_v10  ;;  %v1131_v24 = vunpack.c.h.bf16 %v1379_v10  ;;  %v235_v27 = vmul.f32 %v1376_v7, %v1106_v4  ;;  %v1134_v29 = vunpack.c.l.bf16 %v1382_v15  ;;  %v1410_v32 = vld [vmem:[%s1363_s17 + $0x60] sm:$0xff]   ;;  %v1417_v37 = vld [vmem:[%s1363_s17 + $0x68] sm:$0xff]   ;;  %v1424_v42 = vld [vmem:[%s1363_s17 + $0x70] sm:$0xff]  }
  0x15   : > { %v1135_v30 = vunpack.c.h.bf16 %v1382_v15  ;;  %v1138_v31 = vunpack.c.l.bf16 %v1385_v16  ;;  %v236_v33 = vmul.f32 %v1376_v7, %v1107_v8  ;;  %v1139_v34 = vunpack.c.h.bf16 %v1385_v16  ;;  %v1430_v46 = vld [vmem:[%s1363_s17 + $0x78] sm:$0xff]  }
  0x16   : > { %v1142_v35 = vunpack.c.l.bf16 %v1389_v21  ;;  %v1143_v36 = vunpack.c.h.bf16 %v1389_v21  ;;  %v237_v38 = vmul.f32 %v1376_v7, %v1110_v9  ;;  %v1146_v39 = vunpack.c.l.bf16 %v1395_v25 }
  0x17   : > { %v1147_v40 = vunpack.c.h.bf16 %v1395_v25  ;;  %v1150_v41 = vunpack.c.l.bf16 %v1398_v26  ;;  %v238_v43 = vmul.f32 %v1376_v7, %v1111_v11  ;;  %v1151_v44 = vunpack.c.h.bf16 %v1398_v26 }
  0x18   : > { %v1154_v45 = vunpack.c.l.bf16 %v1410_v32  ;;  %v239_v47 = vmul.f32 %v1376_v7, %v1114_v12  ;;  %v1434_v48 = vadd.f32 %v1404_v28, %v235_v27  ;;  %v1155_v49 = vunpack.c.h.bf16 %v1410_v32 }
  0x19   : > { %v1158_v50 = vunpack.c.l.bf16 %v1417_v37  ;;  %v240_v51 = vmul.f32 %v1376_v7, %v1115_v13  ;;  %v1440_v52 = vadd.f32 %v1404_v28, %v236_v33  ;;  %v1159_v53 = vunpack.c.h.bf16 %v1417_v37 }
  0x1a   : > { %2840 = vst [vmem:[#allocation2_spill] sm:$0xff] %v1434_v48  ;;  %v1162_v54 = vunpack.c.l.bf16 %v1424_v42  ;;  %v241_v55 = vmul.f32 %v1376_v7, %v1118_v14  ;;  %v1446_v56 = vadd.f32 %v1404_v28, %v237_v38  ;;  %v1163_v57 = vunpack.c.h.bf16 %v1424_v42 }
  0x1b   : > { %2841 = vst [vmem:[#allocation3_spill] sm:$0xff] %v1440_v52  ;;  %v1166_v58 = vunpack.c.l.bf16 %v1430_v46  ;;  %v242_v59 = vmul.f32 %v1376_v7, %v1119_v17  ;;  %v1452_v60 = vadd.f32 %v1404_v28, %v238_v43  ;;  %v1167_v61 = vunpack.c.h.bf16 %v1430_v46 }
  0x1c   : > { %2842 = vst [vmem:[#allocation4_spill] sm:$0xff] %v1446_v56  ;;  %v243_v62 = vmul.f32 %v1376_v7, %v1122_v18  ;;  %v1457_v63 = vadd.f32 %v1404_v28, %v239_v47  ;;  %v1069_v0 = vmul.f32 -1.442695, %v1434_v48  ;;  %v244_v1 = vmul.f32 %v1376_v7, %v1123_v19 }
  0x1d   : > { %2843 = vst [vmem:[#allocation5_spill] sm:$0xff] %v1452_v60  ;;  %v245_v2 = vmul.f32 %v1376_v7, %v1126_v20  ;;  %v1463_v3 = vadd.f32 %v1404_v28, %v240_v51  ;;  %v1070_v4 = vmul.f32 -1.442695, %v1440_v52  ;;  %v246_v5 = vmul.f32 %v1376_v7, %v1127_v22 }
  0x1e   : > { %2844 = vst [vmem:[#allocation6_spill] sm:$0xff] %v1457_v63  ;;  %v247_v6 = vmul.f32 %v1376_v7, %v1130_v23  ;;  %v1469_v8 = vadd.f32 %v1404_v28, %v241_v55  ;;  %v1071_v9 = vmul.f32 -1.442695, %v1446_v56  ;;  %v248_v10 = vmul.f32 %v1376_v7, %v1131_v24 }
  0x1f   : > { %2845 = vst [vmem:[#allocation7_spill] sm:$0xff] %v1463_v3  ;;  %v249_v11 = vmul.f32 %v1376_v7, %v1134_v29  ;;  %v1475_v12 = vadd.f32 %v1404_v28, %v242_v59  ;;  %v1072_v13 = vmul.f32 -1.442695, %v1452_v60  ;;  %v250_v14 = vmul.f32 %v1376_v7, %v1135_v30 }
  0x20   : > { %2846 = vst [vmem:[#allocation8_spill] sm:$0xff] %v1469_v8  ;;  %v1480_v15 = vadd.f32 %v1404_v28, %v243_v62  ;;  %1193 = vpow2.f32 %v1069_v0  ;;  %v1073_v16 = vmul.f32 -1.442695, %v1457_v63  ;;  %v251_v17 = vmul.f32 %v1376_v7, %v1138_v31 }
  0x21   : > { %2847 = vst [vmem:[#allocation9_spill] sm:$0xff] %v1475_v12  ;;  %v1485_v18 = vadd.f32 %v1404_v28, %v244_v1  ;;  %1195 = vpow2.f32 %v1070_v4  ;;  %v1074_v19 = vmul.f32 -1.442695, %v1463_v3  ;;  %v252_v20 = vmul.f32 %v1376_v7, %v1139_v34 }
  0x22   : > { %2848 = vst [vmem:[#allocation10_spill] sm:$0xff] %v1480_v15  ;;  %v1490_v21 = vadd.f32 %v1404_v28, %v245_v2  ;;  %1197 = vpow2.f32 %v1071_v9  ;;  %v1075_v22 = vmul.f32 -1.442695, %v1469_v8  ;;  %v253_v23 = vmul.f32 %v1376_v7, %v1142_v35 }
  0x23   : > { %2849 = vst [vmem:[#allocation11_spill] sm:$0xff] %v1485_v18  ;;  %v1495_v24 = vadd.f32 %v1404_v28, %v246_v5  ;;  %1199 = vpow2.f32 %v1072_v13  ;;  %v1076_v25 = vmul.f32 -1.442695, %v1475_v12  ;;  %v254_v27 = vmul.f32 %v1376_v7, %v1143_v36 }
  0x24   : > { %2850 = vst [vmem:[#allocation12_spill] sm:$0xff] %v1490_v21  ;;  %v1500_v29 = vadd.f32 %v1404_v28, %v247_v6  ;;  %1201 = vpow2.f32 %v1073_v16  ;;  %v1077_v30 = vmul.f32 -1.442695, %v1480_v15  ;;  %v255_v31 = vmul.f32 %v1376_v7, %v1146_v39 }
  0x25   : > { %2851 = vst [vmem:[#allocation13_spill] sm:$0xff] %v1495_v24  ;;  %v1505_v33 = vadd.f32 %v1404_v28, %v248_v10  ;;  %1203 = vpow2.f32 %v1074_v19  ;;  %v1078_v34 = vmul.f32 -1.442695, %v1485_v18  ;;  %v256_v38 = vmul.f32 %v1376_v7, %v1147_v40 }
  0x26   : > { %2852 = vst [vmem:[#allocation14_spill] sm:$0xff] %v1500_v29  ;;  %v1508_v35 = vpop.eup %1193  ;;  %v1512_v36 = vadd.f32 %v1404_v28, %v249_v11  ;;  %1205 = vpow2.f32 %v1075_v22  ;;  %v1079_v43 = vmul.f32 -1.442695, %v1490_v21  ;;  %v257_v39 = vmul.f32 %v1376_v7, %v1150_v41 }
  0x27   : > { %2853 = vst [vmem:[#allocation15_spill] sm:$0xff] %v1505_v33  ;;  %v1515_v47 = vpop.eup %1195  ;;  %v1521_v51 = vadd.f32 %v1404_v28, %v250_v14  ;;  %1207 = vpow2.f32 %v1076_v25  ;;  %v1080_v55 = vmul.f32 -1.442695, %v1495_v24  ;;  %v258_v40 = vmul.f32 %v1376_v7, %v1151_v44 }
  0x28   : > { %2854 = vst [vmem:[#allocation16_spill] sm:$0xff] %v1512_v36  ;;  %v1524_v59 = vpop.eup %1197  ;;  %v1530_v62 = vadd.f32 %v1404_v28, %v251_v17  ;;  %1209 = vpow2.f32 %v1077_v30  ;;  %v1081_v0 = vmul.f32 -1.442695, %v1500_v29  ;;  %v259_v41 = vmul.f32 %v1376_v7, %v1154_v45 }
  0x29   : > { %2855 = vst [vmem:[#allocation17_spill] sm:$0xff] %v1521_v51  ;;  %v1533_v1 = vpop.eup %1199  ;;  %v1539_v2 = vadd.f32 %v1404_v28, %v252_v20  ;;  %1211 = vpow2.f32 %v1078_v34  ;;  %v1082_v26 = vmul.f32 -1.442695, %v1505_v33  ;;  %v260_v44 = vmul.f32 %v1376_v7, %v1155_v49 }
  0x2a   : > { %2856 = vst [vmem:[#allocation18_spill] sm:$0xff] %v1530_v62  ;;  %v1542_v4 = vpop.eup %1201  ;;  %v1548_v5 = vadd.f32 %v1404_v28, %v253_v23  ;;  %1213 = vpow2.f32 %v1079_v43  ;;  %v1083_v6 = vmul.f32 -1.442695, %v1512_v36  ;;  %v261_v45 = vmul.f32 %v1376_v7, %v1158_v50 }
  0x2b   : > { %2857 = vst [vmem:[#allocation19_spill] sm:$0xff] %v1539_v2  ;;  %v1551_v9 = vpop.eup %1203  ;;  %v1557_v10 = vadd.f32 %v1404_v28, %v254_v27  ;;  %1215 = vpow2.f32 %v1080_v55  ;;  %v1084_v32 = vmul.f32 -1.442695, %v1521_v51  ;;  %v262_v49 = vmul.f32 %v1376_v7, %v1159_v53 }
  0x2c   : > { %2858 = vst [vmem:[#allocation20_spill] sm:$0xff] %v1548_v5  ;;  %v1560_v11 = vpop.eup %1205  ;;  %v1566_v13 = vadd.f32 %v1404_v28, %v255_v31  ;;  %1217 = vpow2.f32 %v1081_v0  ;;  %v1085_v14 = vmul.f32 -1.442695, %v1530_v62  ;;  %v263_v50 = vmul.f32 %v1376_v7, %v1162_v54 }
  0x2d   : > { %2859 = vst [vmem:[#allocation21_spill] sm:$0xff] %v1557_v10  ;;  %v1569_v16 = vpop.eup %1207  ;;  %v1575_v17 = vadd.f32 %v1404_v28, %v256_v38  ;;  %1219 = vpow2.f32 %v1082_v26  ;;  %v1086_v37 = vmul.f32 -1.442695, %v1539_v2  ;;  %v264_v53 = vmul.f32 %v1376_v7, %v1163_v57 }
  0x2e   : > { %2860 = vst [vmem:[#allocation22_spill] sm:$0xff] %v1566_v13  ;;  %v1578_v19 = vpop.eup %1209  ;;  %v1584_v20 = vadd.f32 %v1404_v28, %v257_v39  ;;  %1221 = vpow2.f32 %v1083_v6  ;;  %v1087_v22 = vmul.f32 -1.442695, %v1548_v5  ;;  %v265_v54 = vmul.f32 %v1376_v7, %v1166_v58 }
  0x2f   : > { %2861 = vst [vmem:[#allocation23_spill] sm:$0xff] %v1575_v17  ;;  %v1587_v23 = vpop.eup %1211  ;;  %v1593_v25 = vadd.f32 %v1404_v28, %v258_v40  ;;  %1223 = vpow2.f32 %v1084_v32  ;;  %v1088_v42 = vmul.f32 -1.442695, %v1557_v10  ;;  %v266_v57 = vmul.f32 %v1376_v7, %v1167_v61 }
  0x30   : > { %2862 = vst [vmem:[#allocation24_spill] sm:$0xff] %v1584_v20  ;;  %v1596_v27 = vpop.eup %1213  ;;  %v1602_v30 = vadd.f32 %v1404_v28, %v259_v41  ;;  %1225 = vpow2.f32 %v1085_v14  ;;  %v1089_v31 = vmul.f32 -1.442695, %v1566_v13  ;;  %v1606_v58 = vadd.f32 %v1404_v28, %v260_v44 }
  0x31   : > { %2863 = vst [vmem:[#allocation25_spill] sm:$0xff] %v1593_v25  ;;  %v1216_v34 = vpop.eup %1215  ;;  %v1609_v38 = vadd.f32 %v1404_v28, %v261_v45  ;;  %1227 = vpow2.f32 %v1086_v37  ;;  %v1090_v43 = vmul.f32 -1.442695, %v1575_v17  ;;  %v1613_v46 = vadd.f32 %v1404_v28, %v262_v49 }
  0x32   : > { %2864 = vst [vmem:[#allocation26_spill] sm:$0xff] %v1602_v30  ;;  %v1218_v39 = vpop.eup %1217  ;;  %v1616_v7 = vadd.f32 %v1404_v28, %v263_v50  ;;  %1229 = vpow2.f32 %v1087_v22  ;;  %v1091_v61 = vmul.f32 -1.442695, %v1584_v20  ;;  %v1620_v40 = vadd.f32 %v1404_v28, %v264_v53 }
  0x33   : > { %2865 = vst [vmem:[#allocation27_spill] sm:$0xff] %v1606_v58  ;;  %v1220_v55 = vpop.eup %1219  ;;  %v1623_v0 = vadd.f32 %v1404_v28, %v265_v54  ;;  %1231 = vpow2.f32 %v1088_v42  ;;  %v1092_v41 = vmul.f32 -1.442695, %v1593_v25  ;;  %v1627_v44 = vadd.f32 %v1404_v28, %v266_v57 }
  0x34   : > { %2866 = vst [vmem:[#allocation28_spill] sm:$0xff] %v1609_v38  ;;  %v1222_v26 = vpop.eup %1221  ;;  %1233 = vpow2.f32 %v1089_v31  ;;  %v1093_v6 = vmul.f32 -1.442695, %v1602_v30  ;;  %v1094_v32 = vmul.f32 -1.442695, %v1606_v58  ;;  %v1632_v49 = vadd.f32 1.0, %v1508_v35 }
  0x35   : > { %2867 = vst [vmem:[#allocation29_spill] sm:$0xff] %v1613_v46  ;;  %v1224_v45 = vpop.eup %1223  ;;  %1235 = vpow2.f32 %v1090_v43  ;;  %v1095_v50 = vmul.f32 -1.442695, %v1609_v38  ;;  %v1096_v37 = vmul.f32 -1.442695, %v1613_v46  ;;  %v1646_v31 = vadd.f32 1.0, %v1515_v47 }
  0x36   : > { %2868 = vst [vmem:[#allocation30_spill] sm:$0xff] %v1616_v7  ;;  %v1226_v14 = vpop.eup %1225  ;;  %1237 = vpow2.f32 %v1091_v61  ;;  %v1097_v53 = vmul.f32 -1.442695, %v1616_v7  ;;  %v1098_v22 = vmul.f32 -1.442695, %v1620_v40  ;;  %v442_v42 = vand.u32 2147483648, %v1632_v49 }
  0x37   : > { %2869 = vst [vmem:[#allocation31_spill] sm:$0xff] %v1620_v40  ;;  %v1228_v28 = vpop.eup %1227  ;;  %1239 = vpow2.f32 %v1092_v41  ;;  %v1639_v54 = vmul.f32 -1.442695, %v1623_v0  ;;  %v1643_v35 = vmul.f32 -1.442695, %v1627_v44  ;;  %v1649_v43 = vadd.f32 1.0, %v1524_v59 }
  0x38   : > { %2870 = vst [vmem:[#allocation32_spill] sm:$0xff] %v1623_v0  ;;  %v1230_v57 = vpop.eup %1229  ;;  %1241 = vpow2.f32 %v1093_v6  ;;  %v1652_v41 = vadd.f32 1.0, %v1533_v1  ;;  %v1655_v0 = vadd.f32 1.0, %v1542_v4  ;;  %v1658_v40 = vadd.f32 1.0, %v1551_v9 }
  0x39   : > { %2871 = vst [vmem:[#allocation33_spill] sm:$0xff] %v1627_v44  ;;  %v1232_v61 = vpop.eup %1231  ;;  %1243 = vpow2.f32 %v1094_v32  ;;  %v1661_v44 = vadd.f32 1.0, %v1560_v11  ;;  %v457_v59 = vand.u32 2147483648, %v1646_v31  ;;  %v1666_v1 = vadd.f32 1.0, %v1569_v16 }
  0x3a   : > { %v1234_v6 = vpop.eup %1233  ;;  %1245 = vpow2.f32 %v1095_v50  ;;  %v1668_v32 = vor.u32 1.1754944e-38, %v442_v42  ;;  %v472_v4 = vand.u32 2147483648, %v1649_v43  ;;  %v1672_v46 = vadd.f32 1.0, %v1578_v19 }
  0x3b   : > { %v1236_v7 = vpop.eup %1235  ;;  %1247 = vpow2.f32 %v1096_v37  ;;  %v1675_v11 = vadd.f32 1.0, %v1587_v23  ;;  %v1680_v37 = vadd.f32 1.0, %v1596_v27  ;;  %v1682_v16 = vadd.f32 1.0, %v1216_v34 }
  0x3c   : > { %v1238_v9 = vpop.eup %1237  ;;  %1249 = vrcp.f32 %v1632_v49  ;;  %v1686_v19 = vadd.f32 1.0, %v1218_v39  ;;  %v1688_v58 = vor.u32 1.1754944e-38, %v457_v59  ;;  %v487_v23 = vand.u32 2147483648, %v1652_v41 }
  0x3d   : > { %v1240_v47 = vpop.eup %1239  ;;  %1251 = vrcp.f32 %v1646_v31  ;;  %v1692_v30 = vadd.f32 1.0, %v1220_v55  ;;  %v1694_v27 = vor.u32 1.1754944e-38, %v472_v4  ;;  %v502_v34 = vand.u32 2147483648, %v1655_v0 }
  0x3e   : > { %v1242_v38 = vpop.eup %1241  ;;  %1253 = vrcp.f32 %v1649_v43  ;;  %v1698_v42 = vadd.f32 1.0, %v1222_v26  ;;  %v1700_v39 = vadd.f32 1.0, %v1224_v45  ;;  %v1703_v17 = vadd.f32 1.0, %v1226_v14 }
  0x3f   : > { %v1244_v50 = vpop.eup %1243  ;;  %1255 = vrcp.f32 %v1652_v41  ;;  %v517_v4 = vand.u32 2147483648, %v1658_v40  ;;  %v1709_v10 = vadd.f32 1.0, %v1228_v28  ;;  %v1711_v5 = vadd.f32 1.0, %v1230_v57 }
  0x40   : > { %v1246_v25 = vpop.eup %1245  ;;  %1257 = vpow2.f32 %v1097_v53  ;;  %v1713_v26 = vor.u32 1.1754944e-38, %v487_v23  ;;  %v1718_v53 = vor.u32 1.1754944e-38, %v502_v34  ;;  %v1725_v28 = vadd.f32 1.0, %v1232_v61 }
  0x41   : > { %v1248_v20 = vpop.eup %1247  ;;  %1259 = vpow2.f32 %v1098_v22  ;;  %v532_v22 = vand.u32 2147483648, %v1661_v44  ;;  %v1727_v57 = vadd.f32 1.0, %v1234_v6  ;;  %v1734_v34 = vadd.f32 1.0, %v1236_v7 }
  0x42   : > { %v1707_v13 = vpop.eup %1249  ;;  %1261 = vrcp.f32 %v1655_v0  ;;  %2872 = vst [vmem:[#allocation34_spill] sm:$0xff] %v1725_v28  ;;  %v1736_v2 = vadd.f32 1.0, %v1238_v9  ;;  %v1738_v14 = vor.u32 1.1754944e-38, %v517_v4  ;;  %v547_v23 = vand.u32 2147483648, %v1666_v1 }
  0x43   : > { %v1716_v45 = vpop.eup %1251  ;;  %1263 = vrcp.f32 %v1658_v40  ;;  %2873 = vst [vmem:[#allocation35_spill] sm:$0xff] %v1727_v57  ;;  %v432_v61 = vmul.f32 %v1707_v13, %v1632_v49  ;;  %v1747_v7 = vadd.f32 1.0, %v1240_v47  ;;  %vm436_vm0 = vweird.f32 %v1632_v49 }
  0x44   : > { %v1723_v55 = vpop.eup %1253  ;;  %1265 = vrcp.f32 %v1661_v44  ;;  %2874 = vst [vmem:[#allocation36_spill] sm:$0xff] %v1734_v34  ;;  %v447_v6 = vmul.f32 %v1716_v45, %v1646_v31  ;;  %v1752_v9 = vor.u32 1.1754944e-38, %v532_v22  ;;  %vm451_vm1 = vweird.f32 %v1646_v31 }
  0x45   : > { %v1731_v59 = vpop.eup %1255  ;;  %1267 = vpow2.f32 %v1639_v54  ;;  %2875 = vst [vmem:[#allocation37_spill] sm:$0xff] %v1736_v2  ;;  %v462_v54 = vmul.f32 %v1723_v55, %v1649_v43  ;;  %v1764_v29 = vadd.f32 1.0, %v1242_v38  ;;  %v1766_v24 = vadd.f32 1.0, %v1244_v50 }
  0x46   : > { %v1258_v62 = vpop.eup %1257  ;;  %1269 = vrcp.f32 %v1666_v1  ;;  %2876 = vst [vmem:[#allocation38_spill] sm:$0xff] %v1747_v7  ;;  %v477_v36 = vmul.f32 %v1731_v59, %v1652_v41  ;;  %v1768_v22 = vadd.f32 1.0, %v1246_v25  ;;  %vm466_vm2 = vweird.f32 %v1649_v43 }
  0x47   : > { %v1260_v51 = vpop.eup %1259  ;;  %1271 = vpow2.f32 %v1643_v35  ;;  %v562_v35 = vand.u32 2147483648, %v1672_v46  ;;  %2877 = vst [vmem:[#allocation39_spill] sm:$0xff] %v1764_v29  ;;  %v433_v15 = vsub.f32 1.0, %v432_v61  ;;  %v448_v33 = vsub.f32 1.0, %v447_v6 }
  0x48   : > { %v1754_v4 = vpop.eup %1261  ;;  %1273 = vrcp.f32 %v1672_v46  ;;  %2878 = vst [vmem:[#allocation40_spill] sm:$0xff] %v1766_v24  ;;  %vm481_vm3 = vweird.f32 %v1652_v41  ;;  %v1775_v12 = vor.u32 1.1754944e-38, %v547_v23  ;;  %v1778_v8 = vadd.f32 1.0, %v1248_v20 }
  0x49   : > { %v1762_v47 = vpop.eup %1263  ;;  %2879 = vst [vmem:[#allocation41_spill] sm:$0xff] %v1768_v22  ;;  %1275 = vrcp.f32 %v1675_v11  ;;  %v463_v50 = vsub.f32 1.0, %v462_v54  ;;  %v492_v25 = vmul.f32 %v1754_v4, %v1655_v0  ;;  %v1785_v22 = vadd.f32 1.0, %v1258_v62 }
  0x4a   : > { %v1772_v18 = vpop.eup %1265  ;;  %2880 = vst [vmem:[#allocation42_spill] sm:$0xff] %v1778_v8  ;;  %1277 = vrcp.f32 %v1680_v37  ;;  %v478_v61 = vsub.f32 1.0, %v477_v36  ;;  %v507_v23 = vmul.f32 %v1762_v47, %v1658_v40  ;;  %v1789_v6 = vor.u32 1.1754944e-38, %v562_v35 }
  0x4b   : > { %v1268_v38 = vpop.eup %1267  ;;  %2881 = vst [vmem:[#allocation43_spill] sm:$0xff] %v1785_v22  ;;  %v1791_v3 = vadd.f32 1.0, %v1260_v51  ;;  %vm496_vm4 = vweird.f32 %v1655_v0  ;;  %v522_v20 = vmul.f32 %v1772_v18, %v1661_v44  ;;  %v577_v8 = vand.u32 2147483648, %v1675_v11 }
  0x4c   : > { %v1783_v21 = vpop.eup %1269  ;;  %v1800_v36 = vadd.f32 1.0, %v1268_v38  ;;  %v434_v22 = vmul.f32 %v1707_v13, %v433_v15  ;;  %v449_v35 = vmul.f32 %v1716_v45, %v448_v33  ;;  %vm437_vm6 = vweird.f32 %v1707_v13 }
  0x4d   : > { %v1272_v24 = vpop.eup %1271  ;;  %2882 = vst [vmem:[#allocation44_spill] sm:$0xff] %v1791_v3  ;;  %v2884_v3 = vand.u32 2147483647, %v1632_v49  ;;  %v2887_v29 = vand.u32 2147483647, %v1646_v31  ;;  %v464_v15 = vmul.f32 %v1723_v55, %v463_v50  ;;  %vm452_vm11 = vweird.f32 %v1716_v45  ;;  %vm1853_vm15 = vmor %vm436_vm0, %vm437_vm6 }
  0x4e   : > { %v1798_v62 = vpop.eup %1273  ;;  %2883 = vst [vmem:[#allocation45_spill] sm:$0xff] %v1800_v36  ;;  %v2890_v33 = vand.u32 2147483647, %v1649_v43  ;;  %v493_v36 = vsub.f32 1.0, %v492_v25  ;;  %v479_v50 = vmul.f32 %v1731_v59, %v478_v61  ;;  %v2894_v60 = vand.u32 2147483647, %v1652_v41  ;;  %vm1865_vm14 = vmor %vm451_vm1, %vm452_vm11 }
  0x4f   : > { %vm1809_vm7 = vcmp.eq.f32.partialorder %v2884_v3, 8.507059e+37  ;;  %vm1815_vm8 = vcmp.eq.f32.partialorder %v2887_v29, 8.507059e+37  ;;  %v537_v3 = vmul.f32 %v1783_v21, %v1666_v1  ;;  %v1829_v63 = vpop.eup %1275  ;;  %v1831_v29 = vadd.f32 1.0, %v1272_v24 }
  0x50   : > { %vm1822_vm9 = vcmp.eq.f32.partialorder %v2890_v33, 8.507059e+37  ;;  %vm1837_vm12 = vcmp.eq.f32.partialorder %v2894_v60, 8.507059e+37  ;;  %v508_v25 = vsub.f32 1.0, %v507_v23  ;;  %v1841_v56 = vpop.eup %1277  ;;  %vm467_vm13 = vweird.f32 %v1723_v55 }
  0x51   : > { %2893 = vst [vmem:[#allocation46_spill] sm:$0xff] %v1831_v29  ;;  %v523_v52 = vsub.f32 1.0, %v522_v20  ;;  %v552_v24 = vmul.f32 %v1798_v62, %v1672_v46  ;;  %1279 = vrcp.f32 %v1682_v16  ;;  %v435_v61 = vadd.f32 %v1707_v13, %v434_v22  ;;  %vm1878_vm6 = vmor %vm466_vm2, %vm467_vm13 }
  0x52   : > { %v450_v23 = vadd.f32 %v1716_v45, %v449_v35  ;;  %vm482_vm10 = vweird.f32 %v1731_v59  ;;  %v1859_v20 = vor.u32 1.1754944e-38, %v577_v8  ;;  %v465_v49 = vadd.f32 %v1723_v55, %v464_v15 }
  0x53   : > { %v494_v29 = vmul.f32 %v1754_v4, %v493_v36  ;;  %v538_v48 = vsub.f32 1.0, %v537_v3  ;;  %v567_v35 = vmul.f32 %v1829_v63, %v1675_v11  ;;  %v480_v31 = vadd.f32 %v1731_v59, %v479_v50  ;;  %vm1895_vm2 = vmor %vm481_vm3, %vm482_vm10 }
  0x54   : > { %v2903_v15 = vand.u32 2147483647, %v1655_v0  ;;  %v509_v3 = vmul.f32 %v1762_v47, %v508_v25  ;;  %v582_v7 = vmul.f32 %v1841_v56, %v1680_v37  ;;  %v592_v2 = vand.u32 2147483648, %v1680_v37 }
  0x55   : > { %vm497_vm11 = vweird.f32 %v1754_v4  ;;  %v2908_v50 = vand.u32 2147483647, %v1658_v40  ;;  %v524_v25 = vmul.f32 %v1772_v18, %v523_v52  ;;  %v2911_v34 = vand.u32 2147483647, %v1661_v44 }
  0x56   : > { %vm1885_vm1 = vcmp.eq.f32.partialorder %v2903_v15, 8.507059e+37  ;;  %v553_v57 = vsub.f32 1.0, %v552_v24  ;;  %v439_v28 = vsel %vm1853_vm15, %v1707_v13, %v435_v61  ;;  %vm527_vm10 = vweird.f32 %v1772_v18 }
  0x57   : > { %vm1903_vm0 = vcmp.eq.f32.partialorder %v2908_v50, 8.507059e+37  ;;  %vm1910_vm5 = vcmp.eq.f32.partialorder %v2911_v34, 8.507059e+37  ;;  %v454_v50 = vsel %vm1865_vm14, %v1716_v45, %v450_v23  ;;  %1281 = vrcp.f32 %v1686_v19  ;;  %v1924_v52 = vpop.eup %1279  ;;  %vm1944_vm14 = vmor %vm496_vm4, %vm497_vm11 }
  0x58   : > { %v469_v34 = vsel %vm1878_vm6, %v1723_v55, %v465_v49  ;;  %v495_v24 = vadd.f32 %v1754_v4, %v494_v29  ;;  %v539_v13 = vmul.f32 %v1783_v21, %v538_v48  ;;  %v2914_v61 = vand.u32 2147483647, %v1666_v1 }
  0x59   : > { %v568_v60 = vsub.f32 1.0, %v567_v35  ;;  %v484_v23 = vsel %vm1895_vm2, %v1731_v59, %v480_v31  ;;  %v510_v48 = vadd.f32 %v1762_v47, %v509_v3  ;;  %v583_v29 = vsub.f32 1.0, %v582_v7 }
  0x5a   : > { %vm1933_vm15 = vcmp.eq.f32.partialorder %v2914_v61, 8.507059e+37  ;;  %1283 = vrcp.f32 %v1692_v30  ;;  %vm2919_vm6 = vweird.f32 %v1762_v47  ;;  %vm2920_vm13 = vweird.f32 %v1658_v40 }
  0x5b   : > { %vm1954_vm3 = vmor %vm2920_vm13, %vm2919_vm6  ;;  %v525_v59 = vadd.f32 %v1772_v18, %v524_v25  ;;  %vm542_vm4 = vweird.f32 %v1783_v21  ;;  %v554_v0 = vmul.f32 %v1798_v62, %v553_v57  ;;  %v2923_v49 = vand.u32 2147483647, %v1672_v46 }
  0x5c   : > { %v1967_v35 = vor.u32 1.1754944e-38, %v592_v2  ;;  %v1972_v40 = vsel %vm1809_vm7, %v1668_v32, %v439_v28  ;;  %v1977_v8 = vsel %vm1815_vm8, %v1688_v58, %v454_v50  ;;  %v1982_v57 = vsel %vm1822_vm9, %v1694_v27, %v469_v34 }
  0x5d   : > { %vm1963_vm2 = vcmp.eq.f32.partialorder %v2923_v49, 8.507059e+37  ;;  %vm2926_vm11 = vweird.f32 %v1661_v44  ;;  %v597_v32 = vmul.f32 %v1924_v52, %v1682_v16  ;;  %v1997_v58 = vsel %vm1837_vm12, %v1713_v26, %v484_v23  ;;  %v2008_v51 = vpop.eup %1281 }
  0x5e   : > { %vm1988_vm13 = vmor %vm2926_vm11, %vm527_vm10  ;;  %v540_v28 = vadd.f32 %v1783_v21, %v539_v13  ;;  %vm557_vm7 = vweird.f32 %v1798_v62  ;;  %v569_v27 = vmul.f32 %v1829_v63, %v568_v60  ;;  %v2929_v44 = vand.u32 2147483647, %v1675_v11 }
  0x5f   : > { %v499_v38 = vsel %vm1944_vm14, %v1754_v4, %v495_v24  ;;  %v514_v26 = vsel %vm1954_vm3, %v1762_v47, %v510_v48  ;;  %vm2932_vm9 = vweird.f32 %v1666_v1  ;;  %v584_v31 = vmul.f32 %v1841_v56, %v583_v29 }
  0x60   : > { %vm2004_vm8 = vcmp.eq.f32.partialorder %v2929_v44, 8.507059e+37  ;;  %vm2020_vm12 = vmor %vm2932_vm9, %vm542_vm4  ;;  %1285 = vrcp.f32 %v1698_v42  ;;  %v529_v4 = vsel %vm1988_vm13, %v1772_v18, %v525_v59  ;;  %v555_v3 = vadd.f32 %v1798_v62, %v554_v0  ;;  %v2038_v43 = vpop.eup %1283 }
  0x61   : > { %vm572_vm3 = vweird.f32 %v1829_v63  ;;  %v2935_v47 = vand.u32 2147483647, %v1680_v37  ;;  %1287 = vrcp.f32 %v1700_v39  ;;  %vm2938_vm14 = vweird.f32 %v1672_v46 }
  0x62   : > { %vm2044_vm6 = vmor %vm2938_vm14, %vm557_vm7  ;;  %vm587_vm4 = vweird.f32 %v1841_v56  ;;  %v598_v25 = vsub.f32 1.0, %v597_v32  ;;  %v605_v50 = vand.u32 2147483647, %v1682_v16  ;;  %1289 = vrcp.f32 %v1703_v17 }
  0x63   : > { %vm2033_vm10 = vcmp.eq.f32.partialorder %v2935_v47, 8.507059e+37  ;;  %v2054_v34 = vsel %vm1885_vm1, %v1718_v53, %v499_v38  ;;  %v544_v46 = vsel %vm2020_vm12, %v1783_v21, %v540_v28  ;;  %v570_v24 = vadd.f32 %v1829_v63, %v569_v27 }
  0x64   : > { %v612_v13 = vmul.f32 %v2008_v51, %v1686_v19  ;;  %v2065_v61 = vsel %vm1903_vm0, %v1738_v14, %v514_v26  ;;  %v2070_v36 = vsel %vm1910_vm5, %v1752_v9, %v529_v4  ;;  %vm2941_vm1 = vweird.f32 %v1675_v11 }
  0x65   : > { %vm2076_vm11 = vmor %vm2941_vm1, %vm572_vm3  ;;  %v585_v53 = vadd.f32 %v1841_v56, %v584_v31  ;;  %v607_v60 = vand.u32 2147483648, %v1682_v16  ;;  %v559_v14 = vsel %vm2044_vm6, %v1798_v62, %v555_v3  ;;  %vm2944_vm0 = vweird.f32 %v1680_v37 }
  0x66   : > { %vm2087_vm5 = vmor %vm2944_vm0, %vm587_vm4  ;;  %vm601_vm13 = vweird.f32 %v1682_v16  ;;  %v627_v11 = vmul.f32 %v2038_v43, %v1692_v30  ;;  %1291 = vrcp.f32 %v1709_v10  ;;  %v2095_v15 = vpop.eup %1285  ;;  %v2100_v41 = vsel %vm1933_vm15, %v1775_v12, %v544_v46 }
  0x67   : > { %v599_v37 = vmul.f32 %v1924_v52, %v598_v25  ;;  %vm2103_vm7 = vcmp.eq.f32.partialorder %v605_v50, 8.507059e+37  ;;  %vm616_vm9 = vweird.f32 %v1686_v19  ;;  %v2108_v23 = vpop.eup %1287  ;;  %v574_v55 = vsel %vm2076_vm11, %v1829_v63, %v570_v24  ;;  %v2955_v50 = vld [vmem:[#allocation34_spill] sm:$0xff] }
  0x68   : > { %v613_v48 = vsub.f32 1.0, %v612_v13  ;;  %v620_v29 = vand.u32 2147483647, %v1686_v19  ;;  %v622_v12 = vand.u32 2147483648, %v1686_v19  ;;  %v2115_v45 = vpop.eup %1289  ;;  %v2120_v22 = vsel %vm1963_vm2, %v1789_v6, %v559_v14 }
  0x69   : > { %v589_v59 = vsel %vm2087_vm5, %v1841_v56, %v585_v53  ;;  %vm602_vm15 = vweird.f32 %v1924_v52  ;;  %v608_v0 = vor.u32 1.1754944e-38, %v607_v60  ;;  %v628_v63 = vsub.f32 1.0, %v627_v11 }
  0x6a   : > { %v635_v49 = vand.u32 2147483647, %v1692_v30  ;;  %v642_v2 = vmul.f32 %v2095_v15, %v1698_v42  ;;  %1293 = vrcp.f32 %v1711_v5  ;;  %v2133_v6 = vsel %vm2004_vm8, %v1859_v20, %v574_v55  ;;  %vm2143_vm12 = vmor %vm601_vm13, %vm602_vm15  ;;  %v2998_v55 = vld [vmem:[#allocation7_spill] sm:$0xff] }
  0x6b   : > { %v600_v7 = vadd.f32 %v1924_v52, %v599_v37  ;;  %vm631_vm2 = vweird.f32 %v1692_v30  ;;  %v657_v56 = vmul.f32 %v2108_v23, %v1700_v39  ;;  %v614_v27 = vmul.f32 %v2008_v51, %v613_v48 }
  0x6c   : > { %v2139_v32 = vpop.eup %1291  ;;  %vm2148_vm3 = vcmp.eq.f32.partialorder %v620_v29, 8.507059e+37  ;;  %v623_v44 = vor.u32 1.1754944e-38, %v622_v12  ;;  %v637_v54 = vand.u32 2147483648, %v1692_v30  ;;  %v672_v38 = vmul.f32 %v2115_v45, %v1703_v17 }
  0x6d   : > { %v2158_v16 = vsel %vm2033_vm10, %v1967_v35, %v589_v59  ;;  %vm617_vm8 = vweird.f32 %v2008_v51  ;;  %v650_v26 = vand.u32 2147483647, %v1698_v42  ;;  %v652_v33 = vand.u32 2147483648, %v1698_v42 }
  0x6e   : > { %v629_v31 = vmul.f32 %v2038_v43, %v628_v63  ;;  %vm2164_vm14 = vcmp.eq.f32.partialorder %v635_v49, 8.507059e+37  ;;  %v643_v3 = vsub.f32 1.0, %v642_v2  ;;  %v665_v47 = vand.u32 2147483647, %v1700_v39  ;;  %vm2184_vm6 = vmor %vm616_vm9, %vm617_vm8 }
  0x6f   : > { %v667_v18 = vand.u32 2147483648, %v1700_v39  ;;  %v604_v35 = vsel %vm2143_vm12, %v1924_v52, %v600_v7  ;;  %v658_v1 = vsub.f32 1.0, %v657_v56  ;;  %v687_v25 = vmul.f32 %v2139_v32, %v1709_v10 }
  0x70   : > { %1295 = vrcp.f32 %v2955_v50  ;;  %v2176_v46 = vpop.eup %1293  ;;  %v615_v24 = vadd.f32 %v2008_v51, %v614_v27  ;;  %vm632_vm10 = vweird.f32 %v2038_v43  ;;  %v638_v13 = vor.u32 1.1754944e-38, %v637_v54 }
  0x71   : > { %v673_v21 = vsub.f32 1.0, %v672_v38  ;;  %vm646_vm4 = vweird.f32 %v1698_v42  ;;  %v653_v53 = vor.u32 1.1754944e-38, %v652_v33  ;;  %vm661_vm1 = vweird.f32 %v1700_v39  ;;  %vm2204_vm5 = vmor %vm631_vm2, %vm632_vm10  ;;  %v2987_v33 = vld [vmem:[#allocation3_spill] sm:$0xff] }
  0x72   : > { %v680_v60 = vand.u32 2147483647, %v1703_v17  ;;  %v2193_v14 = vsel %vm2103_vm7, %v608_v0, %v604_v35  ;;  %v630_v9 = vadd.f32 %v2038_v43, %v629_v31  ;;  %v644_v11 = vmul.f32 %v2095_v15, %v643_v3  ;;  %v2964_v0 = vld [vmem:[#allocation35_spill] sm:$0xff] }
  0x73   : > { %vm2197_vm11 = vcmp.eq.f32.partialorder %v650_v26, 8.507059e+37  ;;  %vm676_vm0 = vweird.f32 %v1703_v17  ;;  %v659_v62 = vmul.f32 %v2108_v23, %v658_v1  ;;  %vm2209_vm13 = vcmp.eq.f32.partialorder %v665_v47, 8.507059e+37 }
  0x74   : > { %v668_v48 = vor.u32 1.1754944e-38, %v667_v18  ;;  %v688_v29 = vsub.f32 1.0, %v687_v25  ;;  %v702_v12 = vmul.f32 %v2176_v46, %v1711_v5  ;;  %v619_v59 = vsel %vm2184_vm6, %v2008_v51, %v615_v24 }
  0x75   : > { %vm647_vm7 = vweird.f32 %v2095_v15  ;;  %v674_v30 = vmul.f32 %v2115_v45, %v673_v21  ;;  %1297 = vrcp.f32 %v2964_v0  ;;  %vm662_vm9 = vweird.f32 %v2108_v23  ;;  %v2976_v21 = vld [vmem:[#allocation37_spill] sm:$0xff] }
  0x76   : > { %v2221_v63 = vpop.eup %1295  ;;  %vm2224_vm15 = vcmp.eq.f32.partialorder %v680_v60, 8.507059e+37  ;;  %v682_v2 = vand.u32 2147483648, %v1703_v17  ;;  %v695_v7 = vand.u32 2147483647, %v1709_v10  ;;  %v634_v51 = vsel %vm2204_vm5, %v2038_v43, %v630_v9  ;;  %vm2242_vm12 = vmor %vm646_vm4, %vm647_vm7 }
  0x77   : > { %v645_v56 = vadd.f32 %v2095_v15, %v644_v11  ;;  %vm677_vm2 = vweird.f32 %v2115_v45  ;;  %v697_v28 = vand.u32 2147483648, %v1709_v10  ;;  %v2238_v27 = vsel %vm2148_vm3, %v623_v44, %v619_v59  ;;  %vm2250_vm8 = vmor %vm661_vm1, %vm662_vm9  ;;  %v2971_v44 = vld [vmem:[#allocation36_spill] sm:$0xff] }
  0x78   : > { %v660_v38 = vadd.f32 %v2108_v23, %v659_v62  ;;  %v689_v43 = vmul.f32 %v2139_v32, %v688_v29  ;;  %v703_v26 = vsub.f32 1.0, %v702_v12  ;;  %v675_v20 = vadd.f32 %v2115_v45, %v674_v30  ;;  %vm2265_vm10 = vmor %vm676_vm0, %vm677_vm2 }
  0x79   : > { %vm691_vm3 = vweird.f32 %v1709_v10  ;;  %v717_v42 = vmul.f32 %v2221_v63, %v2955_v50  ;;  %1299 = vrcp.f32 %v2971_v44  ;;  %v2261_v31 = vsel %vm2164_vm14, %v638_v13, %v634_v51  ;;  %v2985_v51 = vld [vmem:[#allocation38_spill] sm:$0xff] }
  0x7a   : > { %v683_v3 = vor.u32 1.1754944e-38, %v682_v2  ;;  %vm692_vm6 = vweird.f32 %v2139_v32  ;;  %vm2270_vm4 = vcmp.eq.f32.partialorder %v695_v7, 8.507059e+37  ;;  %v649_v4 = vsel %vm2242_vm12, %v2095_v15, %v645_v56 }
  0x7b   : > { %v2274_v18 = vpop.eup %1297  ;;  %v698_v35 = vor.u32 1.1754944e-38, %v697_v28  ;;  %v710_v17 = vand.u32 2147483647, %v1711_v5  ;;  %v712_v1 = vand.u32 2147483648, %v1711_v5  ;;  %v664_v25 = vsel %vm2250_vm8, %v2108_v23, %v660_v38  ;;  %vm2292_vm14 = vmor %vm691_vm3, %vm692_vm6 }
  0x7c   : > { %v690_v24 = vadd.f32 %v2139_v32, %v689_v43  ;;  %v704_v13 = vmul.f32 %v2176_v46, %v703_v26  ;;  %1301 = vrcp.f32 %v2976_v21  ;;  %v679_v52 = vsel %vm2265_vm10, %v2115_v45, %v675_v20  ;;  %v2986_v43 = vld [vmem:[#allocation2_spill] sm:$0xff] }
  0x7d   : > { %vm706_vm1 = vweird.f32 %v1711_v5  ;;  %v718_v60 = vsub.f32 1.0, %v717_v42  ;;  %v725_v23 = vand.u32 2147483647, %v2955_v50  ;;  %v2300_v9 = vsel %vm2197_vm11, %v653_v53, %v649_v4  ;;  %v2988_v42 = vld [vmem:[#allocation4_spill] sm:$0xff] }
  0x7e   : > { %vm707_vm0 = vweird.f32 %v2176_v46  ;;  %vm721_vm5 = vweird.f32 %v2955_v50  ;;  %v732_v10 = vmul.f32 %v2274_v18, %v2964_v0  ;;  %v2310_v11 = vsel %vm2209_vm13, %v668_v48, %v664_v25 }
  0x7f   : > { %v2306_v45 = vpop.eup %1299  ;;  %vm2312_vm7 = vcmp.eq.f32.partialorder %v710_v17, 8.507059e+37  ;;  %v713_v19 = vor.u32 1.1754944e-38, %v712_v1  ;;  %v727_v53 = vand.u32 2147483648, %v2955_v50  ;;  %v2319_v62 = vsel %vm2224_vm15, %v683_v3, %v679_v52  ;;  %vm2328_vm13 = vmor %vm706_vm1, %vm707_vm0  ;;  %v2993_v17 = vld [vmem:[#allocation5_spill] sm:$0xff]  ;;  %v2994_v52 = vld [vmem:[#allocation6_spill] sm:$0xff] }
  0x80   : > { %v694_v29 = vsel %vm2292_vm14, %v2139_v32, %v690_v24  ;;  %v705_v12 = vadd.f32 %v2176_v46, %v704_v13  ;;  %vm736_vm11 = vweird.f32 %v2964_v0  ;;  %v719_v48 = vmul.f32 %v2221_v63, %v718_v60 }
  0x81   : > { %vm2333_vm9 = vcmp.eq.f32.partialorder %v725_v23, 8.507059e+37  ;;  %v740_v30 = vand.u32 2147483647, %v2964_v0  ;;  %v742_v32 = vand.u32 2147483648, %v2964_v0  ;;  %v733_v2 = vsub.f32 1.0, %v732_v10 }
  0x82   : > { %v2339_v49 = vpop.eup %1301  ;;  %v747_v5 = vmul.f32 %v2306_v45, %v2971_v44  ;;  %v757_v7 = vand.u32 2147483648, %v2971_v44  ;;  %1303 = vrcp.f32 %v2985_v51  ;;  %v2347_v56 = vsel %vm2270_vm4, %v698_v35, %v694_v29 }
  0x83   : > { %vm722_vm15 = vweird.f32 %v2221_v63  ;;  %v728_v28 = vor.u32 1.1754944e-38, %v727_v53  ;;  %v755_v54 = vand.u32 2147483647, %v2971_v44  ;;  %v709_v38 = vsel %vm2328_vm13, %v2176_v46, %v705_v12 }
  0x84   : > { %vm751_vm2 = vweird.f32 %v2971_v44  ;;  %v911_v26 = vmul.f32 %v1972_v40, %v2986_v43  ;;  %v912_v20 = vmul.f32 %v1977_v8, %v2987_v33  ;;  %v913_v39 = vmul.f32 %v1982_v57, %v2988_v42  ;;  %vm2367_vm8 = vmor %vm721_vm5, %vm722_vm15 }
  0x85   : > { %v720_v3 = vadd.f32 %v2221_v63, %v719_v48  ;;  %vm737_vm12 = vweird.f32 %v2274_v18  ;;  %v743_v47 = vor.u32 1.1754944e-38, %v742_v32  ;;  %v762_v4 = vmul.f32 %v2339_v49, %v2976_v21 }
  0x86   : > { %v734_v40 = vmul.f32 %v2274_v18, %v733_v2  ;;  %vm2372_vm3 = vcmp.eq.f32.partialorder %v740_v30, 8.507059e+37  ;;  %v748_v57 = vsub.f32 1.0, %v747_v5  ;;  %v2376_v35 = vor.u32 1.1754944e-38, %v757_v7  ;;  %vm2411_vm14 = vmor %vm736_vm11, %vm737_vm12  ;;  %v3001_v5 = vld [vmem:[#allocation40_spill] sm:$0xff] }
  0x87   : > { %v914_v1 = vmul.f32 %v1997_v58, %v2993_v17  ;;  %v2382_v25 = vsel %vm2312_vm7, %v713_v19, %v709_v38  ;;  %vm766_vm10 = vweird.f32 %v2976_v21  ;;  %v770_v50 = vand.u32 2147483647, %v2976_v21  ;;  %v2995_v19 = vld [vmem:[#allocation39_spill] sm:$0xff] }
  0x88   : > { %v772_v24 = vand.u32 2147483648, %v2976_v21  ;;  %vm943_vm6 = vcmask 130048   ;;  %v2387_v13 = vpop.eup %1303  ;;  %v915_v15 = vmul.f32 %v2054_v34, %v2994_v52  ;;  %v724_v10 = vsel %vm2367_vm8, %v2221_v63, %v720_v3 }
  0x89   : > { %v944_v60 = vsel %vm943_vm6, %v911_v26, 0.0  ;;  %v945_v58 = vsel %vm943_vm6, %v912_v20, 0.0  ;;  %v947_v23 = vsel %vm943_vm6, %v913_v39, 0.0  ;;  %v763_v37 = vsub.f32 1.0, %v762_v4 }
  0x8a   : > { %1305 = vrcp.f32 %v2995_v19  ;;  %v946_v53 = vadd.f32 %v945_v58, %v944_v60  ;;  %v735_v29 = vadd.f32 %v2274_v18, %v734_v40  ;;  %v749_v12 = vmul.f32 %v2306_v45, %v748_v57  ;;  %v3009_v60 = vld [vmem:[#allocation41_spill] sm:$0xff] }
  0x8b   : > { %vm2400_vm4 = vcmp.eq.f32.partialorder %v755_v54, 8.507059e+37  ;;  %v916_v48 = vmul.f32 %v2065_v61, %v2998_v55  ;;  %v949_v30 = vsel %vm943_vm6, %v914_v1, 0.0  ;;  %v777_v32 = vmul.f32 %v2387_v13, %v2985_v51  ;;  %v3002_v54 = vld [vmem:[#allocation8_spill] sm:$0xff]  ;;  %v3008_v1 = vld [vmem:[#allocation10_spill] sm:$0xff] }
  0x8c   : > { %v787_v2 = vand.u32 2147483648, %v2985_v51  ;;  %1307 = vrcp.f32 %v3001_v5  ;;  %v948_v7 = vadd.f32 %v947_v23, %v946_v53  ;;  %v2421_v61 = vsel %vm2333_vm9, %v728_v28, %v724_v10  ;;  %v3015_v55 = vld [vmem:[#allocation12_spill] sm:$0xff]  ;;  %v3024_v28 = vld [vmem:[#allocation15_spill] sm:$0xff] }
  0x8d   : > { %vm752_vm1 = vweird.f32 %v2306_v45  ;;  %v917_v0 = vmul.f32 %v2070_v36, %v3002_v54  ;;  %v951_v38 = vsel %vm943_vm6, %v915_v15, 0.0  ;;  %v764_v43 = vmul.f32 %v2339_v49, %v763_v37  ;;  %v3005_v36 = vld [vmem:[#allocation9_spill] sm:$0xff] }
  0x8e   : > { %v773_v26 = vor.u32 1.1754944e-38, %v772_v24  ;;  %v785_v33 = vand.u32 2147483647, %v2985_v51  ;;  %v950_v20 = vadd.f32 %v949_v30, %v948_v7  ;;  %v739_v42 = vsel %vm2411_vm14, %v2274_v18, %v735_v29  ;;  %vm2445_vm7 = vmor %vm751_vm2, %vm752_vm1 }
  0x8f   : > { %v750_v59 = vadd.f32 %v2306_v45, %v749_v12  ;;  %vm2433_vm0 = vcmp.eq.f32.partialorder %v770_v50, 8.507059e+37  ;;  %vm781_vm5 = vweird.f32 %v2985_v51  ;;  %v918_v39 = vmul.f32 %v2100_v41, %v3005_v36  ;;  %v3019_v36 = vld [vmem:[#allocation14_spill] sm:$0xff] }
  0x90   : > { %v953_v3 = vsel %vm943_vm6, %v916_v48, 0.0  ;;  %v2441_v4 = vpop.eup %1305  ;;  %vm767_vm11 = vweird.f32 %v2339_v49  ;;  %v778_v18 = vsub.f32 1.0, %v777_v32  ;;  %v2450_v40 = vor.u32 1.1754944e-38, %v787_v2 }
  0x91   : > { %v952_v57 = vadd.f32 %v951_v38, %v950_v20  ;;  %v800_v17 = vand.u32 2147483647, %v2995_v19  ;;  %v802_v41 = vand.u32 2147483648, %v2995_v19  ;;  %v919_v50 = vmul.f32 %v2120_v22, %v3008_v1  ;;  %vm2470_vm13 = vmor %vm766_vm10, %vm767_vm11  ;;  %v3046_v22 = vld [vmem:[#allocation22_spill] sm:$0xff] }
  0x92   : > { %v955_v24 = vsel %vm943_vm6, %v917_v0, 0.0  ;;  %v2457_v44 = vpop.eup %1307  ;;  %v2461_v52 = vsel %vm2372_vm3, %v743_v47, %v739_v42  ;;  %v765_v15 = vadd.f32 %v2339_v49, %v764_v43  ;;  %1309 = vrcp.f32 %v3009_v60  ;;  %v3012_v47 = vld [vmem:[#allocation11_spill] sm:$0xff]  ;;  %v3016_v0 = vld [vmem:[#allocation42_spill] sm:$0xff] }
  0x93   : > { %v954_v58 = vadd.f32 %v953_v3, %v952_v57  ;;  %v754_v23 = vsel %vm2445_vm7, %v2306_v45, %v750_v59  ;;  %v792_v8 = vmul.f32 %v2441_v4, %v2995_v19  ;;  %v920_v10 = vmul.f32 %v2133_v6, %v3012_v47  ;;  %v3018_v59 = vld [vmem:[#allocation43_spill] sm:$0xff] }
  0x94   : > { %v957_v37 = vsel %vm943_vm6, %v918_v39, 0.0  ;;  %v779_v53 = vmul.f32 %v2387_v13, %v778_v18  ;;  %vm782_vm9 = vweird.f32 %v2387_v13  ;;  %v817_v45 = vand.u32 2147483648, %v3001_v5 }
  0x95   : > { %v956_v29 = vadd.f32 %v955_v24, %v954_v58  ;;  %vm2482_vm15 = vcmp.eq.f32.partialorder %v785_v33, 8.507059e+37  ;;  %vm796_vm2 = vweird.f32 %v2995_v19  ;;  %v2487_v12 = vor.u32 1.1754944e-38, %v802_v41  ;;  %vm2526_vm8 = vmor %vm781_vm5, %vm782_vm9  ;;  %v3025_v24 = vld [vmem:[#allocation44_spill] sm:$0xff] }
  0x96   : > { %v807_v6 = vmul.f32 %v2457_v44, %v3001_v5  ;;  %v921_v48 = vmul.f32 %v2158_v16, %v3015_v55  ;;  %v959_v30 = vsel %vm943_vm6, %v919_v50, 0.0  ;;  %v2497_v63 = vsel %vm2400_vm4, %v2376_v35, %v754_v23  ;;  %v3017_v16 = vld [vmem:[#allocation13_spill] sm:$0xff] }
  0x97   : > { %v769_v32 = vsel %vm2470_vm13, %v2339_v49, %v765_v15  ;;  %v815_v2 = vand.u32 2147483647, %v3001_v5  ;;  %v958_v7 = vadd.f32 %v957_v37, %v956_v29  ;;  %v793_v54 = vsub.f32 1.0, %v792_v8  ;;  %v3030_v55 = vld [vmem:[#allocation17_spill] sm:$0xff] }
  0x98   : > { %vm811_vm12 = vweird.f32 %v3001_v5  ;;  %1311 = vrcp.f32 %v3016_v0  ;;  %v922_v38 = vmul.f32 %v2193_v14, %v3017_v16  ;;  %v961_v43 = vsel %vm943_vm6, %v920_v10, 0.0  ;;  %v2508_v34 = vpop.eup %1309 }
  0x99   : > { %v780_v35 = vadd.f32 %v2387_v13, %v779_v53  ;;  %v2511_v33 = vor.u32 1.1754944e-38, %v817_v45  ;;  %v832_v49 = vand.u32 2147483648, %v3009_v60  ;;  %v960_v20 = vadd.f32 %v959_v30, %v958_v7  ;;  %v3029_v53 = vld [vmem:[#allocation45_spill] sm:$0xff]  ;;  %v3033_v7 = vld [vmem:[#allocation46_spill] sm:$0xff] }
  0x9a   : > { %v808_v42 = vsub.f32 1.0, %v807_v6  ;;  %1313 = vrcp.f32 %v3018_v59  ;;  %v923_v39 = vmul.f32 %v2238_v27, %v3019_v36  ;;  %v963_v3 = vsel %vm943_vm6, %v921_v48, 0.0  ;;  %v3039_v36 = vld [vmem:[#allocation19_spill] sm:$0xff] }
  0x9b   : > { %v2520_v14 = vsel %vm2433_vm0, %v773_v26, %v769_v32  ;;  %vm797_vm3 = vweird.f32 %v2441_v4  ;;  %v830_v18 = vand.u32 2147483647, %v3009_v60  ;;  %v962_v57 = vadd.f32 %v961_v43, %v960_v20 }
  0x9c   : > { %v794_v27 = vmul.f32 %v2441_v4, %v793_v54  ;;  %vm2533_vm10 = vcmp.eq.f32.partialorder %v800_v17, 8.507059e+37  ;;  %v822_v26 = vmul.f32 %v2508_v34, %v3009_v60  ;;  %v924_v51 = vmul.f32 %v2261_v31, %v3024_v28  ;;  %v3028_v31 = vld [vmem:[#allocation16_spill] sm:$0xff]  ;;  %vm2578_vm0 = vmor %vm796_vm2, %vm797_vm3 }
  0x9d   : > { %v965_v1 = vsel %vm943_vm6, %v922_v38, 0.0  ;;  %vm812_vm4 = vweird.f32 %v2457_v44  ;;  %v2543_v50 = vor.u32 1.1754944e-38, %v832_v49  ;;  %1315 = vrcp.f32 %v3025_v24 }
  0x9e   : > { %v964_v15 = vadd.f32 %v963_v3, %v962_v57  ;;  %v2546_v58 = vpop.eup %1311  ;;  %v784_v17 = vsel %vm2526_vm8, %v2387_v13, %v780_v35  ;;  %v809_v23 = vmul.f32 %v2457_v44, %v808_v42  ;;  %vm2552_vm14 = vcmp.eq.f32.partialorder %v815_v2, 8.507059e+37  ;;  %vm2596_vm7 = vmor %vm811_vm12, %vm812_vm4 }
  0x9f   : > { %vm826_vm1 = vweird.f32 %v3009_v60  ;;  %v925_v8 = vmul.f32 %v2300_v9, %v3028_v31  ;;  %v967_v47 = vsel %vm943_vm6, %v923_v39, 0.0  ;;  %v845_v10 = vand.u32 2147483647, %v3016_v0 }
  0xa0   : > { %v847_v37 = vand.u32 2147483648, %v3016_v0  ;;  %1317 = vrcp.f32 %v3029_v53  ;;  %v966_v13 = vadd.f32 %v965_v1, %v964_v15  ;;  %v2563_v45 = vpop.eup %1313  ;;  %v795_v29 = vadd.f32 %v2441_v4, %v794_v27 }
  0xa1   : > { %v823_v6 = vsub.f32 1.0, %v822_v26  ;;  %v926_v48 = vmul.f32 %v2310_v11, %v3030_v55  ;;  %v969_v30 = vsel %vm943_vm6, %v924_v51, 0.0  ;;  %v2572_v9 = vsel %vm2482_vm15, %v2450_v40, %v784_v17  ;;  %v3034_v40 = vld [vmem:[#allocation18_spill] sm:$0xff] }
  0xa2   : > { %v837_v2 = vmul.f32 %v2546_v58, %v3016_v0  ;;  %1319 = vrcp.f32 %v3033_v7  ;;  %v968_v11 = vadd.f32 %v967_v47, %v966_v13  ;;  %v810_v54 = vadd.f32 %v2457_v44, %v809_v23 }
  0xa3   : > { %vm827_vm5 = vweird.f32 %v2508_v34  ;;  %v927_v21 = vmul.f32 %v2319_v62, %v3034_v40  ;;  %v971_v16 = vsel %vm943_vm6, %v925_v8, 0.0  ;;  %v2590_v19 = vpop.eup %1315  ;;  %vm841_vm11 = vweird.f32 %v3016_v0  ;;  %v3049_v40 = vld [vmem:[#allocation23_spill] sm:$0xff] }
  0xa4   : > { %v2601_v43 = vor.u32 1.1754944e-38, %v847_v37  ;;  %v852_v35 = vmul.f32 %v2563_v45, %v3018_v59  ;;  %v862_v62 = vand.u32 2147483648, %v3018_v59  ;;  %v970_v49 = vadd.f32 %v969_v30, %v968_v11  ;;  %vm2651_vm12 = vmor %vm826_vm1, %vm827_vm5 }
  0xa5   : > { %v799_v20 = vsel %vm2578_vm0, %v2441_v4, %v795_v29  ;;  %v824_v5 = vmul.f32 %v2508_v34, %v823_v6  ;;  %vm2610_vm13 = vcmp.eq.f32.partialorder %v830_v18, 8.507059e+37  ;;  %v928_v39 = vmul.f32 %v2347_v56, %v3039_v36  ;;  %v3040_v56 = vld [vmem:[#allocation20_spill] sm:$0xff] }
  0xa6   : > { %v973_v3 = vsel %vm943_vm6, %v926_v48, 0.0  ;;  %v2617_v46 = vpop.eup %1317  ;;  %v838_v57 = vsub.f32 1.0, %v837_v2  ;;  %vm842_vm9 = vweird.f32 %v2546_v58  ;;  %vm856_vm15 = vweird.f32 %v3018_v59 }
  0xa7   : > { %v860_v4 = vand.u32 2147483647, %v3018_v59  ;;  %v972_v27 = vadd.f32 %v971_v16, %v970_v49  ;;  %v814_v18 = vsel %vm2596_vm7, %v2457_v44, %v810_v54  ;;  %v867_v26 = vmul.f32 %v2590_v19, %v3025_v24  ;;  %v3052_v49 = vld [vmem:[#allocation24_spill] sm:$0xff] }
  0xa8   : > { %v929_v28 = vmul.f32 %v2382_v25, %v3040_v56  ;;  %v975_v51 = vsel %vm943_vm6, %v927_v21, 0.0  ;;  %v2630_v1 = vpop.eup %1319  ;;  %v804_v15 = vsel %vm2533_vm10, %v2487_v12, %v799_v20  ;;  %v853_v17 = vsub.f32 1.0, %v852_v35  ;;  %v3041_v25 = vld [vmem:[#allocation21_spill] sm:$0xff] }
  0xa9   : > { %v2635_v23 = vor.u32 1.1754944e-38, %v862_v62  ;;  %v974_v31 = vadd.f32 %v973_v3, %v972_v27  ;;  %v825_v44 = vadd.f32 %v2508_v34, %v824_v5  ;;  %vm871_vm2 = vweird.f32 %v3025_v24 }
  0xaa   : > { %v882_v8 = vmul.f32 %v2617_v46, %v3029_v53  ;;  %v930_v47 = vmul.f32 %v2421_v61, %v3041_v25  ;;  %v977_v37 = vsel %vm943_vm6, %v928_v39, 0.0  ;;  %v819_v12 = vsel %vm2552_vm14, %v2511_v33, %v814_v18  ;;  %vm2686_vm14 = vmor %vm841_vm11, %vm842_vm9 }
  0xab   : > { %v839_v13 = vmul.f32 %v2546_v58, %v838_v57  ;;  %v875_v29 = vand.u32 2147483647, %v3025_v24  ;;  %v976_v6 = vadd.f32 %v975_v51, %v974_v31  ;;  %vm2657_vm8 = vcmp.eq.f32.partialorder %v845_v10, 8.507059e+37 }
  0xac   : > { %v868_v55 = vsub.f32 1.0, %v867_v26  ;;  %v897_v33 = vmul.f32 %v2630_v1, %v3033_v7  ;;  %v931_v60 = vmul.f32 %v2461_v52, %v3046_v22  ;;  %v979_v48 = vsel %vm943_vm6, %v929_v28, 0.0  ;;  %v3058_v28 = vld [vmem:[#allocation26_spill] sm:$0xff] }
  0xad   : > { %v854_v30 = vmul.f32 %v2563_v45, %v853_v17  ;;  %v877_v32 = vand.u32 2147483648, %v3025_v24  ;;  %vm886_vm3 = vweird.f32 %v3029_v53  ;;  %v978_v2 = vadd.f32 %v977_v37, %v976_v6 }
  0xae   : > { %v829_v10 = vsel %vm2651_vm12, %v2508_v34, %v825_v44  ;;  %vm2672_vm10 = vcmp.eq.f32.partialorder %v860_v4, 8.507059e+37  ;;  %v883_v54 = vsub.f32 1.0, %v882_v8  ;;  %v932_v52 = vmul.f32 %v2497_v63, %v3049_v40  ;;  %v3057_v4 = vld [vmem:[#allocation25_spill] sm:$0xff]  ;;  %v3070_v34 = vld [vmem:[#allocation32_spill] sm:$0xff] }
  0xaf   : > { %v981_v21 = vsel %vm943_vm6, %v930_v47, 0.0  ;;  %v840_v16 = vadd.f32 %v2546_v58, %v839_v13  ;;  %vm857_vm4 = vweird.f32 %v2563_v45  ;;  %v890_v38 = vand.u32 2147483647, %v3029_v53 }
  0xb0   : > { %v980_v35 = vadd.f32 %v979_v48, %v978_v2  ;;  %v869_v62 = vmul.f32 %v2590_v19, %v868_v55  ;;  %v898_v63 = vsub.f32 1.0, %v897_v33  ;;  %v933_v20 = vmul.f32 %v2520_v14, %v3052_v49  ;;  %vm2704_vm0 = vmor %vm856_vm15, %vm857_vm4 }
  0xb1   : > { %v983_v5 = vsel %vm943_vm6, %v931_v60, 0.0  ;;  %v834_v36 = vsel %vm2610_vm13, %v2543_v50, %v829_v10  ;;  %v855_v39 = vadd.f32 %v2563_v45, %v854_v30  ;;  %vm2698_vm1 = vcmp.eq.f32.partialorder %v875_v29, 8.507059e+37  ;;  %v3067_v60 = vld [vmem:[#allocation29_spill] sm:$0xff]  ;;  %v3068_v10 = vld [vmem:[#allocation30_spill] sm:$0xff] }
  0xb2   : > { %v982_v3 = vadd.f32 %v981_v21, %v980_v35  ;;  %vm872_vm5 = vweird.f32 %v2590_v19  ;;  %v884_v14 = vmul.f32 %v2617_v46, %v883_v54  ;;  %v934_v50 = vmul.f32 %v2572_v9, %v3057_v4 }
  0xb3   : > { %v985_v42 = vsel %vm943_vm6, %v932_v52, 0.0  ;;  %v844_v27 = vsel %vm2686_vm14, %v2546_v58, %v840_v16  ;;  %v878_v18 = vor.u32 1.1754944e-38, %v877_v32  ;;  %vm887_vm7 = vweird.f32 %v2617_v46  ;;  %vm2726_vm11 = vmor %vm871_vm2, %vm872_vm5  ;;  %v3069_v52 = vld [vmem:[#allocation31_spill] sm:$0xff] }
  0xb4   : > { %v984_v59 = vadd.f32 %v983_v5, %v982_v3  ;;  %v870_v26 = vadd.f32 %v2590_v19, %v869_v62  ;;  %v899_v56 = vmul.f32 %v2630_v1, %v898_v63  ;;  %v935_v51 = vmul.f32 %v804_v15, %v3058_v28  ;;  %v3061_v15 = vld [vmem:[#allocation27_spill] sm:$0xff]  ;;  %vm2743_vm15 = vmor %vm886_vm3, %vm887_vm7 }
  0xb5   : > { %v987_v17 = vsel %vm943_vm6, %v933_v20, 0.0  ;;  %v859_v9 = vsel %vm2704_vm0, %v2563_v45, %v855_v39  ;;  %v892_v31 = vand.u32 2147483648, %v3029_v53  ;;  %vm901_vm13 = vweird.f32 %v3033_v7 }
  0xb6   : > { %v986_v44 = vadd.f32 %v985_v42, %v984_v59  ;;  %v885_v8 = vadd.f32 %v2617_v46, %v884_v14  ;;  %vm902_vm9 = vweird.f32 %v2630_v1  ;;  %v936_v25 = vmul.f32 %v819_v12, %v3061_v15 }
  0xb7   : > { %v989_v47 = vsel %vm943_vm6, %v934_v50, 0.0  ;;  %v849_v24 = vsel %vm2657_vm8, %v2601_v43, %v844_v27  ;;  %v905_v37 = vand.u32 2147483647, %v3033_v7  ;;  %v907_v41 = vand.u32 2147483648, %v3033_v7  ;;  %v3064_v43 = vld [vmem:[#allocation28_spill] sm:$0xff]  ;;  %vm2760_vm2 = vmor %vm901_vm13, %vm902_vm9 }
  0xb8   : > { %v988_v13 = vadd.f32 %v987_v17, %v986_v44  ;;  %v874_v12 = vsel %vm2726_vm11, %v2590_v19, %v870_v26  ;;  %v900_v29 = vadd.f32 %v2630_v1, %v899_v56  ;;  %v937_v6 = vmul.f32 %v834_v36, %v3064_v43 }
  0xb9   : > { %v991_v61 = vsel %vm943_vm6, %v935_v51, 0.0  ;;  %v864_v53 = vsel %vm2672_vm10, %v2635_v23, %v859_v9  ;;  %v893_v55 = vor.u32 1.1754944e-38, %v892_v31  ;;  %v889_v19 = vsel %vm2743_vm15, %v2617_v46, %v885_v8 }
  0xba   : > { %v990_v22 = vadd.f32 %v989_v47, %v988_v13  ;;  %vm891_vm12 = vcmp.eq.f32.partialorder %v890_v38, 8.507059e+37  ;;  %v938_v48 = vmul.f32 %v849_v24, %v3067_v60  ;;  %v993_v30 = vsel %vm943_vm6, %v936_v25, 0.0 }
  0xbb   : > { %v879_v23 = vsel %vm2698_vm1, %v878_v18, %v874_v12  ;;  %v908_v32 = vor.u32 1.1754944e-38, %v907_v41  ;;  %v904_v7 = vsel %vm2760_vm2, %v2630_v1, %v900_v29  ;;  %vm906_vm8 = vcmp.eq.f32.partialorder %v905_v37, 8.507059e+37  ;;  %v3071_v1 = vld [vmem:[#allocation33_spill] sm:$0xff] }
  0xbc   : > { %v992_v2 = vadd.f32 %v991_v61, %v990_v22  ;;  %v939_v11 = vmul.f32 %v864_v53, %v3068_v10  ;;  %v995_v54 = vsel %vm943_vm6, %v937_v6, 0.0  ;;  %v894_v46 = vsel %vm891_vm12, %v893_v55, %v889_v19 }
  0xbd   : > { %v940_v21 = vmul.f32 %v879_v23, %v3069_v52  ;;  %v997_v16 = vsel %vm943_vm6, %v938_v48, 0.0  ;;  %v909_v38 = vsel %vm906_vm8, %v908_v32, %v904_v7  ;;  %v941_v62 = vmul.f32 %v894_v46, %v3070_v34 }
  0xbe   : > { %v994_v40 = vadd.f32 %v993_v30, %v992_v2  ;;  %v999_v63 = vsel %vm943_vm6, %v939_v11, 0.0  ;;  %v942_v20 = vmul.f32 %v909_v38, %v3071_v1  ;;  %vm1013_vm3 = vcmask 122880  }
  0xbf   : > { %v1001_v5 = vsel %vm943_vm6, %v940_v21, 0.0  ;;  %v1003_v39 = vsel %vm943_vm6, %v941_v62, 0.0 }
  0xc0   : > { %v996_v35 = vadd.f32 %v995_v54, %v994_v40  ;;  %v1005_v3 = vsel %vm943_vm6, %v942_v20, 0.0 }
  0xc2   : > { %v998_v49 = vadd.f32 %v997_v16, %v996_v35 }
  0xc4   : > { %v1000_v36 = vadd.f32 %v999_v63, %v998_v49 }
  0xc6   : > { %v1002_v0 = vadd.f32 %v1001_v5, %v1000_v36 }
  0xc8   : > { %v1004_v57 = vadd.f32 %v1003_v39, %v1002_v0 }
  0xca   : > { %v1006_v14 = vadd.f32 %v1005_v3, %v1004_v57 }
  0xcc   : > { %v1007_v4 = vrot.slane %v1006_v14, 4 }
  0xce   : > { %v1008_v50 = vadd.f32 %v1007_v4, %v1006_v14 }
  0xd0   : > { %v1009_v42 = vrot.slane %v1008_v50, 2 }
  0xd2   : > { %v1010_v27 = vadd.f32 %v1009_v42, %v1008_v50 }
  0xd4   : > { %v1011_v18 = vrot.slane %v1010_v27, 1 }
  0xd6   : > { %v1012_v59 = vadd.f32 %v1011_v18, %v1010_v27 }
  0xd8   : > { %1014 = vst.msk [vmem:[%s166_s24] sm:$0x1] %vm1013_vm3, %v1012_v59 }
  0xd9 PF: > { %s13_s12 = sadd.s32 1, %s1327_s12  }
  0xda   : > { %p10_p4 = scmp.ge.s32.totalorder %s13_s12, 4  }
  0xdc   :  { %12 = sbr.rel (!%p10_p4) target bundleno = 1 (0x1), region = 62 }

// kernel: mbconv_forward.5
= control target key start
LH: loop header
LB: loop body
LE: loop exit
PB: predicated region body
PF: predicated region fallthrough
CT: control target
= control target key end

     0   :  { %vm337_vm0 = vcmask 1041408   ;;  %vm240_vm1 = vcmask 31744   ;;  %vm574_vm2 = vcmask 125952   ;;  %vm639_vm3 = vcmask 130048   ;;  %s2110_s1 = inlined_call_operand.vmem [shape: bf16[4,16], index: 1, kind: input, shape index: {}]   ;;  %s2111_s0 = inlined_call_operand.vmem [shape: bf16[512,4], index: 0, kind: input, shape index: {}]   ;;  %s2112_s2 = inlined_call_operand.vmem [shape: bf16[512,16], index: 2, kind: output, shape index: {0}]   ;;  %s2113_s3 = inlined_call_operand.vmem [shape: f32[1,1,16], index: 3, kind: output, shape index: {1}]   ;;  %s2114_s4 = inlined_call_operand.vmem [shape: f32[1,1,16], index: 4, kind: output, shape index: {2}]  }
   0x1   :  { %v79_v0 = vld [vmem:[%s2110_s1] sm:$0x3]  ;;  %v1146_v4 = vld [vmem:[%s2111_s0 + $0x8] sm:$0xff]  ;;  %v1147_v7 = vld [vmem:[%s2111_s0 + $0x10] sm:$0xff]  ;;  %vm773_vm4 = vcmask 122880  }
   0x2   :  { %v339_v1 = vsel %vm337_vm0, %v79_v0, 0  ;;  %v1145_v2 = vld [vmem:[%s2111_s0] sm:$0xff]  ;;  %v1154_v5 = vld [vmem:[%s2111_s0 + $0x48] sm:$0xff]  ;;  %v1155_v8 = vld [vmem:[%s2111_s0 + $0x50] sm:$0xff] }
   0x3   :  { %v1153_v3 = vld [vmem:[%s2111_s0 + $0x40] sm:$0xff]  ;;  %348 = vmatpush.bf16.msra.mxu0 %v339_v1  ;;  %1177 = vmatpush.bf16.msra.mxu1 %v339_v1  ;;  %v1162_v9 = vld [vmem:[%s2111_s0 + $0x88] sm:$0xff]  ;;  %v1148_v10 = vld [vmem:[%s2111_s0 + $0x18] sm:$0xff] }
   0x4   :  { %1178 = vmatpush.bf16.msra.mxu2 %v339_v1  ;;  %1179 = vmatpush.bf16.msra.mxu3 %v339_v1  ;;  %v1161_v6 = vld [vmem:[%s2111_s0 + $0x80] sm:$0xff]  ;;  %v1156_v11 = vld [vmem:[%s2111_s0 + $0x58] sm:$0xff]  ;;  %v1163_v12 = vld [vmem:[%s2111_s0 + $0x90] sm:$0xff] }
   0x5   :  { %v1169_v13 = vld [vmem:[%s2111_s0 + $0xc0] sm:$0xff]  ;;  %v1164_v16 = vld [vmem:[%s2111_s0 + $0x98] sm:$0xff]  ;;  %v1170_v17 = vld [vmem:[%s2111_s0 + $0xc8] sm:$0xff] }
   0x6   :  { %1113 = vmatmul.msk.bf16.vlgmr.msra.gmra.mxu0 %vm240_vm1, %v1145_v2  ;;  %1121 = vmatmul.msk.bf16.vlgmr.msra.gmra.mxu1 %vm240_vm1, %v1153_v3  ;;  %v1149_v14 = vld [vmem:[%s2111_s0 + $0x20] sm:$0xff]  ;;  %v1150_v18 = vld [vmem:[%s2111_s0 + $0x28] sm:$0xff]  ;;  %v1171_v21 = vld [vmem:[%s2111_s0 + $0xd0] sm:$0xff] }
   0x7   :  { %1129 = vmatmul.msk.bf16.vlgmr.msra.gmra.mxu2 %vm240_vm1, %v1161_v6  ;;  %1137 = vmatmul.msk.bf16.vlgmr.msra.gmra.mxu3 %vm240_vm1, %v1169_v13  ;;  %v1157_v15 = vld [vmem:[%s2111_s0 + $0x60] sm:$0xff]  ;;  %v1158_v19 = vld [vmem:[%s2111_s0 + $0x68] sm:$0xff]  ;;  %v1151_v22 = vld [vmem:[%s2111_s0 + $0x30] sm:$0xff] }
   0x8   :  { %v1165_v20 = vld [vmem:[%s2111_s0 + $0xa0] sm:$0xff]  ;;  %v1159_v23 = vld [vmem:[%s2111_s0 + $0x70] sm:$0xff]  ;;  %v1166_v24 = vld [vmem:[%s2111_s0 + $0xa8] sm:$0xff] }
   0x9   :  { %v1172_v25 = vld [vmem:[%s2111_s0 + $0xd8] sm:$0xff]  ;;  %v1167_v28 = vld [vmem:[%s2111_s0 + $0xb0] sm:$0xff]  ;;  %v1173_v29 = vld [vmem:[%s2111_s0 + $0xe0] sm:$0xff] }
   0xa   :  { %v1152_v26 = vld [vmem:[%s2111_s0 + $0x38] sm:$0xff]  ;;  %v1174_v35 = vld [vmem:[%s2111_s0 + $0xe8] sm:$0xff]  ;;  %v1175_v56 = vld [vmem:[%s2111_s0 + $0xf0] sm:$0xff] }
   0xb   :  { %v1160_v27 = vld [vmem:[%s2111_s0 + $0x78] sm:$0xff] }
   0xc   :  { %v1168_v34 = vld [vmem:[%s2111_s0 + $0xb8] sm:$0xff] }
  0x16   :  { %1114 = vmatmul.msk.bf16.gmra.mxu0 %vm240_vm1, %v1146_v4  ;;  %1122 = vmatmul.msk.bf16.gmra.mxu1 %vm240_vm1, %v1154_v5 }
  0x17   :  { %1130 = vmatmul.msk.bf16.gmra.mxu2 %vm240_vm1, %v1162_v9  ;;  %1138 = vmatmul.msk.bf16.gmra.mxu3 %vm240_vm1, %v1170_v17 }
  0x26   :  { %1115 = vmatmul.msk.bf16.gmra.mxu0 %vm240_vm1, %v1147_v7  ;;  %1123 = vmatmul.msk.bf16.gmra.mxu1 %vm240_vm1, %v1155_v8 }
  0x27   :  { %1131 = vmatmul.msk.bf16.gmra.mxu2 %vm240_vm1, %v1163_v12  ;;  %1139 = vmatmul.msk.bf16.gmra.mxu3 %vm240_vm1, %v1171_v21 }
  0x36   :  { %1116 = vmatmul.msk.bf16.gmra.mxu0 %vm240_vm1, %v1148_v10  ;;  %1124 = vmatmul.msk.bf16.gmra.mxu1 %vm240_vm1, %v1156_v11 }
  0x37   :  { %1132 = vmatmul.msk.bf16.gmra.mxu2 %vm240_vm1, %v1164_v16  ;;  %1140 = vmatmul.msk.bf16.gmra.mxu3 %vm240_vm1, %v1172_v25 }
  0x46   :  { %1117 = vmatmul.msk.bf16.gmra.mxu0 %vm240_vm1, %v1149_v14  ;;  %1125 = vmatmul.msk.bf16.gmra.mxu1 %vm240_vm1, %v1157_v15  ;;  %v1176_v15 = vld [vmem:[%s2111_s0 + $0xf8] sm:$0xff] }
  0x47   :  { %1133 = vmatmul.msk.bf16.gmra.mxu2 %vm240_vm1, %v1165_v20  ;;  %1141 = vmatmul.msk.bf16.gmra.mxu3 %vm240_vm1, %v1173_v29 }
  0x56   :  { %1118 = vmatmul.msk.bf16.gmra.mxu0 %vm240_vm1, %v1150_v18  ;;  %1126 = vmatmul.msk.bf16.gmra.mxu1 %vm240_vm1, %v1158_v19 }
  0x57   :  { %1134 = vmatmul.msk.bf16.gmra.mxu2 %vm240_vm1, %v1166_v24  ;;  %1142 = vmatmul.msk.bf16.gmra.mxu3 %vm240_vm1, %v1174_v35 }
  0x66   :  { %1119 = vmatmul.msk.bf16.gmra.mxu0 %vm240_vm1, %v1151_v22  ;;  %1127 = vmatmul.msk.bf16.gmra.mxu1 %vm240_vm1, %v1159_v23 }
  0x67   :  { %1135 = vmatmul.msk.bf16.gmra.mxu2 %vm240_vm1, %v1167_v28  ;;  %1143 = vmatmul.msk.bf16.gmra.mxu3 %vm240_vm1, %v1175_v56 }
  0x76   :  { %1120 = vmatmul.msk.bf16.gmra.mxu0 %vm240_vm1, %v1152_v26  ;;  %1128 = vmatmul.msk.bf16.gmra.mxu1 %vm240_vm1, %v1160_v27 }
  0x77   :  { %1136 = vmatmul.msk.bf16.gmra.mxu2 %vm240_vm1, %v1168_v34  ;;  %1144 = vmatmul.msk.bf16.gmra.mxu3 %vm240_vm1, %v1176_v15 }
  0x83   :  { %v350_v30 = vpop.f32.mrf.mxu0  ;;  %v1320_v31 = vpop.f32.mrf.mxu1 }
  0x84   :  { %v510_v32 = vpack.c.bf16 %v350_v30, %v350_v30  ;;  %v526_v33 = vpack.c.bf16 %v1320_v31, %v1320_v31  ;;  %v775_v36 = vmul.f32 %v350_v30, %v350_v30  ;;  %v640_v37 = vsel %vm639_vm3, %v350_v30, 0.0 }
  0x86   :  { %575 = vst.msk [vmem:[%s2112_s2] sm:$0xf] %vm574_vm2, %v510_v32  ;;  %v839_v45 = vsel %vm639_vm3, %v775_v36, 0.0 }
  0x87   :  { %591 = vst.msk [vmem:[%s2112_s2 + $0x40] sm:$0xf] %vm574_vm2, %v526_v33 }
  0x8a   :  { %v1379_v0 = vpop.f32.mrf.mxu2  ;;  %v1484_v35 = vpop.f32.mrf.mxu3 }
  0x8b   :  { %v352_v38 = vpop.f32.mrf.mxu0  ;;  %v1341_v39 = vpop.f32.mrf.mxu1  ;;  %v542_v4 = vpack.c.bf16 %v1379_v0, %v1379_v0 }
  0x8c   :  { %v511_v40 = vpack.c.bf16 %v352_v38, %v352_v38  ;;  %v641_v41 = vsel %vm639_vm3, %v352_v38, 0.0  ;;  %v776_v42 = vmul.f32 %v352_v38, %v352_v38  ;;  %v527_v43 = vpack.c.bf16 %v1341_v39, %v1341_v39 }
  0x8d   :  { %v642_v44 = vadd.f32 %v641_v41, %v640_v37  ;;  %607 = vst.msk [vmem:[%s2112_s2 + $0x80] sm:$0xf] %vm574_vm2, %v542_v4  ;;  %v558_v37 = vpack.c.bf16 %v1484_v35, %v1484_v35 }
  0x8e   :  { %576 = vst.msk [vmem:[%s2112_s2 + $0x4] sm:$0xf] %vm574_vm2, %v511_v40  ;;  %v840_v46 = vsel %vm639_vm3, %v776_v42, 0.0 }
  0x8f   :  { %v841_v47 = vadd.f32 %v840_v46, %v839_v45  ;;  %592 = vst.msk [vmem:[%s2112_s2 + $0x44] sm:$0xf] %vm574_vm2, %v527_v43 }
  0x90   :  { %623 = vst.msk [vmem:[%s2112_s2 + $0xc0] sm:$0xf] %vm574_vm2, %v558_v37 }
  0x92   :  { %v1401_v11 = vpop.f32.mrf.mxu2 }
  0x93   :  { %v355_v48 = vpop.f32.mrf.mxu0  ;;  %v1356_v49 = vpop.f32.mrf.mxu1  ;;  %v543_v13 = vpack.c.bf16 %v1401_v11, %v1401_v11 }
  0x94   :  { %v512_v50 = vpack.c.bf16 %v355_v48, %v355_v48  ;;  %v643_v51 = vsel %vm639_vm3, %v355_v48, 0.0  ;;  %v777_v52 = vmul.f32 %v355_v48, %v355_v48  ;;  %v528_v53 = vpack.c.bf16 %v1356_v49, %v1356_v49 }
  0x95   :  { %v644_v54 = vadd.f32 %v643_v51, %v642_v44  ;;  %608 = vst.msk [vmem:[%s2112_s2 + $0x84] sm:$0xf] %vm574_vm2, %v543_v13  ;;  %v1516_v44 = vpop.f32.mrf.mxu3 }
  0x96   :  { %577 = vst.msk [vmem:[%s2112_s2 + $0x8] sm:$0xf] %vm574_vm2, %v512_v50  ;;  %v842_v55 = vsel %vm639_vm3, %v777_v52, 0.0  ;;  %v559_v46 = vpack.c.bf16 %v1516_v44, %v1516_v44 }
  0x97   :  { %v843_v57 = vadd.f32 %v842_v55, %v841_v47  ;;  %593 = vst.msk [vmem:[%s2112_s2 + $0x48] sm:$0xf] %vm574_vm2, %v528_v53 }
  0x98   :  { %624 = vst.msk [vmem:[%s2112_s2 + $0xc4] sm:$0xf] %vm574_vm2, %v559_v46 }
  0x9a   :  { %v1434_v21 = vpop.f32.mrf.mxu2 }
  0x9b   :  { %v357_v58 = vpop.f32.mrf.mxu0  ;;  %v1374_v59 = vpop.f32.mrf.mxu1  ;;  %v544_v22 = vpack.c.bf16 %v1434_v21, %v1434_v21 }
  0x9c   :  { %v513_v60 = vpack.c.bf16 %v357_v58, %v357_v58  ;;  %v645_v61 = vsel %vm639_vm3, %v357_v58, 0.0  ;;  %v778_v62 = vmul.f32 %v357_v58, %v357_v58  ;;  %v529_v63 = vpack.c.bf16 %v1374_v59, %v1374_v59 }
  0x9d   :  { %v646_v1 = vadd.f32 %v645_v61, %v644_v54  ;;  %609 = vst.msk [vmem:[%s2112_s2 + $0x88] sm:$0xf] %vm574_vm2, %v544_v22  ;;  %v1548_v53 = vpop.f32.mrf.mxu3 }
  0x9e   :  { %578 = vst.msk [vmem:[%s2112_s2 + $0xc] sm:$0xf] %vm574_vm2, %v513_v60  ;;  %v844_v2 = vsel %vm639_vm3, %v778_v62, 0.0  ;;  %v560_v55 = vpack.c.bf16 %v1548_v53, %v1548_v53 }
  0x9f   :  { %v845_v3 = vadd.f32 %v844_v2, %v843_v57  ;;  %594 = vst.msk [vmem:[%s2112_s2 + $0x4c] sm:$0xf] %vm574_vm2, %v529_v63 }
  0xa0   :  { %625 = vst.msk [vmem:[%s2112_s2 + $0xc8] sm:$0xf] %vm574_vm2, %v560_v55 }
  0xa2   :  { %v1458_v27 = vpop.f32.mrf.mxu2 }
  0xa3   :  { %v360_v5 = vpop.f32.mrf.mxu0  ;;  %v1396_v6 = vpop.f32.mrf.mxu1  ;;  %v545_v28 = vpack.c.bf16 %v1458_v27, %v1458_v27 }
  0xa4   :  { %v514_v7 = vpack.c.bf16 %v360_v5, %v360_v5  ;;  %v647_v8 = vsel %vm639_vm3, %v360_v5, 0.0  ;;  %v779_v9 = vmul.f32 %v360_v5, %v360_v5  ;;  %v530_v10 = vpack.c.bf16 %v1396_v6, %v1396_v6 }
  0xa5   :  { %v1403_v12 = vadd.f32 %v647_v8, %v646_v1  ;;  %610 = vst.msk [vmem:[%s2112_s2 + $0x8c] sm:$0xf] %vm574_vm2, %v545_v28  ;;  %v1580_v62 = vpop.f32.mrf.mxu3 }
  0xa6   :  { %579 = vst.msk [vmem:[%s2112_s2 + $0x10] sm:$0xf] %vm574_vm2, %v514_v7  ;;  %v846_v14 = vsel %vm639_vm3, %v779_v9, 0.0  ;;  %v561_v1 = vpack.c.bf16 %v1580_v62, %v1580_v62 }
  0xa7   :  { %v1415_v16 = vadd.f32 %v846_v14, %v845_v3  ;;  %595 = vst.msk [vmem:[%s2112_s2 + $0x50] sm:$0xf] %vm574_vm2, %v530_v10 }
  0xa8   :  { %626 = vst.msk [vmem:[%s2112_s2 + $0xcc] sm:$0xf] %vm574_vm2, %v561_v1 }
  0xaa   :  { %v1482_v34 = vpop.f32.mrf.mxu2 }
  0xab   :  { %v1426_v17 = vpop.f32.mrf.mxu0  ;;  %v1428_v18 = vpop.f32.mrf.mxu1  ;;  %v546_v36 = vpack.c.bf16 %v1482_v34, %v1482_v34 }
  0xac   :  { %v515_v19 = vpack.c.bf16 %v1426_v17, %v1426_v17  ;;  %v531_v20 = vpack.c.bf16 %v1428_v18, %v1428_v18  ;;  %v780_v13 = vmul.f32 %v1426_v17, %v1426_v17 }
  0xad   :  { %611 = vst.msk [vmem:[%s2112_s2 + $0x90] sm:$0xf] %vm574_vm2, %v546_v36  ;;  %v1608_v8 = vpop.f32.mrf.mxu3 }
  0xae   :  { %580 = vst.msk [vmem:[%s2112_s2 + $0x14] sm:$0xf] %vm574_vm2, %v515_v19  ;;  %v562_v28 = vpack.c.bf16 %v1608_v8, %v1608_v8 }
  0xaf   :  { %596 = vst.msk [vmem:[%s2112_s2 + $0x54] sm:$0xf] %vm574_vm2, %v531_v20 }
  0xb0   :  { %627 = vst.msk [vmem:[%s2112_s2 + $0xd0] sm:$0xf] %vm574_vm2, %v562_v28 }
  0xb2   :  { %v1514_v43 = vpop.f32.mrf.mxu2 }
  0xb3   :  { %v1450_v23 = vpop.f32.mrf.mxu0  ;;  %v1452_v24 = vpop.f32.mrf.mxu1  ;;  %v547_v45 = vpack.c.bf16 %v1514_v43, %v1514_v43 }
  0xb4   :  { %v516_v25 = vpack.c.bf16 %v1450_v23, %v1450_v23  ;;  %v532_v26 = vpack.c.bf16 %v1452_v24, %v1452_v24 }
  0xb5   :  { %612 = vst.msk [vmem:[%s2112_s2 + $0x94] sm:$0xf] %vm574_vm2, %v547_v45  ;;  %v1626_v20 = vpop.f32.mrf.mxu3 }
  0xb6   :  { %581 = vst.msk [vmem:[%s2112_s2 + $0x18] sm:$0xf] %vm574_vm2, %v516_v25  ;;  %v649_v25 = vsel %vm639_vm3, %v1426_v17, 0.0  ;;  %v848_v17 = vsel %vm639_vm3, %v780_v13, 0.0 }
  0xb7   :  { %597 = vst.msk [vmem:[%s2112_s2 + $0x58] sm:$0xf] %vm574_vm2, %v532_v26  ;;  %v781_v26 = vmul.f32 %v1450_v23, %v1450_v23  ;;  %v650_v37 = vadd.f32 %v649_v25, %v1403_v12  ;;  %v849_v12 = vadd.f32 %v848_v17, %v1415_v16 }
  0xba   :  { %v1546_v52 = vpop.f32.mrf.mxu2 }
  0xbb   :  { %v1474_v29 = vpop.f32.mrf.mxu0  ;;  %v1476_v30 = vpop.f32.mrf.mxu1  ;;  %v548_v54 = vpack.c.bf16 %v1546_v52, %v1546_v52 }
  0xbc   :  { %v517_v32 = vpack.c.bf16 %v1474_v29, %v1474_v29  ;;  %v533_v33 = vpack.c.bf16 %v1476_v30, %v1476_v30 }
  0xbd   :  { %613 = vst.msk [vmem:[%s2112_s2 + $0x98] sm:$0xf] %vm574_vm2, %v548_v54 }
  0xbe   :  { %582 = vst.msk [vmem:[%s2112_s2 + $0x1c] sm:$0xf] %vm574_vm2, %v517_v32  ;;  %v782_v32 = vmul.f32 %v1474_v29, %v1474_v29 }
  0xbf   :  { %598 = vst.msk [vmem:[%s2112_s2 + $0x5c] sm:$0xf] %vm574_vm2, %v533_v33  ;;  %v651_v33 = vsel %vm639_vm3, %v1450_v23, 0.0  ;;  %v850_v23 = vsel %vm639_vm3, %v781_v26, 0.0 }
  0xc0   :  { %v652_v46 = vadd.f32 %v651_v33, %v650_v37  ;;  %v851_v1 = vadd.f32 %v850_v23, %v849_v12 }
  0xc2   :  { %v1578_v61 = vpop.f32.mrf.mxu2 }
  0xc3   :  { %v1506_v38 = vpop.f32.mrf.mxu0  ;;  %v1508_v40 = vpop.f32.mrf.mxu1  ;;  %v549_v63 = vpack.c.bf16 %v1578_v61, %v1578_v61 }
  0xc4   :  { %v518_v41 = vpack.c.bf16 %v1506_v38, %v1506_v38  ;;  %v534_v42 = vpack.c.bf16 %v1508_v40, %v1508_v40  ;;  %v783_v45 = vmul.f32 %v1506_v38, %v1506_v38 }
  0xc5   :  { %614 = vst.msk [vmem:[%s2112_s2 + $0x9c] sm:$0xf] %vm574_vm2, %v549_v63  ;;  %v1687_v63 = vpop.f32.mrf.mxu3 }
  0xc6   :  { %583 = vst.msk [vmem:[%s2112_s2 + $0x20] sm:$0xf] %vm574_vm2, %v518_v41  ;;  %v563_v41 = vpack.c.bf16 %v1626_v20, %v1626_v20 }
  0xc7   :  { %599 = vst.msk [vmem:[%s2112_s2 + $0x60] sm:$0xf] %vm574_vm2, %v534_v42  ;;  %v653_v42 = vsel %vm639_vm3, %v1474_v29, 0.0  ;;  %v655_v29 = vsel %vm639_vm3, %v1506_v38, 0.0 }
  0xc8   :  { %628 = vst.msk [vmem:[%s2112_s2 + $0xd4] sm:$0xf] %vm574_vm2, %v563_v41 }
  0xca   :  { %v1606_v7 = vpop.f32.mrf.mxu2 }
  0xcb   :  { %v1538_v47 = vpop.f32.mrf.mxu0  ;;  %v1540_v48 = vpop.f32.mrf.mxu1  ;;  %v550_v22 = vpack.c.bf16 %v1606_v7, %v1606_v7 }
  0xcc   :  { %v519_v50 = vpack.c.bf16 %v1538_v47, %v1538_v47  ;;  %v535_v51 = vpack.c.bf16 %v1540_v48, %v1540_v48  ;;  %v784_v55 = vmul.f32 %v1538_v47, %v1538_v47  ;;  %v657_v13 = vsel %vm639_vm3, %v1538_v47, 0.0 }
  0xcd   :  { %615 = vst.msk [vmem:[%s2112_s2 + $0xa0] sm:$0xf] %vm574_vm2, %v550_v22 }
  0xce   :  { %584 = vst.msk [vmem:[%s2112_s2 + $0x24] sm:$0xf] %vm574_vm2, %v519_v50  ;;  %v852_v50 = vsel %vm639_vm3, %v782_v32, 0.0  ;;  %v856_v25 = vsel %vm639_vm3, %v784_v55, 0.0 }
  0xcf   :  { %600 = vst.msk [vmem:[%s2112_s2 + $0x64] sm:$0xf] %vm574_vm2, %v535_v51 }
  0xd2   :  { %v1624_v19 = vpop.f32.mrf.mxu2 }
  0xd3   :  { %v1570_v56 = vpop.f32.mrf.mxu0  ;;  %v1572_v57 = vpop.f32.mrf.mxu1  ;;  %v551_v36 = vpack.c.bf16 %v1624_v19, %v1624_v19 }
  0xd4   :  { %v520_v58 = vpack.c.bf16 %v1570_v56, %v1570_v56  ;;  %v536_v60 = vpack.c.bf16 %v1572_v57, %v1572_v57  ;;  %v785_v38 = vmul.f32 %v1570_v56, %v1570_v56  ;;  %v659_v47 = vsel %vm639_vm3, %v1570_v56, 0.0 }
  0xd5   :  { %616 = vst.msk [vmem:[%s2112_s2 + $0xa4] sm:$0xf] %vm574_vm2, %v551_v36 }
  0xd6   :  { %585 = vst.msk [vmem:[%s2112_s2 + $0x28] sm:$0xf] %vm574_vm2, %v520_v58  ;;  %v858_v32 = vsel %vm639_vm3, %v785_v38, 0.0 }
  0xd7   :  { %601 = vst.msk [vmem:[%s2112_s2 + $0x68] sm:$0xf] %vm574_vm2, %v536_v60 }
  0xda   :  { %v1685_v60 = vpop.f32.mrf.mxu2 }
  0xdb   :  { %v377_v2 = vpop.f32.mrf.mxu0  ;;  %v1602_v3 = vpop.f32.mrf.mxu1 }
  0xdc   :  { %v521_v4 = vpack.c.bf16 %v377_v2, %v377_v2  ;;  %v537_v5 = vpack.c.bf16 %v1602_v3, %v1602_v3  ;;  %v786_v22 = vmul.f32 %v377_v2, %v377_v2  ;;  %v661_v17 = vsel %vm639_vm3, %v377_v2, 0.0 }
  0xde   :  { %586 = vst.msk [vmem:[%s2112_s2 + $0x2c] sm:$0xf] %vm574_vm2, %v521_v4  ;;  %v654_v4 = vadd.f32 %v653_v42, %v652_v46  ;;  %v860_v41 = vsel %vm639_vm3, %v786_v22, 0.0 }
  0xdf   :  { %602 = vst.msk [vmem:[%s2112_s2 + $0x6c] sm:$0xf] %vm574_vm2, %v537_v5  ;;  %v854_v5 = vsel %vm639_vm3, %v783_v45, 0.0 }
  0xe3   :  { %v380_v9 = vpop.f32.mrf.mxu0  ;;  %v1618_v10 = vpop.f32.mrf.mxu1 }
  0xe4   :  { %v522_v14 = vpack.c.bf16 %v380_v9, %v380_v9  ;;  %v538_v15 = vpack.c.bf16 %v1618_v10, %v1618_v10  ;;  %v787_v33 = vmul.f32 %v380_v9, %v380_v9  ;;  %v663_v45 = vsel %vm639_vm3, %v380_v9, 0.0 }
  0xe6   :  { %587 = vst.msk [vmem:[%s2112_s2 + $0x30] sm:$0xf] %vm574_vm2, %v522_v14  ;;  %v853_v14 = vadd.f32 %v852_v50, %v851_v1  ;;  %v1713_v50 = vpop.f32.mrf.mxu2 }
  0xe7   :  { %603 = vst.msk [vmem:[%s2112_s2 + $0x70] sm:$0xf] %vm574_vm2, %v538_v15  ;;  %v656_v15 = vadd.f32 %v655_v29, %v654_v4  ;;  %v1715_v29 = vpop.f32.mrf.mxu3  ;;  %v564_v4 = vpack.c.bf16 %v1687_v63, %v1687_v63 }
  0xe8   :  { %v855_v26 = vadd.f32 %v854_v5, %v853_v14  ;;  %v553_v14 = vpack.c.bf16 %v1713_v50, %v1713_v50 }
  0xe9   :  { %v658_v28 = vadd.f32 %v657_v13, %v656_v15  ;;  %629 = vst.msk [vmem:[%s2112_s2 + $0xd8] sm:$0xf] %vm574_vm2, %v564_v4  ;;  %v673_v4 = vsel %vm639_vm3, %v1341_v39, 0.0 }
  0xea   :  { %v857_v36 = vadd.f32 %v856_v25, %v855_v26  ;;  %v565_v25 = vpack.c.bf16 %v1715_v29, %v1715_v29  ;;  %618 = vst.msk [vmem:[%s2112_s2 + $0xac] sm:$0xf] %vm574_vm2, %v553_v14  ;;  %v791_v26 = vmul.f32 %v1320_v31, %v1320_v31  ;;  %v794_v14 = vmul.f32 %v1374_v59, %v1374_v59 }
  0xeb   :  { %v382_v51 = vpop.f32.mrf.mxu0  ;;  %v1673_v54 = vpop.f32.mrf.mxu1  ;;  %v660_v37 = vadd.f32 %v659_v47, %v658_v28 }
  0xec   :  { %v523_v58 = vpack.c.bf16 %v382_v51, %v382_v51  ;;  %v539_v16 = vpack.c.bf16 %v1673_v54, %v1673_v54  ;;  %v788_v12 = vmul.f32 %v382_v51, %v382_v51  ;;  %v859_v2 = vadd.f32 %v858_v32, %v857_v36  ;;  %630 = vst.msk [vmem:[%s2112_s2 + $0xdc] sm:$0xf] %vm574_vm2, %v565_v25 }
  0xed   :  { %v662_v55 = vadd.f32 %v661_v17, %v660_v37  ;;  %v665_v1 = vsel %vm639_vm3, %v382_v51, 0.0 }
  0xee   :  { %588 = vst.msk [vmem:[%s2112_s2 + $0x34] sm:$0xf] %vm574_vm2, %v523_v58  ;;  %v552_v58 = vpack.c.bf16 %v1685_v60, %v1685_v60  ;;  %v861_v5 = vadd.f32 %v860_v41, %v859_v2  ;;  %v864_v38 = vsel %vm639_vm3, %v788_v12, 0.0  ;;  %v671_v2 = vsel %vm639_vm3, %v1320_v31, 0.0 }
  0xef   :  { %604 = vst.msk [vmem:[%s2112_s2 + $0x74] sm:$0xf] %vm574_vm2, %v539_v16  ;;  %v862_v16 = vsel %vm639_vm3, %v787_v33, 0.0  ;;  %v664_v13 = vadd.f32 %v663_v45, %v662_v55  ;;  %v1761_v45 = vpop.f32.mrf.mxu2  ;;  %v1763_v12 = vpop.f32.mrf.mxu3  ;;  %v792_v55 = vmul.f32 %v1341_v39, %v1341_v39  ;;  %v870_v31 = vsel %vm639_vm3, %v791_v26, 0.0 }
  0xf0   :  { %617 = vst.msk [vmem:[%s2112_s2 + $0xa8] sm:$0xf] %vm574_vm2, %v552_v58  ;;  %v863_v15 = vadd.f32 %v862_v16, %v861_v5  ;;  %v793_v16 = vmul.f32 %v1356_v49, %v1356_v49  ;;  %v795_v39 = vmul.f32 %v1396_v6, %v1396_v6  ;;  %v554_v26 = vpack.c.bf16 %v1761_v45, %v1761_v45 }
  0xf1   :  { %v666_v22 = vadd.f32 %v665_v1, %v664_v13 }
  0xf2   :  { %v865_v28 = vadd.f32 %v864_v38, %v863_v15  ;;  %v872_v38 = vsel %vm639_vm3, %v792_v55, 0.0  ;;  %v874_v15 = vsel %vm639_vm3, %v793_v16, 0.0  ;;  %619 = vst.msk [vmem:[%s2112_s2 + $0xb0] sm:$0xf] %vm574_vm2, %v554_v26  ;;  %v681_v55 = vsel %vm639_vm3, %v1428_v18, 0.0 }
  0xf3   :  { %v385_v23 = vpop.f32.mrf.mxu0  ;;  %v1708_v42 = vpop.f32.mrf.mxu1 }
  0xf4   :  { %v524_v46 = vpack.c.bf16 %v385_v23, %v385_v23  ;;  %v540_v56 = vpack.c.bf16 %v1708_v42, %v1708_v42  ;;  %v789_v9 = vmul.f32 %v385_v23, %v385_v23  ;;  %v667_v51 = vsel %vm639_vm3, %v385_v23, 0.0 }
  0xf5   :  { %v668_v32 = vadd.f32 %v667_v51, %v666_v22  ;;  %v675_v51 = vsel %vm639_vm3, %v1356_v49, 0.0 }
  0xf6   :  { %589 = vst.msk [vmem:[%s2112_s2 + $0x38] sm:$0xf] %vm574_vm2, %v524_v46  ;;  %v866_v47 = vsel %vm639_vm3, %v789_v9, 0.0 }
  0xf7   :  { %605 = vst.msk [vmem:[%s2112_s2 + $0x78] sm:$0xf] %vm574_vm2, %v540_v56  ;;  %v867_v46 = vadd.f32 %v866_v47, %v865_v28  ;;  %v677_v47 = vsel %vm639_vm3, %v1374_v59, 0.0  ;;  %v566_v28 = vpack.c.bf16 %v1763_v12, %v1763_v12  ;;  %v1797_v49 = vpop.f32.mrf.mxu2  ;;  %v679_v59 = vsel %vm639_vm3, %v1396_v6, 0.0 }
  0xf9   :  { %631 = vst.msk [vmem:[%s2112_s2 + $0xe0] sm:$0xf] %vm574_vm2, %v566_v28 }
  0xfb   :  { %v387_v17 = vpop.f32.mrf.mxu0  ;;  %v1752_v33 = vpop.f32.mrf.mxu1 }
  0xfc   :  { %v525_v36 = vpack.c.bf16 %v387_v17, %v387_v17  ;;  %v669_v37 = vsel %vm639_vm3, %v387_v17, 0.0  ;;  %v790_v41 = vmul.f32 %v387_v17, %v387_v17  ;;  %v541_v23 = vpack.c.bf16 %v1752_v33, %v1752_v33 }
  0xfd   :  { %v670_v56 = vadd.f32 %v669_v37, %v668_v32  ;;  %v1799_v32 = vpop.f32.mrf.mxu3  ;;  %v876_v37 = vsel %vm639_vm3, %v794_v14, 0.0 }
  0xfe   :  { %590 = vst.msk [vmem:[%s2112_s2 + $0x3c] sm:$0xf] %vm574_vm2, %v525_v36  ;;  %v868_v58 = vsel %vm639_vm3, %v790_v41, 0.0  ;;  %v796_v41 = vmul.f32 %v1428_v18, %v1428_v18  ;;  %v567_v6 = vpack.c.bf16 %v1799_v32, %v1799_v32  ;;  %v683_v18 = vsel %vm639_vm3, %v1452_v24, 0.0 }
  0xff   :  { %v672_v1 = vadd.f32 %v671_v2, %v670_v56  ;;  %v869_v9 = vadd.f32 %v868_v58, %v867_v46  ;;  %606 = vst.msk [vmem:[%s2112_s2 + $0x7c] sm:$0xf] %vm574_vm2, %v541_v23  ;;  %v555_v23 = vpack.c.bf16 %v1797_v49, %v1797_v49  ;;  %v878_v2 = vsel %vm639_vm3, %v795_v39, 0.0  ;;  %v1841_v14 = vpop.f32.mrf.mxu2 }
 0x100   :  { %v797_v58 = vmul.f32 %v1452_v24, %v1452_v24  ;;  %632 = vst.msk [vmem:[%s2112_s2 + $0xe4] sm:$0xf] %vm574_vm2, %v567_v6  ;;  %v800_v39 = vmul.f32 %v1540_v48, %v1540_v48 }
 0x101   :  { %v674_v5 = vadd.f32 %v673_v4, %v672_v1  ;;  %v871_v13 = vadd.f32 %v870_v31, %v869_v9  ;;  %620 = vst.msk [vmem:[%s2112_s2 + $0xb4] sm:$0xf] %vm574_vm2, %v555_v23  ;;  %v880_v9 = vsel %vm639_vm3, %v796_v41, 0.0  ;;  %v798_v31 = vmul.f32 %v1476_v30, %v1476_v30 }
 0x102   :  { %v888_v41 = vsel %vm639_vm3, %v800_v39, 0.0  ;;  %v802_v23 = vmul.f32 %v1602_v3, %v1602_v3  ;;  %v806_v39 = vmul.f32 %v1752_v33, %v1752_v33 }
 0x103   :  { %v676_v22 = vadd.f32 %v675_v51, %v674_v5  ;;  %v873_v25 = vadd.f32 %v872_v38, %v871_v13  ;;  %v882_v13 = vsel %vm639_vm3, %v797_v58, 0.0  ;;  %v685_v38 = vsel %vm639_vm3, %v1476_v30, 0.0 }
 0x104   :  { %v799_v51 = vmul.f32 %v1508_v40, %v1508_v40  ;;  %v884_v24 = vsel %vm639_vm3, %v798_v31, 0.0  ;;  %v801_v30 = vmul.f32 %v1572_v57, %v1572_v57  ;;  %v804_v31 = vmul.f32 %v1673_v54, %v1673_v54 }
 0x105   :  { %v678_v17 = vadd.f32 %v677_v47, %v676_v22  ;;  %v875_v36 = vadd.f32 %v874_v15, %v873_v25  ;;  %v1843_v15 = vpop.f32.mrf.mxu3  ;;  %v687_v47 = vsel %vm639_vm3, %v1508_v40, 0.0  ;;  %v691_v40 = vsel %vm639_vm3, %v1572_v57, 0.0 }
 0x106   :  { %v568_v58 = vpack.c.bf16 %v1843_v15, %v1843_v15 }
 0x107   :  { %v680_v46 = vadd.f32 %v679_v59, %v678_v17  ;;  %v877_v56 = vadd.f32 %v876_v37, %v875_v36  ;;  %v886_v17 = vsel %vm639_vm3, %v799_v51, 0.0  ;;  %v689_v36 = vsel %vm639_vm3, %v1540_v48, 0.0  ;;  %v1869_v57 = vpop.f32.mrf.mxu2 }
 0x108   :  { %v803_v48 = vmul.f32 %v1618_v10, %v1618_v10  ;;  %633 = vst.msk [vmem:[%s2112_s2 + $0xe8] sm:$0xf] %vm574_vm2, %v568_v58  ;;  %v697_v51 = vsel %vm639_vm3, %v1673_v54, 0.0  ;;  %v699_v54 = vsel %vm639_vm3, %v1708_v42, 0.0 }
 0x109   :  { %v682_v16 = vadd.f32 %v681_v55, %v680_v46  ;;  %v879_v1 = vadd.f32 %v878_v2, %v877_v56  ;;  %v890_v46 = vsel %vm639_vm3, %v801_v30, 0.0  ;;  %v693_v2 = vsel %vm639_vm3, %v1602_v3, 0.0 }
 0x10a   :  { %v556_v55 = vpack.c.bf16 %v1841_v14, %v1841_v14  ;;  %v695_v3 = vsel %vm639_vm3, %v1618_v10, 0.0 }
 0x10b   :  { %v881_v4 = vadd.f32 %v880_v9, %v879_v1  ;;  %v684_v5 = vadd.f32 %v683_v18, %v682_v16  ;;  %v892_v18 = vsel %vm639_vm3, %v802_v23, 0.0  ;;  %v900_v23 = vsel %vm639_vm3, %v806_v39, 0.0 }
 0x10c   :  { %621 = vst.msk [vmem:[%s2112_s2 + $0xb8] sm:$0xf] %vm574_vm2, %v556_v55 }
 0x10d   :  { %v686_v22 = vadd.f32 %v685_v38, %v684_v5  ;;  %v883_v25 = vadd.f32 %v882_v13, %v881_v4  ;;  %v1871_v16 = vpop.f32.mrf.mxu3  ;;  %v557_v4 = vpack.c.bf16 %v1869_v57, %v1869_v57  ;;  %v894_v38 = vsel %vm639_vm3, %v803_v48, 0.0 }
 0x10e   :  { %v569_v10 = vpack.c.bf16 %v1871_v16, %v1871_v16 }
 0x10f   :  { %v688_v26 = vadd.f32 %v687_v47, %v686_v22  ;;  %v885_v28 = vadd.f32 %v884_v24, %v883_v25  ;;  %v805_v22 = vmul.f32 %v1708_v42, %v1708_v42  ;;  %622 = vst.msk [vmem:[%s2112_s2 + $0xbc] sm:$0xf] %vm574_vm2, %v557_v4  ;;  %v896_v47 = vsel %vm639_vm3, %v804_v31, 0.0 }
 0x110   :  { %634 = vst.msk [vmem:[%s2112_s2 + $0xec] sm:$0xf] %vm574_vm2, %v569_v10  ;;  %v703_v42 = vsel %vm639_vm3, %v1379_v0, 0.0  ;;  %v811_v31 = vmul.f32 %v1482_v34, %v1482_v34 }
 0x111   :  { %v690_v37 = vadd.f32 %v689_v36, %v688_v26  ;;  %v887_v59 = vadd.f32 %v886_v17, %v885_v28  ;;  %v807_v28 = vmul.f32 %v1379_v0, %v1379_v0  ;;  %v898_v17 = vsel %vm639_vm3, %v805_v22, 0.0 }
 0x112   :  { %v701_v36 = vsel %vm639_vm3, %v1752_v33, 0.0  ;;  %v809_v33 = vmul.f32 %v1434_v21, %v1434_v21  ;;  %v707_v0 = vsel %vm639_vm3, %v1434_v21, 0.0 }
 0x113   :  { %v692_v56 = vadd.f32 %v691_v40, %v690_v37  ;;  %v889_v6 = vadd.f32 %v888_v41, %v887_v59  ;;  %v808_v40 = vmul.f32 %v1401_v11, %v1401_v11 }
 0x115   :  { %v694_v1 = vadd.f32 %v693_v2, %v692_v56  ;;  %v891_v9 = vadd.f32 %v890_v46, %v889_v6  ;;  %v1913_v37 = vpop.f32.mrf.mxu3  ;;  %v902_v6 = vsel %vm639_vm3, %v807_v28, 0.0  ;;  %v705_v2 = vsel %vm639_vm3, %v1401_v11, 0.0 }
 0x116   :  { %v904_v58 = vsel %vm639_vm3, %v808_v40, 0.0  ;;  %v709_v11 = vsel %vm639_vm3, %v1458_v27, 0.0  ;;  %v570_v4 = vpack.c.bf16 %v1913_v37, %v1913_v37  ;;  %v814_v28 = vmul.f32 %v1578_v61, %v1578_v61 }
 0x117   :  { %v696_v5 = vadd.f32 %v695_v3, %v694_v1  ;;  %v893_v13 = vadd.f32 %v892_v18, %v891_v9  ;;  %v810_v1 = vmul.f32 %v1458_v27, %v1458_v27  ;;  %v906_v3 = vsel %vm639_vm3, %v809_v33, 0.0 }
 0x118   :  { %v812_v27 = vmul.f32 %v1514_v43, %v1514_v43  ;;  %635 = vst.msk [vmem:[%s2112_s2 + $0xf0] sm:$0xf] %vm574_vm2, %v570_v4 }
 0x119   :  { %v895_v25 = vadd.f32 %v894_v38, %v893_v13  ;;  %v698_v24 = vadd.f32 %v697_v51, %v696_v5  ;;  %v908_v38 = vsel %vm639_vm3, %v810_v1, 0.0  ;;  %v711_v51 = vsel %vm639_vm3, %v1482_v34, 0.0 }
 0x11a   :  { %v713_v34 = vsel %vm639_vm3, %v1514_v43, 0.0  ;;  %v717_v43 = vsel %vm639_vm3, %v1578_v61, 0.0  ;;  %v721_v61 = vsel %vm639_vm3, %v1624_v19, 0.0  ;;  %v818_v1 = vmul.f32 %v1713_v50, %v1713_v50 }
 0x11b   :  { %v897_v30 = vadd.f32 %v896_v47, %v895_v25  ;;  %v700_v26 = vadd.f32 %v699_v54, %v698_v24  ;;  %v910_v24 = vsel %vm639_vm3, %v811_v31, 0.0  ;;  %v813_v47 = vmul.f32 %v1546_v52, %v1546_v52 }
 0x11d   :  { %v899_v59 = vadd.f32 %v898_v17, %v897_v30  ;;  %v702_v41 = vadd.f32 %v701_v36, %v700_v26  ;;  %v1937_v5 = vpop.f32.mrf.mxu3  ;;  %v912_v30 = vsel %vm639_vm3, %v812_v27, 0.0  ;;  %v715_v26 = vsel %vm639_vm3, %v1546_v52, 0.0 }
 0x11e   :  { %v571_v10 = vpack.c.bf16 %v1937_v5, %v1937_v5  ;;  %v719_v52 = vsel %vm639_vm3, %v1606_v7, 0.0 }
 0x11f   :  { %v704_v46 = vadd.f32 %v703_v42, %v702_v41  ;;  %v901_v56 = vadd.f32 %v900_v23, %v899_v59  ;;  %v914_v59 = vsel %vm639_vm3, %v813_v47, 0.0  ;;  %v815_v41 = vmul.f32 %v1606_v7, %v1606_v7 }
 0x120   :  { %636 = vst.msk [vmem:[%s2112_s2 + $0xf4] sm:$0xf] %vm574_vm2, %v571_v10  ;;  %v723_v7 = vsel %vm639_vm3, %v1685_v60, 0.0  ;;  %v924_v10 = vsel %vm639_vm3, %v818_v1, 0.0 }
 0x121   :  { %v706_v48 = vadd.f32 %v705_v2, %v704_v46  ;;  %v903_v55 = vadd.f32 %v902_v6, %v901_v56  ;;  %v916_v46 = vsel %vm639_vm3, %v814_v28, 0.0  ;;  %v816_v56 = vmul.f32 %v1624_v19, %v1624_v19 }
 0x122   :  { %v918_v33 = vsel %vm639_vm3, %v815_v41, 0.0  ;;  %v725_v19 = vsel %vm639_vm3, %v1713_v50, 0.0  ;;  %v820_v50 = vmul.f32 %v1797_v49, %v1797_v49  ;;  %v823_v28 = vmul.f32 %v1484_v35, %v1484_v35 }
 0x123   :  { %v708_v9 = vadd.f32 %v707_v0, %v706_v48  ;;  %v905_v18 = vadd.f32 %v904_v58, %v903_v55  ;;  %v817_v48 = vmul.f32 %v1685_v60, %v1685_v60  ;;  %v920_v0 = vsel %vm639_vm3, %v816_v56, 0.0 }
 0x124   :  { %v928_v47 = vsel %vm639_vm3, %v820_v50, 0.0 }
 0x125   :  { %v710_v13 = vadd.f32 %v709_v11, %v708_v9  ;;  %v907_v21 = vadd.f32 %v906_v3, %v905_v18  ;;  %v1969_v42 = vpop.f32.mrf.mxu3  ;;  %v922_v3 = vsel %vm639_vm3, %v817_v48, 0.0  ;;  %v819_v11 = vmul.f32 %v1761_v45, %v1761_v45 }
 0x126   :  { %v572_v31 = vpack.c.bf16 %v1969_v42, %v1969_v42 }
 0x127   :  { %v712_v22 = vadd.f32 %v711_v51, %v710_v13  ;;  %v909_v25 = vadd.f32 %v908_v38, %v907_v21  ;;  %v727_v38 = vsel %vm639_vm3, %v1761_v45, 0.0  ;;  %v729_v45 = vsel %vm639_vm3, %v1797_v49, 0.0 }
 0x128   :  { %637 = vst.msk [vmem:[%s2112_s2 + $0xf8] sm:$0xf] %vm574_vm2, %v572_v31 }
 0x129   :  { %v714_v54 = vadd.f32 %v713_v34, %v712_v22  ;;  %v911_v39 = vadd.f32 %v910_v24, %v909_v25  ;;  %v926_v22 = vsel %vm639_vm3, %v819_v11, 0.0  ;;  %v821_v25 = vmul.f32 %v1841_v14, %v1841_v14 }
 0x12a   :  { %v829_v11 = vmul.f32 %v1687_v63, %v1687_v63 }
 0x12b   :  { %v913_v17 = vadd.f32 %v912_v30, %v911_v39  ;;  %v716_v36 = vadd.f32 %v715_v26, %v714_v54  ;;  %v731_v54 = vsel %vm639_vm3, %v1841_v14, 0.0  ;;  %v822_v39 = vmul.f32 %v1869_v57, %v1869_v57 }
 0x12c   :  { %v930_v49 = vsel %vm639_vm3, %v821_v25, 0.0  ;;  %v824_v14 = vmul.f32 %v1516_v44, %v1516_v44  ;;  %v946_v50 = vsel %vm639_vm3, %v829_v11, 0.0  ;;  %v832_v25 = vmul.f32 %v1799_v32, %v1799_v32 }
 0x12d   :  { %v718_v40 = vadd.f32 %v717_v43, %v716_v36  ;;  %v915_v23 = vadd.f32 %v914_v59, %v913_v17  ;;  %v1993_v4 = vpop.f32.mrf.mxu3  ;;  %v733_v17 = vsel %vm639_vm3, %v1869_v57, 0.0  ;;  %v735_v43 = vsel %vm639_vm3, %v1484_v35, 0.0 }
 0x12e   :  { %v573_v21 = vpack.c.bf16 %v1993_v4, %v1993_v4  ;;  %v932_v41 = vsel %vm639_vm3, %v822_v39, 0.0  ;;  %v825_v57 = vmul.f32 %v1548_v53, %v1548_v53  ;;  %v739_v35 = vsel %vm639_vm3, %v1548_v53, 0.0 }
 0x12f   :  { %v720_v6 = vadd.f32 %v719_v52, %v718_v40  ;;  %v917_v2 = vadd.f32 %v916_v46, %v915_v23  ;;  %v934_v46 = vsel %vm639_vm3, %v823_v28, 0.0  ;;  %v737_v52 = vsel %vm639_vm3, %v1516_v44, 0.0 }
 0x130   :  { %638 = vst.msk [vmem:[%s2112_s2 + $0xfc] sm:$0xf] %vm574_vm2, %v573_v21  ;;  %v741_v44 = vsel %vm639_vm3, %v1580_v62, 0.0  ;;  %v743_v53 = vsel %vm639_vm3, %v1608_v8, 0.0  ;;  %v830_v21 = vmul.f32 %v1715_v29, %v1715_v29  ;;  %v834_v28 = vmul.f32 %v1871_v16, %v1871_v16 }
 0x131   :  { %v722_v55 = vadd.f32 %v721_v61, %v720_v6  ;;  %v919_v58 = vadd.f32 %v918_v33, %v917_v2  ;;  %v936_v2 = vsel %vm639_vm3, %v824_v14, 0.0  ;;  %v826_v33 = vmul.f32 %v1580_v62, %v1580_v62 }
 0x132   :  { %v745_v62 = vsel %vm639_vm3, %v1626_v20, 0.0 }
 0x133   :  { %v724_v9 = vadd.f32 %v723_v7, %v722_v55  ;;  %v921_v18 = vadd.f32 %v920_v0, %v919_v58  ;;  %v938_v55 = vsel %vm639_vm3, %v825_v57, 0.0  ;;  %v827_v58 = vmul.f32 %v1608_v8, %v1608_v8 }
 0x134   :  { %v940_v1 = vsel %vm639_vm3, %v826_v33, 0.0  ;;  %v747_v8 = vsel %vm639_vm3, %v1687_v63, 0.0  ;;  %v751_v63 = vsel %vm639_vm3, %v1763_v12, 0.0  ;;  %v837_v57 = vmul.f32 %v1969_v42, %v1969_v42 }
 0x135   :  { %v726_v13 = vadd.f32 %v725_v19, %v724_v9  ;;  %v923_v60 = vadd.f32 %v922_v3, %v921_v18  ;;  %v828_v9 = vmul.f32 %v1626_v20, %v1626_v20  ;;  %v942_v19 = vsel %vm639_vm3, %v827_v58, 0.0 }
 0x136   :  { %v749_v20 = vsel %vm639_vm3, %v1715_v29, 0.0  ;;  %v753_v29 = vsel %vm639_vm3, %v1799_v32, 0.0  ;;  %v757_v32 = vsel %vm639_vm3, %v1871_v16, 0.0  ;;  %v761_v16 = vsel %vm639_vm3, %v1937_v5, 0.0 }
 0x137   :  { %v925_v51 = vadd.f32 %v924_v10, %v923_v60  ;;  %v728_v27 = vadd.f32 %v727_v38, %v726_v13  ;;  %v944_v60 = vsel %vm639_vm3, %v828_v9, 0.0 }
 0x139   :  { %v927_v24 = vadd.f32 %v926_v22, %v925_v51  ;;  %v730_v34 = vadd.f32 %v729_v45, %v728_v27  ;;  %v831_v51 = vmul.f32 %v1763_v12, %v1763_v12  ;;  %v948_v45 = vsel %vm639_vm3, %v830_v21, 0.0 }
 0x13a   :  { %v755_v12 = vsel %vm639_vm3, %v1843_v15, 0.0 }
 0x13b   :  { %v929_v30 = vadd.f32 %v928_v47, %v927_v24  ;;  %v732_v26 = vadd.f32 %v731_v54, %v730_v34  ;;  %v950_v47 = vsel %vm639_vm3, %v831_v51, 0.0  ;;  %v833_v54 = vmul.f32 %v1843_v15, %v1843_v15 }
 0x13c   :  { %v759_v15 = vsel %vm639_vm3, %v1913_v37, 0.0 }
 0x13d   :  { %v931_v36 = vadd.f32 %v930_v49, %v929_v30  ;;  %v734_v59 = vadd.f32 %v733_v17, %v732_v26  ;;  %v952_v26 = vsel %vm639_vm3, %v832_v25, 0.0 }
 0x13f   :  { %v736_v40 = vadd.f32 %v735_v43, %v734_v59  ;;  %v933_v23 = vadd.f32 %v932_v41, %v931_v36  ;;  %v954_v36 = vsel %vm639_vm3, %v833_v54, 0.0  ;;  %v835_v59 = vmul.f32 %v1913_v37, %v1913_v37 }
 0x140   :  { %v956_v41 = vsel %vm639_vm3, %v834_v28, 0.0  ;;  %v763_v37 = vsel %vm639_vm3, %v1969_v42, 0.0 }
 0x141   :  { %v738_v56 = vadd.f32 %v737_v52, %v736_v40  ;;  %v935_v6 = vadd.f32 %v934_v46, %v933_v23  ;;  %v836_v40 = vmul.f32 %v1937_v5, %v1937_v5  ;;  %v958_v52 = vsel %vm639_vm3, %v835_v59, 0.0 }
 0x142   :  { %v765_v5 = vsel %vm639_vm3, %v1993_v4, 0.0 }
 0x143   :  { %v740_v61 = vadd.f32 %v739_v35, %v738_v56  ;;  %v937_v48 = vadd.f32 %v936_v2, %v935_v6  ;;  %v960_v2 = vsel %vm639_vm3, %v836_v40, 0.0  ;;  %v838_v35 = vmul.f32 %v1993_v4, %v1993_v4 }
 0x145   :  { %v742_v0 = vadd.f32 %v741_v44, %v740_v61  ;;  %v939_v7 = vadd.f32 %v938_v55, %v937_v48  ;;  %v962_v48 = vsel %vm639_vm3, %v837_v57, 0.0  ;;  %v964_v58 = vsel %vm639_vm3, %v838_v35, 0.0 }
 0x147   :  { %v744_v18 = vadd.f32 %v743_v53, %v742_v0  ;;  %v941_v3 = vadd.f32 %v940_v1, %v939_v7 }
 0x149   :  { %v746_v31 = vadd.f32 %v745_v62, %v744_v18  ;;  %v943_v13 = vadd.f32 %v942_v19, %v941_v3 }
 0x14b   :  { %v945_v10 = vadd.f32 %v944_v60, %v943_v13  ;;  %v748_v38 = vadd.f32 %v747_v8, %v746_v31 }
 0x14d   :  { %v750_v27 = vadd.f32 %v749_v20, %v748_v38  ;;  %v947_v22 = vadd.f32 %v946_v50, %v945_v10 }
 0x14f   :  { %v752_v24 = vadd.f32 %v751_v63, %v750_v27  ;;  %v949_v34 = vadd.f32 %v948_v45, %v947_v22 }
 0x151   :  { %v754_v39 = vadd.f32 %v753_v29, %v752_v24  ;;  %v951_v30 = vadd.f32 %v950_v47, %v949_v34 }
 0x153   :  { %v756_v49 = vadd.f32 %v755_v12, %v754_v39  ;;  %v953_v17 = vadd.f32 %v952_v26, %v951_v30 }
 0x155   :  { %v758_v43 = vadd.f32 %v757_v32, %v756_v49  ;;  %v955_v14 = vadd.f32 %v954_v36, %v953_v17 }
 0x157   :  { %v957_v23 = vadd.f32 %v956_v41, %v955_v14  ;;  %v760_v46 = vadd.f32 %v759_v15, %v758_v43 }
 0x159   :  { %v959_v56 = vadd.f32 %v958_v52, %v957_v23  ;;  %v762_v6 = vadd.f32 %v761_v16, %v760_v46 }
 0x15b   :  { %v961_v33 = vadd.f32 %v960_v2, %v959_v56  ;;  %v764_v61 = vadd.f32 %v763_v37, %v762_v6 }
 0x15d   :  { %v963_v55 = vadd.f32 %v962_v48, %v961_v33  ;;  %v766_v44 = vadd.f32 %v765_v5, %v764_v61 }
 0x15f   :  { %v767_v0 = vrot.slane %v766_v44, 4  ;;  %v965_v7 = vadd.f32 %v964_v58, %v963_v55 }
 0x161   :  { %v768_v1 = vadd.f32 %v767_v0, %v766_v44  ;;  %v966_v53 = vrot.slane %v965_v7, 4 }
 0x163   :  { %v769_v9 = vrot.slane %v768_v1, 2  ;;  %v967_v42 = vadd.f32 %v966_v53, %v965_v7 }
 0x165   :  { %v770_v18 = vadd.f32 %v769_v9, %v768_v1  ;;  %v968_v3 = vrot.slane %v967_v42, 2 }
 0x167   :  { %v771_v19 = vrot.slane %v770_v18, 1  ;;  %v969_v62 = vadd.f32 %v968_v3, %v967_v42 }
 0x169   :  { %v772_v11 = vadd.f32 %v771_v19, %v770_v18  ;;  %v970_v31 = vrot.slane %v969_v62, 1 }
 0x16b   :  { %774 = vst.msk [vmem:[%s2113_s3] sm:$0x1] %vm773_vm4, %v772_v11  ;;  %v971_v4 = vadd.f32 %v970_v31, %v969_v62 }
 0x16d   :  { %972 = vst.msk [vmem:[%s2114_s4] sm:$0x1] %vm773_vm4, %v971_v4 }

// kernel: mbconv_forward.6
= control target key start
LH: loop header
LB: loop body
LE: loop exit
PB: predicated region body
PF: predicated region fallthrough
CT: control target
= control target key end

     0   :  { %12 = vsyncpa [#allocation4], 0  ;;  %s3702_s21 = smov 0   ;;  %s6275_s0 = inlined_call_operand.vmem [shape: bf16[2,16,16,16], index: 0, kind: input, shape index: {}]   ;;  %s6276_s1 = inlined_call_operand.vmem [shape: f32[1,16], index: 1, kind: input, shape index: {}]   ;;  %s6277_s2 = inlined_call_operand.vmem [shape: f32[1,16], index: 2, kind: input, shape index: {}]   ;;  %s6278_s3 = inlined_call_operand.hbm [shape: f32[3,3,16], index: 3, kind: input, shape index: {}]   ;;  %s6279_s4 = inlined_call_operand.vmem [shape: bf16[2,16,16,16], index: 4, kind: output, shape index: {0}]   ;;  %s6280_s5 = inlined_call_operand.vmem [shape: f32[2,1,16], index: 5, kind: output, shape index: {1}]   ;;  %s6281_s6 = inlined_call_operand.vmem [shape: f32[2,1,16], index: 6, kind: output, shape index: {2}]  }
   0x1 LB: > { %s207_s24 = sshll.u32 %s6278_s3, 4  ;;  %s3323_s25 = sadd.s32 4294967295, %s3661_s21   ;;  %s3661_s21 = sphi %s3702_s21, %s18_s21   ;;  %s208_s24 = int_to_ptr.hbm [resolvable:$true] %s207_s24 }
   0x2   : > { %p3325_p0 = scmp.ge.s32.totalorder %s3661_s21, 1  ;;  %p190_p1 = scmp.lt.s32.totalorder %s3661_s21, 3 }
   0x3   : > { %p3473_p2 = scmp.eq.s32.totalorder %s3323_s25, 0  ;;  %s3663_s26 = smov [#allocation3]  }
   0x4   : > { %p191_p3 = pnand %p3325_p0, %p190_p1  ;;  %s209_s27 = sshll.u32 %s3663_s26, 4  ;;  %s210_s27 = int_to_ptr.vmem [resolvable:$true] %s209_s27 }
   0x5   : > { %s3664_s28 = smov 64   ;;  %s3665_s29 = smov 4  }
   0x6   : > { %p3469_p4 = pneg %p191_p3  ;;  %233 = sbr.rel (%p191_p3) target bundleno = 533 (0x215), region = 36 }
   0x8   : > { %p3470_p5 = pnand %p3473_p2, %p3469_p4 }
   0xa   : > { %3472 = dma.hbm_to_vmem [thread:$0]  (!%p3470_p5), %s208_s24, 192, %s210_s27, [#allocation4], %s3664_s28, %s3664_s28, %s3665_s29  }
   0xb   : > { %3656 = dma.done.wait (%p3473_p2), [#allocation4], 192  }
   0xc   : > { %3658 = vsyncadd (%p3473_p2), [#allocation4], 4294967104  ;;  %vm6282_vm0 = vcmask 130048   ;;  %v3666_v0 = vmov 0.0   ;;  %p270_p6 = scmp.lt.s32.totalorder %s3323_s25, 1  ;;  %vm1065_vm1 = vcmask 123904  }
   0xd   : > { %1063 = vst.msk [vmem:[#allocation2] sm:$0xff] %vm6282_vm0, %v3666_v0  ;;  %vm1072_vm2 = vcmask 122880   ;;  %v3742_v4 = vld [vmem:[%s6276_s1] ss:$0 sm:$0xff] }
   0xe   : > { %1064 = vst.msk [vmem:[#allocation2 + $0x8] sm:$0xff] %vm6282_vm0, %v3666_v0  ;;  %s6499_s25 = smov (!%p270_p6, %s3323_s25), 1  ;;  %v3749_v8 = vld [vmem:[%s6277_s2] ss:$0 sm:$0xff] }
   0xf   : > { %1068 = vst.msk [vmem:[#allocation2 + $0x198] sm:$0xff] %vm6282_vm0, %v3666_v0  ;;  %s3384_s30 = sshll.u32 %s6499_s25, 7  ;;  %s282_s24 = scalar_lea.vmem %s6280_s5, %s6499_s25 }
  0x10   : > { %1069 = vst.msk [vmem:[#allocation2 + $0x1a0] sm:$0xff] %vm6282_vm0, %v3666_v0  ;;  %s3731_s9 = scalar_lea.vmem %s6275_s0, %s3384_s30  ;;  %s4832_s20 = scalar_lea.vmem %s6279_s4, %s3384_s30 }
  0x11   : > { %1066 = vst.msk [vmem:[#allocation2 + $0x10] sm:$0x3] %vm1065_vm1, %v3666_v0  ;;  %v3387_v1 = vld [vmem:[%s3731_s9] sm:$0xff]   ;;  %v3450_v2 = vld [vmem:[%s3731_s9 + $0x8] sm:$0xff]   ;;  %v3455_v14 = vld [vmem:[%s3731_s9 + $0x30] sm:$0xff]   ;;  %s285_s28 = scalar_lea.vmem %s6281_s6, %s6499_s25 }
  0x12   : > { %1070 = vst.msk [vmem:[#allocation2 + $0x1a8] sm:$0x3] %vm1065_vm1, %v3666_v0  ;;  %v3388_v3 = vunpack.c.l.bf16 %v3387_v1  ;;  %v3389_v5 = vunpack.c.h.bf16 %v3387_v1  ;;  %v3392_v6 = vunpack.c.l.bf16 %v3450_v2  ;;  %v3393_v7 = vunpack.c.h.bf16 %v3450_v2  ;;  %v3454_v9 = vld [vmem:[%s3731_s9 + $0x28] sm:$0xff]   ;;  %v3456_v19 = vld [vmem:[%s3731_s9 + $0x38] sm:$0xff]   ;;  %v3457_v39 = vld [vmem:[%s3731_s9 + $0x40] sm:$0xff]  }
  0x13   : > { %1073 = vst.msk [vmem:[#allocation2 + $0x18] sm:$0x1] %vm1072_vm2, %v3666_v0  ;;  %v3408_v15 = vunpack.c.l.bf16 %v3454_v9  ;;  %v3409_v16 = vunpack.c.h.bf16 %v3454_v9  ;;  %v3412_v17 = vunpack.c.l.bf16 %v3455_v14  ;;  %v3413_v18 = vunpack.c.h.bf16 %v3455_v14  ;;  %v3458_v43 = vld [vmem:[%s3731_s9 + $0x48] sm:$0xff]  }
  0x14   : > { %1074 = vst.msk [vmem:[#allocation2 + $0x30] sm:$0x1] %vm1072_vm2, %v3666_v0  ;;  %v354_v10 = vmul.f32 %v3742_v4, %v3388_v3  ;;  %v355_v11 = vmul.f32 %v3742_v4, %v3389_v5  ;;  %v356_v12 = vmul.f32 %v3742_v4, %v3392_v6  ;;  %v357_v13 = vmul.f32 %v3742_v4, %v3393_v7 }
  0x15   : > { %1075 = vst.msk [vmem:[#allocation2 + $0x48] sm:$0x1] %vm1072_vm2, %v3666_v0  ;;  %v364_v24 = vmul.f32 %v3742_v4, %v3408_v15  ;;  %v365_v25 = vmul.f32 %v3742_v4, %v3409_v16  ;;  %v366_v26 = vmul.f32 %v3742_v4, %v3412_v17  ;;  %v367_v27 = vmul.f32 %v3742_v4, %v3413_v18 }
  0x16   : > { %1076 = vst.msk [vmem:[#allocation2 + $0x60] sm:$0x1] %vm1072_vm2, %v3666_v0  ;;  %v3765_v20 = vadd.f32 %v3749_v8, %v354_v10  ;;  %v3768_v21 = vadd.f32 %v3749_v8, %v355_v11  ;;  %v3771_v22 = vadd.f32 %v3749_v8, %v356_v12  ;;  %v3774_v23 = vadd.f32 %v3749_v8, %v357_v13 }
  0x17   : > { %1077 = vst.msk [vmem:[#allocation2 + $0x78] sm:$0x1] %vm1072_vm2, %v3666_v0  ;;  %v3416_v30 = vunpack.c.l.bf16 %v3456_v19  ;;  %v3417_v31 = vunpack.c.h.bf16 %v3456_v19  ;;  %v3791_v34 = vadd.f32 %v3749_v8, %v364_v24  ;;  %v3794_v35 = vadd.f32 %v3749_v8, %v365_v25 }
  0x18   : > { %1078 = vst.msk [vmem:[#allocation2 + $0x90] sm:$0x1] %vm1072_vm2, %v3666_v0  ;;  %v3334_v28 = vmul.f32 -1.442695, %v3765_v20  ;;  %v3335_v29 = vmul.f32 -1.442695, %v3768_v21  ;;  %v3799_v36 = vadd.f32 %v3749_v8, %v366_v26  ;;  %v3802_v37 = vadd.f32 %v3749_v8, %v367_v27 }
  0x19   : > { %1079 = vst.msk [vmem:[#allocation2 + $0xa8] sm:$0x1] %vm1072_vm2, %v3666_v0  ;;  %v3336_v32 = vmul.f32 -1.442695, %v3771_v22  ;;  %v3337_v33 = vmul.f32 -1.442695, %v3774_v23  ;;  %v368_v38 = vmul.f32 %v3742_v4, %v3416_v30  ;;  %v369_v42 = vmul.f32 %v3742_v4, %v3417_v31 }
  0x1a   : > { %1080 = vst.msk [vmem:[#allocation2 + $0xc0] sm:$0x1] %vm1072_vm2, %v3666_v0  ;;  %3489 = vpow2.f32 %v3334_v28  ;;  %v3344_v40 = vmul.f32 -1.442695, %v3791_v34  ;;  %v3345_v41 = vmul.f32 -1.442695, %v3794_v35  ;;  %v3420_v45 = vunpack.c.l.bf16 %v3457_v39 }
  0x1b   : > { %1081 = vst.msk [vmem:[#allocation2 + $0xd8] sm:$0x1] %vm1072_vm2, %v3666_v0  ;;  %3491 = vpow2.f32 %v3335_v29  ;;  %v3346_v44 = vmul.f32 -1.442695, %v3799_v36  ;;  %v3347_v46 = vmul.f32 -1.442695, %v3802_v37  ;;  %v3821_v47 = vadd.f32 %v3749_v8, %v368_v38 }
  0x1c   : > { %1082 = vst.msk [vmem:[#allocation2 + $0xf0] sm:$0x1] %vm1072_vm2, %v3666_v0  ;;  %3493 = vpow2.f32 %v3336_v32  ;;  %v3421_v48 = vunpack.c.h.bf16 %v3457_v39  ;;  %v3826_v49 = vadd.f32 %v3749_v8, %v369_v42  ;;  %v3424_v50 = vunpack.c.l.bf16 %v3458_v43 }
  0x1d   : > { %1083 = vst.msk [vmem:[#allocation2 + $0x108] sm:$0x1] %vm1072_vm2, %v3666_v0  ;;  %3495 = vpow2.f32 %v3337_v33  ;;  %v3425_v52 = vunpack.c.h.bf16 %v3458_v43  ;;  %v370_v55 = vmul.f32 %v3742_v4, %v3420_v45  ;;  %v3348_v58 = vmul.f32 -1.442695, %v3821_v47 }
  0x1e   : > { %1084 = vst.msk [vmem:[#allocation2 + $0x120] sm:$0x1] %vm1072_vm2, %v3666_v0  ;;  %3497 = vpow2.f32 %v3344_v40  ;;  %v371_v59 = vmul.f32 %v3742_v4, %v3421_v48  ;;  %v3846_v62 = vmul.f32 -1.442695, %v3826_v49  ;;  %v3849_v63 = vmul.f32 %v3742_v4, %v3424_v50 }
  0x1f   : > { %1085 = vst.msk [vmem:[#allocation2 + $0x138] sm:$0x1] %vm1072_vm2, %v3666_v0  ;;  %3499 = vpow2.f32 %v3345_v41  ;;  %v3857_v5 = vmul.f32 %v3742_v4, %v3425_v52  ;;  %v3867_v11 = vadd.f32 %v3749_v8, %v370_v55 }
  0x20   : > { %1086 = vst.msk [vmem:[#allocation2 + $0x150] sm:$0x1] %vm1072_vm2, %v3666_v0  ;;  %v3490_v51 = vpop.eup %3489  ;;  %3501 = vpow2.f32 %v3346_v44  ;;  %v3875_v13 = vadd.f32 %v3749_v8, %v371_v59 }
  0x21   : > { %1087 = vst.msk [vmem:[#allocation2 + $0x168] sm:$0x1] %vm1072_vm2, %v3666_v0  ;;  %v3492_v53 = vpop.eup %3491  ;;  %v3832_v54 = vadd.f32 1.0, %v3490_v51  ;;  %3503 = vpow2.f32 %v3347_v46  ;;  %v4043_v46 = vadd.f32 %v3749_v8, %v3849_v63 }
  0x22   : > { %1088 = vst.msk [vmem:[#allocation2 + $0x180] sm:$0x1] %vm1072_vm2, %v3666_v0  ;;  %v3494_v56 = vpop.eup %3493  ;;  %v3837_v57 = vadd.f32 1.0, %v3492_v53 }
  0x23   : > { %1089 = vst.msk [vmem:[#allocation2 + $0x29] sm:$0x1] %vm1072_vm2, %v3666_v0  ;;  %v3496_v60 = vpop.eup %3495  ;;  %3505 = vrcp.f32 %v3832_v54  ;;  %v561_v61 = vand.u32 2147483648, %v3832_v54  ;;  %v559_v2 = vand.u32 2147483647, %v3832_v54  ;;  %v3862_v9 = vadd.f32 1.0, %v3494_v56 }
  0x24   : > { %1090 = vst.msk [vmem:[#allocation2 + $0x41] sm:$0x1] %vm1072_vm2, %v3666_v0  ;;  %v3498_v1 = vpop.eup %3497  ;;  %3507 = vrcp.f32 %v3837_v57  ;;  %v574_v3 = vand.u32 2147483647, %v3837_v57  ;;  %v576_v7 = vand.u32 2147483648, %v3837_v57  ;;  %v3864_v10 = vadd.f32 1.0, %v3496_v60 }
  0x25   : > { %1091 = vst.msk [vmem:[#allocation2 + $0x59] sm:$0x1] %vm1072_vm2, %v3666_v0  ;;  %v3500_v6 = vpop.eup %3499  ;;  %vm555_vm3 = vweird.f32 %v3832_v54  ;;  %v3872_v12 = vadd.f32 1.0, %v3498_v1  ;;  %3509 = vpow2.f32 %v3348_v58  ;;  %v3881_v15 = vor.u32 1.1754944e-38, %v561_v61 }
  0x26   : > { %1092 = vst.msk [vmem:[#allocation2 + $0x71] sm:$0x1] %vm1072_vm2, %v3666_v0  ;;  %v3877_v14 = vpop.eup %3501  ;;  %vm570_vm4 = vweird.f32 %v3837_v57  ;;  %3511 = vrcp.f32 %v3862_v9  ;;  %v591_v16 = vand.u32 2147483648, %v3862_v9  ;;  %vm3890_vm5 = vcmp.eq.f32.partialorder %v559_v2, 8.507059e+37 }
  0x27   : > { %1093 = vst.msk [vmem:[#allocation2 + $0x89] sm:$0x1] %vm1072_vm2, %v3666_v0  ;;  %v3886_v17 = vpop.eup %3503  ;;  %v589_v19 = vand.u32 2147483647, %v3862_v9  ;;  %3513 = vrcp.f32 %v3864_v10  ;;  %v606_v24 = vand.u32 2147483648, %v3864_v10  ;;  %v3897_v25 = vadd.f32 1.0, %v3500_v6 }
  0x28   : > { %1094 = vst.msk [vmem:[#allocation2 + $0xa1] sm:$0x1] %vm1072_vm2, %v3666_v0  ;;  %vm3901_vm6 = vcmp.eq.f32.partialorder %v574_v3, 8.507059e+37  ;;  %v3905_v28 = vor.u32 1.1754944e-38, %v576_v7  ;;  %vm585_vm7 = vweird.f32 %v3862_v9  ;;  %v604_v29 = vand.u32 2147483647, %v3864_v10 }
  0x29   : > { %1095 = vst.msk [vmem:[#allocation2 + $0xb9] sm:$0x1] %vm1072_vm2, %v3666_v0  ;;  %v3506_v26 = vpop.eup %3505  ;;  %3515 = vrcp.f32 %v3872_v12  ;;  %v3913_v32 = vor.u32 1.1754944e-38, %v591_v16  ;;  %vm600_vm8 = vweird.f32 %v3864_v10  ;;  %v709_v38 = vand.u32 2147483647, %v3872_v12 }
  0x2a   : > { %1096 = vst.msk [vmem:[#allocation2 + $0xd1] sm:$0x1] %vm1072_vm2, %v3666_v0  ;;  %v3508_v30 = vpop.eup %3507  ;;  %v551_v31 = vmul.f32 %v3506_v26, %v3832_v54  ;;  %vm556_vm10 = vweird.f32 %v3506_v26  ;;  %v711_v39 = vand.u32 2147483648, %v3872_v12  ;;  %vm3924_vm12 = vcmp.eq.f32.partialorder %v589_v19, 8.507059e+37 }
  0x2b   : > { %1097 = vst.msk [vmem:[#allocation2 + $0xe9] sm:$0x1] %vm1072_vm2, %v3666_v0  ;;  %v566_v33 = vmul.f32 %v3508_v30, %v3837_v57  ;;  %v3510_v40 = vpop.eup %3509  ;;  %vm571_vm11 = vweird.f32 %v3508_v30  ;;  %v3928_v43 = vor.u32 1.1754944e-38, %v606_v24  ;;  %3517 = vrcp.f32 %v3897_v25  ;;  %vm3952_vm1 = vmor %vm555_vm3, %vm556_vm10 }
  0x2c   : > { %1098 = vst.msk [vmem:[#allocation2 + $0x101] sm:$0x1] %vm1072_vm2, %v3666_v0  ;;  %v552_v41 = vsub.f32 1.0, %v551_v31  ;;  %v3512_v44 = vpop.eup %3511  ;;  %vm3933_vm13 = vcmp.eq.f32.partialorder %v604_v29, 8.507059e+37  ;;  %v724_v48 = vand.u32 2147483647, %v3897_v25  ;;  %vm3962_vm9 = vmor %vm570_vm4, %vm571_vm11 }
  0x2d   : > { %1099 = vst.msk [vmem:[#allocation2 + $0x119] sm:$0x1] %vm1072_vm2, %v3666_v0  ;;  %v567_v45 = vsub.f32 1.0, %v566_v33  ;;  %v726_v50 = vand.u32 2147483648, %v3897_v25  ;;  %v3514_v51 = vpop.eup %3513  ;;  %v581_v53 = vmul.f32 %v3512_v44, %v3862_v9  ;;  %vm3943_vm15 = vcmp.eq.f32.partialorder %v709_v38, 8.507059e+37 }
  0x2e   : > { %1100 = vst.msk [vmem:[#allocation2 + $0x131] sm:$0x1] %vm1072_vm2, %v3666_v0  ;;  %v553_v52 = vmul.f32 %v3506_v26, %v552_v41  ;;  %v712_v56 = vor.u32 1.1754944e-38, %v711_v39  ;;  %vm586_vm14 = vweird.f32 %v3512_v44  ;;  %v596_v61 = vmul.f32 %v3514_v51, %v3864_v10 }
  0x2f   : > { %1101 = vst.msk [vmem:[#allocation2 + $0x149] sm:$0x1] %vm1072_vm2, %v3666_v0  ;;  %v3516_v58 = vpop.eup %3515  ;;  %v568_v60 = vmul.f32 %v3508_v30, %v567_v45  ;;  %vm601_vm0 = vweird.f32 %v3514_v51  ;;  %v582_v54 = vsub.f32 1.0, %v581_v53  ;;  %v727_v6 = vor.u32 1.1754944e-38, %v726_v50  ;;  %vm3983_vm4 = vmor %vm585_vm7, %vm586_vm14 }
  0x30   : > { %1102 = vst.msk [vmem:[#allocation2 + $0x161] sm:$0x1] %vm1072_vm2, %v3666_v0  ;;  %v554_v1 = vadd.f32 %v3506_v26, %v553_v52  ;;  %v701_v3 = vmul.f32 %v3516_v58, %v3872_v12  ;;  %v597_v16 = vsub.f32 1.0, %v596_v61  ;;  %vm706_vm3 = vweird.f32 %v3516_v58 }
  0x31   : > { %1103 = vst.msk [vmem:[#allocation2 + $0x179] sm:$0x1] %vm1072_vm2, %v3666_v0  ;;  %v569_v7 = vadd.f32 %v3508_v30, %v568_v60  ;;  %v3968_v19 = vadd.f32 1.0, %v3877_v14  ;;  %v3518_v24 = vpop.eup %3517  ;;  %v583_v29 = vmul.f32 %v3512_v44, %v582_v54  ;;  %v3973_v31 = vadd.f32 1.0, %v3886_v17 }
  0x32   : > { %1104 = vst.msk [vmem:[#allocation2 + $0x191] sm:$0x1] %vm1072_vm2, %v3666_v0  ;;  %v558_v0 = vsel %vm3952_vm1, %v3506_v26, %v554_v1  ;;  %v702_v57 = vsub.f32 1.0, %v701_v3  ;;  %v598_v26 = vmul.f32 %v3514_v51, %v597_v16  ;;  %v716_v39 = vmul.f32 %v3518_v24, %v3897_v25 }
  0x33   : > { %v563_v33 = vsel %vm3890_vm5, %v3881_v15, %v558_v0  ;;  %v573_v38 = vsel %vm3962_vm9, %v3508_v30, %v569_v7  ;;  %v584_v15 = vadd.f32 %v3512_v44, %v583_v29  ;;  %vm3995_vm5 = vmor %vm600_vm8, %vm601_vm0  ;;  %vm6301_vm7 = vweird.f32 %v3872_v12 }
  0x34   : > { %v1030_v17 = vmul.f32 %v563_v33, %v3765_v20  ;;  %v578_v18 = vsel %vm3901_vm6, %v3905_v28, %v573_v38  ;;  %v703_v9 = vmul.f32 %v3516_v58, %v702_v57  ;;  %v599_v45 = vadd.f32 %v3514_v51, %v598_v26  ;;  %vm4003_vm9 = vmor %vm6301_vm7, %vm706_vm3 }
  0x35   : > { %v1031_v41 = vmul.f32 %v578_v18, %v3768_v21  ;;  %v717_v27 = vsub.f32 1.0, %v716_v39  ;;  %vm721_vm6 = vweird.f32 %v3518_v24  ;;  %vm6304_vm10 = vcmask 130048  }
  0x36   : > { %1105 = vst.msk [vmem:[#allocation2 + $0x19] sm:$0xff] %vm6304_vm10, %v1030_v17  ;;  %v588_v10 = vsel %vm3983_vm4, %v3512_v44, %v584_v15  ;;  %v704_v28 = vadd.f32 %v3516_v58, %v703_v9  ;;  %3519 = vrcp.f32 %v3968_v19  ;;  %v4011_v50 = vadd.f32 1.0, %v3510_v40  ;;  %vm6305_vm0 = vmmov %vm6304_vm10  ;;  %v4089_v15 = vld [vmem:[%s3731_s9 + $0x50] sm:$0xff]  }
  0x37   : > { %1106 = vst.msk [vmem:[#allocation2 + $0x21] sm:$0xff] %vm6305_vm0, %v1031_v41  ;;  %v593_v21 = vsel %vm3924_vm12, %v3913_v32, %v588_v10  ;;  %v603_v12 = vsel %vm3995_vm5, %v3514_v51, %v599_v45  ;;  %v718_v52 = vmul.f32 %v3518_v24, %v717_v27  ;;  %v739_v53 = vand.u32 2147483647, %v3968_v19  ;;  %vm6310_vm14 = vmmov %vm6305_vm0 }
  0x38   : > { %v1032_v59 = vmul.f32 %v593_v21, %v3771_v22  ;;  %v608_v44 = vsel %vm3933_vm13, %v3928_v43, %v603_v12  ;;  %v708_v40 = vsel %vm4003_vm9, %v3516_v58, %v704_v28  ;;  %vm6306_vm8 = vweird.f32 %v3897_v25  ;;  %vm6309_vm13 = vmmov %vm6305_vm0  ;;  %v3451_v58 = vld [vmem:[%s3731_s9 + $0x10] sm:$0xff]  }
  0x39   : > { %vm4028_vm11 = vmor %vm6306_vm8, %vm721_vm6  ;;  %v741_v32 = vand.u32 2147483648, %v3968_v19  ;;  %v1033_v51 = vmul.f32 %v608_v44, %v3774_v23  ;;  %v713_v22 = vsel %vm3943_vm15, %v712_v56, %v708_v40  ;;  %v719_v60 = vadd.f32 %v3518_v24, %v718_v52 }
  0x3a   : > { %vm725_vm12 = vcmp.eq.f32.partialorder %v724_v48, 8.507059e+37  ;;  %1107 = vst.msk [vmem:[#allocation2 + $0x31] sm:$0xff] %vm6309_vm13, %v1032_v59  ;;  %v1040_v43 = vmul.f32 %v713_v22, %v3791_v34  ;;  %3521 = vrcp.f32 %v3973_v31  ;;  %v4047_v23 = vadd.f32 %v3749_v8, %v3857_v5  ;;  %vm6313_vm3 = vmmov %vm6305_vm0 }
  0x3b   : > { %1108 = vst.msk [vmem:[#allocation2 + $0x39] sm:$0xff] %vm6310_vm14, %v1033_v51  ;;  %v723_v25 = vsel %vm4028_vm11, %v3518_v24, %v719_v60  ;;  %vm735_vm15 = vweird.f32 %v3968_v19  ;;  %vm4053_vm1 = vcmp.eq.f32.partialorder %v739_v53, 8.507059e+37  ;;  %3523 = vrcp.f32 %v4011_v50  ;;  %vm6314_vm9 = vmmov %vm6305_vm0 }
  0x3c   : > { %v3520_v34 = vpop.eup %3519  ;;  %1115 = vst.msk [vmem:[#allocation2 + $0x91] sm:$0xff] %vm6313_vm3, %v1040_v43  ;;  %v728_v63 = vsel %vm725_vm12, %v727_v6, %v723_v25  ;;  %v742_v55 = vor.u32 1.1754944e-38, %v741_v32  ;;  %v754_v5 = vand.u32 2147483647, %v3973_v31  ;;  %v756_v56 = vand.u32 2147483648, %v3973_v31  ;;  %vm6323_vm14 = vmmov %vm6313_vm3 }
  0x3d   : > { %v1041_v61 = vmul.f32 %v728_v63, %v3794_v35  ;;  %v731_v1 = vmul.f32 %v3520_v34, %v3968_v19  ;;  %vm750_vm4 = vweird.f32 %v3973_v31  ;;  %v771_v2 = vand.u32 2147483648, %v4011_v50 }
  0x3e   : > { %vm736_vm5 = vweird.f32 %v3520_v34  ;;  %vm765_vm7 = vweird.f32 %v4011_v50  ;;  %v769_v54 = vand.u32 2147483647, %v4011_v50  ;;  %3525 = vpow2.f32 %v3846_v62 }
  0x3f   : > { %1116 = vst.msk [vmem:[#allocation2 + $0x99] sm:$0xff] %vm6314_vm9, %v1041_v61  ;;  %v732_v3 = vsub.f32 1.0, %v731_v1  ;;  %v3350_v6 = vmul.f32 -1.442695, %v3867_v11  ;;  %v3351_v35 = vmul.f32 -1.442695, %v3875_v13  ;;  %v3396_v7 = vunpack.c.l.bf16 %v3451_v58  ;;  %vm4081_vm10 = vmor %vm735_vm15, %vm736_vm5 }
  0x40   : > { %v3522_v16 = vpop.eup %3521  ;;  %vm4072_vm6 = vcmp.eq.f32.partialorder %v754_v5, 8.507059e+37  ;;  %v757_v0 = vor.u32 1.1754944e-38, %v756_v56  ;;  %v3352_v29 = vmul.f32 -1.442695, %v4043_v46  ;;  %v3397_v57 = vunpack.c.h.bf16 %v3451_v58  ;;  %vm6324_vm15 = vmmov %vm6313_vm3 }
  0x41   : > { %v3524_v33 = vpop.eup %3523  ;;  %v733_v62 = vmul.f32 %v3520_v34, %v732_v3  ;;  %v746_v38 = vmul.f32 %v3522_v16, %v3973_v31  ;;  %v772_v14 = vor.u32 1.1754944e-38, %v771_v2  ;;  %3527 = vpow2.f32 %v3350_v6 }
  0x42   : > { %v761_v39 = vmul.f32 %v3524_v33, %v4011_v50  ;;  %3529 = vpow2.f32 %v3351_v35  ;;  %v3353_v17 = vmul.f32 -1.442695, %v4047_v23  ;;  %v358_v18 = vmul.f32 %v3742_v4, %v3396_v7 }
  0x43   : > { %v734_v30 = vadd.f32 %v3520_v34, %v733_v62  ;;  %v747_v9 = vsub.f32 1.0, %v746_v38  ;;  %vm751_vm0 = vweird.f32 %v3522_v16  ;;  %v359_v41 = vmul.f32 %v3742_v4, %v3397_v57 }
  0x44   : > { %v3526_v45 = vpop.eup %3525  ;;  %v762_v19 = vsub.f32 1.0, %v761_v39  ;;  %vm766_vm8 = vweird.f32 %v3524_v33  ;;  %3531 = vpow2.f32 %v3352_v29  ;;  %v4093_v20 = vadd.f32 %v3749_v8, %v358_v18  ;;  %vm4104_vm11 = vmor %vm750_vm4, %vm751_vm0 }
  0x45   : > { %v738_v27 = vsel %vm4081_vm10, %v3520_v34, %v734_v30  ;;  %v748_v10 = vmul.f32 %v3522_v16, %v747_v9  ;;  %v4097_v28 = vadd.f32 1.0, %v3526_v45  ;;  %v3428_v21 = vunpack.c.l.bf16 %v4089_v15  ;;  %vm4113_vm12 = vmor %vm765_vm7, %vm766_vm8 }
  0x46   : > { %v743_v12 = vsel %vm4053_vm1, %v742_v55, %v738_v27  ;;  %v763_v53 = vmul.f32 %v3524_v33, %v762_v19  ;;  %3533 = vpow2.f32 %v3353_v17  ;;  %v3338_v59 = vmul.f32 -1.442695, %v4093_v20  ;;  %vm6325_vm1 = vmmov %vm6313_vm3 }
  0x47   : > { %v3528_v44 = vpop.eup %3527  ;;  %v1042_v40 = vmul.f32 %v743_v12, %v3799_v36  ;;  %v749_v42 = vadd.f32 %v3522_v16, %v748_v10  ;;  %3535 = vrcp.f32 %v4097_v28  ;;  %v4119_v31 = vadd.f32 %v3749_v8, %v359_v41 }
  0x48   : > { %v3530_v51 = vpop.eup %3529  ;;  %v764_v22 = vadd.f32 %v3524_v33, %v763_v53  ;;  %vm770_vm13 = vcmp.eq.f32.partialorder %v769_v54, 8.507059e+37  ;;  %v4121_v60 = vadd.f32 1.0, %v3528_v44  ;;  %3537 = vpow2.f32 %v3338_v59 }
  0x49   : > { %1117 = vst.msk [vmem:[#allocation2 + $0xa9] sm:$0xff] %vm6323_vm14, %v1042_v40  ;;  %v753_v36 = vsel %vm4104_vm11, %v3522_v16, %v749_v42  ;;  %v4126_v50 = vadd.f32 1.0, %v3530_v51  ;;  %v374_v43 = vmul.f32 %v3742_v4, %v3428_v21  ;;  %v784_v63 = vand.u32 2147483647, %v4097_v28 }
  0x4a   : > { %v3532_v25 = vpop.eup %3531  ;;  %v758_v48 = vsel %vm4072_vm6, %v757_v0, %v753_v36  ;;  %v768_v34 = vsel %vm4113_vm12, %v3524_v33, %v764_v22  ;;  %v786_v55 = vand.u32 2147483648, %v4097_v28  ;;  %3539 = vrcp.f32 %v4121_v60 }
  0x4b   : > { %v1043_v5 = vmul.f32 %v758_v48, %v3802_v37  ;;  %v773_v56 = vsel %vm770_vm13, %v772_v14, %v768_v34  ;;  %v3339_v58 = vmul.f32 -1.442695, %v4119_v31  ;;  %v799_v2 = vand.u32 2147483647, %v4121_v60 }
  0x4c   : > { %v3534_v61 = vpop.eup %3533  ;;  %v1044_v1 = vmul.f32 %v773_v56, %v3821_v47  ;;  %v801_v54 = vand.u32 2147483648, %v4121_v60  ;;  %3541 = vrcp.f32 %v4126_v50  ;;  %v814_v6 = vand.u32 2147483647, %v4126_v50 }
  0x4d   : > { %v3536_v3 = vpop.eup %3535  ;;  %1118 = vst.msk [vmem:[#allocation2 + $0xb1] sm:$0xff] %vm6324_vm15, %v1043_v5  ;;  %v816_v37 = vand.u32 2147483648, %v4126_v50  ;;  %v4145_v35 = vadd.f32 1.0, %v3532_v25  ;;  %v4148_v7 = vadd.f32 %v3749_v8, %v374_v43  ;;  %vm780_vm3 = vweird.f32 %v4097_v28 }
  0x4e   : > { %1119 = vst.msk [vmem:[#allocation2 + $0xc1] sm:$0xff] %vm6325_vm1, %v1044_v1  ;;  %v776_v47 = vmul.f32 %v3536_v3, %v4097_v28  ;;  %vm4153_vm4 = vcmp.eq.f32.partialorder %v784_v63, 8.507059e+37  ;;  %v787_v24 = vor.u32 1.1754944e-38, %v786_v55  ;;  %v3538_v0 = vpop.eup %3537  ;;  %vm781_vm5 = vweird.f32 %v3536_v3 }
  0x4f   : > { %vm795_vm7 = vweird.f32 %v4121_v60  ;;  %vm810_vm9 = vweird.f32 %v4126_v50  ;;  %3543 = vrcp.f32 %v4145_v35  ;;  %vm4160_vm6 = vcmp.eq.f32.partialorder %v799_v2, 8.507059e+37  ;;  %vm4180_vm8 = vmor %vm780_vm3, %vm781_vm5 }
  0x50   : > { %v777_v29 = vsub.f32 1.0, %v776_v47  ;;  %v802_v33 = vor.u32 1.1754944e-38, %v801_v54  ;;  %v829_v62 = vand.u32 2147483647, %v4145_v35  ;;  %v4165_v38 = vadd.f32 1.0, %v3534_v61  ;;  %v3540_v14 = vpop.eup %3539 }
  0x51   : > { %vm4167_vm10 = vcmp.eq.f32.partialorder %v814_v6, 8.507059e+37  ;;  %v817_v39 = vor.u32 1.1754944e-38, %v816_v37  ;;  %v831_v17 = vand.u32 2147483648, %v4145_v35  ;;  %v4172_v18 = vadd.f32 1.0, %v3538_v0 }
  0x52   : > { %3545 = vpow2.f32 %v3339_v58  ;;  %v3542_v30 = vpop.eup %3541  ;;  %v778_v9 = vmul.f32 %v3536_v3, %v777_v29  ;;  %v791_v41 = vmul.f32 %v3540_v14, %v4121_v60  ;;  %vm825_vm0 = vweird.f32 %v4145_v35 }
  0x53   : > { %v3354_v45 = vmul.f32 -1.442695, %v4148_v7  ;;  %vm796_vm11 = vweird.f32 %v3540_v14  ;;  %v806_v27 = vmul.f32 %v3542_v30, %v4126_v50  ;;  %3547 = vrcp.f32 %v4165_v38 }
  0x54   : > { %v3429_v10 = vunpack.c.h.bf16 %v4089_v15  ;;  %v779_v21 = vadd.f32 %v3536_v3, %v778_v9  ;;  %v792_v12 = vsub.f32 1.0, %v791_v41  ;;  %vm811_vm12 = vweird.f32 %v3542_v30  ;;  %vm4203_vm15 = vmor %vm795_vm7, %vm796_vm11 }
  0x55   : > { %vm4187_vm13 = vcmp.eq.f32.partialorder %v829_v62, 8.507059e+37  ;;  %v844_v28 = vand.u32 2147483647, %v4165_v38  ;;  %v3544_v53 = vpop.eup %3543  ;;  %v807_v59 = vsub.f32 1.0, %v806_v27  ;;  %v832_v44 = vor.u32 1.1754944e-38, %v831_v17  ;;  %vm4212_vm5 = vmor %vm810_vm9, %vm811_vm12 }
  0x56   : > { %vm840_vm14 = vweird.f32 %v4165_v38  ;;  %3549 = vrcp.f32 %v4172_v18  ;;  %v783_v40 = vsel %vm4180_vm8, %v3536_v3, %v779_v21  ;;  %v793_v15 = vmul.f32 %v3540_v14, %v792_v12 }
  0x57   : > { %v821_v42 = vmul.f32 %v3544_v53, %v4145_v35  ;;  %v846_v32 = vand.u32 2147483648, %v4165_v38  ;;  %v788_v22 = vsel %vm4153_vm4, %v787_v24, %v783_v40  ;;  %v808_v43 = vmul.f32 %v3542_v30, %v807_v59  ;;  %v3460_v40 = vld [vmem:[%s3731_s9 + $0x58] sm:$0xff]  }
  0x58   : > { %v3546_v51 = vpop.eup %3545  ;;  %vm826_vm1 = vweird.f32 %v3544_v53  ;;  %vm615_vm3 = vweird.f32 %v4172_v18  ;;  %v1045_v25 = vmul.f32 %v788_v22, %v3826_v49  ;;  %v794_v48 = vadd.f32 %v3540_v14, %v793_v15  ;;  %v3453_v22 = vld [vmem:[%s3731_s9 + $0x20] sm:$0xff]  }
  0x59   : > { %v822_v63 = vsub.f32 1.0, %v821_v42  ;;  %vm4216_vm4 = vcmp.eq.f32.partialorder %v844_v28, 8.507059e+37  ;;  %v3548_v55 = vpop.eup %3547  ;;  %v809_v5 = vadd.f32 %v3542_v30, %v808_v43  ;;  %v619_v56 = vand.u32 2147483647, %v4172_v18  ;;  %vm4234_vm9 = vmor %vm825_vm0, %vm826_vm1 }
  0x5a   : > { %v4221_v58 = vadd.f32 1.0, %v3546_v51  ;;  %3551 = vpow2.f32 %v3354_v45  ;;  %vm6342_vm7 = vcmask 130048   ;;  %v798_v49 = vsel %vm4203_vm15, %v3540_v14, %v794_v48  ;;  %v3452_v14 = vld [vmem:[%s3731_s9 + $0x18] sm:$0xff]  }
  0x5b   : > { %1120 = vst.msk [vmem:[#allocation2 + $0xc9] sm:$0xff] %vm6342_vm7, %v1045_v25  ;;  %v823_v50 = vmul.f32 %v3544_v53, %v822_v63  ;;  %v836_v61 = vmul.f32 %v3548_v55, %v4165_v38  ;;  %v847_v1 = vor.u32 1.1754944e-38, %v846_v32  ;;  %v803_v54 = vsel %vm4160_vm6, %v802_v33, %v798_v49  ;;  %vm6347_vm0 = vmmov %vm6342_vm7 }
  0x5c   : > { %v3550_v2 = vpop.eup %3549  ;;  %v813_v3 = vsel %vm4212_vm5, %v3542_v30, %v809_v5  ;;  %vm841_vm8 = vweird.f32 %v3548_v55  ;;  %v621_v37 = vand.u32 2147483648, %v4172_v18  ;;  %v1046_v47 = vmul.f32 %v803_v54, %v3867_v11  ;;  %vm6357_vm7 = vmmov %vm6347_vm0 }
  0x5d   : > { %v818_v16 = vsel %vm4167_vm10, %v817_v39, %v813_v3  ;;  %v824_v24 = vadd.f32 %v3544_v53, %v823_v50  ;;  %v837_v0 = vsub.f32 1.0, %v836_v61  ;;  %v611_v57 = vmul.f32 %v3550_v2, %v4172_v18  ;;  %vm6348_vm10 = vmmov %vm6347_vm0  ;;  %v3461_v39 = vld [vmem:[%s3731_s9 + $0x60] sm:$0xff]  }
  0x5e   : > { %v1047_v29 = vmul.f32 %v818_v16, %v3875_v13  ;;  %vm4244_vm6 = vcmp.eq.f32.partialorder %v619_v56, 8.507059e+37  ;;  %3553 = vrcp.f32 %v4221_v58  ;;  %1121 = vst.msk [vmem:[#allocation2 + $0xd9] sm:$0xff] %vm6347_vm0, %v1046_v47  ;;  %vm616_vm11 = vweird.f32 %v3550_v2  ;;  %vm4260_vm12 = vmor %vm840_vm14, %vm841_vm8 }
  0x5f   : > { %v828_v11 = vsel %vm4234_vm9, %v3544_v53, %v824_v24  ;;  %v838_v33 = vmul.f32 %v3548_v55, %v837_v0  ;;  %v634_v62 = vand.u32 2147483647, %v4221_v58  ;;  %v612_v17 = vsub.f32 1.0, %v611_v57  ;;  %vm6351_vm14 = vmmov %vm6347_vm0 }
  0x60   : > { %v3552_v26 = vpop.eup %3551  ;;  %1122 = vst.msk [vmem:[#allocation2 + $0xe1] sm:$0xff] %vm6348_vm10, %v1047_v29  ;;  %v833_v13 = vsel %vm4187_vm13, %v832_v44, %v828_v11  ;;  %v636_v30 = vand.u32 2147483648, %v4221_v58  ;;  %v375_v9 = vmul.f32 %v3742_v4, %v3429_v10  ;;  %v622_v19 = vor.u32 1.1754944e-38, %v621_v37  ;;  %vm4279_vm15 = vmor %vm615_vm3, %vm616_vm11 }
  0x61   : > { %v1048_v41 = vmul.f32 %v833_v13, %v4043_v46  ;;  %v839_v45 = vadd.f32 %v3548_v55, %v838_v33  ;;  %v4267_v27 = vadd.f32 1.0, %v3552_v26  ;;  %v613_v21 = vmul.f32 %v3550_v2, %v612_v17 }
  0x62   : > { %vm630_vm13 = vweird.f32 %v4221_v58  ;;  %v4271_v38 = vadd.f32 %v3749_v8, %v375_v9  ;;  %v3400_v12 = vunpack.c.l.bf16 %v3452_v14  ;;  %vm4283_vm1 = vcmp.eq.f32.partialorder %v634_v62, 8.507059e+37 }
  0x63   : > { %1123 = vst.msk [vmem:[#allocation2 + $0xf1] sm:$0xff] %vm6351_vm14, %v1048_v41  ;;  %v843_v10 = vsel %vm4260_vm12, %v3548_v55, %v839_v45  ;;  %v637_v28 = vor.u32 1.1754944e-38, %v636_v30  ;;  %3555 = vrcp.f32 %v4267_v27  ;;  %v614_v44 = vadd.f32 %v3550_v2, %v613_v21 }
  0x64   : > { %v3554_v53 = vpop.eup %3553  ;;  %v848_v59 = vsel %vm4216_vm4, %v847_v1, %v843_v10  ;;  %vm855_vm5 = vweird.f32 %v4267_v27  ;;  %v3355_v18 = vmul.f32 -1.442695, %v4271_v38  ;;  %v859_v32 = vand.u32 2147483647, %v4267_v27  ;;  %vm6356_vm4 = vmmov %vm6347_vm0 }
  0x65   : > { %v1049_v15 = vmul.f32 %v848_v59, %v4047_v23  ;;  %v626_v42 = vmul.f32 %v3554_v53, %v4221_v58  ;;  %v861_v51 = vand.u32 2147483648, %v4267_v27  ;;  %v618_v36 = vsel %vm4279_vm15, %v3550_v2, %v614_v44  ;;  %vm6362_vm11 = vmmov %vm6356_vm4 }
  0x66   : > { %vm631_vm3 = vweird.f32 %v3554_v53  ;;  %3557 = vpow2.f32 %v3355_v18  ;;  %v360_v43 = vmul.f32 %v3742_v4, %v3400_v12  ;;  %v623_v25 = vsel %vm4244_vm6, %v622_v19, %v618_v36  ;;  %v4369_v18 = vld [vmem:[%s3731_s9 + $0x68] sm:$0xff]   ;;  %vm6363_vm12 = vmmov %vm6356_vm4 }
  0x67   : > { %1124 = vst.msk [vmem:[#allocation2 + $0xf9] sm:$0xff] %vm6356_vm4, %v1049_v15  ;;  %v627_v23 = vsub.f32 1.0, %v626_v42  ;;  %v3401_v48 = vunpack.c.h.bf16 %v3452_v14  ;;  %v3432_v34 = vunpack.c.l.bf16 %v3460_v40  ;;  %v1034_v63 = vmul.f32 %v623_v25, %v4093_v20  ;;  %vm4314_vm9 = vmor %vm630_vm13, %vm631_vm3 }
  0x68   : > { %v4306_v60 = vadd.f32 %v3749_v8, %v360_v43  ;;  %v3433_v55 = vunpack.c.h.bf16 %v3460_v40  ;;  %v3404_v5 = vunpack.c.l.bf16 %v3453_v22  ;;  %v3405_v1 = vunpack.c.h.bf16 %v3453_v22 }
  0x69   : > { %v3556_v56 = vpop.eup %3555  ;;  %v628_v49 = vmul.f32 %v3554_v53, %v627_v23  ;;  %v361_v50 = vmul.f32 %v3742_v4, %v3401_v48  ;;  %v376_v61 = vmul.f32 %v3742_v4, %v3432_v34  ;;  %1109 = vst.msk [vmem:[#allocation2 + $0x49] sm:$0xff] %vm6357_vm7, %v1034_v63  ;;  %v862_v9 = vor.u32 1.1754944e-38, %v861_v51 }
  0x6a   : > { %v851_v20 = vmul.f32 %v3556_v56, %v4267_v27  ;;  %vm856_vm8 = vweird.f32 %v3556_v56  ;;  %v3340_v54 = vmul.f32 -1.442695, %v4306_v60  ;;  %v377_v3 = vmul.f32 %v3742_v4, %v3433_v55 }
  0x6b   : > { %v629_v6 = vadd.f32 %v3554_v53, %v628_v49  ;;  %v4322_v37 = vadd.f32 %v3749_v8, %v361_v50  ;;  %v4325_v47 = vadd.f32 %v3749_v8, %v376_v61  ;;  %v362_v58 = vmul.f32 %v3742_v4, %v3404_v5  ;;  %vm4349_vm6 = vmor %vm855_vm5, %vm856_vm8  ;;  %v4404_v61 = vld [vmem:[%s6277_s2] ss:$0 sm:$0xff] }
  0x6c   : > { %v3558_v16 = vpop.eup %3557  ;;  %v852_v24 = vsub.f32 1.0, %v851_v20  ;;  %3559 = vpow2.f32 %v3340_v54  ;;  %v4329_v0 = vadd.f32 %v3749_v8, %v377_v3  ;;  %v363_v29 = vmul.f32 %v3742_v4, %v3405_v1 }
  0x6d   : > { %v633_v57 = vsel %vm4314_vm9, %v3554_v53, %v629_v6  ;;  %v4334_v35 = vadd.f32 1.0, %v3558_v16  ;;  %v3341_v11 = vmul.f32 -1.442695, %v4322_v37  ;;  %v3356_v33 = vmul.f32 -1.442695, %v4325_v47 }
  0x6e   : > { %v638_v62 = vsel %vm4283_vm1, %v637_v28, %v633_v57  ;;  %v853_v14 = vmul.f32 %v3556_v56, %v852_v24  ;;  %v3357_v26 = vmul.f32 -1.442695, %v4329_v0  ;;  %v4342_v13 = vadd.f32 %v3749_v8, %v362_v58  ;;  %v4423_v6 = vld [vmem:[%s6276_s1] ss:$0 sm:$0xff] }
  0x6f   : > { %v1035_v17 = vmul.f32 %v638_v62, %v4119_v31  ;;  %3561 = vrcp.f32 %v4334_v35  ;;  %vm860_vm0 = vcmp.eq.f32.partialorder %v859_v32, 8.507059e+37  ;;  %v4357_v31 = vadd.f32 %v3749_v8, %v363_v29 }
  0x70   : > { %v854_v41 = vadd.f32 %v3556_v56, %v853_v14  ;;  %3563 = vpow2.f32 %v3341_v11  ;;  %v3342_v45 = vmul.f32 -1.442695, %v4342_v13  ;;  %v3436_v19 = vunpack.c.l.bf16 %v3461_v39 }
  0x71   : > { %1110 = vst.msk [vmem:[#allocation2 + $0x51] sm:$0xff] %vm6362_vm11, %v1035_v17  ;;  %3565 = vpow2.f32 %v3356_v33  ;;  %v3437_v12 = vunpack.c.h.bf16 %v3461_v39  ;;  %v874_v46 = vand.u32 2147483647, %v4334_v35  ;;  %v3343_v28 = vmul.f32 -1.442695, %v4357_v31 }
  0x72   : > { %v3560_v27 = vpop.eup %3559  ;;  %v858_v21 = vsel %vm4349_vm6, %v3556_v56, %v854_v41  ;;  %3567 = vpow2.f32 %v3357_v26  ;;  %v876_v59 = vand.u32 2147483648, %v4334_v35  ;;  %v378_v44 = vmul.f32 %v3742_v4, %v3436_v19 }
  0x73   : > { %v863_v10 = vsel %vm860_vm0, %v862_v9, %v858_v21  ;;  %v4362_v52 = vadd.f32 1.0, %v3560_v27  ;;  %3569 = vpow2.f32 %v3342_v45  ;;  %vm870_vm10 = vweird.f32 %v4334_v35 }
  0x74   : > { %v1050_v53 = vmul.f32 %v863_v10, %v4148_v7  ;;  %v379_v51 = vmul.f32 %v3742_v4, %v3437_v12  ;;  %vm4378_vm13 = vcmp.eq.f32.partialorder %v874_v46, 8.507059e+37  ;;  %v4385_v25 = vadd.f32 %v3749_v8, %v378_v44 }
  0x75   : > { %v3562_v40 = vpop.eup %3561  ;;  %3571 = vrcp.f32 %v4362_v52  ;;  %v651_v15 = vand.u32 2147483648, %v4362_v52  ;;  %v649_v7 = vand.u32 2147483647, %v4362_v52  ;;  %v3440_v23 = vunpack.c.l.bf16 %v4369_v18 }
  0x76   : > { %v3564_v42 = vpop.eup %3563  ;;  %1125 = vst.msk [vmem:[#allocation2 + $0x109] sm:$0xff] %vm6363_vm12, %v1050_v53  ;;  %v866_v32 = vmul.f32 %v3562_v40, %v4334_v35  ;;  %3573 = vpow2.f32 %v3343_v28  ;;  %vm871_vm14 = vweird.f32 %v3562_v40  ;;  %v877_v63 = vor.u32 1.1754944e-38, %v876_v59 }
  0x77   : > { %v3566_v22 = vpop.eup %3565  ;;  %v4382_v43 = vadd.f32 1.0, %v3564_v42  ;;  %vm645_vm15 = vweird.f32 %v4362_v52  ;;  %v4391_v4 = vor.u32 1.1754944e-38, %v651_v15  ;;  %vm4395_vm1 = vcmp.eq.f32.partialorder %v649_v7, 8.507059e+37  ;;  %vm4412_vm5 = vmor %vm870_vm10, %vm871_vm14 }
  0x78   : > { %v3568_v48 = vpop.eup %3567  ;;  %v867_v34 = vsub.f32 1.0, %v866_v32  ;;  %v4388_v55 = vadd.f32 1.0, %v3566_v22  ;;  %v4407_v1 = vadd.f32 %v4404_v61, %v379_v51  ;;  %v3358_v3 = vmul.f32 -1.442695, %v4385_v25 }
  0x79   : > { %3575 = vrcp.f32 %v4382_v43  ;;  %v666_v5 = vand.u32 2147483648, %v4382_v43  ;;  %v3570_v56 = vpop.eup %3569  ;;  %v664_v50 = vand.u32 2147483647, %v4382_v43  ;;  %vm660_vm3 = vweird.f32 %v4382_v43 }
  0x7a   : > { %v868_v49 = vmul.f32 %v3562_v40, %v867_v34  ;;  %3577 = vrcp.f32 %v4388_v55  ;;  %v4417_v54 = vadd.f32 1.0, %v3568_v48  ;;  %v4426_v58 = vmul.f32 %v4423_v6, %v3440_v23 }
  0x7b   : > { %v3572_v2 = vpop.eup %3571  ;;  %vm885_vm4 = vweird.f32 %v4388_v55  ;;  %v889_v57 = vand.u32 2147483647, %v4388_v55  ;;  %v667_v35 = vor.u32 1.1754944e-38, %v666_v5  ;;  %v891_v11 = vand.u32 2147483648, %v4388_v55 }
  0x7c   : > { %v3574_v16 = vpop.eup %3573  ;;  %v869_v24 = vadd.f32 %v3562_v40, %v868_v49  ;;  %v641_v29 = vmul.f32 %v3572_v2, %v4362_v52  ;;  %vm646_vm7 = vweird.f32 %v3572_v2  ;;  %3579 = vrcp.f32 %v4417_v54 }
  0x7d   : > { %vm4435_vm9 = vcmp.eq.f32.partialorder %v664_v50, 8.507059e+37  ;;  %v904_v26 = vand.u32 2147483647, %v4417_v54  ;;  %v4440_v39 = vadd.f32 1.0, %v3570_v56  ;;  %v906_v9 = vand.u32 2147483648, %v4417_v54  ;;  %vm4456_vm6 = vmor %vm645_vm15, %vm646_vm7 }
  0x7e   : > { %v873_v33 = vsel %vm4412_vm5, %v3562_v40, %v869_v24  ;;  %v642_v62 = vsub.f32 1.0, %v641_v29  ;;  %v4445_v41 = vadd.f32 1.0, %v3574_v16  ;;  %3581 = vpow2.f32 %v3358_v3 }
  0x7f   : > { %v3576_v17 = vpop.eup %3575  ;;  %v878_v30 = vsel %vm4378_vm13, %v877_v63, %v873_v33  ;;  %vm4449_vm8 = vcmp.eq.f32.partialorder %v889_v57, 8.507059e+37  ;;  %v892_v28 = vor.u32 1.1754944e-38, %v891_v11  ;;  %vm900_vm0 = vweird.f32 %v4417_v54 }
  0x80   : > { %v3578_v45 = vpop.eup %3577  ;;  %v1051_v19 = vmul.f32 %v878_v30, %v4271_v38  ;;  %v643_v27 = vmul.f32 %v3572_v2, %v642_v62  ;;  %v656_v21 = vmul.f32 %v3576_v17, %v4382_v43  ;;  %3583 = vrcp.f32 %v4440_v39 }
  0x81   : > { %v881_v46 = vmul.f32 %v3578_v45, %v4388_v55  ;;  %vm661_vm10 = vweird.f32 %v3576_v17  ;;  %vm886_vm12 = vweird.f32 %v3578_v45  ;;  %vm4464_vm13 = vcmp.eq.f32.partialorder %v904_v26, 8.507059e+37 }
  0x82   : > { %1126 = vst.msk [vmem:[#allocation2 + $0x111] sm:$0xff] %vm6362_vm11, %v1051_v19  ;;  %v644_v38 = vadd.f32 %v3572_v2, %v643_v27  ;;  %v657_v53 = vsub.f32 1.0, %v656_v21  ;;  %v3580_v52 = vpop.eup %3579  ;;  %v907_v40 = vor.u32 1.1754944e-38, %v906_v9  ;;  %v679_v15 = vand.u32 2147483647, %v4440_v39  ;;  %vm4479_vm15 = vmor %vm660_vm3, %vm661_vm10 }
  0x83   : > { %v882_v44 = vsub.f32 1.0, %v881_v46  ;;  %3585 = vrcp.f32 %v4445_v41  ;;  %v896_v7 = vmul.f32 %v3580_v52, %v4417_v54  ;;  %vm675_vm14 = vweird.f32 %v4440_v39  ;;  %vm4489_vm7 = vmor %vm885_vm4, %vm886_vm12 }
  0x84   : > { %v648_v42 = vsel %vm4456_vm6, %v3572_v2, %v644_v38  ;;  %v658_v32 = vmul.f32 %v3576_v17, %v657_v53  ;;  %v3582_v51 = vpop.eup %3581  ;;  %v681_v48 = vand.u32 2147483648, %v4440_v39  ;;  %vm690_vm5 = vweird.f32 %v4445_v41  ;;  %vm6384_vm6 = vmmov %vm6362_vm11 }
  0x85   : > { %v653_v22 = vsel %vm4395_vm1, %v4391_v4, %v648_v42  ;;  %v883_v23 = vmul.f32 %v3578_v45, %v882_v44  ;;  %v897_v43 = vsub.f32 1.0, %v896_v7  ;;  %vm901_vm1 = vweird.f32 %v3580_v52 }
  0x86   : > { %v1036_v34 = vmul.f32 %v653_v22, %v4306_v60  ;;  %v659_v63 = vadd.f32 %v3576_v17, %v658_v32  ;;  %v3584_v4 = vpop.eup %3583  ;;  %vm4493_vm3 = vcmp.eq.f32.partialorder %v679_v15, 8.507059e+37  ;;  %v694_v8 = vand.u32 2147483647, %v4445_v41  ;;  %vm4511_vm4 = vmor %vm900_vm0, %vm901_vm1  ;;  %v1137_v32 = vld [vmem:[#allocation3] sm:$0x7] }
  0x87   : > { %v884_v56 = vadd.f32 %v3578_v45, %v883_v23  ;;  %v4498_v50 = vadd.f32 1.0, %v3582_v51  ;;  %v898_v55 = vmul.f32 %v3580_v52, %v897_v43  ;;  %v671_v2 = vmul.f32 %v3584_v4, %v4440_v39 }
  0x88   : > { %1111 = vst.msk [vmem:[#allocation2 + $0x61] sm:$0xff] %vm6384_vm6, %v1036_v34  ;;  %v663_v60 = vsel %vm4479_vm15, %v3576_v17, %v659_v63  ;;  %v696_v20 = vand.u32 2147483648, %v4445_v41  ;;  %vm676_vm11 = vweird.f32 %v3584_v4  ;;  %v3359_v57 = vmul.f32 -1.442695, %v4407_v1 }
  0x89   : > { %v3586_v3 = vpop.eup %3585  ;;  %v668_v16 = vsel %vm4435_vm9, %v667_v35, %v663_v60  ;;  %v888_v24 = vsel %vm4489_vm7, %v3578_v45, %v884_v56  ;;  %v899_v62 = vadd.f32 %v3580_v52, %v898_v55  ;;  %v672_v35 = vsub.f32 1.0, %v671_v2  ;;  %vm6387_vm9 = vmmov %vm6384_vm6  ;;  %v3463_v45 = vld [vmem:[%s3731_s9 + $0x70] sm:$0xff]   ;;  %v1142_v55 = vld [vmem:[#allocation2] sm:$0xff] }
  0x8a   : > { %v1037_v11 = vmul.f32 %v668_v16, %v4322_v37  ;;  %v893_v33 = vsel %vm4449_vm8, %v892_v28, %v888_v24  ;;  %v682_v26 = vor.u32 1.1754944e-38, %v681_v48  ;;  %v686_v54 = vmul.f32 %v3586_v3, %v4445_v41  ;;  %vm6390_vm8 = vmmov %vm6384_vm6  ;;  %v4592_v2 = vld [vmem:[#allocation2 + $0x8] sm:$0xff] }
  0x8b   : > { %v1052_v14 = vmul.f32 %v893_v33, %v4325_v47  ;;  %3587 = vrcp.f32 %v4498_v50  ;;  %v903_v17 = vsel %vm4511_vm4, %v3580_v52, %v899_v62  ;;  %v673_v30 = vmul.f32 %v3584_v4, %v672_v35  ;;  %vm4536_vm10 = vmor %vm675_vm14, %vm676_vm11 }
  0x8c   : > { %1112 = vst.msk [vmem:[#allocation2 + $0x69] sm:$0xff] %vm6387_vm9, %v1037_v11  ;;  %vm4525_vm0 = vcmp.eq.f32.partialorder %v694_v8, 8.507059e+37  ;;  %v697_v9 = vor.u32 1.1754944e-38, %v696_v20  ;;  %v908_v47 = vsel %vm4464_vm13, %v907_v40, %v903_v17  ;;  %v687_v27 = vsub.f32 1.0, %v686_v54  ;;  %vm6393_vm13 = vmmov %vm6384_vm6 }
  0x8d   : > { %1127 = vst.msk [vmem:[#allocation2 + $0x121] sm:$0xff] %vm6390_vm8, %v1052_v14  ;;  %vm691_vm12 = vweird.f32 %v3586_v3  ;;  %3589 = vpow2.f32 %v3359_v57  ;;  %v1053_v21 = vmul.f32 %v908_v47, %v4329_v0  ;;  %v674_v12 = vadd.f32 %v3584_v4, %v673_v30 }
  0x8e   : > { %vm915_vm15 = vweird.f32 %v4498_v50  ;;  %v4544_v10 = vadd.f32 %v4404_v61, %v4426_v58  ;;  %v688_v46 = vmul.f32 %v3586_v3, %v687_v27  ;;  %v919_v28 = vand.u32 2147483647, %v4498_v50  ;;  %vm4553_vm14 = vmor %vm690_vm5, %vm691_vm12 }
  0x8f   : > { %v3441_v39 = vunpack.c.h.bf16 %v4369_v18  ;;  %v3444_v38 = vunpack.c.l.bf16 %v3463_v45  ;;  %1128 = vst.msk [vmem:[#allocation2 + $0x129] sm:$0xff] %vm6393_vm13, %v1053_v21  ;;  %v678_v53 = vsel %vm4536_vm10, %v3584_v4, %v674_v12  ;;  %v921_v58 = vand.u32 2147483648, %v4498_v50  ;;  %vm6396_vm5 = vmmov %vm6384_vm6 }
  0x90   : > { %v3360_v59 = vmul.f32 -1.442695, %v4544_v10  ;;  %v3445_v52 = vunpack.c.h.bf16 %v3463_v45  ;;  %v683_v18 = vsel %vm4493_vm3, %v682_v26, %v678_v53  ;;  %v689_v40 = vadd.f32 %v3586_v3, %v688_v46  ;;  %vm6399_vm3 = vmmov %vm6396_vm5 }
  0x91   : > { %v3588_v44 = vpop.eup %3587  ;;  %v381_v15 = vmul.f32 %v4423_v6, %v3441_v39  ;;  %v382_v42 = vmul.f32 %v4423_v6, %v3444_v38  ;;  %v1038_v41 = vmul.f32 %v683_v18, %v4342_v13  ;;  %v4565_v51 = vperm.slane %v1137_v32, 0 }
  0x92   : > { %v911_v7 = vmul.f32 %v3588_v44, %v4498_v50  ;;  %3591 = vpow2.f32 %v3360_v59  ;;  %v693_v36 = vsel %vm4553_vm14, %v3586_v3, %v689_v40  ;;  %v383_v34 = vmul.f32 %v4423_v6, %v3445_v52 }
  0x93   : > { %v3590_v22 = vpop.eup %3589  ;;  %v4570_v23 = vadd.f32 %v4404_v61, %v381_v15  ;;  %v4573_v48 = vadd.f32 %v4404_v61, %v382_v42  ;;  %1113 = vst.msk [vmem:[#allocation2 + $0x79] sm:$0xff] %vm6396_vm5, %v1038_v41  ;;  %v698_v13 = vsel %vm4525_vm0, %v697_v9, %v693_v36  ;;  %vm916_vm7 = vweird.f32 %v3588_v44  ;;  %vm6404_vm0 = vmmov %vm6399_vm3 }
  0x94   : > { %v912_v63 = vsub.f32 1.0, %v911_v7  ;;  %v4579_v5 = vadd.f32 1.0, %v3590_v22  ;;  %v1039_v43 = vmul.f32 %v698_v13, %v4357_v31  ;;  %v4585_v49 = vadd.f32 %v4404_v61, %v383_v34  ;;  %vm4597_vm6 = vmor %vm915_vm15, %vm916_vm7 }
  0x95   : > { %v3361_v4 = vmul.f32 -1.442695, %v4570_v23  ;;  %v3362_v56 = vmul.f32 -1.442695, %v4573_v48  ;;  %vm4587_vm1 = vcmp.eq.f32.partialorder %v919_v28, 8.507059e+37  ;;  %v922_v20 = vor.u32 1.1754944e-38, %v921_v58 }
  0x96   : > { %v913_v8 = vmul.f32 %v3588_v44, %v912_v63  ;;  %3593 = vrcp.f32 %v4579_v5  ;;  %1114 = vst.msk [vmem:[#allocation2 + $0x81] sm:$0xff] %vm6399_vm3, %v1039_v43  ;;  %v3363_v3 = vmul.f32 -1.442695, %v4585_v49  ;;  %v4602_v16 = vperm.slane %v1137_v32, 1 }
  0x97   : > { %3595 = vpow2.f32 %v3361_v4  ;;  %vm930_vm4 = vweird.f32 %v4579_v5  ;;  %v1167_v57 = vmul.f32 %v4565_v51, %v1142_v55  ;;  %v934_v11 = vand.u32 2147483647, %v4579_v5 }
  0x98   : > { %v3592_v24 = vpop.eup %3591  ;;  %v914_v29 = vadd.f32 %v3588_v44, %v913_v8  ;;  %3597 = vpow2.f32 %v3362_v56  ;;  %v936_v50 = vand.u32 2147483648, %v4579_v5  ;;  %v1200_v62 = vmul.f32 %v4602_v16, %v1142_v55 }
  0x99   : > { %v4608_v33 = vadd.f32 1.0, %v3592_v24  ;;  %3599 = vpow2.f32 %v3363_v3  ;;  %v4615_v14 = vmul.f32 %v4602_v16, %v4592_v2  ;;  %v4617_v26 = vperm.slane %v1137_v32, 2  ;;  %v1138_v32 = vld [vmem:[#allocation3 + $0x4] sm:$0x7] }
  0x9a   : > { %v918_v35 = vsel %vm4597_vm6, %v3588_v44, %v914_v29  ;;  %vm1248_vm11 = vcmask 1046528   ;;  %v1249_v45 = vrot.slane %v1200_v62, 1  ;;  %vm4627_vm9 = vcmp.eq.f32.partialorder %v934_v11, 8.507059e+37  ;;  %v1144_v29 = vld [vmem:[#allocation2 + $0x10] sm:$0x3] }
  0x9b   : > { %v923_v54 = vsel %vm4587_vm1, %v922_v20, %v918_v35  ;;  %3601 = vrcp.f32 %v4608_v33  ;;  %v949_v17 = vand.u32 2147483647, %v4608_v33  ;;  %v951_v9 = vand.u32 2147483648, %v4608_v33 }
  0x9c   : > { %v3594_v30 = vpop.eup %3593  ;;  %v1054_v37 = vmul.f32 %v923_v54, %v4385_v25  ;;  %v1250_v47 = vrot.slane %v4615_v14, 1  ;;  %v937_v12 = vor.u32 1.1754944e-38, %v936_v50  ;;  %v1322_v46 = vmul.f32 %v4617_v26, %v1142_v55  ;;  %v4691_v50 = vld [vmem:[#allocation2 + $0x18] sm:$0xff] }
  0x9d   : > { %v3596_v19 = vpop.eup %3595  ;;  %v926_v27 = vmul.f32 %v3594_v30, %v4579_v5  ;;  %vm945_vm8 = vweird.f32 %v4608_v33  ;;  %vm1370_vm10 = vcmask 1045504   ;;  %vm931_vm12 = vweird.f32 %v3594_v30 }
  0x9e   : > { %v3598_v28 = vpop.eup %3597  ;;  %1129 = vst.msk [vmem:[#allocation2 + $0x139] sm:$0xff] %vm6404_vm0, %v1054_v37  ;;  %v4634_v25 = vadd.f32 1.0, %v3596_v19  ;;  %v1251_v39 = vsel %vm1248_vm11, %v1249_v45, %v1250_v47  ;;  %v952_v53 = vor.u32 1.1754944e-38, %v951_v9  ;;  %vm4641_vm15 = vcmp.eq.f32.partialorder %v949_v17, 8.507059e+37  ;;  %vm4656_vm13 = vmor %vm930_vm4, %vm931_vm12  ;;  %v4706_v37 = vld [vmem:[#allocation2 + $0x20] sm:$0xff] }
  0x9f   : > { %v927_v38 = vsub.f32 1.0, %v926_v27  ;;  %v4639_v0 = vadd.f32 1.0, %v3598_v28  ;;  %v3600_v58 = vpop.eup %3599  ;;  %v1305_v44 = vadd.f32 %v1251_v39, %v1167_v57  ;;  %v4649_v18 = vmul.f32 %v4617_v26, %v4592_v2 }
  0xa0   : > { %3603 = vrcp.f32 %v4634_v25  ;;  %v966_v52 = vand.u32 2147483648, %v4634_v25  ;;  %v964_v42 = vand.u32 2147483647, %v4634_v25  ;;  %v1371_v41 = vrot.slane %v1322_v46, 2  ;;  %v1750_v46 = vld [vmem:[#allocation2 + $0x40] sm:$0x3] }
  0xa1   : > { %v3602_v40 = vpop.eup %3601  ;;  %v928_v15 = vmul.f32 %v3594_v30, %v927_v38  ;;  %3605 = vrcp.f32 %v4639_v0  ;;  %vm960_vm14 = vweird.f32 %v4634_v25  ;;  %vm975_vm5 = vweird.f32 %v4639_v0 }
  0xa2   : > { %v941_v22 = vmul.f32 %v3602_v40, %v4608_v33  ;;  %v979_v36 = vand.u32 2147483647, %v4639_v0  ;;  %vm946_vm7 = vweird.f32 %v3602_v40  ;;  %v981_v13 = vand.u32 2147483648, %v4639_v0 }
  0xa3   : > { %v929_v34 = vadd.f32 %v3594_v30, %v928_v15  ;;  %v4665_v63 = vadd.f32 1.0, %v3600_v58  ;;  %v4667_v5 = vor.u32 1.1754944e-38, %v966_v52  ;;  %v1372_v4 = vrot.slane %v4649_v18, 2  ;;  %vm4697_vm6 = vmor %vm945_vm8, %vm946_vm7 }
  0xa4   : > { %v942_v43 = vsub.f32 1.0, %v941_v22  ;;  %v4670_v56 = vperm.slane %v1138_v32, 0  ;;  %vm4674_vm1 = vcmp.eq.f32.partialorder %v964_v42, 8.507059e+37  ;;  %v4678_v55 = vor.u32 1.1754944e-38, %v981_v13 }
  0xa5   : > { %v933_v8 = vsel %vm4656_vm13, %v3594_v30, %v929_v34  ;;  %3607 = vrcp.f32 %v4665_v63  ;;  %v4681_v31 = vperm.slane %v1138_v32, 1  ;;  %vm4685_vm3 = vcmp.eq.f32.partialorder %v979_v36, 8.507059e+37 }
  0xa6   : > { %v3604_v20 = vpop.eup %3603  ;;  %v938_v3 = vsel %vm4627_vm9, %v937_v12, %v933_v8  ;;  %v943_v24 = vmul.f32 %v3602_v40, %v942_v43  ;;  %v994_v57 = vand.u32 2147483647, %v4665_v63  ;;  %v996_v11 = vand.u32 2147483648, %v4665_v63 }
  0xa7   : > { %v3606_v62 = vpop.eup %3605  ;;  %v1055_v35 = vmul.f32 %v938_v3, %v4407_v1  ;;  %v956_v17 = vmul.f32 %v3604_v20, %v4634_v25  ;;  %vm990_vm4 = vweird.f32 %v4665_v63  ;;  %v1373_v30 = vsel %vm1370_vm10, %v1371_v41, %v1372_v4 }
  0xa8   : > { %v944_v9 = vadd.f32 %v3602_v40, %v943_v24  ;;  %vm961_vm9 = vweird.f32 %v3604_v20  ;;  %v971_v1 = vmul.f32 %v3606_v62, %v4639_v0  ;;  %vm976_vm0 = vweird.f32 %v3606_v62  ;;  %v4759_v24 = vld [vmem:[#allocation2 + $0x38] sm:$0xff] }
  0xa9   : > { %vm6415_vm12 = vcmask 130048   ;;  %v957_v33 = vsub.f32 1.0, %v956_v17  ;;  %v997_v45 = vor.u32 1.1754944e-38, %v996_v11  ;;  %v1427_v19 = vadd.f32 %v1373_v30, %v1305_v44  ;;  %v1139_v44 = vld [vmem:[#allocation3 + $0x8] sm:$0x7]  ;;  %vm4732_vm13 = vmor %vm960_vm14, %vm961_vm9  ;;  %v4768_v30 = vld [vmem:[#allocation2 + $0x30] sm:$0xff] }
  0xaa   : > { %1130 = vst.msk [vmem:[#allocation2 + $0x141] sm:$0xff] %vm6415_vm12, %v1055_v35  ;;  %v1471_v27 = vmul.f32 %v4670_v56, %v4691_v50  ;;  %v948_v21 = vsel %vm4697_vm6, %v3602_v40, %v944_v9  ;;  %v972_v12 = vsub.f32 1.0, %v971_v1  ;;  %vm4714_vm8 = vcmp.eq.f32.partialorder %v994_v57, 8.507059e+37  ;;  %vm6422_vm14 = vmmov %vm6415_vm12 }
  0xab   : > { %v1504_v28 = vmul.f32 %v4681_v31, %v4691_v50  ;;  %v4722_v39 = vmul.f32 %v4681_v31, %v4706_v37  ;;  %v3608_v38 = vpop.eup %3607  ;;  %v953_v58 = vsel %vm4641_vm15, %v952_v53, %v948_v21  ;;  %v958_v52 = vmul.f32 %v3604_v20, %v957_v33  ;;  %vm4740_vm15 = vmor %vm975_vm5, %vm976_vm0 }
  0xac   : > { %v1487_v15 = vadd.f32 %v1471_v27, %v1427_v19  ;;  %v4726_v40 = vperm.slane %v1138_v32, 2  ;;  %v1056_v42 = vmul.f32 %v953_v58, %v4544_v10  ;;  %v973_v7 = vmul.f32 %v3606_v62, %v972_v12 }
  0xad   : > { %v986_v22 = vmul.f32 %v3608_v38, %v4665_v63  ;;  %vm991_vm7 = vweird.f32 %v3608_v38  ;;  %v959_v59 = vadd.f32 %v3604_v20, %v958_v52  ;;  %v1552_v10 = vrot.slane %v1504_v28, 1 }
  0xae   : > { %v1553_v32 = vrot.slane %v4722_v39, 1  ;;  %v1625_v25 = vmul.f32 %v4726_v40, %v4691_v50  ;;  %1131 = vst.msk [vmem:[#allocation2 + $0x151] sm:$0xff] %vm6422_vm14, %v1056_v42  ;;  %v974_v36 = vadd.f32 %v3606_v62, %v973_v7  ;;  %v4750_v13 = vmul.f32 %v4726_v40, %v4706_v37  ;;  %vm4777_vm5 = vmor %vm990_vm4, %vm991_vm7 }
  0xaf   : > { %v987_v34 = vsub.f32 1.0, %v986_v22  ;;  %v4752_v43 = vperm.slane %v1139_v44, 0  ;;  %v963_v0 = vsel %vm4732_vm13, %v3604_v20, %v959_v59  ;;  %v4761_v57 = vperm.slane %v1139_v44, 1 }
  0xb0   : > { %v1554_v8 = vsel %vm1248_vm11, %v1552_v10, %v1553_v32  ;;  %v1673_v3 = vrot.slane %v1625_v25, 2  ;;  %v968_v11 = vsel %vm4674_vm1, %v4667_v5, %v963_v0  ;;  %v978_v35 = vsel %vm4740_vm15, %v3606_v62, %v974_v36  ;;  %vm6425_vm1 = vmmov %vm6415_vm12  ;;  %v3464_v36 = vld [vmem:[%s3731_s9 + $0x78] sm:$0xff]  }
  0xb1   : > { %v988_v54 = vmul.f32 %v3608_v38, %v987_v34  ;;  %v1608_v17 = vadd.f32 %v1554_v8, %v1487_v15  ;;  %v1057_v20 = vmul.f32 %v968_v11, %v4570_v23  ;;  %v983_v9 = vsel %vm4685_vm3, %v4678_v55, %v978_v35  ;;  %vm6426_vm3 = vmmov %vm6425_vm1  ;;  %v1448_v15 = vld [vmem:[#allocation2 + $0x28] sm:$0x3] }
  0xb2   : > { %v1674_v5 = vrot.slane %v4750_v13, 2  ;;  %v1773_v60 = vmul.f32 %v4752_v43, %v4768_v30  ;;  %v1058_v62 = vmul.f32 %v983_v9, %v4573_v48  ;;  %v1806_v23 = vmul.f32 %v4761_v57, %v4768_v30  ;;  %vm6427_vm4 = vmmov %vm6425_vm1 }
  0xb3   : > { %v989_v33 = vadd.f32 %v3608_v38, %v988_v54  ;;  %v1807_v55 = vmul.f32 %v4761_v57, %v4759_v24  ;;  %1132 = vst.msk [vmem:[#allocation2 + $0x159] sm:$0xff] %vm6425_vm1, %v1057_v20  ;;  %v4791_v19 = vperm.slane %v1139_v44, 2  ;;  %v1168_v27 = vmul.f32 %v4565_v51, %v4592_v2  ;;  %v4835_v20 = vld [vmem:[#allocation2 + $0x20] sm:$0xff]  ;;  %vm6428_vm9 = vmmov %vm6425_vm1 }
  0xb4   : > { %v1675_v63 = vsel %vm1370_vm10, %v1673_v3, %v1674_v5  ;;  %1133 = vst.msk [vmem:[#allocation2 + $0x169] sm:$0xff] %vm6426_vm3, %v1058_v62  ;;  %v1854_v12 = vrot.slane %v1806_v23, 1  ;;  %v1202_v2 = vmul.f32 %v4602_v16, %v1144_v29  ;;  %v1324_v7 = vmul.f32 %v4617_v26, %v1144_v29  ;;  %vm6429_vm0 = vmmov %vm6425_vm1 }
  0xb5   : > { %v993_v48 = vsel %vm4777_vm5, %v3608_v38, %v989_v33  ;;  %v1729_v21 = vadd.f32 %v1675_v63, %v1608_v17  ;;  %v1855_v28 = vrot.slane %v1807_v55, 1  ;;  %v1927_v52 = vmul.f32 %v4791_v19, %v4768_v30  ;;  %vm6430_vm12 = vmmov %vm6429_vm0 }
  0xb6   : > { %v998_v58 = vsel %vm4714_vm8, %v997_v45, %v993_v48  ;;  %v4804_v44 = vmul.f32 %v4791_v19, %v4759_v24  ;;  %vm2066_vm6 = vcmask 125952   ;;  %v1252_v59 = vrot.slane %v1202_v2, 1  ;;  %vm6431_vm8 = vmmov %vm6429_vm0 }
  0xb7   : > { %v1059_v42 = vmul.f32 %v998_v58, %v4585_v49  ;;  %v1789_v38 = vadd.f32 %v1773_v60, %v1729_v21  ;;  %v1856_v41 = vsel %vm1248_vm11, %v1854_v12, %v1855_v28  ;;  %v1975_v45 = vrot.slane %v1927_v52, 2  ;;  %vm6436_vm1 = vmmov %vm6429_vm0 }
  0xb8   : > { %v1976_v22 = vrot.slane %v4804_v44, 2  ;;  %v1374_v10 = vrot.slane %v1324_v7, 2  ;;  %v1506_v25 = vmul.f32 %v4681_v31, %v1448_v15  ;;  %v1627_v49 = vmul.f32 %v4726_v40, %v1448_v15 }
  0xb9   : > { %1134 = vst.msk [vmem:[#allocation2 + $0x171] sm:$0xff] %vm6427_vm4, %v1059_v42  ;;  %v1910_v53 = vadd.f32 %v1856_v41, %v1789_v38  ;;  %v1253_v13 = vsel %vm1248_vm11, %v1250_v47, %v1252_v59  ;;  %v1472_v0 = vmul.f32 %v4670_v56, %v4706_v37  ;;  %v1808_v8 = vmul.f32 %v4761_v57, %v1750_v46  ;;  %vm6437_vm4 = vmmov %vm6429_vm0 }
  0xba   : > { %v1977_v34 = vsel %vm1370_vm10, %v1975_v45, %v1976_v22  ;;  %v1306_v11 = vadd.f32 %v1253_v13, %v1168_v27  ;;  %v1375_v35 = vsel %vm1370_vm10, %v1372_v4, %v1374_v10  ;;  %v1555_v54 = vrot.slane %v1506_v25, 1 }
  0xbb   : > { %v2031_v3 = vadd.f32 %v1977_v34, %v1910_v53  ;;  %v1676_v14 = vrot.slane %v1627_v49, 2  ;;  %v1857_v47 = vrot.slane %v1808_v8, 1  ;;  %v1929_v37 = vmul.f32 %v4791_v19, %v1750_v46 }
  0xbc   : > { %v3448_v17 = vunpack.c.l.bf16 %v3464_v36  ;;  %v1428_v18 = vadd.f32 %v1375_v35, %v1306_v11  ;;  %v1774_v4 = vmul.f32 %v4752_v43, %v4759_v24  ;;  %v1556_v62 = vsel %vm1248_vm11, %v1553_v32, %v1555_v54  ;;  %v4897_v11 = vld [vmem:[#allocation2 + $0x50] sm:$0xff] }
  0xbd   : > { %v2047_v9 = vpack.c.bf16 %v2031_v3, %v2031_v3  ;;  %v2121_v1 = vmul.f32 %v2031_v3, %v2031_v3  ;;  %v2083_v60 = vsel %vm6428_vm9, %v2031_v3, 0.0  ;;  %v1677_v33 = vsel %vm1370_vm10, %v1674_v5, %v1676_v14  ;;  %v4895_v3 = vld [vmem:[#allocation2 + $0x48] sm:$0xff] }
  0xbe   : > { %v1858_v23 = vsel %vm1248_vm11, %v1855_v28, %v1857_v47  ;;  %v1488_v55 = vadd.f32 %v1472_v0, %v1428_v18  ;;  %v1978_v29 = vrot.slane %v1929_v37, 2  ;;  %v384_v63 = vmul.f32 %v4423_v6, %v3448_v17 }
  0xbf   : > { %2067 = vst.msk [vmem:[%s4832_s20] sm:$0xf] %vm2066_vm6, %v2047_v9  ;;  %v3449_v27 = vunpack.c.h.bf16 %v3464_v36  ;;  %v2137_v48 = vsel %vm6429_vm0, %v2121_v1, 0.0  ;;  %v1169_v21 = vmul.f32 %v4691_v50, %v4565_v51  ;;  %v1203_v39 = vmul.f32 %v4691_v50, %v4602_v16 }
  0xc0   : > { %v4855_v32 = vmul.f32 %v4602_v16, %v4835_v20  ;;  %v1609_v5 = vadd.f32 %v1556_v62, %v1488_v55  ;;  %v4858_v12 = vadd.f32 %v4404_v61, %v384_v63  ;;  %v1325_v58 = vmul.f32 %v4691_v50, %v4617_v26 }
  0xc1   : > { %v385_v28 = vmul.f32 %v4423_v6, %v3449_v27  ;;  %v1254_v52 = vrot.slane %v1203_v39, 1  ;;  %v4866_v15 = vmul.f32 %v4617_v26, %v4835_v20  ;;  %v1473_v42 = vmul.f32 %v4768_v30, %v4670_v56 }
  0xc2   : > { %v1255_v2 = vrot.slane %v4855_v32, 1  ;;  %v1730_v38 = vadd.f32 %v1677_v33, %v1609_v5  ;;  %v3364_v41 = vmul.f32 -1.442695, %v4858_v12  ;;  %v1376_v6 = vrot.slane %v1325_v58, 2  ;;  %v1147_v5 = vld [vmem:[#allocation2 + $0x28] sm:$0x3] }
  0xc3   : > { %v4872_v7 = vadd.f32 %v4404_v61, %v385_v28  ;;  %v1377_v46 = vrot.slane %v4866_v15, 2  ;;  %v1507_v45 = vmul.f32 %v4768_v30, %v4681_v31  ;;  %v4882_v59 = vmul.f32 %v4759_v24, %v4681_v31 }
  0xc4   : > { %v1256_v50 = vsel %vm1248_vm11, %v1254_v52, %v1255_v2  ;;  %v1790_v53 = vadd.f32 %v1774_v4, %v1730_v38  ;;  %3609 = vpow2.f32 %v3364_v41  ;;  %v1628_v34 = vmul.f32 %v4768_v30, %v4726_v40 }
  0xc5   : > { %v3365_v10 = vmul.f32 -1.442695, %v4872_v7  ;;  %v1307_v61 = vadd.f32 %v1256_v50, %v1169_v21  ;;  %v1378_v25 = vsel %vm1370_vm10, %v1376_v6, %v1377_v46  ;;  %v1557_v49 = vrot.slane %v1507_v45, 1 }
  0xc6   : > { %v1558_v36 = vrot.slane %v4882_v59, 1  ;;  %v1911_v13 = vadd.f32 %v1858_v23, %v1790_v53  ;;  %v4893_v8 = vmul.f32 %v4759_v24, %v4726_v40  ;;  %v1979_v35 = vsel %vm1370_vm10, %v1976_v22, %v1978_v29 }
  0xc7   : > { %3611 = vpow2.f32 %v3365_v10  ;;  %v1429_v0 = vadd.f32 %v1378_v25, %v1307_v61  ;;  %v1678_v14 = vrot.slane %v1628_v34, 2  ;;  %v1809_v47 = vmul.f32 %v4761_v57, %v4895_v3  ;;  %v1451_v25 = vld [vmem:[#allocation2 + $0x40] sm:$0x3] }
  0xc8   : > { %v1559_v54 = vsel %vm1248_vm11, %v1557_v49, %v1558_v36  ;;  %v2032_v37 = vadd.f32 %v1979_v35, %v1911_v13  ;;  %v1679_v9 = vrot.slane %v4893_v8, 2  ;;  %v4910_v1 = vmul.f32 %v4761_v57, %v4897_v11 }
  0xc9   : > { %v1489_v17 = vadd.f32 %v1473_v42, %v1429_v0  ;;  %v1775_v44 = vmul.f32 %v4752_v43, %v4895_v3  ;;  %v1859_v22 = vrot.slane %v1809_v47, 1  ;;  %v1930_v18 = vmul.f32 %v4791_v19, %v4895_v3 }
  0xca   : > { %v4918_v4 = vmul.f32 %v4791_v19, %v4897_v11  ;;  %v3610_v62 = vpop.eup %3609  ;;  %v2048_v33 = vpack.c.bf16 %v2032_v37, %v2032_v37  ;;  %v2084_v23 = vsel %vm6430_vm12, %v2032_v37, 0.0  ;;  %v2122_v55 = vmul.f32 %v2032_v37, %v2032_v37  ;;  %vm6442_vm12 = vmmov %vm6436_vm1 }
  0xcb   : > { %v1610_v29 = vadd.f32 %v1559_v54, %v1489_v17  ;;  %v2085_v63 = vadd.f32 %v2084_v23, %v2083_v60  ;;  %v4921_v27 = vadd.f32 1.0, %v3610_v62  ;;  %v1680_v21 = vsel %vm1370_vm10, %v1678_v14, %v1679_v9 }
  0xcc   : > { %v1860_v39 = vrot.slane %v4910_v1, 1  ;;  %2068 = vst.msk [vmem:[%s4832_s20 + $0x4] sm:$0xf] %vm2066_vm6, %v2048_v33  ;;  %v2138_v58 = vsel %vm6431_vm8, %v2122_v55, 0.0  ;;  %v1980_v42 = vrot.slane %v1930_v18, 2  ;;  %v1981_v38 = vrot.slane %v4918_v4, 2  ;;  %vm6443_vm8 = vmmov %vm6436_vm1 }
  0xcd   : > { %v3612_v28 = vpop.eup %3611  ;;  %v1731_v52 = vadd.f32 %v1680_v21, %v1610_v29  ;;  %v2139_v41 = vadd.f32 %v2138_v58, %v2137_v48  ;;  %3613 = vrcp.f32 %v4921_v27  ;;  %v1170_v60 = vmul.f32 %v4565_v51, %v4835_v20 }
  0xce   : > { %v1009_v6 = vand.u32 2147483647, %v4921_v27  ;;  %v1011_v50 = vand.u32 2147483648, %v4921_v27  ;;  %v4936_v45 = vadd.f32 1.0, %v3612_v28  ;;  %vm1005_vm13 = vweird.f32 %v4921_v27 }
  0xcf   : > { %v1791_v53 = vadd.f32 %v1775_v44, %v1731_v52  ;;  %v1861_v10 = vsel %vm1248_vm11, %v1859_v22, %v1860_v39  ;;  %v1205_v48 = vmul.f32 %v4602_v16, %v1147_v5  ;;  %v1327_v61 = vmul.f32 %v4617_v26, %v1147_v5 }
  0xd0   : > { %v1012_v49 = vor.u32 1.1754944e-38, %v1011_v50  ;;  %3615 = vrcp.f32 %v4936_v45  ;;  %v1024_v20 = vand.u32 2147483647, %v4936_v45  ;;  %v1982_v34 = vsel %vm1370_vm10, %v1980_v42, %v1981_v38  ;;  %v1753_v42 = vld [vmem:[#allocation2 + $0x58] sm:$0x3] }
  0xd1   : > { %v1026_v13 = vand.u32 2147483648, %v4936_v45  ;;  %v1912_v0 = vadd.f32 %v1861_v10, %v1791_v53  ;;  %v1257_v35 = vrot.slane %v1205_v48, 1  ;;  %v1379_v54 = vrot.slane %v1327_v61, 2 }
  0xd2   : > { %vm4950_vm7 = vcmp.eq.f32.partialorder %v1009_v6, 8.507059e+37  ;;  %vm1020_vm15 = vweird.f32 %v4936_v45  ;;  %v1474_v47 = vmul.f32 %v4759_v24, %v4670_v56  ;;  %v1509_v37 = vmul.f32 %v4681_v31, %v1451_v25 }
  0xd3   : > { %v1630_v17 = vmul.f32 %v4726_v40, %v1451_v25  ;;  %v3614_v44 = vpop.eup %3613  ;;  %v1027_v22 = vor.u32 1.1754944e-38, %v1026_v13  ;;  %v2033_v18 = vadd.f32 %v1982_v34, %v1912_v0  ;;  %v1258_v62 = vsel %vm1248_vm11, %v1255_v2, %v1257_v35 }
  0xd4   : > { %v1380_v33 = vsel %vm1370_vm10, %v1377_v46, %v1379_v54  ;;  %v1001_v23 = vmul.f32 %v3614_v44, %v4921_v27  ;;  %vm1006_vm14 = vweird.f32 %v3614_v44  ;;  %v1308_v55 = vadd.f32 %v1258_v62, %v1170_v60  ;;  %v4976_v60 = vld [vmem:[#allocation2 + $0x38] sm:$0xff] }
  0xd5   : > { %v1560_v24 = vrot.slane %v1509_v37, 1  ;;  %vm4966_vm5 = vcmp.eq.f32.partialorder %v1024_v20, 8.507059e+37  ;;  %v2049_v21 = vpack.c.bf16 %v2033_v18, %v2033_v18  ;;  %v2086_v5 = vsel %vm6436_vm1, %v2033_v18, 0.0  ;;  %vm4992_vm9 = vmor %vm1005_vm13, %vm1006_vm14 }
  0xd6   : > { %v2123_v32 = vmul.f32 %v2033_v18, %v2033_v18  ;;  %v1681_v28 = vrot.slane %v1630_v17, 2  ;;  %v3616_v2 = vpop.eup %3615  ;;  %v1002_v58 = vsub.f32 1.0, %v1001_v23  ;;  %v4971_v15 = vadd.f32 %v2086_v5, %v2085_v63  ;;  %vm6444_vm13 = vmmov %vm6436_vm1 }
  0xd7   : > { %v1430_v46 = vadd.f32 %v1380_v33, %v1308_v55  ;;  %v1561_v52 = vsel %vm1248_vm11, %v1558_v36, %v1560_v24  ;;  %v1016_v6 = vmul.f32 %v3616_v2, %v4936_v45  ;;  %vm1021_vm3 = vweird.f32 %v3616_v2  ;;  %2069 = vst.msk [vmem:[%s4832_s20 + $0x8] sm:$0xf] %vm2066_vm6, %v2049_v21  ;;  %vm6447_vm14 = vmmov %vm6436_vm1 }
  0xd8   : > { %v2140_v50 = vsel %vm6437_vm4, %v2123_v32, 0.0  ;;  %v1682_v63 = vsel %vm1370_vm10, %v1679_v9, %v1681_v28  ;;  %v1003_v53 = vmul.f32 %v3614_v44, %v1002_v58  ;;  %v1776_v36 = vmul.f32 %v4752_v43, %v4897_v11  ;;  %vm5013_vm0 = vmor %vm1020_vm15, %vm1021_vm3 }
  0xd9   : > { %v4985_v10 = vadd.f32 %v2140_v50, %v2139_v41  ;;  %v1490_v59 = vadd.f32 %v1474_v47, %v1430_v46  ;;  %v1017_v61 = vsub.f32 1.0, %v1016_v6  ;;  %v1811_v25 = vmul.f32 %v4761_v57, %v1753_v42  ;;  %v1754_v46 = vld [vmem:[#allocation2 + $0x60] sm:$0xff]  ;;  %vm6446_vm15 = vmmov %vm6436_vm1 }
  0xda   : > { %v1932_v8 = vmul.f32 %v4791_v19, %v1753_v42  ;;  %v1171_v9 = vmul.f32 %v4768_v30, %v4565_v51  ;;  %v1004_v41 = vadd.f32 %v3614_v44, %v1003_v53  ;;  %v1206_v11 = vmul.f32 %v4768_v30, %v4602_v16  ;;  %vm6449_vm3 = vmmov %vm6436_vm1 }
  0xdb   : > { %v1611_v20 = vadd.f32 %v1561_v52, %v1490_v59  ;;  %v5004_v27 = vmul.f32 %v4602_v16, %v4976_v60  ;;  %v1018_v34 = vmul.f32 %v3616_v2, %v1017_v61  ;;  %v1862_v13 = vrot.slane %v1811_v25, 1  ;;  %vm6450_vm4 = vmmov %vm6436_vm1 }
  0xdc   : > { %v1983_v0 = vrot.slane %v1932_v8, 2  ;;  %v1328_v35 = vmul.f32 %v4768_v30, %v4617_v26  ;;  %v1008_v54 = vsel %vm4992_vm9, %v3614_v44, %v1004_v41  ;;  %v1259_v17 = vrot.slane %v1206_v11, 1  ;;  %vm6451_vm9 = vmmov %vm6436_vm1 }
  0xdd   : > { %v1732_v37 = vadd.f32 %v1682_v63, %v1611_v20  ;;  %v1260_v18 = vrot.slane %v5004_v27, 1  ;;  %v1013_v62 = vsel %vm4950_vm7, %v1012_v49, %v1008_v54  ;;  %v1019_v33 = vadd.f32 %v3616_v2, %v1018_v34  ;;  %v1453_v49 = vld [vmem:[#allocation2 + $0x50] sm:$0xff]  ;;  %vm6445_vm7 = vmmov %vm6436_vm1 }
  0xde   : > { %v1863_v30 = vsel %vm1248_vm11, %v1860_v39, %v1862_v13  ;;  %v1984_v45 = vsel %vm1370_vm10, %v1981_v38, %v1983_v0  ;;  %v1060_v44 = vmul.f32 %v1013_v62, %v4858_v12  ;;  %v5032_v14 = vmul.f32 %v4617_v26, %v4976_v60  ;;  %v1454_v13 = vld [vmem:[#allocation2 + $0x58] sm:$0x3] }
  0xdf   : > { %v1792_v23 = vadd.f32 %v1776_v36, %v1732_v37  ;;  %v1261_v55 = vsel %vm1248_vm11, %v1259_v17, %v1260_v18  ;;  %v1023_v1 = vsel %vm5013_vm0, %v3616_v2, %v1019_v33  ;;  %v1381_v24 = vrot.slane %v1328_v35, 2  ;;  %v1155_v36 = vld [vmem:[#allocation2 + $0x68] sm:$0xff]  ;;  %vm6452_vm0 = vmmov %vm6436_vm1 }
  0xe0   : > { %v1309_v39 = vadd.f32 %v1261_v55, %v1171_v9  ;;  %v1475_v4 = vmul.f32 %v4895_v3, %v4670_v56  ;;  %1135 = vst.msk [vmem:[#allocation2 + $0x181] sm:$0xff] %vm6442_vm12, %v1060_v44  ;;  %v1028_v12 = vsel %vm4966_vm5, %v1027_v22, %v1023_v1  ;;  %v1382_v21 = vrot.slane %v5032_v14, 2  ;;  %v1150_v9 = vld [vmem:[#allocation2 + $0x40] sm:$0x3]  ;;  %v1756_v44 = vld [vmem:[#allocation2 + $0x70] sm:$0x3]  ;;  %vm6448_vm5 = vmmov %vm6436_vm1 }
  0xe1   : > { %v1913_v38 = vadd.f32 %v1863_v30, %v1792_v23  ;;  %v1510_v5 = vmul.f32 %v4895_v3, %v4681_v31  ;;  %v1061_v32 = vmul.f32 %v1028_v12, %v4872_v7  ;;  %v1511_v28 = vmul.f32 %v4681_v31, %v1453_v49  ;;  %vm6453_vm12 = vmmov %vm6452_vm0 }
  0xe2   : > { %v1631_v2 = vmul.f32 %v4895_v3, %v4726_v40  ;;  %v1632_v58 = vmul.f32 %v4726_v40, %v1453_v49  ;;  %v1383_v29 = vsel %vm1370_vm10, %v1381_v24, %v1382_v21  ;;  %v1812_v3 = vmul.f32 %v4761_v57, %v1754_v46 }
  0xe3   : > { %v2034_v52 = vadd.f32 %v1984_v45, %v1913_v38  ;;  %v1562_v22 = vrot.slane %v1510_v5, 1  ;;  %1136 = vst.msk [vmem:[#allocation2 + $0x189] sm:$0xff] %vm6443_vm8, %v1061_v32  ;;  %v1431_v42 = vadd.f32 %v1383_v29, %v1309_v39  ;;  %v1563_v6 = vrot.slane %v1511_v28, 1  ;;  %v1160_v38 = vld [vmem:[#allocation2 + $0x90] sm:$0xff]  ;;  %v5076_v5 = vld [vmem:[#allocation2 + $0x98] sm:$0xff]  ;;  %vm6454_vm8 = vmmov %vm6452_vm0 }
  0xe4   : > { %v1683_v50 = vrot.slane %v1631_v2, 2  ;;  %v1684_v63 = vrot.slane %v1632_v58, 2  ;;  %v1813_v20 = vmul.f32 %v4761_v57, %v1155_v36  ;;  %v1864_v11 = vrot.slane %v1812_v3, 1 }
  0xe5   : > { %v2050_v7 = vpack.c.bf16 %v2034_v52, %v2034_v52  ;;  %v2088_v53 = vsel %vm6444_vm13, %v2034_v52, 0.0  ;;  %v2124_v59 = vmul.f32 %v2034_v52, %v2034_v52  ;;  %v1491_v61 = vadd.f32 %v1475_v4, %v1431_v42  ;;  %vm6455_vm13 = vmmov %vm6452_vm0 }
  0xe6   : > { %v2089_v48 = vadd.f32 %v2088_v53, %v4971_v15  ;;  %v1564_v25 = vsel %vm1248_vm11, %v1562_v22, %v1563_v6  ;;  %v1685_v8 = vsel %vm1370_vm10, %v1683_v50, %v1684_v63  ;;  %v1933_v34 = vmul.f32 %v4791_v19, %v1754_v46 }
  0xe7   : > { %2070 = vst.msk [vmem:[%s4832_s20 + $0xc] sm:$0xf] %vm2066_vm6, %v2050_v7  ;;  %v2142_v41 = vsel %vm6445_vm7, %v2124_v59, 0.0  ;;  %v1612_v35 = vadd.f32 %v1564_v25, %v1491_v61  ;;  %v1777_v15 = vmul.f32 %v4752_v43, %v1754_v46  ;;  %v5064_v54 = vmul.f32 %v4791_v19, %v1155_v36  ;;  %vm6456_vm7 = vmmov %vm6452_vm0 }
  0xe8   : > { %v2143_v0 = vadd.f32 %v2142_v41, %v4985_v10  ;;  %v1865_v47 = vrot.slane %v1813_v20, 1  ;;  %v1985_v37 = vrot.slane %v1933_v34, 2  ;;  %v1208_v17 = vmul.f32 %v4602_v16, %v1150_v9  ;;  %v5103_v34 = vld [vmem:[#allocation2 + $0xa8] sm:$0xff] }
  0xe9   : > { %v1330_v62 = vmul.f32 %v4617_v26, %v1150_v9  ;;  %v1733_v33 = vadd.f32 %v1685_v8, %v1612_v35  ;;  %v1986_v30 = vrot.slane %v5064_v54, 2  ;;  %v1172_v45 = vmul.f32 %v4565_v51, %v4976_v60  ;;  %v5099_v8 = vld [vmem:[#allocation2 + $0xb0] sm:$0xff] }
  0xea   : > { %v1512_v10 = vmul.f32 %v4681_v31, %v1454_v13  ;;  %v1866_v23 = vsel %vm1248_vm11, %v1864_v11, %v1865_v47  ;;  %v1262_v55 = vrot.slane %v1208_v17, 1  ;;  %v1633_v1 = vmul.f32 %v4726_v40, %v1454_v13 }
  0xeb   : > { %v1384_v14 = vrot.slane %v1330_v62, 2  ;;  %v1793_v39 = vadd.f32 %v1777_v15, %v1733_v33  ;;  %v1987_v24 = vsel %vm1370_vm10, %v1985_v37, %v1986_v30  ;;  %v1476_v4 = vmul.f32 %v4670_v56, %v1453_v49  ;;  %v5120_v62 = vld [vmem:[#allocation2 + $0xc0] sm:$0xff] }
  0xec   : > { %v1565_v12 = vrot.slane %v1512_v10, 1  ;;  %v1263_v60 = vsel %vm1248_vm11, %v1260_v18, %v1262_v55  ;;  %v1686_v28 = vrot.slane %v1633_v1, 2  ;;  %v1814_v2 = vmul.f32 %v4761_v57, %v1756_v44 }
  0xed   : > { %v1385_v32 = vsel %vm1370_vm10, %v1382_v21, %v1384_v14  ;;  %v1914_v58 = vadd.f32 %v1866_v23, %v1793_v39  ;;  %v1310_v46 = vadd.f32 %v1263_v60, %v1172_v45  ;;  %v1778_v52 = vmul.f32 %v4752_v43, %v1155_v36 }
  0xee   : > { %v1935_v29 = vmul.f32 %v4791_v19, %v1756_v44  ;;  %v1566_v49 = vsel %vm1248_vm11, %v1563_v6, %v1565_v12  ;;  %v1687_v22 = vsel %vm1370_vm10, %v1684_v63, %v1686_v28  ;;  %v1867_v42 = vrot.slane %v1814_v2, 1  ;;  %v5125_v44 = vld [vmem:[#allocation2 + $0xc8] sm:$0xff]  ;;  %v1162_v28 = vld [vmem:[#allocation2 + $0xa0] sm:$0x3] }
  0xef   : > { %v1218_v27 = vmul.f32 %v4602_v16, %v1160_v38  ;;  %v2035_v50 = vadd.f32 %v1987_v24, %v1914_v58  ;;  %v1432_v18 = vadd.f32 %v1385_v32, %v1310_v46  ;;  %v1179_v21 = vmul.f32 %v4565_v51, %v1160_v38  ;;  %v1466_v46 = vld [vmem:[#allocation2 + $0xb8] sm:$0x3] }
  0xf0   : > { %v5091_v7 = vmul.f32 %v4602_v16, %v5076_v5  ;;  %v1988_v53 = vrot.slane %v1935_v29, 2  ;;  %v1340_v3 = vmul.f32 %v4617_v26, %v1160_v38  ;;  %v5096_v6 = vmul.f32 %v4617_v26, %v5076_v5 }
  0xf1   : > { %v1279_v59 = vrot.slane %v1218_v27, 1  ;;  %v2051_v63 = vpack.c.bf16 %v2035_v50, %v2035_v50  ;;  %v2090_v36 = vsel %vm6446_vm15, %v2035_v50, 0.0  ;;  %v2125_v61 = vmul.f32 %v2035_v50, %v2035_v50  ;;  %vm6457_vm15 = vmmov %vm6452_vm0 }
  0xf2   : > { %v1492_v25 = vadd.f32 %v1476_v4, %v1432_v18  ;;  %v2091_v9 = vadd.f32 %v2090_v36, %v2089_v48  ;;  %v1868_v41 = vsel %vm1248_vm11, %v1865_v47, %v1867_v42  ;;  %v1280_v20 = vrot.slane %v5091_v7, 1 }
  0xf3   : > { %v1401_v11 = vrot.slane %v1340_v3, 2  ;;  %2071 = vst.msk [vmem:[%s4832_s20 + $0x10] sm:$0xf] %vm2066_vm6, %v2051_v63  ;;  %v2144_v13 = vsel %vm6447_vm14, %v2125_v61, 0.0  ;;  %v1402_v15 = vrot.slane %v5096_v6, 2  ;;  %v1483_v54 = vmul.f32 %v4670_v56, %v5103_v34  ;;  %vm6458_vm14 = vmmov %vm6452_vm0 }
  0xf4   : > { %v1613_v35 = vadd.f32 %v1566_v49, %v1492_v25  ;;  %v2145_v37 = vadd.f32 %v2144_v13, %v2143_v0  ;;  %v1281_v48 = vsel %vm1248_vm11, %v1279_v59, %v1280_v20  ;;  %v1522_v47 = vmul.f32 %v4681_v31, %v5103_v34 }
  0xf5   : > { %v5118_v17 = vmul.f32 %v4681_v31, %v5099_v8  ;;  %v1317_v45 = vadd.f32 %v1281_v48, %v1179_v21  ;;  %v1403_v10 = vsel %vm1370_vm10, %v1401_v11, %v1402_v15  ;;  %v1643_v0 = vmul.f32 %v4726_v40, %v5103_v34 }
  0xf6   : > { %v1734_v33 = vadd.f32 %v1687_v22, %v1613_v35  ;;  %v1989_v23 = vsel %vm1370_vm10, %v1986_v30, %v1988_v53  ;;  %v1582_v55 = vrot.slane %v1522_v47, 1  ;;  %v5131_v1 = vmul.f32 %v4726_v40, %v5099_v8  ;;  %v1768_v47 = vld [vmem:[#allocation2 + $0xd0] sm:$0x3] }
  0xf7   : > { %v1583_v14 = vrot.slane %v5118_v17, 1  ;;  %v1439_v24 = vadd.f32 %v1403_v10, %v1317_v45  ;;  %v1703_v4 = vrot.slane %v1643_v0, 2  ;;  %v1824_v12 = vmul.f32 %v4761_v57, %v5120_v62  ;;  %v5167_v17 = vld [vmem:[#allocation2 + $0xb0] sm:$0xff] }
  0xf8   : > { %v1794_v39 = vadd.f32 %v1778_v52, %v1734_v33  ;;  %v1704_v60 = vrot.slane %v5131_v1, 2  ;;  %v5139_v30 = vmul.f32 %v4761_v57, %v5125_v44  ;;  %v1945_v32 = vmul.f32 %v4791_v19, %v5120_v62 }
  0xf9   : > { %v1584_v38 = vsel %vm1248_vm11, %v1582_v55, %v1583_v14  ;;  %v1499_v58 = vadd.f32 %v1483_v54, %v1439_v24  ;;  %v1785_v29 = vmul.f32 %v4752_v43, %v5120_v62  ;;  %v1884_v49 = vrot.slane %v1824_v12, 1 }
  0xfa   : > { %v1915_v2 = vadd.f32 %v1868_v41, %v1794_v39  ;;  %v1705_v52 = vsel %vm1370_vm10, %v1703_v4, %v1704_v60  ;;  %v5148_v22 = vmul.f32 %v4791_v19, %v5125_v44  ;;  %v1885_v50 = vrot.slane %v5139_v30, 1 }
  0xfb   : > { %v1620_v27 = vadd.f32 %v1584_v38, %v1499_v58  ;;  %v1220_v18 = vmul.f32 %v4602_v16, %v1162_v28  ;;  %v2005_v21 = vrot.slane %v1945_v32, 2  ;;  %v1180_v53 = vmul.f32 %v4565_v51, %v5076_v5 }
  0xfc   : > { %v2036_v42 = vadd.f32 %v1989_v23, %v1915_v2  ;;  %v1342_v59 = vmul.f32 %v4617_v26, %v1162_v28  ;;  %v1524_v3 = vmul.f32 %v4681_v31, %v1466_v46  ;;  %v2006_v41 = vrot.slane %v5148_v22, 2 }
  0xfd   : > { %v1741_v61 = vadd.f32 %v1705_v52, %v1620_v27  ;;  %v1282_v11 = vrot.slane %v1220_v18, 1  ;;  %v1886_v54 = vsel %vm1248_vm11, %v1884_v49, %v1885_v50  ;;  %v1645_v48 = vmul.f32 %v4726_v40, %v1466_v46 }
  0xfe   : > { %v2052_v6 = vpack.c.bf16 %v2036_v42, %v2036_v42  ;;  %v2092_v63 = vsel %vm6448_vm5, %v2036_v42, 0.0  ;;  %v2126_v36 = vmul.f32 %v2036_v42, %v2036_v42  ;;  %v1404_v13 = vrot.slane %v1342_v59, 2  ;;  %vm6459_vm5 = vmmov %vm6452_vm0 }
  0xff   : > { %v5157_v25 = vadd.f32 %v2092_v63, %v2091_v9  ;;  %v1801_v5 = vadd.f32 %v1785_v29, %v1741_v61  ;;  %v1283_v33 = vsel %vm1248_vm11, %v1280_v20, %v1282_v11  ;;  %v1585_v10 = vrot.slane %v1524_v3, 1  ;;  %v5218_v63 = vld [vmem:[#allocation2 + $0xe0] sm:$0xff] }
 0x100   : > { %2072 = vst.msk [vmem:[%s4832_s20 + $0x14] sm:$0xf] %vm2066_vm6, %v2052_v6  ;;  %v2146_v35 = vsel %vm6436_vm1, %v2126_v36, 0.0  ;;  %v1405_v45 = vsel %vm1370_vm10, %v1402_v15, %v1404_v13  ;;  %v1318_v23 = vadd.f32 %v1283_v33, %v1180_v53  ;;  %v1484_v55 = vmul.f32 %v4670_v56, %v5099_v8  ;;  %vm6460_vm1 = vmmov %vm6452_vm0 }
 0x101   : > { %v5169_v9 = vadd.f32 %v2146_v35, %v2145_v37  ;;  %v1922_v0 = vadd.f32 %v1886_v54, %v1801_v5  ;;  %v2007_v1 = vsel %vm1370_vm10, %v2005_v21, %v2006_v41  ;;  %v1706_v39 = vrot.slane %v1645_v48, 2  ;;  %v5227_v48 = vld [vmem:[#allocation2 + $0xd8] sm:$0xff] }
 0x102   : > { %v1826_v37 = vmul.f32 %v4761_v57, %v1768_v47  ;;  %v1221_v7 = vmul.f32 %v5103_v34, %v4602_v16  ;;  %v1440_v15 = vadd.f32 %v1405_v45, %v1318_v23  ;;  %v1947_v24 = vmul.f32 %v4791_v19, %v1768_v47 }
 0x103   : > { %v5183_v20 = vadd.f32 %v2007_v1, %v1922_v0  ;;  %v5188_v4 = vmul.f32 %v4602_v16, %v5167_v17  ;;  %v1586_v8 = vsel %vm1248_vm11, %v1583_v14, %v1585_v10  ;;  %v1343_v38 = vmul.f32 %v5103_v34, %v4617_v26  ;;  %v1165_v0 = vld [vmem:[#allocation2 + $0xb8] sm:$0x3] }
 0x104   : > { %v1284_v12 = vrot.slane %v1221_v7, 1  ;;  %v1500_v28 = vadd.f32 %v1484_v55, %v1440_v15  ;;  %v1181_v2 = vmul.f32 %v5103_v34, %v4565_v51  ;;  %v1707_v58 = vsel %vm1370_vm10, %v1704_v60, %v1706_v39  ;;  %v1469_v55 = vld [vmem:[#allocation2 + $0xd0] sm:$0x3] }
 0x105   : > { %v2059_v32 = vpack.c.bf16 %v5183_v20, %v5183_v20  ;;  %v1786_v46 = vmul.f32 %v4752_v43, %v5125_v44  ;;  %v1285_v52 = vrot.slane %v5188_v4, 1  ;;  %v1344_v14 = vmul.f32 %v4617_v26, %v5167_v17 }
 0x106   : > { %v1621_v29 = vadd.f32 %v1586_v8, %v1500_v28  ;;  %v1887_v49 = vrot.slane %v1826_v37, 1  ;;  %v2008_v42 = vrot.slane %v1947_v24, 2  ;;  %v1406_v27 = vrot.slane %v1343_v38, 2 }
 0x107   : > { %2079 = vst.msk [vmem:[%s4832_s20 + $0x30] sm:$0xf] %vm2066_vm6, %v2059_v32  ;;  %v1286_v18 = vsel %vm1248_vm11, %v1284_v12, %v1285_v52  ;;  %v1407_v21 = vrot.slane %v1344_v14, 2  ;;  %v1525_v34 = vmul.f32 %v5120_v62, %v4681_v31  ;;  %v5210_v60 = vmul.f32 %v5125_v44, %v4681_v31 }
 0x108   : > { %v1742_v53 = vadd.f32 %v1707_v58, %v1621_v29  ;;  %v1319_v59 = vadd.f32 %v1286_v18, %v1181_v2  ;;  %v1646_v3 = vmul.f32 %v5120_v62, %v4726_v40  ;;  %v5216_v6 = vmul.f32 %v5125_v44, %v4726_v40  ;;  %v1771_v58 = vld [vmem:[#allocation2 + $0xe8] sm:$0x3] }
 0x109   : > { %v1408_v36 = vsel %vm1370_vm10, %v1406_v27, %v1407_v21  ;;  %v1587_v61 = vrot.slane %v1525_v34, 1  ;;  %v1588_v11 = vrot.slane %v5210_v60, 1  ;;  %v1888_v35 = vsel %vm1248_vm11, %v1885_v50, %v1887_v49 }
 0x10a   : > { %v1802_v13 = vadd.f32 %v1786_v46, %v1742_v53  ;;  %v1441_v5 = vadd.f32 %v1408_v36, %v1319_v59  ;;  %v1485_v54 = vmul.f32 %v5120_v62, %v4670_v56  ;;  %v1708_v47 = vrot.slane %v1646_v3, 2 }
 0x10b   : > { %v1709_v33 = vrot.slane %v5216_v6, 2  ;;  %v1827_v45 = vmul.f32 %v4761_v57, %v5227_v48  ;;  %v1828_v10 = vmul.f32 %v4761_v57, %v5218_v63  ;;  %v2009_v30 = vsel %vm1370_vm10, %v2006_v41, %v2008_v42  ;;  %v5254_v42 = vld [vmem:[#allocation2 + $0xc8] sm:$0xff] }
 0x10c   : > { %v1923_v23 = vadd.f32 %v1888_v35, %v1802_v13  ;;  %v1501_v50 = vadd.f32 %v1485_v54, %v1441_v5  ;;  %v1589_v1 = vsel %vm1248_vm11, %v1587_v61, %v1588_v11  ;;  %v1948_v37 = vmul.f32 %v4791_v19, %v5227_v48 }
 0x10d   : > { %v1889_v39 = vrot.slane %v1827_v45, 1  ;;  %v1949_v7 = vmul.f32 %v4791_v19, %v5218_v63  ;;  %v1890_v4 = vrot.slane %v1828_v10, 1  ;;  %v1223_v22 = vmul.f32 %v4602_v16, %v1165_v0 }
 0x10e   : > { %v5242_v15 = vadd.f32 %v2009_v30, %v1923_v23  ;;  %v1622_v24 = vadd.f32 %v1589_v1, %v1501_v50  ;;  %v1710_v41 = vsel %vm1370_vm10, %v1708_v47, %v1709_v33  ;;  %v1345_v8 = vmul.f32 %v4617_v26, %v1165_v0 }
 0x10f   : > { %v1527_v12 = vmul.f32 %v4681_v31, %v1469_v55  ;;  %v1787_v28 = vmul.f32 %v4752_v43, %v5227_v48  ;;  %v1182_v2 = vmul.f32 %v4565_v51, %v5167_v17  ;;  %v2010_v46 = vrot.slane %v1948_v37, 2 }
 0x110   : > { %v2060_v38 = vpack.c.bf16 %v5242_v15, %v5242_v15  ;;  %v1743_v32 = vadd.f32 %v1710_v41, %v1622_v24  ;;  %v2011_v14 = vrot.slane %v1949_v7, 2  ;;  %v1287_v29 = vrot.slane %v1223_v22, 1 }
 0x111   : > { %v1409_v49 = vrot.slane %v1345_v8, 2  ;;  %v1891_v18 = vsel %vm1248_vm11, %v1889_v39, %v1890_v4  ;;  %v1486_v34 = vmul.f32 %v5125_v44, %v4670_v56  ;;  %v1648_v60 = vmul.f32 %v4726_v40, %v1469_v55 }
 0x112   : > { %2080 = vst.msk [vmem:[%s4832_s20 + $0x34] sm:$0xf] %vm2066_vm6, %v2060_v38  ;;  %v1803_v27 = vadd.f32 %v1787_v28, %v1743_v32  ;;  %v1288_v53 = vsel %vm1248_vm11, %v1285_v52, %v1287_v29  ;;  %v1590_v59 = vrot.slane %v1527_v12, 1  ;;  %v1829_v3 = vmul.f32 %v4761_v57, %v1771_v58  ;;  %v5301_v32 = vld [vmem:[#allocation2 + $0xf0] sm:$0xff]  ;;  %v5303_v28 = vld [vmem:[#allocation2 + $0xf8] sm:$0xff] }
 0x113   : > { %v1410_v17 = vsel %vm1370_vm10, %v1407_v21, %v1409_v49  ;;  %v1320_v36 = vadd.f32 %v1288_v53, %v1182_v2  ;;  %v1711_v61 = vrot.slane %v1648_v60, 2  ;;  %v1950_v13 = vmul.f32 %v4791_v19, %v1771_v58 }
 0x114   : > { %v1924_v6 = vadd.f32 %v1891_v18, %v1803_v27  ;;  %v2012_v35 = vsel %vm1370_vm10, %v2010_v46, %v2011_v14  ;;  %v1892_v5 = vrot.slane %v1829_v3, 1  ;;  %v2233_v44 = vmul.f32 %v5120_v62, %v4602_v16 }
 0x115   : > { %v5271_v54 = vmul.f32 %v5254_v42, %v4602_v16  ;;  %v1442_v21 = vadd.f32 %v1410_v17, %v1320_v36  ;;  %v1788_v47 = vmul.f32 %v4752_v43, %v5218_v63  ;;  %v2013_v45 = vrot.slane %v1950_v13, 2 }
 0x116   : > { %v5273_v52 = vadd.f32 %v2012_v35, %v1924_v6  ;;  %v1591_v10 = vsel %vm1248_vm11, %v1588_v11, %v1590_v59  ;;  %v2281_v0 = vrot.slane %v2233_v44, 1  ;;  %v2353_v30 = vmul.f32 %v5120_v62, %v4617_v26  ;;  %v2179_v59 = vld [vmem:[#allocation2 + $0xd0] sm:$0x3] }
 0x117   : > { %v2282_v23 = vrot.slane %v5271_v54, 1  ;;  %v1502_v55 = vadd.f32 %v1486_v34, %v1442_v21  ;;  %v1712_v1 = vsel %vm1370_vm10, %v1709_v33, %v1711_v61  ;;  %v2201_v39 = vmul.f32 %v5120_v62, %v4565_v51  ;;  %v2478_v54 = vld [vmem:[#allocation2 + $0xe8] sm:$0x3] }
 0x118   : > { %v2061_v50 = vpack.c.bf16 %v5273_v52, %v5273_v52  ;;  %v1893_v37 = vsel %vm1248_vm11, %v1890_v4, %v1892_v5  ;;  %v2354_v11 = vmul.f32 %v5254_v42, %v4617_v26  ;;  %v2401_v24 = vrot.slane %v2353_v30, 2 }
 0x119   : > { %v2283_v7 = vsel %vm1248_vm11, %v2281_v0, %v2282_v23  ;;  %v1623_v22 = vadd.f32 %v1591_v10, %v1502_v55  ;;  %v2014_v41 = vsel %vm1370_vm10, %v2011_v14, %v2013_v45  ;;  %v2532_v33 = vmul.f32 %v5227_v48, %v4681_v31 }
 0x11a   : > { %2081 = vst.msk [vmem:[%s4832_s20 + $0x38] sm:$0xf] %vm2066_vm6, %v2061_v50  ;;  %v2337_v8 = vadd.f32 %v2283_v7, %v2201_v39  ;;  %v2402_v12 = vrot.slane %v2354_v11, 2  ;;  %v2533_v62 = vmul.f32 %v5218_v63, %v4681_v31  ;;  %v2652_v4 = vmul.f32 %v5227_v48, %v4726_v40  ;;  %v2777_v11 = vld [vmem:[#allocation2 + $0x100] sm:$0x3] }
 0x11b   : > { %v2653_v38 = vmul.f32 %v5218_v63, %v4726_v40  ;;  %v1744_v2 = vadd.f32 %v1712_v1, %v1623_v22  ;;  %v2500_v58 = vmul.f32 %v5227_v48, %v4670_v56  ;;  %v2580_v46 = vrot.slane %v2532_v33, 1 }
 0x11c   : > { %v2831_v14 = vmul.f32 %v5301_v32, %v4761_v57  ;;  %v2403_v29 = vsel %vm1370_vm10, %v2401_v24, %v2402_v12  ;;  %v2581_v49 = vrot.slane %v2533_v62, 1  ;;  %v2700_v27 = vrot.slane %v2652_v4, 2 }
 0x11d   : > { %v2701_v18 = vrot.slane %v2653_v38, 2  ;;  %v1804_v34 = vadd.f32 %v1788_v47, %v1744_v2  ;;  %v2457_v60 = vadd.f32 %v2403_v29, %v2337_v8  ;;  %v2832_v53 = vmul.f32 %v5303_v28, %v4761_v57 }
 0x11e   : > { %v2879_v17 = vrot.slane %v2831_v14, 1  ;;  %v2582_v3 = vsel %vm1248_vm11, %v2580_v46, %v2581_v49  ;;  %v2799_v6 = vmul.f32 %v5301_v32, %v4752_v43  ;;  %v2951_v36 = vmul.f32 %v5301_v32, %v4791_v19 }
 0x11f   : > { %v2952_v61 = vmul.f32 %v5303_v28, %v4791_v19  ;;  %v1925_v13 = vadd.f32 %v1893_v37, %v1804_v34  ;;  %v2516_v35 = vadd.f32 %v2500_v58, %v2457_v60  ;;  %v2702_v5 = vsel %vm1370_vm10, %v2700_v27, %v2701_v18 }
 0x120   : > { %v2880_v44 = vrot.slane %v2832_v53, 1  ;;  %v2999_v21 = vrot.slane %v2951_v36, 2  ;;  %v2235_v45 = vmul.f32 %v2179_v59, %v4602_v16  ;;  %v2355_v10 = vmul.f32 %v2179_v59, %v4617_v26 }
 0x121   : > { %v3000_v47 = vrot.slane %v2952_v61, 2  ;;  %v5322_v0 = vadd.f32 %v2014_v41, %v1925_v13  ;;  %v2636_v30 = vadd.f32 %v2582_v3, %v2516_v35  ;;  %v2202_v55 = vmul.f32 %v5254_v42, %v4565_v51 }
 0x122   : > { %v2881_v50 = vsel %vm1248_vm11, %v2879_v17, %v2880_v44  ;;  %v2284_v1 = vrot.slane %v2235_v45, 1  ;;  %v2404_v39 = vrot.slane %v2355_v10, 2  ;;  %v2501_v37 = vmul.f32 %v5218_v63, %v4670_v56  ;;  %v2181_v63 = vld [vmem:[#allocation2 + $0xe0] sm:$0xff] }
 0x123   : > { %v2534_v7 = vmul.f32 %v2478_v54, %v4681_v31  ;;  %v2062_v24 = vpack.c.bf16 %v5322_v0, %v5322_v0  ;;  %v2756_v22 = vadd.f32 %v2702_v5, %v2636_v30  ;;  %v3001_v41 = vsel %vm1370_vm10, %v2999_v21, %v3000_v47 }
 0x124   : > { %v2654_v8 = vmul.f32 %v2478_v54, %v4726_v40  ;;  %v2285_v33 = vsel %vm1248_vm11, %v2282_v23, %v2284_v1  ;;  %v2405_v42 = vsel %vm1370_vm10, %v2402_v12, %v2404_v39  ;;  %v2800_v4 = vmul.f32 %v5303_v28, %v4752_v43 }
 0x125   : > { %v2583_v62 = vrot.slane %v2534_v7, 1  ;;  %2082 = vst.msk [vmem:[%s4832_s20 + $0x3c] sm:$0xf] %vm2066_vm6, %v2062_v24  ;;  %v2815_v38 = vadd.f32 %v2799_v6, %v2756_v22  ;;  %v2338_v2 = vadd.f32 %v2285_v33, %v2202_v55  ;;  %v2833_v46 = vmul.f32 %v2777_v11, %v4761_v57 }
 0x126   : > { %v2703_v58 = vrot.slane %v2654_v8, 2  ;;  %v2953_v29 = vmul.f32 %v2777_v11, %v4791_v19  ;;  %v2203_v23 = vmul.f32 %v5227_v48, %v4565_v51  ;;  %v2236_v12 = vmul.f32 %v5227_v48, %v4602_v16 }
 0x127   : > { %v2584_v14 = vsel %vm1248_vm11, %v2581_v49, %v2583_v62  ;;  %v2935_v27 = vadd.f32 %v2881_v50, %v2815_v38  ;;  %v2458_v34 = vadd.f32 %v2405_v42, %v2338_v2  ;;  %v2882_v53 = vrot.slane %v2833_v46, 1  ;;  %v5383_v62 = vld [vmem:[#allocation2 + $0x110] sm:$0xff] }
 0x128   : > { %v2704_v60 = vsel %vm1370_vm10, %v2701_v18, %v2703_v58  ;;  %v3002_v17 = vrot.slane %v2953_v29, 2  ;;  %v5349_v59 = vmul.f32 %v2181_v63, %v4602_v16  ;;  %v2286_v3 = vrot.slane %v2236_v12, 1 }
 0x129   : > { %v2356_v49 = vmul.f32 %v5227_v48, %v4617_v26  ;;  %v3055_v6 = vadd.f32 %v3001_v41, %v2935_v27  ;;  %v2517_v36 = vadd.f32 %v2501_v37, %v2458_v34  ;;  %v2883_v61 = vsel %vm1248_vm11, %v2880_v44, %v2882_v53  ;;  %v5381_v41 = vld [vmem:[#allocation2 + $0x108] sm:$0xff] }
 0x12a   : > { %v5355_v13 = vmul.f32 %v2181_v63, %v4617_v26  ;;  %v3003_v35 = vsel %vm1370_vm10, %v3000_v47, %v3002_v17  ;;  %v2287_v18 = vrot.slane %v5349_v59, 1  ;;  %v2502_v54 = vmul.f32 %v5301_v32, %v4670_v56  ;;  %v2182_v27 = vld [vmem:[#allocation2 + $0xe8] sm:$0x3] }
 0x12b   : > { %v2406_v5 = vrot.slane %v2356_v49, 2  ;;  %v3071_v21 = vpack.c.bf16 %v3055_v6, %v3055_v6  ;;  %v3106_v45 = vsel %vm6449_vm3, %v3055_v6, 0.0  ;;  %v3144_v48 = vmul.f32 %v3055_v6, %v3055_v6  ;;  %vm6461_vm3 = vmmov %vm6452_vm0 }
 0x12c   : > { %v2637_v10 = vadd.f32 %v2584_v14, %v2517_v36  ;;  %v2288_v44 = vsel %vm1248_vm11, %v2286_v3, %v2287_v18  ;;  %v2407_v30 = vrot.slane %v5355_v13, 2  ;;  %v2535_v47 = vmul.f32 %v5301_v32, %v4681_v31 }
 0x12d   : > { %v5370_v50 = vmul.f32 %v5303_v28, %v4681_v31  ;;  %3366 = vst.msk [vmem:[%s4832_s20 + $0x40] sm:$0xf] %vm2066_vm6, %v3071_v21  ;;  %v3160_v55 = vsel %vm6450_vm4, %v3144_v48, 0.0  ;;  %v2339_v39 = vadd.f32 %v2288_v44, %v2203_v23  ;;  %v2655_v37 = vmul.f32 %v5301_v32, %v4726_v40  ;;  %vm6462_vm4 = vmmov %vm6452_vm0 }
 0x12e   : > { %v2757_v1 = vadd.f32 %v2704_v60, %v2637_v10  ;;  %v2408_v7 = vsel %vm1370_vm10, %v2406_v5, %v2407_v30  ;;  %v2585_v11 = vrot.slane %v2535_v47, 1  ;;  %v2656_v22 = vmul.f32 %v5303_v28, %v4726_v40 }
 0x12f   : > { %v2586_v24 = vrot.slane %v5370_v50, 1  ;;  %v2459_v33 = vadd.f32 %v2408_v7, %v2339_v39  ;;  %v2705_v42 = vrot.slane %v2655_v37, 2  ;;  %v2801_v38 = vmul.f32 %v5381_v41, %v4752_v43 }
 0x130   : > { %v2816_v8 = vadd.f32 %v2800_v4, %v2757_v1  ;;  %v2706_v58 = vrot.slane %v2656_v22, 2  ;;  %v2834_v46 = vmul.f32 %v5381_v41, %v4761_v57  ;;  %v2835_v14 = vmul.f32 %v5383_v62, %v4761_v57 }
 0x131   : > { %v2587_v2 = vsel %vm1248_vm11, %v2585_v11, %v2586_v24  ;;  %v2518_v23 = vadd.f32 %v2502_v54, %v2459_v33  ;;  %v2954_v4 = vmul.f32 %v5381_v41, %v4791_v19  ;;  %v2955_v12 = vmul.f32 %v5383_v62, %v4791_v19  ;;  %v2481_v54 = vld [vmem:[#allocation2 + $0x100] sm:$0x3] }
 0x132   : > { %v2936_v29 = vadd.f32 %v2883_v61, %v2816_v8  ;;  %v2707_v34 = vsel %vm1370_vm10, %v2705_v42, %v2706_v58  ;;  %v2884_v60 = vrot.slane %v2834_v46, 1  ;;  %v2885_v53 = vrot.slane %v2835_v14, 1  ;;  %v5416_v42 = vld [vmem:[#allocation2 + $0xf8] sm:$0xff] }
 0x133   : > { %v2204_v17 = vmul.f32 %v2181_v63, %v4565_v51  ;;  %v2638_v49 = vadd.f32 %v2587_v2, %v2518_v23  ;;  %v3004_v6 = vrot.slane %v2954_v4, 2  ;;  %v3005_v36 = vrot.slane %v2955_v12, 2 }
 0x134   : > { %v3056_v3 = vadd.f32 %v3003_v35, %v2936_v29  ;;  %v2886_v61 = vsel %vm1248_vm11, %v2884_v60, %v2885_v53  ;;  %v2238_v13 = vmul.f32 %v2182_v27, %v4602_v16  ;;  %v2358_v5 = vmul.f32 %v2182_v27, %v4617_v26 }
 0x135   : > { %v2503_v21 = vmul.f32 %v5303_v28, %v4670_v56  ;;  %v2758_v63 = vadd.f32 %v2707_v34, %v2638_v49  ;;  %v3006_v47 = vsel %vm1370_vm10, %v3004_v6, %v3005_v36  ;;  %v2537_v7 = vmul.f32 %v2481_v54, %v4681_v31  ;;  %v2780_v28 = vld [vmem:[#allocation2 + $0x118] sm:$0x3] }
 0x136   : > { %v3072_v48 = vpack.c.bf16 %v3056_v3, %v3056_v3  ;;  %v3107_v10 = vsel %vm6451_vm9, %v3056_v3, 0.0  ;;  %v3145_v44 = vmul.f32 %v3056_v3, %v3056_v3  ;;  %v2289_v50 = vrot.slane %v2238_v13, 1  ;;  %vm6463_vm9 = vmmov %vm6452_vm0 }
 0x137   : > { %v3108_v35 = vadd.f32 %v3107_v10, %v3106_v45  ;;  %v2409_v1 = vrot.slane %v2358_v5, 2  ;;  %v2817_v37 = vadd.f32 %v2801_v38, %v2758_v63  ;;  %v2657_v11 = vmul.f32 %v2481_v54, %v4726_v40 }
 0x138   : > { %3367 = vst.msk [vmem:[%s4832_s20 + $0x44] sm:$0xf] %vm2066_vm6, %v3072_v48  ;;  %v3161_v39 = vsel %vm6452_vm0, %v3145_v44, 0.0  ;;  %v2290_v8 = vsel %vm1248_vm11, %v2287_v18, %v2289_v50  ;;  %v2802_v33 = vmul.f32 %v5383_v62, %v4752_v43  ;;  %v2588_v38 = vrot.slane %v2537_v7, 1 }
 0x139   : > { %v3162_v22 = vadd.f32 %v3161_v39, %v3160_v55  ;;  %v2410_v45 = vsel %vm1370_vm10, %v2407_v30, %v2409_v1  ;;  %v2937_v2 = vadd.f32 %v2886_v61, %v2817_v37  ;;  %v2340_v46 = vadd.f32 %v2290_v8, %v2204_v17 }
 0x13a   : > { %v2708_v14 = vrot.slane %v2657_v11, 2  ;;  %v2836_v29 = vmul.f32 %v2780_v28, %v4761_v57  ;;  %v2956_v23 = vmul.f32 %v2780_v28, %v4791_v19  ;;  %v2205_v59 = vmul.f32 %v5301_v32, %v4565_v51  ;;  %v5459_v11 = vld [vmem:[#allocation2 + $0x120] sm:$0xff] }
 0x13b   : > { %v2239_v18 = vmul.f32 %v5301_v32, %v4602_v16  ;;  %v3057_v30 = vadd.f32 %v3006_v47, %v2937_v2  ;;  %v2460_v55 = vadd.f32 %v2410_v45, %v2340_v46  ;;  %v2589_v4 = vsel %vm1248_vm11, %v2586_v24, %v2588_v38 }
 0x13c   : > { %v2709_v12 = vsel %vm1370_vm10, %v2706_v58, %v2708_v14  ;;  %v2887_v27 = vrot.slane %v2836_v29, 1  ;;  %v3007_v34 = vrot.slane %v2956_v23, 2  ;;  %v5428_v60 = vmul.f32 %v5416_v42, %v4602_v16  ;;  %v5467_v29 = vld [vmem:[#allocation2 + $0x128] sm:$0xff] }
 0x13d   : > { %v2291_v17 = vrot.slane %v2239_v18, 1  ;;  %v3073_v3 = vpack.c.bf16 %v3057_v30, %v3057_v30  ;;  %v3109_v49 = vsel %vm6453_vm12, %v3057_v30, 0.0  ;;  %v3146_v6 = vmul.f32 %v3057_v30, %v3057_v30  ;;  %v2185_v30 = vld [vmem:[#allocation2 + $0x100] sm:$0x3]  ;;  %vm6464_vm12 = vmmov %vm6452_vm0 }
 0x13e   : > { %v2519_v61 = vadd.f32 %v2503_v21, %v2460_v55  ;;  %v3110_v13 = vadd.f32 %v3109_v49, %v3108_v35  ;;  %v2888_v5 = vsel %vm1248_vm11, %v2885_v53, %v2887_v27  ;;  %v3008_v54 = vsel %vm1370_vm10, %v3005_v36, %v3007_v34 }
 0x13f   : > { %v2292_v24 = vrot.slane %v5428_v60, 1  ;;  %3368 = vst.msk [vmem:[%s4832_s20 + $0x48] sm:$0xf] %vm2066_vm6, %v3073_v3  ;;  %v3163_v58 = vsel %vm6454_vm8, %v3146_v6, 0.0  ;;  %v2359_v10 = vmul.f32 %v5301_v32, %v4617_v26  ;;  %v5441_v44 = vmul.f32 %v5416_v42, %v4617_v26  ;;  %vm6465_vm8 = vmmov %vm6452_vm0 }
 0x140   : > { %v2639_v48 = vadd.f32 %v2589_v4, %v2519_v61  ;;  %v3164_v21 = vadd.f32 %v3163_v58, %v3162_v22  ;;  %v2504_v36 = vmul.f32 %v5381_v41, %v4670_v56  ;;  %v2538_v63 = vmul.f32 %v5381_v41, %v4681_v31 }
 0x141   : > { %v2293_v53 = vsel %vm1248_vm11, %v2291_v17, %v2292_v24  ;;  %v2411_v50 = vrot.slane %v2359_v10, 2  ;;  %v2412_v32 = vrot.slane %v5441_v44, 2  ;;  %v2539_v1 = vmul.f32 %v5383_v62, %v4681_v31 }
 0x142   : > { %v2759_v35 = vadd.f32 %v2709_v12, %v2639_v48  ;;  %v2341_v47 = vadd.f32 %v2293_v53, %v2205_v59  ;;  %v2590_v39 = vrot.slane %v2538_v63, 1  ;;  %v2658_v37 = vmul.f32 %v5381_v41, %v4726_v40  ;;  %v2484_v48 = vld [vmem:[#allocation2 + $0x118] sm:$0x3] }
 0x143   : > { %v5457_v7 = vmul.f32 %v5383_v62, %v4726_v40  ;;  %v2413_v22 = vsel %vm1370_vm10, %v2411_v50, %v2412_v32  ;;  %v2803_v8 = vmul.f32 %v5459_v11, %v4752_v43  ;;  %v2837_v45 = vmul.f32 %v5459_v11, %v4761_v57 }
 0x144   : > { %v2818_v28 = vadd.f32 %v2802_v33, %v2759_v35  ;;  %v2461_v2 = vadd.f32 %v2413_v22, %v2341_v47  ;;  %v2591_v46 = vrot.slane %v2539_v1, 1  ;;  %v2710_v38 = vrot.slane %v2658_v37, 2  ;;  %v2783_v37 = vld [vmem:[#allocation2 + $0x130] sm:$0x3] }
 0x145   : > { %v2711_v14 = vrot.slane %v5457_v7, 2  ;;  %v2838_v59 = vmul.f32 %v5467_v29, %v4761_v57  ;;  %v2889_v33 = vrot.slane %v2837_v45, 1  ;;  %v2957_v18 = vmul.f32 %v5459_v11, %v4791_v19  ;;  %v1151_v45 = vld [vmem:[#allocation2 + $0x48] sm:$0xff] }
 0x146   : > { %v2938_v23 = vadd.f32 %v2888_v5, %v2818_v28  ;;  %v2520_v55 = vadd.f32 %v2504_v36, %v2461_v2  ;;  %v2592_v4 = vsel %vm1248_vm11, %v2590_v39, %v2591_v46  ;;  %v2958_v27 = vmul.f32 %v5467_v29, %v4791_v19 }
 0x147   : > { %v2712_v12 = vsel %vm1370_vm10, %v2710_v38, %v2711_v14  ;;  %v2890_v17 = vrot.slane %v2838_v59, 1  ;;  %v3009_v3 = vrot.slane %v2957_v18, 2  ;;  %v2206_v49 = vmul.f32 %v5416_v42, %v4565_v51 }
 0x148   : > { %v3058_v34 = vadd.f32 %v3008_v54, %v2938_v23  ;;  %v2640_v6 = vadd.f32 %v2592_v4, %v2520_v55  ;;  %v3010_v61 = vrot.slane %v2958_v27, 2  ;;  %v2241_v5 = vmul.f32 %v2185_v30, %v4602_v16 }
 0x149   : > { %v2361_v58 = vmul.f32 %v2185_v30, %v4617_v26  ;;  %v2891_v36 = vsel %vm1248_vm11, %v2889_v33, %v2890_v17  ;;  %v2505_v1 = vmul.f32 %v5383_v62, %v4670_v56  ;;  %v2540_v39 = vmul.f32 %v2484_v48, %v4681_v31 }
 0x14a   : > { %v3074_v10 = vpack.c.bf16 %v3058_v34, %v3058_v34  ;;  %v3111_v44 = vsel %vm6455_vm13, %v3058_v34, 0.0  ;;  %v3147_v53 = vmul.f32 %v3058_v34, %v3058_v34  ;;  %v2760_v63 = vadd.f32 %v2712_v12, %v2640_v6  ;;  %v3619_v34 = vld [vmem:[#allocation2 + $0x50] sm:$0xff]  ;;  %vm6466_vm13 = vmmov %vm6452_vm0 }
 0x14b   : > { %v3112_v54 = vadd.f32 %v3111_v44, %v3110_v13  ;;  %v3011_v35 = vsel %vm1370_vm10, %v3009_v3, %v3010_v61  ;;  %v2294_v47 = vrot.slane %v2241_v5, 1  ;;  %v2414_v50 = vrot.slane %v2361_v58, 2 }
 0x14c   : > { %3369 = vst.msk [vmem:[%s4832_s20 + $0x4c] sm:$0xf] %vm2066_vm6, %v3074_v10  ;;  %v3165_v42 = vsel %vm6456_vm7, %v3147_v53, 0.0  ;;  %v2819_v28 = vadd.f32 %v2803_v8, %v2760_v63  ;;  %v2660_v22 = vmul.f32 %v2484_v48, %v4726_v40  ;;  %v2593_v23 = vrot.slane %v2540_v39, 1  ;;  %v1456_v63 = vld [vmem:[#allocation2 + $0x68] sm:$0xff]  ;;  %vm6467_vm7 = vmmov %vm6452_vm0 }
 0x14d   : > { %v3166_v7 = vadd.f32 %v3165_v42, %v3164_v21  ;;  %v2295_v13 = vsel %vm1248_vm11, %v2292_v24, %v2294_v47  ;;  %v2415_v38 = vsel %vm1370_vm10, %v2412_v32, %v2414_v50  ;;  %v2804_v59 = vmul.f32 %v5467_v29, %v4752_v43 }
 0x14e   : > { %v2342_v2 = vadd.f32 %v2295_v13, %v2206_v49  ;;  %v2939_v62 = vadd.f32 %v2891_v36, %v2819_v28  ;;  %v2713_v33 = vrot.slane %v2660_v22, 2  ;;  %v2839_v18 = vmul.f32 %v2783_v37, %v4761_v57  ;;  %v5511_v36 = vld [vmem:[#allocation2 + $0x60] sm:$0xff]  ;;  %v5530_v22 = vld [vmem:[#allocation2 + $0x78] sm:$0xff] }
 0x14f   : > { %v2959_v21 = vmul.f32 %v2783_v37, %v4791_v19  ;;  %v2594_v60 = vsel %vm1248_vm11, %v2591_v46, %v2593_v23  ;;  %v1173_v24 = vmul.f32 %v4565_v51, %v1151_v45  ;;  %v1209_v30 = vmul.f32 %v4602_v16, %v1151_v45 }
 0x150   : > { %v2462_v8 = vadd.f32 %v2415_v38, %v2342_v2  ;;  %v3059_v55 = vadd.f32 %v3011_v35, %v2939_v62  ;;  %v2714_v32 = vsel %vm1370_vm10, %v2711_v14, %v2713_v33  ;;  %v2892_v4 = vrot.slane %v2839_v18, 1  ;;  %v5537_v18 = vld [vmem:[#allocation2 + $0x80] sm:$0xff] }
 0x151   : > { %v3012_v12 = vrot.slane %v2959_v21, 2  ;;  %v5504_v3 = vmul.f32 %v3619_v34, %v4602_v16  ;;  %v1264_v49 = vrot.slane %v1209_v30, 1  ;;  %v1331_v6 = vmul.f32 %v4617_v26, %v1151_v45  ;;  %v1153_v30 = vld [vmem:[#allocation2 + $0x58] sm:$0x3] }
 0x152   : > { %v2521_v27 = vadd.f32 %v2505_v1, %v2462_v8  ;;  %v3075_v5 = vpack.c.bf16 %v3059_v55, %v3059_v55  ;;  %v3113_v46 = vsel %vm6457_vm15, %v3059_v55, 0.0  ;;  %v3148_v58 = vmul.f32 %v3059_v55, %v3059_v55  ;;  %vm6468_vm15 = vmmov %vm6452_vm0 }
 0x153   : > { %v2893_v48 = vsel %vm1248_vm11, %v2890_v17, %v2892_v4  ;;  %v3114_v10 = vadd.f32 %v3113_v46, %v3112_v54  ;;  %v3013_v14 = vsel %vm1370_vm10, %v3010_v61, %v3012_v12  ;;  %v1265_v53 = vrot.slane %v5504_v3, 1 }
 0x154   : > { %v2641_v44 = vadd.f32 %v2594_v60, %v2521_v27  ;;  %3370 = vst.msk [vmem:[%s4832_s20 + $0x50] sm:$0xf] %vm2066_vm6, %v3075_v5  ;;  %v3167_v35 = vsel %vm6458_vm14, %v3148_v58, 0.0  ;;  %v5517_v47 = vmul.f32 %v3619_v34, %v4617_v26  ;;  %v1386_v42 = vrot.slane %v1331_v6, 2  ;;  %vm6469_vm14 = vmmov %vm6452_vm0 }
 0x155   : > { %v1477_v17 = vmul.f32 %v4670_v56, %v5511_v36  ;;  %v3168_v54 = vadd.f32 %v3167_v35, %v3166_v7  ;;  %v1266_v61 = vsel %vm1248_vm11, %v1264_v49, %v1265_v53  ;;  %v1513_v1 = vmul.f32 %v4681_v31, %v5511_v36 }
 0x156   : > { %v2761_v50 = vadd.f32 %v2714_v32, %v2641_v44  ;;  %v1311_v39 = vadd.f32 %v1266_v61, %v1173_v24  ;;  %v1387_v37 = vrot.slane %v5517_v47, 2  ;;  %v5526_v28 = vmul.f32 %v4681_v31, %v1456_v63 }
 0x157   : > { %v1634_v13 = vmul.f32 %v4726_v40, %v5511_v36  ;;  %v1567_v2 = vrot.slane %v1513_v1, 1  ;;  %v1635_v7 = vmul.f32 %v4726_v40, %v1456_v63  ;;  %v1779_v38 = vmul.f32 %v4752_v43, %v5530_v22 }
 0x158   : > { %v2820_v45 = vadd.f32 %v2804_v59, %v2761_v50  ;;  %v1388_v23 = vsel %vm1370_vm10, %v1386_v42, %v1387_v37  ;;  %v1568_v62 = vrot.slane %v5526_v28, 1  ;;  %v1815_v21 = vmul.f32 %v4761_v57, %v5530_v22  ;;  %v1457_v50 = vld [vmem:[#allocation2 + $0x70] sm:$0x3] }
 0x159   : > { %v1688_v33 = vrot.slane %v1634_v13, 2  ;;  %v1433_v60 = vadd.f32 %v1388_v23, %v1311_v39  ;;  %v1689_v24 = vrot.slane %v1635_v7, 2  ;;  %v1816_v59 = vmul.f32 %v4761_v57, %v5537_v18 }
 0x15a   : > { %v2940_v8 = vadd.f32 %v2893_v48, %v2820_v45  ;;  %v1569_v55 = vsel %vm1248_vm11, %v1567_v2, %v1568_v62  ;;  %v1869_v32 = vrot.slane %v1815_v21, 1  ;;  %v1936_v4 = vmul.f32 %v4791_v19, %v5530_v22  ;;  %v1759_v45 = vld [vmem:[#allocation2 + $0x88] sm:$0x3] }
 0x15b   : > { %v1937_v12 = vmul.f32 %v4791_v19, %v5537_v18  ;;  %v1493_v3 = vadd.f32 %v1477_v17, %v1433_v60  ;;  %v1690_v49 = vsel %vm1370_vm10, %v1688_v33, %v1689_v24  ;;  %v1870_v6 = vrot.slane %v1816_v59, 1  ;;  %v5568_v59 = vld [vmem:[#allocation2 + $0x110] sm:$0xff] }
 0x15c   : > { %v3060_v27 = vadd.f32 %v3013_v14, %v2940_v8  ;;  %v1990_v5 = vrot.slane %v1936_v4, 2  ;;  %v1174_v58 = vmul.f32 %v3619_v34, %v4565_v51  ;;  %v1211_v48 = vmul.f32 %v4602_v16, %v1153_v30 }
 0x15d   : > { %v1991_v46 = vrot.slane %v1937_v12, 2  ;;  %v1614_v42 = vadd.f32 %v1569_v55, %v1493_v3  ;;  %v1871_v14 = vsel %vm1248_vm11, %v1869_v32, %v1870_v6  ;;  %v1333_v28 = vmul.f32 %v4617_v26, %v1153_v30 }
 0x15e   : > { %v3076_v44 = vpack.c.bf16 %v3060_v27, %v3060_v27  ;;  %v3115_v35 = vsel %vm6459_vm5, %v3060_v27, 0.0  ;;  %v3149_v47 = vmul.f32 %v3060_v27, %v3060_v27  ;;  %v1267_v1 = vrot.slane %v1211_v48, 1  ;;  %vm6470_vm5 = vmmov %vm6452_vm0 }
 0x15f   : > { %v5552_v61 = vadd.f32 %v3115_v35, %v3114_v10  ;;  %v1992_v17 = vsel %vm1370_vm10, %v1990_v5, %v1991_v46  ;;  %v1735_v34 = vadd.f32 %v1690_v49, %v1614_v42  ;;  %v1478_v13 = vmul.f32 %v4670_v56, %v1456_v63 }
 0x160   : > { %3371 = vst.msk [vmem:[%s4832_s20 + $0x54] sm:$0xf] %vm2066_vm6, %v3076_v44  ;;  %v3169_v39 = vsel %vm6460_vm1, %v3149_v47, 0.0  ;;  %v1268_v10 = vsel %vm1248_vm11, %v1265_v53, %v1267_v1  ;;  %v1515_v7 = vmul.f32 %v4681_v31, %v1457_v50  ;;  %v1636_v23 = vmul.f32 %v4726_v40, %v1457_v50  ;;  %vm6471_vm1 = vmmov %vm6452_vm0 }
 0x161   : > { %v5561_v2 = vadd.f32 %v3169_v39, %v3168_v54  ;;  %v1795_v33 = vadd.f32 %v1779_v38, %v1735_v34  ;;  %v1312_v21 = vadd.f32 %v1268_v10, %v1174_v58  ;;  %v1389_v8 = vrot.slane %v1333_v28, 2 }
 0x162   : > { %v1780_v60 = vmul.f32 %v4752_v43, %v5537_v18  ;;  %v1570_v30 = vrot.slane %v1515_v7, 1  ;;  %v1691_v55 = vrot.slane %v1636_v23, 2  ;;  %v1817_v63 = vmul.f32 %v4761_v57, %v1759_v45 }
 0x163   : > { %v1938_v54 = vmul.f32 %v4791_v19, %v1759_v45  ;;  %v1916_v32 = vadd.f32 %v1871_v14, %v1795_v33  ;;  %v1390_v53 = vsel %vm1370_vm10, %v1387_v37, %v1389_v8  ;;  %v2207_v4 = vmul.f32 %v5381_v41, %v4565_v51  ;;  %v5609_v8 = vld [vmem:[#allocation2 + $0x138] sm:$0xff] }
 0x164   : > { %v2242_v38 = vmul.f32 %v5381_v41, %v4602_v16  ;;  %v1434_v12 = vadd.f32 %v1390_v53, %v1312_v21  ;;  %v1571_v27 = vsel %vm1248_vm11, %v1568_v62, %v1570_v30  ;;  %v1692_v3 = vsel %vm1370_vm10, %v1689_v24, %v1691_v55 }
 0x165   : > { %v1872_v49 = vrot.slane %v1817_v63, 1  ;;  %v2037_v5 = vadd.f32 %v1992_v17, %v1916_v32  ;;  %v1993_v58 = vrot.slane %v1938_v54, 2  ;;  %v5581_v48 = vmul.f32 %v5568_v59, %v4602_v16  ;;  %v5613_v63 = vld [vmem:[#allocation2 + $0x140] sm:$0xff] }
 0x166   : > { %v2296_v37 = vrot.slane %v2242_v38, 1  ;;  %v1494_v44 = vadd.f32 %v1478_v13, %v1434_v12  ;;  %v2362_v47 = vmul.f32 %v5381_v41, %v4617_v26  ;;  %v5588_v62 = vmul.f32 %v5568_v59, %v4617_v26 }
 0x167   : > { %v1873_v35 = vsel %vm1248_vm11, %v1870_v6, %v1872_v49  ;;  %v2053_v24 = vpack.c.bf16 %v2037_v5, %v2037_v5  ;;  %v2094_v42 = vsel %vm6461_vm3, %v2037_v5, 0.0  ;;  %v2127_v50 = vmul.f32 %v2037_v5, %v2037_v5  ;;  %v2188_v49 = vld [vmem:[#allocation2 + $0x118] sm:$0x3]  ;;  %vm6472_vm3 = vmmov %vm6452_vm0 }
 0x168   : > { %v1994_v14 = vsel %vm1370_vm10, %v1991_v46, %v1993_v58  ;;  %v2095_v17 = vadd.f32 %v2094_v42, %v5157_v25  ;;  %v1615_v1 = vadd.f32 %v1571_v27, %v1494_v44  ;;  %v2297_v39 = vrot.slane %v5581_v48, 1 }
 0x169   : > { %v2416_v34 = vrot.slane %v2362_v47, 2  ;;  %2073 = vst.msk [vmem:[%s4832_s20 + $0x18] sm:$0xf] %vm2066_vm6, %v2053_v24  ;;  %v2148_v41 = vsel %vm6462_vm4, %v2127_v50, 0.0  ;;  %v2417_v6 = vrot.slane %v5588_v62, 2  ;;  %v2506_v28 = vmul.f32 %v5459_v11, %v4670_v56  ;;  %vm6473_vm4 = vmmov %vm6452_vm0 }
 0x16a   : > { %v2541_v13 = vmul.f32 %v5459_v11, %v4681_v31  ;;  %v2149_v46 = vadd.f32 %v2148_v41, %v5169_v9  ;;  %v1736_v45 = vadd.f32 %v1692_v3, %v1615_v1  ;;  %v2298_v25 = vsel %vm1248_vm11, %v2296_v37, %v2297_v39 }
 0x16b   : > { %v2542_v10 = vmul.f32 %v5467_v29, %v4681_v31  ;;  %v2343_v7 = vadd.f32 %v2298_v25, %v2207_v4  ;;  %v2418_v23 = vsel %vm1370_vm10, %v2416_v34, %v2417_v6  ;;  %v2661_v21 = vmul.f32 %v5459_v11, %v4726_v40  ;;  %v2487_v34 = vld [vmem:[#allocation2 + $0x130] sm:$0x3] }
 0x16c   : > { %v2595_v33 = vrot.slane %v2541_v13, 1  ;;  %v1796_v30 = vadd.f32 %v1780_v60, %v1736_v45  ;;  %v2662_v9 = vmul.f32 %v5467_v29, %v4726_v40  ;;  %v2805_v54 = vmul.f32 %v5609_v8, %v4752_v43 }
 0x16d   : > { %v2596_v55 = vrot.slane %v2542_v10, 1  ;;  %v2463_v32 = vadd.f32 %v2418_v23, %v2343_v7  ;;  %v2715_v53 = vrot.slane %v2661_v21, 2  ;;  %v2840_v4 = vmul.f32 %v5609_v8, %v4761_v57 }
 0x16e   : > { %v5621_v38 = vmul.f32 %v5613_v63, %v4761_v57  ;;  %v1917_v12 = vadd.f32 %v1873_v35, %v1796_v30  ;;  %v2716_v27 = vrot.slane %v2662_v9, 2  ;;  %v2960_v3 = vmul.f32 %v5609_v8, %v4791_v19  ;;  %v2786_v30 = vld [vmem:[#allocation2 + $0x148] sm:$0x3] }
 0x16f   : > { %v2597_v60 = vsel %vm1248_vm11, %v2595_v33, %v2596_v55  ;;  %v2522_v5 = vadd.f32 %v2506_v28, %v2463_v32  ;;  %v2894_v58 = vrot.slane %v2840_v4, 1  ;;  %v2961_v37 = vmul.f32 %v5613_v63, %v4791_v19 }
 0x170   : > { %v2895_v48 = vrot.slane %v5621_v38, 1  ;;  %v2038_v44 = vadd.f32 %v1994_v14, %v1917_v12  ;;  %v2717_v47 = vsel %vm1370_vm10, %v2715_v53, %v2716_v27  ;;  %v3014_v62 = vrot.slane %v2960_v3, 2 }
 0x171   : > { %v2208_v35 = vmul.f32 %v5568_v59, %v4565_v51  ;;  %v2642_v24 = vadd.f32 %v2597_v60, %v2522_v5  ;;  %v3015_v50 = vrot.slane %v2961_v37, 2  ;;  %v2244_v1 = vmul.f32 %v2188_v49, %v4602_v16 }
 0x172   : > { %v2896_v42 = vsel %vm1248_vm11, %v2894_v58, %v2895_v48  ;;  %v2054_v41 = vpack.c.bf16 %v2038_v44, %v2038_v44  ;;  %v2096_v28 = vsel %vm6463_vm9, %v2038_v44, 0.0  ;;  %v2128_v13 = vmul.f32 %v2038_v44, %v2038_v44  ;;  %vm6474_vm9 = vmmov %vm6452_vm0 }
 0x173   : > { %v2364_v14 = vmul.f32 %v2188_v49, %v4617_v26  ;;  %v5636_v45 = vadd.f32 %v2096_v28, %v2095_v17  ;;  %v2762_v25 = vadd.f32 %v2717_v47, %v2642_v24  ;;  %v3016_v10 = vsel %vm1370_vm10, %v3014_v62, %v3015_v50 }
 0x174   : > { %v2299_v7 = vrot.slane %v2244_v1, 1  ;;  %2074 = vst.msk [vmem:[%s4832_s20 + $0x1c] sm:$0xf] %vm2066_vm6, %v2054_v41  ;;  %v2150_v59 = vsel %vm6452_vm0, %v2128_v13, 0.0  ;;  %v2507_v33 = vmul.f32 %v5467_v29, %v4670_v56  ;;  %v2543_v21 = vmul.f32 %v2487_v34, %v4681_v31 }
 0x175   : > { %v2419_v23 = vrot.slane %v2364_v14, 2  ;;  %v5645_v9 = vadd.f32 %v2150_v59, %v2149_v46  ;;  %v2821_v32 = vadd.f32 %v2805_v54, %v2762_v25  ;;  %v2663_v53 = vmul.f32 %v2487_v34, %v4726_v40 }
 0x176   : > { %v2300_v17 = vsel %vm1248_vm11, %v2297_v39, %v2299_v7  ;;  %v2598_v12 = vrot.slane %v2543_v21, 1  ;;  %v2806_v60 = vmul.f32 %v5613_v63, %v4752_v43  ;;  %v2842_v29 = vmul.f32 %v2786_v30, %v4761_v57 }
 0x177   : > { %v2344_v4 = vadd.f32 %v2300_v17, %v2208_v35  ;;  %v2420_v38 = vsel %vm1370_vm10, %v2417_v6, %v2419_v23  ;;  %v2941_v3 = vadd.f32 %v2896_v42, %v2821_v32  ;;  %v2718_v49 = vrot.slane %v2663_v53, 2  ;;  %v3620_v35 = vld [vmem:[#allocation2 + $0x68] sm:$0xff]  ;;  %v5689_v17 = vld [vmem:[#allocation2 + $0x90] sm:$0xff] }
 0x178   : > { %v2962_v5 = vmul.f32 %v2786_v30, %v4791_v19  ;;  %v2599_v54 = vsel %vm1248_vm11, %v2596_v55, %v2598_v12  ;;  %v1175_v39 = vmul.f32 %v5511_v36, %v4565_v51  ;;  %v1212_v58 = vmul.f32 %v5511_v36, %v4602_v16 }
 0x179   : > { %v2464_v46 = vadd.f32 %v2420_v38, %v2344_v4  ;;  %v3061_v6 = vadd.f32 %v3016_v10, %v2941_v3  ;;  %v2719_v37 = vsel %vm1370_vm10, %v2716_v27, %v2718_v49  ;;  %v2897_v44 = vrot.slane %v2842_v29, 1  ;;  %v5697_v29 = vld [vmem:[#allocation2 + $0x98] sm:$0xff] }
 0x17a   : > { %v3017_v47 = vrot.slane %v2962_v5, 2  ;;  %v5661_v24 = vmul.f32 %v3620_v35, %v4602_v16  ;;  %v1269_v42 = vrot.slane %v1212_v58, 1  ;;  %v1334_v55 = vmul.f32 %v5511_v36, %v4617_v26  ;;  %v1156_v58 = vld [vmem:[#allocation2 + $0x70] sm:$0x3] }
 0x17b   : > { %v2523_v62 = vadd.f32 %v2507_v33, %v2464_v46  ;;  %v3077_v1 = vpack.c.bf16 %v3061_v6, %v3061_v6  ;;  %v3117_v34 = vsel %vm6464_vm12, %v3061_v6, 0.0  ;;  %v3150_v41 = vmul.f32 %v3061_v6, %v3061_v6  ;;  %vm6475_vm12 = vmmov %vm6452_vm0 }
 0x17c   : > { %v2898_v28 = vsel %vm1248_vm11, %v2895_v48, %v2897_v44  ;;  %v3118_v27 = vadd.f32 %v3117_v34, %v5552_v61  ;;  %v3018_v14 = vsel %vm1370_vm10, %v3015_v50, %v3017_v47  ;;  %v1270_v25 = vrot.slane %v5661_v24, 1 }
 0x17d   : > { %v2643_v13 = vadd.f32 %v2599_v54, %v2523_v62  ;;  %3372 = vst.msk [vmem:[%s4832_s20 + $0x58] sm:$0xf] %vm2066_vm6, %v3077_v1  ;;  %v3171_v10 = vsel %vm6465_vm8, %v3150_v41, 0.0  ;;  %v5674_v7 = vmul.f32 %v3620_v35, %v4617_v26  ;;  %v1391_v36 = vrot.slane %v1334_v55, 2  ;;  %vm6476_vm8 = vmmov %vm6452_vm0 }
 0x17e   : > { %v1479_v59 = vmul.f32 %v5530_v22, %v4670_v56  ;;  %v3172_v48 = vadd.f32 %v3171_v10, %v5561_v2  ;;  %v1271_v61 = vsel %vm1248_vm11, %v1269_v42, %v1270_v25  ;;  %v1516_v50 = vmul.f32 %v5530_v22, %v4681_v31 }
 0x17f   : > { %v2763_v23 = vadd.f32 %v2719_v37, %v2643_v13  ;;  %v1313_v33 = vadd.f32 %v1271_v61, %v1175_v39  ;;  %v1392_v21 = vrot.slane %v5674_v7, 2  ;;  %v5685_v30 = vmul.f32 %v5537_v18, %v4681_v31 }
 0x180   : > { %v1637_v32 = vmul.f32 %v5530_v22, %v4726_v40  ;;  %v1572_v2 = vrot.slane %v1516_v50, 1  ;;  %v1638_v4 = vmul.f32 %v5537_v18, %v4726_v40  ;;  %v1781_v38 = vmul.f32 %v4752_v43, %v5689_v17 }
 0x181   : > { %v2822_v53 = vadd.f32 %v2806_v60, %v2763_v23  ;;  %v1393_v12 = vsel %vm1370_vm10, %v1391_v36, %v1392_v21  ;;  %v1573_v3 = vrot.slane %v5685_v30, 1  ;;  %v1818_v5 = vmul.f32 %v4761_v57, %v5689_v17  ;;  %v1460_v23 = vld [vmem:[#allocation2 + $0x88] sm:$0x3] }
 0x182   : > { %v1693_v49 = vrot.slane %v1637_v32, 2  ;;  %v1435_v54 = vadd.f32 %v1393_v12, %v1313_v33  ;;  %v1694_v60 = vrot.slane %v1638_v4, 2  ;;  %v1819_v39 = vmul.f32 %v4761_v57, %v5697_v29 }
 0x183   : > { %v2942_v46 = vadd.f32 %v2898_v28, %v2822_v53  ;;  %v1574_v6 = vsel %vm1248_vm11, %v1572_v2, %v1573_v3  ;;  %v1874_v37 = vrot.slane %v1818_v5, 1  ;;  %v1939_v44 = vmul.f32 %v4791_v19, %v5689_v17  ;;  %v1762_v53 = vld [vmem:[#allocation2 + $0xa0] sm:$0x3] }
 0x184   : > { %v1940_v47 = vmul.f32 %v4791_v19, %v5697_v29  ;;  %v1495_v24 = vadd.f32 %v1479_v59, %v1435_v54  ;;  %v1695_v42 = vsel %vm1370_vm10, %v1693_v49, %v1694_v60  ;;  %v1875_v55 = vrot.slane %v1819_v39, 1  ;;  %v5729_v39 = vld [vmem:[#allocation2 + $0x128] sm:$0xff] }
 0x185   : > { %v3062_v62 = vadd.f32 %v3018_v14, %v2942_v46  ;;  %v1995_v1 = vrot.slane %v1939_v44, 2  ;;  %v1176_v41 = vmul.f32 %v3620_v35, %v4565_v51  ;;  %v1214_v28 = vmul.f32 %v4602_v16, %v1156_v58 }
 0x186   : > { %v1996_v34 = vrot.slane %v1940_v47, 2  ;;  %v1616_v36 = vadd.f32 %v1574_v6, %v1495_v24  ;;  %v1876_v14 = vsel %vm1248_vm11, %v1874_v37, %v1875_v55  ;;  %v1336_v30 = vmul.f32 %v4617_v26, %v1156_v58 }
 0x187   : > { %v3078_v13 = vpack.c.bf16 %v3062_v62, %v3062_v62  ;;  %v3119_v10 = vsel %vm6466_vm13, %v3062_v62, 0.0  ;;  %v3151_v7 = vmul.f32 %v3062_v62, %v3062_v62  ;;  %v1272_v50 = vrot.slane %v1214_v28, 1  ;;  %vm6477_vm13 = vmmov %vm6452_vm0 }
 0x188   : > { %v5712_v61 = vadd.f32 %v3119_v10, %v3118_v27  ;;  %v1997_v59 = vsel %vm1370_vm10, %v1995_v1, %v1996_v34  ;;  %v1737_v35 = vadd.f32 %v1695_v42, %v1616_v36  ;;  %v1480_v32 = vmul.f32 %v5537_v18, %v4670_v56 }
 0x189   : > { %3373 = vst.msk [vmem:[%s4832_s20 + $0x5c] sm:$0xf] %vm2066_vm6, %v3078_v13  ;;  %v3173_v33 = vsel %vm6467_vm7, %v3151_v7, 0.0  ;;  %v1273_v27 = vsel %vm1248_vm11, %v1270_v25, %v1272_v50  ;;  %v1518_v4 = vmul.f32 %v4681_v31, %v1460_v23  ;;  %v1639_v12 = vmul.f32 %v4726_v40, %v1460_v23  ;;  %vm6478_vm7 = vmmov %vm6452_vm0 }
 0x18a   : > { %v5722_v2 = vadd.f32 %v3173_v33, %v3172_v48  ;;  %v1797_v49 = vadd.f32 %v1781_v38, %v1737_v35  ;;  %v1314_v5 = vadd.f32 %v1273_v27, %v1176_v41  ;;  %v1394_v46 = vrot.slane %v1336_v30, 2 }
 0x18b   : > { %v1782_v54 = vmul.f32 %v4752_v43, %v5697_v29  ;;  %v1575_v58 = vrot.slane %v1518_v4, 1  ;;  %v1696_v6 = vrot.slane %v1639_v12, 2  ;;  %v1820_v18 = vmul.f32 %v4761_v57, %v1762_v53 }
 0x18c   : > { %v1941_v48 = vmul.f32 %v4791_v19, %v1762_v53  ;;  %v1918_v37 = vadd.f32 %v1876_v14, %v1797_v49  ;;  %v1395_v25 = vsel %vm1370_vm10, %v1392_v21, %v1394_v46  ;;  %v2209_v44 = vmul.f32 %v5459_v11, %v4565_v51  ;;  %v5772_v46 = vld [vmem:[#allocation2 + $0x150] sm:$0xff] }
 0x18d   : > { %v2245_v38 = vmul.f32 %v5459_v11, %v4602_v16  ;;  %v1436_v47 = vadd.f32 %v1395_v25, %v1314_v5  ;;  %v1576_v62 = vsel %vm1248_vm11, %v1573_v3, %v1575_v58  ;;  %v1697_v24 = vsel %vm1370_vm10, %v1694_v60, %v1696_v6 }
 0x18e   : > { %v1877_v42 = vrot.slane %v1820_v18, 1  ;;  %v2039_v1 = vadd.f32 %v1997_v59, %v1918_v37  ;;  %v1998_v41 = vrot.slane %v1941_v48, 2  ;;  %v5742_v28 = vmul.f32 %v5729_v39, %v4602_v16  ;;  %v5777_v18 = vld [vmem:[#allocation2 + $0x158] sm:$0xff] }
 0x18f   : > { %v2301_v21 = vrot.slane %v2245_v38, 1  ;;  %v1496_v13 = vadd.f32 %v1480_v32, %v1436_v47  ;;  %v2365_v7 = vmul.f32 %v5459_v11, %v4617_v26  ;;  %v5749_v3 = vmul.f32 %v5729_v39, %v4617_v26 }
 0x190   : > { %v1878_v10 = vsel %vm1248_vm11, %v1875_v55, %v1877_v42  ;;  %v2055_v60 = vpack.c.bf16 %v2039_v1, %v2039_v1  ;;  %v2098_v36 = vsel %vm6468_vm15, %v2039_v1, 0.0  ;;  %v2129_v23 = vmul.f32 %v2039_v1, %v2039_v1  ;;  %v2191_v42 = vld [vmem:[#allocation2 + $0x130] sm:$0x3]  ;;  %vm6479_vm15 = vmmov %vm6452_vm0 }
 0x191   : > { %v1999_v14 = vsel %vm1370_vm10, %v1996_v34, %v1998_v41  ;;  %v2099_v59 = vadd.f32 %v2098_v36, %v5636_v45  ;;  %v1617_v50 = vadd.f32 %v1576_v62, %v1496_v13  ;;  %v2302_v33 = vrot.slane %v5742_v28, 1 }
 0x192   : > { %v2421_v35 = vrot.slane %v2365_v7, 2  ;;  %2075 = vst.msk [vmem:[%s4832_s20 + $0x20] sm:$0xf] %vm2066_vm6, %v2055_v60  ;;  %v2152_v11 = vsel %vm6469_vm14, %v2129_v23, 0.0  ;;  %v2422_v55 = vrot.slane %v5749_v3, 2  ;;  %v2508_v30 = vmul.f32 %v5609_v8, %v4670_v56  ;;  %vm6480_vm14 = vmmov %vm6452_vm0 }
 0x193   : > { %v2544_v32 = vmul.f32 %v5609_v8, %v4681_v31  ;;  %v2153_v34 = vadd.f32 %v2152_v11, %v5645_v9  ;;  %v1738_v53 = vadd.f32 %v1697_v24, %v1617_v50  ;;  %v2303_v45 = vsel %vm1248_vm11, %v2301_v21, %v2302_v33 }
 0x194   : > { %v5767_v27 = vmul.f32 %v5613_v63, %v4681_v31  ;;  %v2345_v4 = vadd.f32 %v2303_v45, %v2209_v44  ;;  %v2423_v12 = vsel %vm1370_vm10, %v2421_v35, %v2422_v55  ;;  %v2664_v5 = vmul.f32 %v5609_v8, %v4726_v40  ;;  %v2490_v35 = vld [vmem:[#allocation2 + $0x148] sm:$0x3] }
 0x195   : > { %v2600_v49 = vrot.slane %v2544_v32, 1  ;;  %v1798_v58 = vadd.f32 %v1782_v54, %v1738_v53  ;;  %v2665_v9 = vmul.f32 %v5613_v63, %v4726_v40  ;;  %v2807_v48 = vmul.f32 %v5772_v46, %v4752_v43 }
 0x196   : > { %v2601_v6 = vrot.slane %v5767_v27, 1  ;;  %v2465_v37 = vadd.f32 %v2423_v12, %v2345_v4  ;;  %v2720_v25 = vrot.slane %v2664_v5, 2  ;;  %v2843_v44 = vmul.f32 %v5772_v46, %v4761_v57 }
 0x197   : > { %v5785_v38 = vmul.f32 %v5777_v18, %v4761_v57  ;;  %v1919_v54 = vadd.f32 %v1878_v10, %v1798_v58  ;;  %v2721_v62 = vrot.slane %v2665_v9, 2  ;;  %v2963_v24 = vmul.f32 %v5772_v46, %v4791_v19  ;;  %v2789_v58 = vld [vmem:[#allocation2 + $0x160] sm:$0x3] }
 0x198   : > { %v2602_v47 = vsel %vm1248_vm11, %v2600_v49, %v2601_v6  ;;  %v2524_v1 = vadd.f32 %v2508_v30, %v2465_v37  ;;  %v2899_v41 = vrot.slane %v2843_v44, 1  ;;  %v2964_v21 = vmul.f32 %v5777_v18, %v4791_v19 }
 0x199   : > { %v2900_v28 = vrot.slane %v5785_v38, 1  ;;  %v2040_v13 = vadd.f32 %v1999_v14, %v1919_v54  ;;  %v2722_v7 = vsel %vm1370_vm10, %v2720_v25, %v2721_v62  ;;  %v3019_v3 = vrot.slane %v2963_v24, 2  ;;  %v5816_v24 = vld [vmem:[#allocation2 + $0x80] sm:$0xff] }
 0x19a   : > { %v2210_v10 = vmul.f32 %v5729_v39, %v4565_v51  ;;  %v2644_v60 = vadd.f32 %v2602_v47, %v2524_v1  ;;  %v3020_v23 = vrot.slane %v2964_v21, 2  ;;  %v2247_v50 = vmul.f32 %v2191_v42, %v4602_v16 }
 0x19b   : > { %v2901_v36 = vsel %vm1248_vm11, %v2899_v41, %v2900_v28  ;;  %v2056_v11 = vpack.c.bf16 %v2040_v13, %v2040_v13  ;;  %v2100_v30 = vsel %vm6470_vm5, %v2040_v13, 0.0  ;;  %v2130_v32 = vmul.f32 %v2040_v13, %v2040_v13  ;;  %vm6481_vm5 = vmmov %vm6452_vm0 }
 0x19c   : > { %v2367_v14 = vmul.f32 %v2191_v42, %v4617_v26  ;;  %v5800_v53 = vadd.f32 %v2100_v30, %v2099_v59  ;;  %v2764_v45 = vadd.f32 %v2722_v7, %v2644_v60  ;;  %v3021_v27 = vsel %vm1370_vm10, %v3019_v3, %v3020_v23 }
 0x19d   : > { %v2304_v4 = vrot.slane %v2247_v50, 1  ;;  %2076 = vst.msk [vmem:[%s4832_s20 + $0x24] sm:$0xf] %vm2066_vm6, %v2056_v11  ;;  %v2154_v39 = vsel %vm6471_vm1, %v2130_v32, 0.0  ;;  %v2509_v49 = vmul.f32 %v5613_v63, %v4670_v56  ;;  %v2546_v5 = vmul.f32 %v2490_v35, %v4681_v31  ;;  %vm6482_vm1 = vmmov %vm6452_vm0 }
 0x19e   : > { %v2424_v12 = vrot.slane %v2367_v14, 2  ;;  %v5809_v9 = vadd.f32 %v2154_v39, %v2153_v34  ;;  %v2823_v37 = vadd.f32 %v2807_v48, %v2764_v45  ;;  %v2666_v25 = vmul.f32 %v2490_v35, %v4726_v40 }
 0x19f   : > { %v2305_v59 = vsel %vm1248_vm11, %v2302_v33, %v2304_v4  ;;  %v2603_v54 = vrot.slane %v2546_v5, 1  ;;  %v2808_v47 = vmul.f32 %v5777_v18, %v4752_v43  ;;  %v2845_v1 = vmul.f32 %v2789_v58, %v4761_v57 }
 0x1a0   : > { %v2346_v44 = vadd.f32 %v2305_v59, %v2210_v10  ;;  %v2425_v38 = vsel %vm1370_vm10, %v2422_v55, %v2424_v12  ;;  %v2943_v63 = vadd.f32 %v2901_v36, %v2823_v37  ;;  %v2723_v42 = vrot.slane %v2666_v25, 2  ;;  %v1764_v25 = vld [vmem:[#allocation2 + $0xb0] sm:$0xff] }
 0x1a1   : > { %v2965_v34 = vmul.f32 %v2789_v58, %v4791_v19  ;;  %v2604_v33 = vsel %vm1248_vm11, %v2601_v6, %v2603_v54  ;;  %v1177_v41 = vmul.f32 %v5530_v22, %v4565_v51  ;;  %v1215_v55 = vmul.f32 %v5530_v22, %v4602_v16 }
 0x1a2   : > { %v2466_v48 = vadd.f32 %v2425_v38, %v2346_v44  ;;  %v3063_v21 = vadd.f32 %v3021_v27, %v2943_v63  ;;  %v2724_v13 = vsel %vm1370_vm10, %v2721_v62, %v2723_v42  ;;  %v2902_v7 = vrot.slane %v2845_v1, 1 }
 0x1a3   : > { %v3022_v3 = vrot.slane %v2965_v34, 2  ;;  %v5828_v60 = vmul.f32 %v4602_v16, %v5816_v24  ;;  %v1274_v36 = vrot.slane %v1215_v55, 1  ;;  %v1337_v6 = vmul.f32 %v5530_v22, %v4617_v26 }
 0x1a4   : > { %v2525_v10 = vadd.f32 %v2509_v49, %v2466_v48  ;;  %v3079_v50 = vpack.c.bf16 %v3063_v21, %v3063_v21  ;;  %v3121_v35 = vsel %vm6472_vm3, %v3063_v21, 0.0  ;;  %v3152_v11 = vmul.f32 %v3063_v21, %v3063_v21  ;;  %vm6483_vm3 = vmmov %vm6452_vm0 }
 0x1a5   : > { %v2903_v30 = vsel %vm1248_vm11, %v2900_v28, %v2902_v7  ;;  %v3122_v32 = vadd.f32 %v3121_v35, %v5712_v61  ;;  %v3023_v14 = vsel %vm1370_vm10, %v3020_v23, %v3022_v3  ;;  %v1275_v45 = vrot.slane %v5828_v60, 1  ;;  %v1763_v28 = vld [vmem:[#allocation2 + $0xa8] sm:$0xff] }
 0x1a6   : > { %v2645_v62 = vadd.f32 %v2604_v33, %v2525_v10  ;;  %3374 = vst.msk [vmem:[%s4832_s20 + $0x60] sm:$0xf] %vm2066_vm6, %v3079_v50  ;;  %v3175_v27 = vsel %vm6473_vm4, %v3152_v11, 0.0  ;;  %v5842_v22 = vmul.f32 %v4617_v26, %v5816_v24  ;;  %v1396_v4 = vrot.slane %v1337_v6, 2  ;;  %vm6484_vm4 = vmmov %vm6452_vm0 }
 0x1a7   : > { %v1481_v39 = vmul.f32 %v5689_v17, %v4670_v56  ;;  %v3176_v61 = vadd.f32 %v3175_v27, %v5722_v2  ;;  %v1276_v23 = vsel %vm1248_vm11, %v1274_v36, %v1275_v45  ;;  %v1519_v49 = vmul.f32 %v5689_v17, %v4681_v31 }
 0x1a8   : > { %v2765_v12 = vadd.f32 %v2724_v13, %v2645_v62  ;;  %v1315_v5 = vadd.f32 %v1276_v23, %v1177_v41  ;;  %v1397_v58 = vrot.slane %v5842_v22, 2  ;;  %v1520_v37 = vmul.f32 %v5697_v29, %v4681_v31 }
 0x1a9   : > { %v1640_v59 = vmul.f32 %v5689_v17, %v4726_v40  ;;  %v1577_v38 = vrot.slane %v1519_v49, 1  ;;  %v1641_v2 = vmul.f32 %v5697_v29, %v4726_v40  ;;  %v1783_v54 = vmul.f32 %v4752_v43, %v1763_v28  ;;  %v1159_v17 = vld [vmem:[#allocation2 + $0x88] sm:$0x3] }
 0x1aa   : > { %v2824_v44 = vadd.f32 %v2808_v47, %v2765_v12  ;;  %v1398_v63 = vsel %vm1370_vm10, %v1396_v4, %v1397_v58  ;;  %v1578_v42 = vrot.slane %v1520_v37, 1  ;;  %v1821_v34 = vmul.f32 %v4761_v57, %v1763_v28  ;;  %v1463_v4 = vld [vmem:[#allocation2 + $0xa0] sm:$0x3] }
 0x1ab   : > { %v1698_v1 = vrot.slane %v1640_v59, 2  ;;  %v1437_v33 = vadd.f32 %v1398_v63, %v1315_v5  ;;  %v1699_v41 = vrot.slane %v1641_v2, 2  ;;  %v1822_v55 = vmul.f32 %v4761_v57, %v1764_v25  ;;  %v1765_v5 = vld [vmem:[#allocation2 + $0xb8] sm:$0x3] }
 0x1ac   : > { %v2944_v48 = vadd.f32 %v2903_v30, %v2824_v44  ;;  %v1579_v47 = vsel %vm1248_vm11, %v1577_v38, %v1578_v42  ;;  %v1879_v21 = vrot.slane %v1821_v34, 1  ;;  %v1942_v13 = vmul.f32 %v4791_v19, %v1763_v28  ;;  %v5889_v34 = vld [vmem:[#allocation2 + $0x140] sm:$0xff] }
 0x1ad   : > { %v5864_v7 = vmul.f32 %v4791_v19, %v1764_v25  ;;  %v1497_v10 = vadd.f32 %v1481_v39, %v1437_v33  ;;  %v1700_v60 = vsel %vm1370_vm10, %v1698_v1, %v1699_v41  ;;  %v1880_v36 = vrot.slane %v1822_v55, 1 }
 0x1ae   : > { %v3064_v3 = vadd.f32 %v3023_v14, %v2944_v48  ;;  %v2000_v6 = vrot.slane %v1942_v13, 2  ;;  %v1178_v35 = vmul.f32 %v4565_v51, %v5816_v24  ;;  %v1217_v11 = vmul.f32 %v4602_v16, %v1159_v17 }
 0x1af   : > { %v2001_v50 = vrot.slane %v5864_v7, 2  ;;  %v1618_v22 = vadd.f32 %v1579_v47, %v1497_v10  ;;  %v1881_v39 = vsel %vm1248_vm11, %v1879_v21, %v1880_v36  ;;  %v1339_v49 = vmul.f32 %v4617_v26, %v1159_v17 }
 0x1b0   : > { %v3080_v30 = vpack.c.bf16 %v3064_v3, %v3064_v3  ;;  %v3123_v62 = vsel %vm6474_vm9, %v3064_v3, 0.0  ;;  %v3153_v27 = vmul.f32 %v3064_v3, %v3064_v3  ;;  %v1277_v28 = vrot.slane %v1217_v11, 1  ;;  %vm6485_vm9 = vmmov %vm6452_vm0 }
 0x1b1   : > { %v5872_v14 = vadd.f32 %v3123_v62, %v3122_v32  ;;  %v1739_v23 = vadd.f32 %v1700_v60, %v1618_v22  ;;  %v2002_v24 = vsel %vm1370_vm10, %v2000_v6, %v2001_v50  ;;  %v1521_v59 = vmul.f32 %v4681_v31, %v1463_v4 }
 0x1b2   : > { %3375 = vst.msk [vmem:[%s4832_s20 + $0x64] sm:$0xf] %vm2066_vm6, %v3080_v30  ;;  %v3177_v12 = vsel %vm6452_vm0, %v3153_v27, 0.0  ;;  %v1278_v32 = vsel %vm1248_vm11, %v1275_v45, %v1277_v28  ;;  %v1642_v44 = vmul.f32 %v4726_v40, %v1463_v4  ;;  %v1399_v63 = vrot.slane %v1339_v49, 2 }
 0x1b3   : > { %v5882_v37 = vadd.f32 %v3177_v12, %v3176_v61  ;;  %v1799_v38 = vadd.f32 %v1783_v54, %v1739_v23  ;;  %v1316_v2 = vadd.f32 %v1278_v32, %v1178_v35  ;;  %v1482_v1 = vmul.f32 %v5697_v29, %v4670_v56  ;;  %v5931_v32 = vld [vmem:[#allocation2 + $0x168] sm:$0xff] }
 0x1b4   : > { %v1580_v48 = vrot.slane %v1521_v59, 1  ;;  %v1701_v33 = vrot.slane %v1642_v44, 2  ;;  %v1823_v55 = vmul.f32 %v4761_v57, %v1765_v5  ;;  %v1944_v61 = vmul.f32 %v4791_v19, %v1765_v5  ;;  %v5933_v59 = vld [vmem:[#allocation2 + $0x170] sm:$0xff] }
 0x1b5   : > { %v1920_v17 = vadd.f32 %v1881_v39, %v1799_v38  ;;  %v1400_v45 = vsel %vm1370_vm10, %v1397_v58, %v1399_v63  ;;  %v1784_v47 = vmul.f32 %v4752_v43, %v1764_v25  ;;  %v2248_v54 = vmul.f32 %v5609_v8, %v4602_v16 }
 0x1b6   : > { %v1438_v21 = vadd.f32 %v1400_v45, %v1316_v2  ;;  %v1581_v13 = vsel %vm1248_vm11, %v1578_v42, %v1580_v48  ;;  %v1882_v29 = vrot.slane %v1823_v55, 1  ;;  %v2211_v3 = vmul.f32 %v5609_v8, %v4565_v51 }
 0x1b7   : > { %v2041_v10 = vadd.f32 %v2002_v24, %v1920_v17  ;;  %v1702_v60 = vsel %vm1370_vm10, %v1699_v41, %v1701_v33  ;;  %v2003_v6 = vrot.slane %v1944_v61, 2  ;;  %v5903_v58 = vmul.f32 %v5889_v34, %v4602_v16 }
 0x1b8   : > { %v1498_v25 = vadd.f32 %v1482_v1, %v1438_v21  ;;  %v2306_v35 = vrot.slane %v2248_v54, 1  ;;  %v2368_v11 = vmul.f32 %v5609_v8, %v4617_v26  ;;  %v5909_v42 = vmul.f32 %v5889_v34, %v4617_v26  ;;  %v2194_v21 = vld [vmem:[#allocation2 + $0x148] sm:$0x3] }
 0x1b9   : > { %v2057_v30 = vpack.c.bf16 %v2041_v10, %v2041_v10  ;;  %v2102_v62 = vsel %vm6475_vm12, %v2041_v10, 0.0  ;;  %v2131_v27 = vmul.f32 %v2041_v10, %v2041_v10  ;;  %v1883_v41 = vsel %vm1248_vm11, %v1880_v36, %v1882_v29  ;;  %vm6486_vm12 = vmmov %vm6452_vm0 }
 0x1ba   : > { %v2103_v22 = vadd.f32 %v2102_v62, %v5800_v53  ;;  %v1619_v4 = vadd.f32 %v1581_v13, %v1498_v25  ;;  %v2307_v39 = vrot.slane %v5903_v58, 1  ;;  %v2426_v28 = vrot.slane %v2368_v11, 2  ;;  %v2493_v62 = vld [vmem:[#allocation2 + $0x160] sm:$0x3] }
 0x1bb   : > { %2077 = vst.msk [vmem:[%s4832_s20 + $0x28] sm:$0xf] %vm2066_vm6, %v2057_v30  ;;  %v2156_v8 = vsel %vm6476_vm8, %v2131_v27, 0.0  ;;  %v2427_v12 = vrot.slane %v5909_v42, 2  ;;  %v2510_v23 = vmul.f32 %v5772_v46, %v4670_v56  ;;  %v2547_v24 = vmul.f32 %v5772_v46, %v4681_v31  ;;  %vm6487_vm8 = vmmov %vm6452_vm0 }
 0x1bc   : > { %v5924_v36 = vadd.f32 %v2156_v8, %v5809_v9  ;;  %v1740_v53 = vadd.f32 %v1702_v60, %v1619_v4  ;;  %v2308_v49 = vsel %vm1248_vm11, %v2306_v35, %v2307_v39  ;;  %v5929_v5 = vmul.f32 %v5777_v18, %v4681_v31 }
 0x1bd   : > { %v2347_v44 = vadd.f32 %v2308_v49, %v2211_v3  ;;  %v2428_v38 = vsel %vm1370_vm10, %v2426_v28, %v2427_v12  ;;  %v2605_v2 = vrot.slane %v2547_v24, 1  ;;  %v2667_v63 = vmul.f32 %v5772_v46, %v4726_v40 }
 0x1be   : > { %v1800_v9 = vadd.f32 %v1784_v47, %v1740_v53  ;;  %v2004_v1 = vsel %vm1370_vm10, %v2001_v50, %v2003_v6  ;;  %v2606_v48 = vrot.slane %v5929_v5, 1  ;;  %v5944_v33 = vmul.f32 %v5777_v18, %v4726_v40 }
 0x1bf   : > { %v2467_v55 = vadd.f32 %v2428_v38, %v2347_v44  ;;  %v2725_v61 = vrot.slane %v2667_v63, 2  ;;  %v2846_v17 = vmul.f32 %v5931_v32, %v4761_v57  ;;  %v5950_v45 = vmul.f32 %v5933_v59, %v4761_v57 }
 0x1c0   : > { %v1921_v47 = vadd.f32 %v1883_v41, %v1800_v9  ;;  %v2607_v7 = vsel %vm1248_vm11, %v2605_v2, %v2606_v48  ;;  %v2726_v50 = vrot.slane %v5944_v33, 2  ;;  %v2966_v54 = vmul.f32 %v5931_v32, %v4791_v19 }
 0x1c1   : > { %v2106_v13 = vsel %vm6477_vm13, %v5183_v20, 0.0  ;;  %v2526_v29 = vadd.f32 %v2510_v23, %v2467_v55  ;;  %v2904_v3 = vrot.slane %v2846_v17, 1  ;;  %v5960_v10 = vmul.f32 %v5933_v59, %v4791_v19  ;;  %vm6488_vm13 = vmmov %vm6452_vm0 }
 0x1c2   : > { %v5962_v60 = vadd.f32 %v2004_v1, %v1921_v47  ;;  %v2727_v6 = vsel %vm1370_vm10, %v2725_v61, %v2726_v50  ;;  %v2905_v58 = vrot.slane %v5950_v45, 1  ;;  %v3024_v25 = vrot.slane %v2966_v54, 2  ;;  %v5993_v61 = vld [vmem:[#allocation2 + $0x158] sm:$0xff] }
 0x1c3   : > { %v2646_v35 = vadd.f32 %v2607_v7, %v2526_v29  ;;  %v2809_v11 = vmul.f32 %v5931_v32, %v4752_v43  ;;  %v3025_v42 = vrot.slane %v5960_v10, 2  ;;  %v2250_v30 = vmul.f32 %v2194_v21, %v4602_v16 }
 0x1c4   : > { %v2058_v27 = vpack.c.bf16 %v5962_v60, %v5962_v60  ;;  %v2104_v41 = vsel %vm6478_vm7, %v5962_v60, 0.0  ;;  %v2212_v4 = vmul.f32 %v5889_v34, %v4565_v51  ;;  %v2370_v28 = vmul.f32 %v2194_v21, %v4617_v26  ;;  %v2792_v34 = vld [vmem:[#allocation2 + $0x178] sm:$0x3]  ;;  %vm6489_vm7 = vmmov %vm6452_vm0 }
 0x1c5   : > { %v2133_v8 = vmul.f32 %v5183_v20, %v5183_v20  ;;  %v2105_v23 = vadd.f32 %v2104_v41, %v2103_v22  ;;  %v2766_v24 = vadd.f32 %v2727_v6, %v2646_v35  ;;  %v2309_v53 = vrot.slane %v2250_v30, 1 }
 0x1c6   : > { %2078 = vst.msk [vmem:[%s4832_s20 + $0x2c] sm:$0xf] %vm2066_vm6, %v2058_v27  ;;  %v2906_v49 = vsel %vm1248_vm11, %v2904_v3, %v2905_v58  ;;  %v3026_v5 = vsel %vm1370_vm10, %v3024_v25, %v3025_v42  ;;  %v2429_v44 = vrot.slane %v2370_v28, 2  ;;  %v2549_v38 = vmul.f32 %v2493_v62, %v4681_v31 }
 0x1c7   : > { %v5986_v2 = vadd.f32 %v2106_v13, %v2105_v23  ;;  %v2825_v63 = vadd.f32 %v2809_v11, %v2766_v24  ;;  %v2310_v20 = vsel %vm1248_vm11, %v2307_v39, %v2309_v53  ;;  %v2511_v22 = vmul.f32 %v5777_v18, %v4670_v56 }
 0x1c8   : > { %v2348_v9 = vadd.f32 %v2310_v20, %v2212_v4  ;;  %v2430_v1 = vsel %vm1370_vm10, %v2427_v12, %v2429_v44  ;;  %v2608_v33 = vrot.slane %v2549_v38, 1  ;;  %v2669_v55 = vmul.f32 %v2493_v62, %v4726_v40 }
 0x1c9   : > { %v2945_v17 = vadd.f32 %v2906_v49, %v2825_v63  ;;  %v2848_v45 = vmul.f32 %v2792_v34, %v4761_v57  ;;  %v5997_v47 = vsel %vm6479_vm15, %v2133_v8, 0.0  ;;  %v2968_v12 = vmul.f32 %v2792_v34, %v4791_v19  ;;  %vm6490_vm15 = vmmov %vm6452_vm0 }
 0x1ca   : > { %v2468_v7 = vadd.f32 %v2430_v1, %v2348_v9  ;;  %v2728_v54 = vrot.slane %v2669_v55, 2  ;;  %v2609_v18 = vsel %vm1248_vm11, %v2606_v48, %v2608_v33  ;;  %v2251_v21 = vmul.f32 %v5772_v46, %v4602_v16 }
 0x1cb   : > { %v5999_v39 = vadd.f32 %v3026_v5, %v2945_v17  ;;  %v2907_v29 = vrot.slane %v2848_v45, 1  ;;  %v6007_v3 = vmul.f32 %v5993_v61, %v4602_v16  ;;  %v2371_v6 = vmul.f32 %v5772_v46, %v4617_v26 }
 0x1cc   : > { %v2527_v13 = vadd.f32 %v2511_v22, %v2468_v7  ;;  %v6013_v25 = vsel %vm6480_vm14, %v5242_v15, 0.0  ;;  %v2134_v48 = vmul.f32 %v5242_v15, %v5242_v15  ;;  %v2729_v11 = vsel %vm1370_vm10, %v2726_v50, %v2728_v54  ;;  %v6052_v22 = vld [vmem:[#allocation2 + $0x188] sm:$0xff]  ;;  %vm6491_vm14 = vmmov %vm6452_vm0 }
 0x1cd   : > { %v3081_v35 = vpack.c.bf16 %v5999_v39, %v5999_v39  ;;  %v2810_v62 = vmul.f32 %v5933_v59, %v4752_v43  ;;  %v2213_v27 = vmul.f32 %v5772_v46, %v4565_v51  ;;  %v2311_v41 = vrot.slane %v2251_v21, 1 }
 0x1ce   : > { %v2647_v30 = vadd.f32 %v2609_v18, %v2527_v13  ;;  %v3027_v4 = vrot.slane %v2968_v12, 2  ;;  %v2312_v28 = vrot.slane %v6007_v3, 1  ;;  %v6029_v15 = vmul.f32 %v5993_v61, %v4617_v26 }
 0x1cf   : > { %3376 = vst.msk [vmem:[%s4832_s20 + $0x68] sm:$0xf] %vm2066_vm6, %v3081_v35  ;;  %v2431_v8 = vrot.slane %v2371_v6, 2  ;;  %v2908_v50 = vsel %vm1248_vm11, %v2905_v58, %v2907_v29  ;;  %v2512_v24 = vmul.f32 %v5931_v32, %v4670_v56  ;;  %v2550_v46 = vmul.f32 %v5931_v32, %v4681_v31  ;;  %v6046_v58 = vld [vmem:[#allocation2 + $0x180] sm:$0xff] }
 0x1d0   : > { %v2767_v23 = vadd.f32 %v2729_v11, %v2647_v30  ;;  %v2313_v53 = vsel %vm1248_vm11, %v2311_v41, %v2312_v28  ;;  %v2432_v49 = vrot.slane %v6029_v15, 2  ;;  %v6042_v5 = vmul.f32 %v5933_v59, %v4681_v31  ;;  %v2197_v35 = vld [vmem:[#allocation2 + $0x160] sm:$0x3]  ;;  %v2496_v15 = vld [vmem:[#allocation2 + $0x178] sm:$0x3] }
 0x1d1   : > { %v2670_v44 = vmul.f32 %v5931_v32, %v4726_v40  ;;  %v2349_v34 = vadd.f32 %v2313_v53, %v2213_v27  ;;  %v2610_v63 = vrot.slane %v2550_v46, 1  ;;  %v6050_v20 = vmul.f32 %v5933_v59, %v4726_v40  ;;  %v2795_v46 = vld [vmem:[#allocation2 + $0x190] sm:$0x3] }
 0x1d2   : > { %v2826_v38 = vadd.f32 %v2810_v62, %v2767_v23  ;;  %v3028_v9 = vsel %vm1370_vm10, %v3025_v42, %v3027_v4  ;;  %v2433_v1 = vsel %vm1370_vm10, %v2431_v8, %v2432_v49  ;;  %v2611_v33 = vrot.slane %v6042_v5, 1 }
 0x1d3   : > { %v2730_v55 = vrot.slane %v2670_v44, 2  ;;  %v2469_v45 = vadd.f32 %v2433_v1, %v2349_v34  ;;  %v2731_v7 = vrot.slane %v6050_v20, 2  ;;  %v2849_v54 = vmul.f32 %v6046_v58, %v4761_v57 }
 0x1d4   : > { %v2946_v17 = vadd.f32 %v2908_v50, %v2826_v38  ;;  %v2612_v18 = vsel %vm1248_vm11, %v2610_v63, %v2611_v33  ;;  %v6065_v12 = vmul.f32 %v6052_v22, %v4761_v57  ;;  %v2969_v10 = vmul.f32 %v6046_v58, %v4791_v19 }
 0x1d5   : > { %v6071_v42 = vmul.f32 %v6052_v22, %v4791_v19  ;;  %v6074_v21 = vsel %vm6481_vm5, %v2134_v48, 0.0  ;;  %v2132_v13 = vmul.f32 %v5962_v60, %v5962_v60  ;;  %v2528_v6 = vadd.f32 %v2512_v24, %v2469_v45  ;;  %vm6492_vm5 = vmmov %vm6452_vm0 }
 0x1d6   : > { %v6078_v29 = vadd.f32 %v3028_v9, %v2946_v17  ;;  %v6082_v11 = vsel %vm6482_vm1, %v5273_v52, 0.0  ;;  %v2732_v30 = vsel %vm1370_vm10, %v2730_v55, %v2731_v7  ;;  %v2909_v62 = vrot.slane %v2849_v54, 1  ;;  %vm6493_vm1 = vmmov %vm6452_vm0 }
 0x1d7   : > { %v2910_v27 = vrot.slane %v6065_v12, 1  ;;  %v6088_v48 = vmul.f32 %v5273_v52, %v5273_v52  ;;  %v2648_v41 = vadd.f32 %v2612_v18, %v2528_v6  ;;  %v2811_v4 = vmul.f32 %v6046_v58, %v4752_v43  ;;  %v6118_v12 = vld [vmem:[#allocation2 + $0x170] sm:$0xff] }
 0x1d8   : > { %v3082_v60 = vpack.c.bf16 %v6078_v29, %v6078_v29  ;;  %v6096_v8 = vmul.f32 %v5322_v0, %v5322_v0  ;;  %v3029_v23 = vrot.slane %v2969_v10, 2  ;;  %v3030_v50 = vrot.slane %v6071_v42, 2 }
 0x1d9   : > { %v2253_v24 = vmul.f32 %v2197_v35, %v4602_v16  ;;  %v2158_v52 = vsel %vm6483_vm3, %v2132_v13, 0.0  ;;  %v2768_v53 = vadd.f32 %v2732_v30, %v2648_v41  ;;  %v2214_v5 = vmul.f32 %v5993_v61, %v4565_v51  ;;  %vm6494_vm3 = vmmov %vm6452_vm0 }
 0x1da   : > { %3377 = vst.msk [vmem:[%s4832_s20 + $0x6c] sm:$0xf] %vm2066_vm6, %v3082_v60  ;;  %v2373_v44 = vmul.f32 %v2197_v35, %v4617_v26  ;;  %v2911_v38 = vsel %vm1248_vm11, %v2909_v62, %v2910_v27  ;;  %v2552_v63 = vmul.f32 %v2496_v15, %v4681_v31  ;;  %v2672_v20 = vmul.f32 %v2496_v15, %v4726_v40 }
 0x1db   : > { %v2314_v34 = vrot.slane %v2253_v24, 1  ;;  %v3125_v9 = vsel %vm6484_vm4, %v5999_v39, 0.0  ;;  %v2827_v1 = vadd.f32 %v2811_v4, %v2768_v53  ;;  %v2851_v17 = vmul.f32 %v2795_v46, %v4761_v57  ;;  %vm6496_vm4 = vmmov %vm6452_vm0 }
 0x1dc   : > { %v2434_v55 = vrot.slane %v2373_v44, 2  ;;  %v3031_v45 = vsel %vm1370_vm10, %v3029_v23, %v3030_v50  ;;  %v2513_v54 = vmul.f32 %v5933_v59, %v4670_v56  ;;  %v2613_v18 = vrot.slane %v2552_v63, 1 }
 0x1dd   : > { %v2315_v61 = vsel %vm1248_vm11, %v2312_v28, %v2314_v34  ;;  %v2947_v10 = vadd.f32 %v2911_v38, %v2827_v1  ;;  %v2733_v6 = vrot.slane %v2672_v20, 2  ;;  %v6122_v35 = vadd.f32 %v2158_v52, %v5924_v36 }
 0x1de   : > { %v2350_v42 = vadd.f32 %v2315_v61, %v2214_v5  ;;  %v2435_v13 = vsel %vm1370_vm10, %v2432_v49, %v2434_v55  ;;  %v6125_v30 = vadd.f32 %v3125_v9, %v5872_v14  ;;  %v3154_v3 = vmul.f32 %v5999_v39, %v5999_v39  ;;  %v2796_v9 = vld [vmem:[#allocation2 + $0x198] sm:$0xff] }
 0x1df   : > { %v2971_v28 = vmul.f32 %v2795_v46, %v4791_v19  ;;  %v6130_v59 = vadd.f32 %v3031_v45, %v2947_v10  ;;  %v2912_v60 = vrot.slane %v2851_v17, 1  ;;  %v2254_v49 = vmul.f32 %v5931_v32, %v4602_v16  ;;  %v6171_v45 = vld [vmem:[#allocation2 + $0x1a0] sm:$0xff] }
 0x1e0   : > { %v2470_v62 = vadd.f32 %v2435_v13, %v2350_v42  ;;  %v2614_v41 = vsel %vm1248_vm11, %v2611_v33, %v2613_v18  ;;  %v6137_v36 = vmul.f32 %v6118_v12, %v4602_v16  ;;  %v2374_v14 = vmul.f32 %v5931_v32, %v4617_v26 }
 0x1e1   : > { %v6143_v39 = vmul.f32 %v6118_v12, %v4617_v26  ;;  %v3083_v4 = vpack.c.bf16 %v6130_v59, %v6130_v59  ;;  %v2734_v23 = vsel %vm1370_vm10, %v2731_v7, %v2733_v6  ;;  %v2215_v33 = vmul.f32 %v5931_v32, %v4565_v51 }
 0x1e2   : > { %v2529_v15 = vadd.f32 %v2513_v54, %v2470_v62  ;;  %v3032_v24 = vrot.slane %v2971_v28, 2  ;;  %v2316_v46 = vrot.slane %v2254_v49, 1  ;;  %v2317_v52 = vrot.slane %v6137_v36, 1  ;;  %v2200_v49 = vld [vmem:[#allocation2 + $0x178] sm:$0x3] }
 0x1e3   : > { %v2436_v53 = vrot.slane %v2374_v14, 2  ;;  %3378 = vst.msk [vmem:[%s4832_s20 + $0x70] sm:$0xf] %vm2066_vm6, %v3083_v4  ;;  %v2812_v44 = vmul.f32 %v6052_v22, %v4752_v43  ;;  %v2913_v38 = vsel %vm1248_vm11, %v2910_v27, %v2912_v60  ;;  %v2437_v34 = vrot.slane %v6143_v39, 2 }
 0x1e4   : > { %v2649_v5 = vadd.f32 %v2614_v41, %v2529_v15  ;;  %v2318_v7 = vsel %vm1248_vm11, %v2316_v46, %v2317_v52  ;;  %v2514_v32 = vmul.f32 %v6046_v58, %v4670_v56  ;;  %v2553_v63 = vmul.f32 %v6046_v58, %v4681_v31  ;;  %v2499_v15 = vld [vmem:[#allocation2 + $0x190] sm:$0x3] }
 0x1e5   : > { %v6166_v20 = vmul.f32 %v6052_v22, %v4681_v31  ;;  %v2351_v55 = vadd.f32 %v2318_v7, %v2215_v33  ;;  %v2438_v27 = vsel %vm1370_vm10, %v2436_v53, %v2437_v34  ;;  %v2673_v17 = vmul.f32 %v6046_v58, %v4726_v40 }
 0x1e6   : > { %v2769_v1 = vadd.f32 %v2734_v23, %v2649_v5  ;;  %v3033_v61 = vsel %vm1370_vm10, %v3030_v50, %v3032_v24  ;;  %v2615_v54 = vrot.slane %v2553_v63, 1  ;;  %v6177_v10 = vmul.f32 %v6052_v22, %v4726_v40 }
 0x1e7   : > { %v2616_v18 = vrot.slane %v6166_v20, 1  ;;  %v2471_v13 = vadd.f32 %v2438_v27, %v2351_v55  ;;  %v2735_v6 = vrot.slane %v2673_v17, 2  ;;  %v2852_v28 = vmul.f32 %v2796_v9, %v4761_v57 }
 0x1e8   : > { %v2828_v42 = vadd.f32 %v2812_v44, %v2769_v1  ;;  %v2736_v58 = vrot.slane %v6177_v10, 2  ;;  %v6184_v60 = vmul.f32 %v6171_v45, %v4761_v57  ;;  %v2972_v50 = vmul.f32 %v2796_v9, %v4791_v19  ;;  %v2798_v10 = vld [vmem:[#allocation2 + $0x1a8] sm:$0x3] }
 0x1e9   : > { %v2617_v62 = vsel %vm1248_vm11, %v2615_v54, %v2616_v18  ;;  %v3179_v41 = vsel %vm6485_vm9, %v3154_v3, 0.0  ;;  %v2530_v39 = vadd.f32 %v2514_v32, %v2471_v13  ;;  %v6190_v4 = vmul.f32 %v6171_v45, %v4791_v19 }
 0x1ea   : > { %v2948_v14 = vadd.f32 %v2913_v38, %v2828_v42  ;;  %v3155_v23 = vmul.f32 %v6078_v29, %v6078_v29  ;;  %v2737_v33 = vsel %vm1370_vm10, %v2735_v6, %v2736_v58  ;;  %v2914_v24 = vrot.slane %v2852_v28, 1 }
 0x1eb   : > { %v2915_v46 = vrot.slane %v6184_v60, 1  ;;  %v2650_v5 = vadd.f32 %v2617_v62, %v2530_v39  ;;  %v2813_v44 = vmul.f32 %v2796_v9, %v4752_v43  ;;  %v2256_v3 = vmul.f32 %v2200_v49, %v4602_v16 }
 0x1ec   : > { %v3068_v53 = vadd.f32 %v3033_v61, %v2948_v14  ;;  %v3034_v38 = vrot.slane %v2972_v50, 2  ;;  %v3035_v7 = vrot.slane %v6190_v4, 2  ;;  %v2376_v32 = vmul.f32 %v2200_v49, %v4617_v26 }
 0x1ed   : > { %v2555_v63 = vmul.f32 %v2499_v15, %v4681_v31  ;;  %v3180_v20 = vadd.f32 %v3179_v41, %v5882_v37  ;;  %v2770_v55 = vadd.f32 %v2737_v33, %v2650_v5  ;;  %v2216_v27 = vmul.f32 %v6118_v12, %v4565_v51 }
 0x1ee   : > { %v3084_v1 = vpack.c.bf16 %v3068_v53, %v3068_v53  ;;  %v3127_v9 = vsel %vm6452_vm0, %v6078_v29, 0.0  ;;  %v2916_v16 = vsel %vm1248_vm11, %v2914_v24, %v2915_v46  ;;  %v2319_v17 = vrot.slane %v2256_v3, 1 }
 0x1ef   : > { %v2439_v61 = vrot.slane %v2376_v32, 2  ;;  %v3128_v26 = vadd.f32 %v3127_v9, %v6125_v30  ;;  %v3181_v31 = vsel %vm6486_vm12, %v3155_v23, 0.0  ;;  %v2829_v37 = vadd.f32 %v2813_v44, %v2770_v55 }
 0x1f0   : > { %3379 = vst.msk [vmem:[%s4832_s20 + $0x74] sm:$0xf] %vm2066_vm6, %v3084_v1  ;;  %v2675_v54 = vmul.f32 %v2499_v15, %v4726_v40  ;;  %v3036_v51 = vsel %vm1370_vm10, %v3034_v38, %v3035_v7  ;;  %v2320_v29 = vsel %vm1248_vm11, %v2317_v52, %v2319_v17  ;;  %v2618_v42 = vrot.slane %v2555_v63, 1 }
 0x1f1   : > { %v2440_v12 = vsel %vm1370_vm10, %v2437_v34, %v2439_v61  ;;  %v3156_v30 = vmul.f32 %v6130_v59, %v6130_v59  ;;  %v2949_v13 = vadd.f32 %v2916_v16, %v2829_v37  ;;  %v2352_v6 = vadd.f32 %v2320_v29, %v2216_v27 }
 0x1f2   : > { %v2515_v40 = vmul.f32 %v6052_v22, %v4670_v56  ;;  %v3182_v28 = vadd.f32 %v3181_v31, %v3180_v20  ;;  %v2738_v62 = vrot.slane %v2675_v54, 2  ;;  %v2854_v50 = vmul.f32 %v2798_v10, %v4761_v57 }
 0x1f3   : > { %v2109_v36 = vadd.f32 %v6013_v25, %v5986_v2  ;;  %v3129_v52 = vsel %vm6487_vm8, %v6130_v59, 0.0  ;;  %v3069_v34 = vadd.f32 %v3036_v51, %v2949_v13  ;;  %v2472_v49 = vadd.f32 %v2440_v12, %v2352_v6 }
 0x1f4   : > { %v2161_v41 = vadd.f32 %v5997_v47, %v6122_v35  ;;  %v3130_v14 = vadd.f32 %v3129_v52, %v3128_v26  ;;  %v2619_v39 = vsel %vm1248_vm11, %v2616_v18, %v2618_v42  ;;  %v2974_v56 = vmul.f32 %v2798_v10, %v4791_v19 }
 0x1f5   : > { %v2111_v22 = vadd.f32 %v6082_v11, %v2109_v36  ;;  %v3183_v57 = vsel %vm6488_vm13, %v3156_v30, 0.0  ;;  %v3085_v15 = vpack.c.bf16 %v3069_v34, %v3069_v34  ;;  %v2531_v2 = vadd.f32 %v2515_v40, %v2472_v49 }
 0x1f6   : > { %v2112_v25 = vsel %vm6489_vm7, %v5322_v0, 0.0  ;;  %v2739_v59 = vsel %vm1370_vm10, %v2736_v58, %v2738_v62  ;;  %v2917_v23 = vrot.slane %v2854_v50, 1  ;;  %v2163_v47 = vadd.f32 %v6074_v21, %v2161_v41 }
 0x1f7   : > { %v2113_v33 = vadd.f32 %v2112_v25, %v2111_v22  ;;  %v3157_v35 = vmul.f32 %v3068_v53, %v3068_v53  ;;  %3380 = vst.msk [vmem:[%s4832_s20 + $0x78] sm:$0xf] %vm2066_vm6, %v3085_v15  ;;  %v2651_v18 = vadd.f32 %v2619_v39, %v2531_v2  ;;  %v2814_v19 = vmul.f32 %v6171_v45, %v4752_v43 }
 0x1f8   : > { %v2164_v11 = vsel %vm6490_vm15, %v6088_v48, 0.0  ;;  %v3184_v24 = vadd.f32 %v3183_v57, %v3182_v28  ;;  %v3037_v5 = vrot.slane %v2974_v56, 2  ;;  %v3131_v0 = vsel %vm6491_vm14, %v3068_v53, 0.0 }
 0x1f9   : > { %v2165_v44 = vadd.f32 %v2164_v11, %v2163_v47  ;;  %v2771_v58 = vadd.f32 %v2739_v59, %v2651_v18  ;;  %v2166_v3 = vsel %vm6492_vm5, %v6096_v8, 0.0  ;;  %v3132_v21 = vadd.f32 %v3131_v0, %v3130_v14 }
 0x1fa   : > { %v2918_v38 = vsel %vm1248_vm11, %v2915_v46, %v2917_v23  ;;  %v2114_v32 = vrot.slane %v2113_v33, 4  ;;  %v3185_v43 = vsel %vm6493_vm1, %v3157_v35, 0.0  ;;  %v3158_v45 = vmul.f32 %v3069_v34, %v3069_v34  ;;  %vm6495_vm11 = vmmov %vm6452_vm0 }
 0x1fb   : > { %v2167_v63 = vadd.f32 %v2166_v3, %v2165_v44  ;;  %v2830_v48 = vadd.f32 %v2814_v19, %v2771_v58  ;;  %v3038_v20 = vsel %vm1370_vm10, %v3035_v7, %v3037_v5  ;;  %v3186_v1 = vadd.f32 %v3185_v43, %v3184_v24  ;;  %vm6497_vm10 = vmmov %vm6452_vm0 }
 0x1fc   : > { %v3133_v8 = vsel %vm6494_vm3, %v3069_v34, 0.0  ;;  %v2115_v27 = vadd.f32 %v2114_v32, %v2113_v33  ;;  %v3187_v46 = vsel %vm6495_vm11, %v3158_v45, 0.0 }
 0x1fd   : > { %v2168_v53 = vrot.slane %v2167_v63, 4  ;;  %v2950_v55 = vadd.f32 %v2918_v38, %v2830_v48  ;;  %v3134_v60 = vadd.f32 %v3133_v8, %v3132_v21  ;;  %v3188_v17 = vadd.f32 %v3187_v46, %v3186_v1 }
 0x1fe   : > { %v2116_v4 = vrot.slane %v2115_v27, 2 }
 0x1ff   : > { %v3070_v9 = vadd.f32 %v3038_v20, %v2950_v55  ;;  %v2169_v16 = vadd.f32 %v2168_v53, %v2167_v63 }
 0x200   : > { %v2117_v29 = vadd.f32 %v2116_v4, %v2115_v27 }
 0x201   : > { %v3086_v61 = vpack.c.bf16 %v3070_v9, %v3070_v9  ;;  %v3159_v26 = vmul.f32 %v3070_v9, %v3070_v9  ;;  %v3135_v31 = vsel %vm6496_vm4, %v3070_v9, 0.0  ;;  %v2170_v10 = vrot.slane %v2169_v16, 2 }
 0x202   : > { %v3136_v37 = vadd.f32 %v3135_v31, %v3134_v60  ;;  %v2118_v40 = vrot.slane %v2117_v29, 1 }
 0x203   : > { %3381 = vst.msk [vmem:[%s4832_s20 + $0x7c] sm:$0xf] %vm2066_vm6, %v3086_v61  ;;  %v3189_v7 = vsel %vm6497_vm10, %v3159_v26, 0.0  ;;  %v2171_v13 = vadd.f32 %v2170_v10, %v2169_v16 }
 0x204   : > { %v3137_v54 = vrot.slane %v3136_v37, 4  ;;  %v3190_v51 = vadd.f32 %v3189_v7, %v3188_v17  ;;  %v2119_v34 = vadd.f32 %v2118_v40, %v2117_v29 }
 0x205   : > { %v2172_v36 = vrot.slane %v2171_v13, 1 }
 0x206   : > { %v3138_v12 = vadd.f32 %v3137_v54, %v3136_v37  ;;  %v3191_v42 = vrot.slane %v3190_v51, 4 }
 0x207   : > { %v2173_v39 = vadd.f32 %v2172_v36, %v2171_v13 }
 0x208   : > { %v3139_v30 = vrot.slane %v3138_v12, 2  ;;  %v3192_v6 = vadd.f32 %v3191_v42, %v3190_v51 }
 0x20a   : > { %v3140_v28 = vadd.f32 %v3139_v30, %v3138_v12  ;;  %v3193_v62 = vrot.slane %v3192_v6, 2 }
 0x20c   : > { %v3141_v50 = vrot.slane %v3140_v28, 1  ;;  %v3194_v52 = vadd.f32 %v3193_v62, %v3192_v6 }
 0x20e   : > { %v3142_v49 = vadd.f32 %v3141_v50, %v3140_v28  ;;  %v3195_v41 = vrot.slane %v3194_v52, 1 }
 0x210   : > { %v3143_v14 = vadd.f32 %v3142_v49, %v2119_v34  ;;  %v3196_v56 = vadd.f32 %v3195_v41, %v3194_v52 }
 0x212   : > { %3198 = vst.msk [vmem:[%s282_s24] sm:$0x1] %vm1072_vm2, %v3143_v14  ;;  %v3197_v22 = vadd.f32 %v3196_v56, %v2173_v39 }
 0x214   : > { %3199 = vst.msk [vmem:[%s285_s28] sm:$0x1] %vm1072_vm2, %v3197_v22 }
 0x215 PF: > { %s18_s21 = sadd.s32 1, %s3661_s21  }
 0x216   : > { %p15_p7 = scmp.ge.s32.totalorder %s18_s21, 4  }
 0x218   :  { %17 = sbr.rel (!%p15_p7) target bundleno = 1 (0x1), region = 105 }
 0x21d   :  { %3245 = vsyncpa [#allocation4], 1 }
 0x21e   :  { %3247 = vsyncpa [#allocation4 + $0x1], 1 }

// kernel: mbconv_forward.8
= control target key start
LH: loop header
LB: loop body
LE: loop exit
PB: predicated region body
PF: predicated region fallthrough
CT: control target
= control target key end

     0   :  { %s1251_s24 = smov 0   ;;  %s1253_s25 = smov 0   ;;  %s1467_s0 = inlined_call_operand.vmem [shape: bf16[2,8,512], index: 0, kind: input, shape index: {}]   ;;  %s1468_s1 = inlined_call_operand.vmem [shape: f32[1,512], index: 1, kind: input, shape index: {}]   ;;  %s1469_s2 = inlined_call_operand.vmem [shape: f32[1,512], index: 2, kind: input, shape index: {}]   ;;  %s1470_s3 = inlined_call_operand.vmem [shape: f32[2,1,512], index: 3, kind: input, shape index: {}]   ;;  %s1471_s4 = inlined_call_operand.vmem [shape: bf16[512,128], index: 4, kind: input, shape index: {}]   ;;  %s1472_s5 = inlined_call_operand.vmem [shape: bf16[16,128], index: 5, kind: output, shape index: {0}]   ;;  %s1473_s6 = inlined_call_operand.vmem [shape: f32[2,1,1,128], index: 6, kind: output, shape index: {1}]   ;;  %s1474_s7 = inlined_call_operand.vmem [shape: f32[2,1,1,128], index: 7, kind: output, shape index: {2}]  }
   0x1   :  { %s1255_s26 = smov 0  }
   0x2 LB: > { %s30_s27 = sadd.s32 1, %s1205_s25  ;;  %p975_p0 = scmp.ge.s32.totalorder %s1209_s26, 1  ;;  %s1209_s26 = sphi %s1255_s26, %s18_s26   ;;  %s1205_s25 = sphi %s1253_s25, %s1488_s25   ;;  %s1201_s24 = sphi %s1251_s24, %s1487_s24  }
   0x3   : > { %p32_p1 = scmp.ge.s32.totalorder %s30_s27, 2  ;;  %p275_p2 = scmp.lt.s32.totalorder %s1209_s26, 3 }
   0x5   : > { %s1490_s27 = smov (%p32_p1, %s30_s27), 0  ;;  %p276_p3 = pnand %p975_p0, %p275_p2 }
   0x6   : > { %p327_p4 = scmp.lt.s32.totalorder (!%p276_p3), %s1201_s24, 1 }
   0x7   : > { %279 = sbr.rel (%p276_p3) target bundleno = 215 (0xd7), region = 40 }
   0xc   : > { %v1122_v0 = vld [vmem:[%s1471_s4 + $0x38] sm:$0xff]  ;;  %v1121_v4 = vld [vmem:[%s1471_s4 + $0x30] sm:$0xff]  ;;  %s1492_s24 = smov (!%p327_p4, %s1201_s24), 1  ;;  %v1120_v8 = vld [vmem:[%s1471_s4 + $0x28] sm:$0xff] }
   0xd   : > { %v1130_v1 = vld [vmem:[%s1471_s4 + $0x78] sm:$0xff]  ;;  %746 = vmatpush.bf16.msra.mxu0 %v1122_v0  ;;  %v1129_v5 = vld [vmem:[%s1471_s4 + $0x70] sm:$0xff]  ;;  %s1114_s21 = sshll.u32 %s1492_s24, 4  ;;  %v1128_v9 = vld [vmem:[%s1471_s4 + $0x68] sm:$0xff]  ;;  %s978_s20 = sshll.u32 %s1492_s24, 2 }
   0xe   : > { %v1138_v2 = vld [vmem:[%s1471_s4 + $0xb8] sm:$0xff]  ;;  %759 = vmatpush.bf16.msra.mxu1 %v1130_v1  ;;  %v1137_v6 = vld [vmem:[%s1471_s4 + $0xb0] sm:$0xff]  ;;  %v1136_v10 = vld [vmem:[%s1471_s4 + $0xa8] sm:$0xff]  ;;  %s335_s13 = scalar_lea.vmem %s1467_s0, %s1114_s21  ;;  %s339_s23 = scalar_lea.vmem %s1470_s3, %s978_s20 }
   0xf   : > { %v1146_v3 = vld [vmem:[%s1471_s4 + $0xf8] sm:$0xff]  ;;  %772 = vmatpush.bf16.msra.mxu2 %v1138_v2  ;;  %v1145_v7 = vld [vmem:[%s1471_s4 + $0xf0] sm:$0xff]  ;;  %v1144_v11 = vld [vmem:[%s1471_s4 + $0xe8] sm:$0xff]  ;;  %s344_s30 = scalar_lea.vmem %s1472_s5, %s978_s20  ;;  %s351_s10 = scalar_lea.vmem %s1473_s6, %s1492_s24 }
  0x10   : > { %785 = vmatpush.bf16.msra.mxu3 %v1146_v3  ;;  %v1119_v12 = vld [vmem:[%s1471_s4 + $0x20] sm:$0xff]  ;;  %v359_v21 = vld [vmem:[%s335_s13 + $0x8] sm:$0xff]  ;;  %v1118_v30 = vld [vmem:[%s1471_s4 + $0x18] sm:$0xff] }
  0x11   : > { %747 = vmatpush.bf16.msra.mxu0 %v1121_v4  ;;  %v1127_v13 = vld [vmem:[%s1471_s4 + $0x60] sm:$0xff]  ;;  %v362_v26 = vunpack.c.l.bf16 %v359_v21  ;;  %v363_v29 = vunpack.c.h.bf16 %v359_v21  ;;  %v1126_v31 = vld [vmem:[%s1471_s4 + $0x58] sm:$0xff]  ;;  %v1117_v43 = vld [vmem:[%s1471_s4 + $0x10] sm:$0xff] }
  0x12   : > { %760 = vmatpush.bf16.msra.mxu1 %v1129_v5  ;;  %v1135_v14 = vld [vmem:[%s1471_s4 + $0xa0] sm:$0xff]  ;;  %v1134_v35 = vld [vmem:[%s1471_s4 + $0x98] sm:$0xff]  ;;  %v1125_v44 = vld [vmem:[%s1471_s4 + $0x50] sm:$0xff] }
  0x13   : > { %773 = vmatpush.bf16.msra.mxu2 %v1137_v6  ;;  %v1143_v15 = vld [vmem:[%s1471_s4 + $0xe0] sm:$0xff]  ;;  %v1142_v36 = vld [vmem:[%s1471_s4 + $0xd8] sm:$0xff]  ;;  %v1133_v48 = vld [vmem:[%s1471_s4 + $0x90] sm:$0xff] }
  0x14   : > { %786 = vmatpush.bf16.msra.mxu3 %v1145_v7  ;;  %v358_v16 = vld [vmem:[%s335_s13] sm:$0xff]  ;;  %v1141_v49 = vld [vmem:[%s1471_s4 + $0xd0] sm:$0xff]  ;;  %v1116_v52 = vld [vmem:[%s1471_s4 + $0x8] sm:$0xff]  ;;  %s357_s13 = scalar_lea.vmem %s1474_s7, %s1492_s24 }
  0x15   : > { %748 = vmatpush.bf16.msra.mxu0 %v1120_v8  ;;  %v360_v17 = vunpack.c.l.bf16 %v358_v16  ;;  %v364_v18 = vld [vmem:[%s1468_s1] sm:$0xf]  ;;  %v361_v20 = vunpack.c.h.bf16 %v358_v16  ;;  %v1124_v53 = vld [vmem:[%s1471_s4 + $0x48] sm:$0xff] }
  0x16   : > { %761 = vmatpush.bf16.msra.mxu1 %v1128_v9  ;;  %v378_v19 = vld [vmem:[%s1469_s2] sm:$0xf]  ;;  %v366_v22 = vperm.slane %v364_v18, 0  ;;  %v367_v24 = vperm.slane %v364_v18, 1  ;;  %v368_v27 = vperm.slane %v364_v18, 2  ;;  %v369_v34 = vperm.slane %v364_v18, 3 }
  0x17   : > { %774 = vmatpush.bf16.msra.mxu2 %v1136_v10  ;;  %v380_v23 = vperm.slane %v378_v19, 0  ;;  %v381_v25 = vperm.slane %v378_v19, 1  ;;  %v382_v28 = vperm.slane %v378_v19, 2  ;;  %v383_v38 = vperm.slane %v378_v19, 3  ;;  %v1132_v54 = vld [vmem:[%s1471_s4 + $0x88] sm:$0xff]  ;;  %v1115_v57 = vld [vmem:[%s1471_s4] sm:$0xff] }
  0x18   : > { %787 = vmatpush.bf16.msra.mxu3 %v1144_v11  ;;  %v374_v32 = vmul.f32 %v366_v22, %v360_v17  ;;  %v375_v33 = vmul.f32 %v367_v24, %v361_v20  ;;  %v376_v37 = vmul.f32 %v368_v27, %v362_v26  ;;  %v377_v41 = vmul.f32 %v369_v34, %v363_v29  ;;  %v1140_v55 = vld [vmem:[%s1471_s4 + $0xc8] sm:$0xff]  ;;  %v1123_v58 = vld [vmem:[%s1471_s4 + $0x40] sm:$0xff] }
  0x19   : > { %749 = vmatpush.bf16.msra.mxu0 %v1119_v12  ;;  %v1131_v60 = vld [vmem:[%s1471_s4 + $0x80] sm:$0xff] }
  0x1a   : > { %762 = vmatpush.bf16.msra.mxu1 %v1127_v13  ;;  %v1341_v39 = vadd.f32 %v380_v23, %v374_v32  ;;  %v1343_v40 = vadd.f32 %v381_v25, %v375_v33  ;;  %v1345_v42 = vadd.f32 %v382_v28, %v376_v37  ;;  %v1355_v47 = vadd.f32 %v383_v38, %v377_v41  ;;  %v1139_v61 = vld [vmem:[%s1471_s4 + $0xc0] sm:$0xff] }
  0x1b   : > { %775 = vmatpush.bf16.msra.mxu2 %v1135_v14  ;;  %v1395_v6 = vld [vmem:[%s339_s23] sm:$0xf] }
  0x1c   : > { %788 = vmatpush.bf16.msra.mxu3 %v1143_v15  ;;  %v980_v45 = vmul.f32 -1.442695, %v1341_v39  ;;  %v981_v46 = vmul.f32 -1.442695, %v1343_v40  ;;  %v982_v50 = vmul.f32 -1.442695, %v1345_v42 }
  0x1d   : > { %750 = vmatpush.bf16.msra.mxu0 %v1118_v30  ;;  %v983_v51 = vmul.f32 -1.442695, %v1355_v47  ;;  %v474_v12 = vperm.slane %v1395_v6, 0  ;;  %v475_v37 = vperm.slane %v1395_v6, 1 }
  0x1e   : > { %763 = vmatpush.bf16.msra.mxu1 %v1126_v31  ;;  %1171 = vpow2.f32 %v980_v45 }
  0x1f   : > { %776 = vmatpush.bf16.msra.mxu2 %v1134_v35  ;;  %1173 = vpow2.f32 %v981_v46 }
  0x20   : > { %789 = vmatpush.bf16.msra.mxu3 %v1142_v36  ;;  %1175 = vpow2.f32 %v982_v50 }
  0x21   : > { %751 = vmatpush.bf16.msra.mxu0 %v1117_v43  ;;  %1177 = vpow2.f32 %v983_v51 }
  0x22   : > { %764 = vmatpush.bf16.msra.mxu1 %v1125_v44 }
  0x23   : > { %777 = vmatpush.bf16.msra.mxu2 %v1133_v48 }
  0x24   : > { %790 = vmatpush.bf16.msra.mxu3 %v1141_v49  ;;  %v1172_v56 = vpop.eup %1171 }
  0x25   : > { %752 = vmatpush.bf16.msra.mxu0 %v1116_v52  ;;  %v1174_v59 = vpop.eup %1173  ;;  %v404_v62 = vadd.f32 1.0, %v1172_v56 }
  0x26   : > { %765 = vmatpush.bf16.msra.mxu1 %v1124_v53  ;;  %v1176_v63 = vpop.eup %1175  ;;  %v405_v0 = vadd.f32 1.0, %v1174_v59 }
  0x27   : > { %778 = vmatpush.bf16.msra.mxu2 %v1132_v54  ;;  %v1178_v1 = vpop.eup %1177  ;;  %1179 = vrcp.f32 %v404_v62  ;;  %v406_v2 = vadd.f32 1.0, %v1176_v63  ;;  %v417_v4 = vand.u32 2147483647, %v404_v62  ;;  %v419_v5 = vand.u32 2147483648, %v404_v62 }
  0x28   : > { %791 = vmatpush.bf16.msra.mxu3 %v1140_v55  ;;  %1181 = vrcp.f32 %v405_v0  ;;  %v407_v3 = vadd.f32 1.0, %v1178_v1  ;;  %v432_v8 = vand.u32 2147483647, %v405_v0  ;;  %v434_v9 = vand.u32 2147483648, %v405_v0 }
  0x29   : > { %753 = vmatpush.bf16.msra.mxu0 %v1115_v57  ;;  %1183 = vrcp.f32 %v406_v2  ;;  %vm413_vm0 = vweird.f32 %v404_v62  ;;  %vm428_vm1 = vweird.f32 %v405_v0  ;;  %vm1398_vm3 = vcmp.eq.f32.partialorder %v417_v4, 8.507059e+37 }
  0x2a   : > { %766 = vmatpush.bf16.msra.mxu1 %v1123_v58  ;;  %1185 = vrcp.f32 %v407_v3  ;;  %v420_v16 = vor.u32 1.1754944e-38, %v419_v5  ;;  %vm1402_vm5 = vcmp.eq.f32.partialorder %v432_v8, 8.507059e+37  ;;  %v435_v20 = vor.u32 1.1754944e-38, %v434_v9 }
  0x2b   : > { %779 = vmatpush.bf16.msra.mxu2 %v1131_v60  ;;  %vm443_vm6 = vweird.f32 %v406_v2  ;;  %v447_v24 = vand.u32 2147483647, %v406_v2  ;;  %v449_v27 = vand.u32 2147483648, %v406_v2  ;;  %vm458_vm8 = vweird.f32 %v407_v3 }
  0x2c   : > { %792 = vmatpush.bf16.msra.mxu3 %v1139_v61  ;;  %v464_v32 = vand.u32 2147483648, %v407_v3  ;;  %v462_v35 = vand.u32 2147483647, %v407_v3  ;;  %v476_v57 = vperm.slane %v1395_v6, 2  ;;  %v477_v60 = vperm.slane %v1395_v6, 3 }
  0x2d   : > { %v1180_v7 = vpop.eup %1179  ;;  %vm1419_vm12 = vcmp.eq.f32.partialorder %v447_v24, 8.507059e+37  ;;  %v450_v46 = vor.u32 1.1754944e-38, %v449_v27 }
  0x2e   : > { %v1182_v10 = vpop.eup %1181  ;;  %v409_v11 = vmul.f32 %v1180_v7, %v404_v62  ;;  %vm414_vm2 = vweird.f32 %v1180_v7  ;;  %v465_v52 = vor.u32 1.1754944e-38, %v464_v32  ;;  %vm463_vm15 = vcmp.eq.f32.partialorder %v462_v35, 8.507059e+37 }
  0x2f   : > { %v424_v13 = vmul.f32 %v1182_v10, %v405_v0  ;;  %v1184_v17 = vpop.eup %1183  ;;  %vm429_vm4 = vweird.f32 %v1182_v10  ;;  %vm1407_vm7 = vmor %vm413_vm0, %vm414_vm2 }
  0x30   : > { %v410_v14 = vsub.f32 1.0, %v409_v11  ;;  %v1186_v21 = vpop.eup %1185  ;;  %v439_v23 = vmul.f32 %v1184_v17, %v406_v2  ;;  %vm1412_vm9 = vmor %vm428_vm1, %vm429_vm4  ;;  %vm444_vm10 = vweird.f32 %v1184_v17 }
  0x31   : > { %v425_v18 = vsub.f32 1.0, %v424_v13  ;;  %v454_v28 = vmul.f32 %v1186_v21, %v407_v3  ;;  %vm459_vm11 = vweird.f32 %v1186_v21  ;;  %vm1428_vm13 = vmor %vm443_vm6, %vm444_vm10 }
  0x32   : > { %v411_v22 = vmul.f32 %v1180_v7, %v410_v14  ;;  %v440_v31 = vsub.f32 1.0, %v439_v23  ;;  %vm460_vm14 = vmor %vm458_vm8, %vm459_vm11 }
  0x33   : > { %v426_v26 = vmul.f32 %v1182_v10, %v425_v18  ;;  %v455_v34 = vsub.f32 1.0, %v454_v28 }
  0x34   : > { %v412_v29 = vadd.f32 %v1180_v7, %v411_v22  ;;  %v441_v38 = vmul.f32 %v1184_v17, %v440_v31 }
  0x35   : > { %v427_v33 = vadd.f32 %v1182_v10, %v426_v26  ;;  %v456_v48 = vmul.f32 %v1186_v21, %v455_v34 }
  0x36   : > { %v416_v36 = vsel %vm1407_vm7, %v1180_v7, %v412_v29  ;;  %v442_v51 = vadd.f32 %v1184_v17, %v441_v38 }
  0x37   : > { %v421_v43 = vsel %vm1398_vm3, %v420_v16, %v416_v36  ;;  %v431_v44 = vsel %vm1412_vm9, %v1182_v10, %v427_v33  ;;  %v457_v54 = vadd.f32 %v1186_v21, %v456_v48 }
  0x38   : > { %v468_v49 = vmul.f32 %v421_v43, %v1341_v39  ;;  %v436_v50 = vsel %vm1402_vm5, %v435_v20, %v431_v44  ;;  %v446_v56 = vsel %vm1428_vm13, %v1184_v17, %v442_v51 }
  0x39   : > { %v469_v53 = vmul.f32 %v436_v50, %v1343_v40  ;;  %v451_v39 = vsel %vm1419_vm12, %v450_v46, %v446_v56  ;;  %v461_v59 = vsel %vm460_vm14, %v1186_v21, %v457_v54 }
  0x3a   : > { %v482_v55 = vmul.f32 %v474_v12, %v468_v49  ;;  %v470_v62 = vmul.f32 %v451_v39, %v1345_v42  ;;  %v466_v63 = vsel %vm463_vm15, %v465_v52, %v461_v59 }
  0x3b   : > { %v483_v58 = vmul.f32 %v475_v37, %v469_v53  ;;  %v471_v0 = vmul.f32 %v466_v63, %v1355_v47 }
  0x3c   : > { %v486_v61 = vpack.c.bf16 %v482_v55, %v482_v55  ;;  %v484_v1 = vmul.f32 %v476_v57, %v470_v62 }
  0x3d   : > { %v487_v40 = vpack.c.bf16 %v483_v58, %v483_v58  ;;  %v485_v2 = vmul.f32 %v477_v60, %v471_v0 }
  0x3e   : > { %754 = vmatmul.bf16.vlgmr.msra.gmra.mxu0 %v486_v61  ;;  %v488_v3 = vpack.c.bf16 %v484_v1, %v484_v1 }
  0x3f   : > { %767 = vmatmul.bf16.vlgmr.msra.gmra.mxu1 %v487_v40  ;;  %v489_v4 = vpack.c.bf16 %v485_v2, %v485_v2 }
  0x40   : > { %780 = vmatmul.bf16.vlgmr.msra.gmra.mxu2 %v488_v3 }
  0x41   : > { %793 = vmatmul.bf16.vlgmr.msra.gmra.mxu3 %v489_v4 }
  0xbb   : > { %v755_v5 = vpop.f32.mrf.mxu0 }
  0xbc   : > { %v768_v7 = vpop.f32.mrf.mxu1 }
  0xbd   : > { %v769_v8 = vadd.f32 %v768_v7, %v755_v5 }
  0xc3   : > { %v757_v6 = vpop.f32.mrf.mxu0  ;;  %v781_v10 = vpop.f32.mrf.mxu2 }
  0xc4   : > { %v770_v9 = vpop.f32.mrf.mxu1  ;;  %v782_v42 = vadd.f32 %v781_v10, %v769_v8  ;;  %v794_v11 = vpop.f32.mrf.mxu3 }
  0xc6   : > { %v795_v12 = vadd.f32 %v794_v11, %v782_v42 }
  0xc8   : > { %v798_v47 = vpack.c.bf16 %v795_v12, %v795_v12  ;;  %v800_v13 = vrot.slane %v795_v12, 4  ;;  %v807_v14 = vmul.f32 %v795_v12, %v795_v12 }
  0xca   : > { %799 = vst [vmem:[%s344_s30] sm:$0xf] %v798_v47  ;;  %v801_v15 = vadd.f32 %v800_v13, %v795_v12  ;;  %v808_v16 = vrot.slane %v807_v14, 4 }
  0xcb   : > { %v783_v17 = vpop.f32.mrf.mxu2 }
  0xcc   : > { %v802_v18 = vrot.slane %v801_v15, 2  ;;  %v809_v19 = vadd.f32 %v808_v16, %v807_v14  ;;  %v796_v20 = vpop.f32.mrf.mxu3 }
  0xce   : > { %v803_v21 = vadd.f32 %v802_v18, %v801_v15  ;;  %v810_v22 = vrot.slane %v809_v19, 2 }
  0xd0   : > { %v804_v23 = vrot.slane %v803_v21, 1  ;;  %v811_v24 = vadd.f32 %v810_v22, %v809_v19 }
  0xd2   : > { %v805_v25 = vadd.f32 %v804_v23, %v803_v21  ;;  %v812_v26 = vrot.slane %v811_v24, 1 }
  0xd4   : > { %806 = vst [vmem:[%s351_s10] sm:$0x1] %v805_v25  ;;  %v813_v27 = vadd.f32 %v812_v26, %v811_v24 }
  0xd6   : > { %814 = vst [vmem:[%s357_s13] sm:$0x1] %v813_v27 }
  0xd7 PF: > { %s18_s26 = sadd.s32 1, %s1209_s26   ;;  %s1487_s24 = smov %s1205_s25 }
  0xd8   : > { %p15_p5 = scmp.ge.s32.totalorder %s18_s26, 4   ;;  %s1488_s25 = smov %s1490_s27 }
  0xda   :  { %17 = sbr.rel (!%p15_p5) target bundleno = 2 (0x2), region = 97 }

// kernel: mbconv_forward.9
= control target key start
LH: loop header
LB: loop body
LE: loop exit
PB: predicated region body
PF: predicated region fallthrough
CT: control target
= control target key end

     0   :  { %s98_s0 = inlined_call_operand.vmem [shape: bf16[16,128], index: 0, kind: input, shape index: {}]   ;;  %s99_s1 = inlined_call_operand.vmem [shape: f32[1,128], index: 1, kind: input, shape index: {}]   ;;  %s100_s2 = inlined_call_operand.vmem [shape: f32[1,128], index: 2, kind: input, shape index: {}]   ;;  %s101_s3 = inlined_call_operand.vmem [shape: bf16[16,128], index: 3, kind: input, shape index: {}]   ;;  %s102_s4 = inlined_call_operand.vmem [shape: f32[16,128], index: 4, kind: output, shape index: {}]  }
   0x1   :  { %v46_v0 = vld [vmem:[%s98_s0] sm:$0xff]  }
   0x2   :  { %v53_v1 = vld [vmem:[%s99_s1] ss:$0 sm:$0xff]  ;;  %v47_v2 = vunpack.c.l.bf16 %v46_v0  ;;  %v48_v5 = vunpack.c.h.bf16 %v46_v0 }
   0x3   :  { %v54_v3 = vld [vmem:[%s100_s2] ss:$0 sm:$0xff] }
   0x4   :  { %v50_v4 = vld [vmem:[%s101_s3] sm:$0xff]   ;;  %v25_v6 = vmul.f32 %v53_v1, %v47_v2  ;;  %v26_v8 = vmul.f32 %v53_v1, %v48_v5 }
   0x5   :  { %v51_v7 = vunpack.c.l.bf16 %v50_v4  ;;  %v52_v9 = vunpack.c.h.bf16 %v50_v4 }
   0x6   :  { %v31_v10 = vadd.f32 %v54_v3, %v25_v6  ;;  %v32_v11 = vadd.f32 %v54_v3, %v26_v8 }
   0x8   :  { %v37_v12 = vadd.f32 %v51_v7, %v31_v10  ;;  %v38_v13 = vadd.f32 %v52_v9, %v32_v11 }
   0xa   :  { %39 = vst [vmem:[%s102_s4] sm:$0xff] %v37_v12 }
   0xb   :  { %40 = vst [vmem:[%s102_s4 + $0x8] sm:$0xff] %v38_v13 }

</bundles_post_ra>
